<compile_context>
chip_gen: v6e
topology: v6e:2x2x1
jax: 0.10.0
libtpu: 0.0.40
codegen_flags: <defaults>
</compile_context>

<pallas_src>
import functools

import jax
import jax.numpy as jnp
from jax.experimental import pallas as pl
from jax.experimental.pallas import tpu as pltpu


# ------------------------------------------------------------------ tuning helpers
def _sublane_multiple(itemsize: int) -> int:
    # Sub-32-bit dtypes pack along sublanes: 8 rows f32, 16 bf16, 32 int8/fp8.
    return max(8, 32 // max(1, itemsize))


@functools.lru_cache(maxsize=None)
def _vmem_budget_and_limit():
    """(single-copy in+out block budget, vmem_limit_bytes), TPU-generation aware."""
    try:
        vmem_cap = int(pltpu.get_tpu_info().vmem_capacity_bytes)
    except Exception:
        vmem_cap = 64 << 20                      # conservative (v7x-sized) default
    if vmem_cap >= (100 << 20):                  # v5e / v6e: 128 MiB VMEM per core
        return 24 << 20, 64 << 20
    return 16 << 20, 48 << 20                    # v7x-class: 64 MiB VMEM per core


def _pick_group_fold(num_row_pairs: int, w_out: int) -> int:
    """How many pooling row-pairs G to fold into one physical row (free reshape).

    Picks G | num_row_pairs so the kernel's output row width G*w_out is a multiple of
    128 lanes (ideally >= 512): lane-dense HBM writebacks, no VMEM lane padding.
    """
    g_cap = max(1, min(num_row_pairs, 128, 4096 // max(w_out, 1)))
    divisors = [g for g in range(1, g_cap + 1) if num_row_pairs % g == 0]
    dense = [g for g in divisors if (g * w_out) % 128 == 0]
    dense_big = [g for g in dense if g * w_out >= 512]
    if dense_big:
        return dense_big[0]   # smallest dense fold -> keeps the most rows for the grid
    if dense:
        return dense[-1]
    return divisors[-1]       # no dense fold exists: fall back to the widest row


def _pick_rows_per_block(rows: int, padded_row_bytes: int, sublane: int,
                         block_budget_bytes: int) -> int:
    """Rows per block: sublane-granular, VMEM-padded-size aware, >= 8 balanced steps."""
    granules = pl.cdiv(rows, sublane)
    if granules <= 1:
        return rows
    max_granules = max(1, block_budget_bytes // max(1, padded_row_bytes * sublane))
    # >= 8 steps (>= 4 per TensorCore on v7x) so DMA-in / compute / writeback pipeline;
    # keep the step count even where possible so both v7x TensorCores stay balanced.
    steps = max(8, pl.cdiv(granules, max_granules))
    steps += steps % 2
    granules_per_block = max(1, min(max_granules, granules // steps))
    return min(granules_per_block * sublane, rows)


# ------------------------------------------------------------------ kernel
def _make_kernel(G: int, W: int, Wo: int, mode: str):
    """2x2 max-pool over G folded row-pair groups living on the lane axis.

    Input block row layout : [g0_row0 | g0_row1 | g1_row0 | g1_row1 | ...] (2W per group)
    Output block row layout: [g0_pool | g1_pool | ...]                     (Wo per group)
    """

    def kernel(x_ref, o_ref):
        for g in range(G):
            base = g * 2 * W
            if mode == "strided_ref":
                # Strided ref reads: even / odd w-columns of both H rows at once.
                ev = x_ref[:, pl.ds(base, W, stride=2)]
                od = x_ref[:, pl.ds(base + 1, W, stride=2)]
                wm = jnp.maximum(ev, od)                         # (rb, W): [row0'|row1']
                out_g = jnp.maximum(wm[:, :Wo], wm[:, Wo:])
            else:
                # H-pair reduce first (pure VPU, halves data before any lane work).
                h = jnp.maximum(x_ref[:, base:base + W],
                                x_ref[:, base + W:base + 2 * W])  # (rb, W)
                if mode == "strided_value":
                    out_g = jnp.maximum(h[:, 0::2], h[:, 1::2])   # lane-pair max
                else:  # "reshape" fallback: always lowers, may cost an XLU relayout
                    out_g = jnp.max(h.reshape(h.shape[0], Wo, 2), axis=-1)
            o_ref[:, g * Wo:(g + 1) * Wo] = out_g

    return kernel


# ------------------------------------------------------------------ builder / wrapper
@functools.lru_cache(maxsize=None)
def _build_pool_fn(shape, dtype_name, mode):
    N, C, H, W = shape
    dtype = jnp.dtype(dtype_name)
    Ho, Wo = H // 2, W // 2
    num_row_pairs = N * C * Ho                    # one per pooled output row
    G = _pick_group_fold(num_row_pairs, Wo)
    rows = num_row_pairs // G
    width_in, width_out = G * 2 * W, G * Wo

    itemsize = dtype.itemsize
    sublane = _sublane_multiple(itemsize)
    # Account for the VMEM (., 128) lane padding of both the input and the output tile.
    padded_row_bytes = (pl.cdiv(width_in, 128) * 128
                        + pl.cdiv(width_out, 128) * 128) * itemsize
    block_budget, vmem_limit = _vmem_budget_and_limit()
    rb = _pick_rows_per_block(rows, padded_row_bytes, sublane, block_budget)

    pooled = pl.pallas_call(
        _make_kernel(G, W, Wo, mode),
        out_shape=jax.ShapeDtypeStruct((rows, width_out), dtype),
        grid=(pl.cdiv(rows, rb),),
        in_specs=[pl.BlockSpec((rb, width_in), lambda i: (i, 0))],
        out_specs=pl.BlockSpec((rb, width_out), lambda i: (i, 0)),
        compiler_params=pltpu.CompilerParams(
            dimension_semantics=("parallel",),    # shard rows across v7x's 2 TCs
            vmem_limit_bytes=vmem_limit,
        ),
        cost_estimate=pl.CostEstimate(
            flops=3 * N * C * Ho * Wo,
            transcendentals=0,
            bytes_accessed=(N * C * H * W + N * C * Ho * Wo) * itemsize,
        ),
    )

    @jax.jit
    def run(x):
        x2 = x.reshape(rows, width_in)   # free row-major regrouping (no data movement)
        return pooled(x2).reshape(N, C, Ho, Wo)

    return run


def _reference_pool(x):
    N, C, H, W = x.shape
    return jnp.max(x.reshape(N, C, H // 2, 2, W // 2, 2), axis=(3, 5))


_MODES = ("strided_value", "strided_ref", "reshape")
_chosen_mode = None


def down_sample_block(x: jax.Array) -> jax.Array:
    """MaxPool2d(2, 2) over an NCHW tensor via a Pallas TPU kernel."""
    global _chosen_mode
    _, _, H, W = x.shape
    assert H % 2 == 0 and W % 2 == 0, "MaxPool2d(2,2) expects even H and W here"

    modes = ([_chosen_mode] if _chosen_mode else []) + \
            [m for m in _MODES if m != _chosen_mode]
    last_err = None
    for mode in modes:
        try:
            fn = _build_pool_fn(tuple(x.shape), str(jnp.dtype(x.dtype)), mode)
            out = jax.block_until_ready(fn(x))
            if mode != _chosen_mode:
                # First use of a formulation: validate it once against pure JAX
                # (guards against strided-lane lowering differences across toolchains).
                ref = _reference_pool(x)
                ok = jnp.all((out == ref) | (jnp.isnan(out) & jnp.isnan(ref)))
                if not bool(ok):
                    raise RuntimeError(f"pallas maxpool mode '{mode}' miscompiled")
            _chosen_mode = mode
            return out
        except Exception as e:   # lowering/compile unsupported -> try next formulation
            last_err = e
    raise last_err


if __name__ == "__main__":
    key = jax.random.PRNGKey(0)
    x = jax.random.normal(key, (2, 4, 16, 16), dtype=jnp.float32)

    out = jax.block_until_ready(down_sample_block(x))

    ref = _reference_pool(x)
    assert out.shape == (2, 4, 8, 8)
    assert out.dtype == x.dtype
    assert bool(jnp.array_equal(out, ref))

    print("KERNEL_OK")
</pallas_src>

<mosaic_0001>
module attributes {stable_mosaic.version = 11 : i64} {
  func.func @kernel(%arg0: i32, %arg1: memref<1x2048xf32, #tpu.memory_space<vmem>>, %arg2: memref<1x512xf32, #tpu.memory_space<vmem>>) attributes {dimension_semantics = [#tpu.dimension_semantics<parallel>], iteration_bounds = array<i64: 1>, scalar_prefetch = 0 : i64, scratch_operands = 0 : i64, tpu.core_type = #tpu.core_type<tc>, window_params = [{transform_indices = @transform_0, window_bounds = array<i64: 1, 2048>}, {transform_indices = @transform_1, window_bounds = array<i64: 1, 512>}]} {
    %c0 = arith.constant 0 : index
    %c0_0 = arith.constant 0 : index
    %0 = tpu.strided_load %arg1[%c0, %c0_0] {strides = array<i32: 1, 2>} : memref<1x2048xf32, #tpu.memory_space<vmem>>, vector<1x16xf32>
    %c0_1 = arith.constant 0 : index
    %c1 = arith.constant 1 : index
    %1 = tpu.strided_load %arg1[%c0_1, %c1] {strides = array<i32: 1, 2>} : memref<1x2048xf32, #tpu.memory_space<vmem>>, vector<1x16xf32>
    %2 = arith.maximumf %0, %1 : vector<1x16xf32>
    %3 = vector.extract_strided_slice %2 {offsets = [0, 0], sizes = [1, 8], strides = [1, 1]} : vector<1x16xf32> to vector<1x8xf32>
    %4 = vector.extract_strided_slice %2 {offsets = [0, 8], sizes = [1, 8], strides = [1, 1]} : vector<1x16xf32> to vector<1x8xf32>
    %5 = arith.maximumf %3, %4 : vector<1x8xf32>
    %c0_2 = arith.constant 0 : index
    %c0_3 = arith.constant 0 : index
    %6 = vector.load %arg2[%c0_2, %c0_3] : memref<1x512xf32, #tpu.memory_space<vmem>>, vector<1x8xf32>
    tpu.vector_store %arg2[%c0_2, %c0_3], %5 {strides = array<i32>} : memref<1x512xf32, #tpu.memory_space<vmem>>, vector<1x8xf32>,
    %c0_4 = arith.constant 0 : index
    %c32 = arith.constant 32 : index
    %7 = tpu.strided_load %arg1[%c0_4, %c32] {strides = array<i32: 1, 2>} : memref<1x2048xf32, #tpu.memory_space<vmem>>, vector<1x16xf32>
    %c0_5 = arith.constant 0 : index
    %c33 = arith.constant 33 : index
    %8 = tpu.strided_load %arg1[%c0_5, %c33] {strides = array<i32: 1, 2>} : memref<1x2048xf32, #tpu.memory_space<vmem>>, vector<1x16xf32>
    %9 = arith.maximumf %7, %8 : vector<1x16xf32>
    %10 = vector.extract_strided_slice %9 {offsets = [0, 0], sizes = [1, 8], strides = [1, 1]} : vector<1x16xf32> to vector<1x8xf32>
    %11 = vector.extract_strided_slice %9 {offsets = [0, 8], sizes = [1, 8], strides = [1, 1]} : vector<1x16xf32> to vector<1x8xf32>
    %12 = arith.maximumf %10, %11 : vector<1x8xf32>
    %c0_6 = arith.constant 0 : index
    %c8 = arith.constant 8 : index
    %13 = vector.load %arg2[%c0_6, %c8] : memref<1x512xf32, #tpu.memory_space<vmem>>, vector<1x8xf32>
    tpu.vector_store %arg2[%c0_6, %c8], %12 {strides = array<i32>} : memref<1x512xf32, #tpu.memory_space<vmem>>, vector<1x8xf32>,
    %c0_7 = arith.constant 0 : index
    %c64 = arith.constant 64 : index
    %14 = tpu.strided_load %arg1[%c0_7, %c64] {strides = array<i32: 1, 2>} : memref<1x2048xf32, #tpu.memory_space<vmem>>, vector<1x16xf32>
    %c0_8 = arith.constant 0 : index
    %c65 = arith.constant 65 : index
    %15 = tpu.strided_load %arg1[%c0_8, %c65] {strides = array<i32: 1, 2>} : memref<1x2048xf32, #tpu.memory_space<vmem>>, vector<1x16xf32>
    %16 = arith.maximumf %14, %15 : vector<1x16xf32>
    %17 = vector.extract_strided_slice %16 {offsets = [0, 0], sizes = [1, 8], strides = [1, 1]} : vector<1x16xf32> to vector<1x8xf32>
    %18 = vector.extract_strided_slice %16 {offsets = [0, 8], sizes = [1, 8], strides = [1, 1]} : vector<1x16xf32> to vector<1x8xf32>
    %19 = arith.maximumf %17, %18 : vector<1x8xf32>
    %c0_9 = arith.constant 0 : index
    %c16 = arith.constant 16 : index
    %20 = vector.load %arg2[%c0_9, %c16] : memref<1x512xf32, #tpu.memory_space<vmem>>, vector<1x8xf32>
    tpu.vector_store %arg2[%c0_9, %c16], %19 {strides = array<i32>} : memref<1x512xf32, #tpu.memory_space<vmem>>, vector<1x8xf32>,
    %c0_10 = arith.constant 0 : index
    %c96 = arith.constant 96 : index
    %21 = tpu.strided_load %arg1[%c0_10, %c96] {strides = array<i32: 1, 2>} : memref<1x2048xf32, #tpu.memory_space<vmem>>, vector<1x16xf32>
    %c0_11 = arith.constant 0 : index
    %c97 = arith.constant 97 : index
    %22 = tpu.strided_load %arg1[%c0_11, %c97] {strides = array<i32: 1, 2>} : memref<1x2048xf32, #tpu.memory_space<vmem>>, vector<1x16xf32>
    %23 = arith.maximumf %21, %22 : vector<1x16xf32>
    %24 = vector.extract_strided_slice %23 {offsets = [0, 0], sizes = [1, 8], strides = [1, 1]} : vector<1x16xf32> to vector<1x8xf32>
    %25 = vector.extract_strided_slice %23 {offsets = [0, 8], sizes = [1, 8], strides = [1, 1]} : vector<1x16xf32> to vector<1x8xf32>
    %26 = arith.maximumf %24, %25 : vector<1x8xf32>
    %c0_12 = arith.constant 0 : index
    %c24 = arith.constant 24 : index
    %27 = vector.load %arg2[%c0_12, %c24] : memref<1x512xf32, #tpu.memory_space<vmem>>, vector<1x8xf32>
    tpu.vector_store %arg2[%c0_12, %c24], %26 {strides = array<i32>} : memref<1x512xf32, #tpu.memory_space<vmem>>, vector<1x8xf32>,
    %c0_13 = arith.constant 0 : index
    %c128 = arith.constant 128 : index
    %28 = tpu.strided_load %arg1[%c0_13, %c128] {strides = array<i32: 1, 2>} : memref<1x2048xf32, #tpu.memory_space<vmem>>, vector<1x16xf32>
    %c0_14 = arith.constant 0 : index
    %c129 = arith.constant 129 : index
    %29 = tpu.strided_load %arg1[%c0_14, %c129] {strides = array<i32: 1, 2>} : memref<1x2048xf32, #tpu.memory_space<vmem>>, vector<1x16xf32>
    %30 = arith.maximumf %28, %29 : vector<1x16xf32>
    %31 = vector.extract_strided_slice %30 {offsets = [0, 0], sizes = [1, 8], strides = [1, 1]} : vector<1x16xf32> to vector<1x8xf32>
    %32 = vector.extract_strided_slice %30 {offsets = [0, 8], sizes = [1, 8], strides = [1, 1]} : vector<1x16xf32> to vector<1x8xf32>
    %33 = arith.maximumf %31, %32 : vector<1x8xf32>
    %c0_15 = arith.constant 0 : index
    %c32_16 = arith.constant 32 : index
    %34 = vector.load %arg2[%c0_15, %c32_16] : memref<1x512xf32, #tpu.memory_space<vmem>>, vector<1x8xf32>
    tpu.vector_store %arg2[%c0_15, %c32_16], %33 {strides = array<i32>} : memref<1x512xf32, #tpu.memory_space<vmem>>, vector<1x8xf32>,
    %c0_17 = arith.constant 0 : index
    %c160 = arith.constant 160 : index
    %35 = tpu.strided_load %arg1[%c0_17, %c160] {strides = array<i32: 1, 2>} : memref<1x2048xf32, #tpu.memory_space<vmem>>, vector<1x16xf32>
    %c0_18 = arith.constant 0 : index
    %c161 = arith.constant 161 : index
    %36 = tpu.strided_load %arg1[%c0_18, %c161] {strides = array<i32: 1, 2>} : memref<1x2048xf32, #tpu.memory_space<vmem>>, vector<1x16xf32>
    %37 = arith.maximumf %35, %36 : vector<1x16xf32>
    %38 = vector.extract_strided_slice %37 {offsets = [0, 0], sizes = [1, 8], strides = [1, 1]} : vector<1x16xf32> to vector<1x8xf32>
    %39 = vector.extract_strided_slice %37 {offsets = [0, 8], sizes = [1, 8], strides = [1, 1]} : vector<1x16xf32> to vector<1x8xf32>
    %40 = arith.maximumf %38, %39 : vector<1x8xf32>
    %c0_19 = arith.constant 0 : index
    %c40 = arith.constant 40 : index
    %41 = vector.load %arg2[%c0_19, %c40] : memref<1x512xf32, #tpu.memory_space<vmem>>, vector<1x8xf32>
    tpu.vector_store %arg2[%c0_19, %c40], %40 {strides = array<i32>} : memref<1x512xf32, #tpu.memory_space<vmem>>, vector<1x8xf32>,
    %c0_20 = arith.constant 0 : index
    %c192 = arith.constant 192 : index
    %42 = tpu.strided_load %arg1[%c0_20, %c192] {strides = array<i32: 1, 2>} : memref<1x2048xf32, #tpu.memory_space<vmem>>, vector<1x16xf32>
    %c0_21 = arith.constant 0 : index
    %c193 = arith.constant 193 : index
    %43 = tpu.strided_load %arg1[%c0_21, %c193] {strides = array<i32: 1, 2>} : memref<1x2048xf32, #tpu.memory_space<vmem>>, vector<1x16xf32>
    %44 = arith.maximumf %42, %43 : vector<1x16xf32>
    %45 = vector.extract_strided_slice %44 {offsets = [0, 0], sizes = [1, 8], strides = [1, 1]} : vector<1x16xf32> to vector<1x8xf32>
    %46 = vector.extract_strided_slice %44 {offsets = [0, 8], sizes = [1, 8], strides = [1, 1]} : vector<1x16xf32> to vector<1x8xf32>
    %47 = arith.maximumf %45, %46 : vector<1x8xf32>
    %c0_22 = arith.constant 0 : index
    %c48 = arith.constant 48 : index
    %48 = vector.load %arg2[%c0_22, %c48] : memref<1x512xf32, #tpu.memory_space<vmem>>, vector<1x8xf32>
    tpu.vector_store %arg2[%c0_22, %c48], %47 {strides = array<i32>} : memref<1x512xf32, #tpu.memory_space<vmem>>, vector<1x8xf32>,
    %c0_23 = arith.constant 0 : index
    %c224 = arith.constant 224 : index
    %49 = tpu.strided_load %arg1[%c0_23, %c224] {strides = array<i32: 1, 2>} : memref<1x2048xf32, #tpu.memory_space<vmem>>, vector<1x16xf32>
    %c0_24 = arith.constant 0 : index
    %c225 = arith.constant 225 : index
    %50 = tpu.strided_load %arg1[%c0_24, %c225] {strides = array<i32: 1, 2>} : memref<1x2048xf32, #tpu.memory_space<vmem>>, vector<1x16xf32>
    %51 = arith.maximumf %49, %50 : vector<1x16xf32>
    %52 = vector.extract_strided_slice %51 {offsets = [0, 0], sizes = [1, 8], strides = [1, 1]} : vector<1x16xf32> to vector<1x8xf32>
    %53 = vector.extract_strided_slice %51 {offsets = [0, 8], sizes = [1, 8], strides = [1, 1]} : vector<1x16xf32> to vector<1x8xf32>
    %54 = arith.maximumf %52, %53 : vector<1x8xf32>
    %c0_25 = arith.constant 0 : index
    %c56 = arith.constant 56 : index
    %55 = vector.load %arg2[%c0_25, %c56] : memref<1x512xf32, #tpu.memory_space<vmem>>, vector<1x8xf32>
    tpu.vector_store %arg2[%c0_25, %c56], %54 {strides = array<i32>} : memref<1x512xf32, #tpu.memory_space<vmem>>, vector<1x8xf32>,
    %c0_26 = arith.constant 0 : index
    %c256 = arith.constant 256 : index
    %56 = tpu.strided_load %arg1[%c0_26, %c256] {strides = array<i32: 1, 2>} : memref<1x2048xf32, #tpu.memory_space<vmem>>, vector<1x16xf32>
    %c0_27 = arith.constant 0 : index
    %c257 = arith.constant 257 : index
    %57 = tpu.strided_load %arg1[%c0_27, %c257] {strides = array<i32: 1, 2>} : memref<1x2048xf32, #tpu.memory_space<vmem>>, vector<1x16xf32>
    %58 = arith.maximumf %56, %57 : vector<1x16xf32>
    %59 = vector.extract_strided_slice %58 {offsets = [0, 0], sizes = [1, 8], strides = [1, 1]} : vector<1x16xf32> to vector<1x8xf32>
    %60 = vector.extract_strided_slice %58 {offsets = [0, 8], sizes = [1, 8], strides = [1, 1]} : vector<1x16xf32> to vector<1x8xf32>
    %61 = arith.maximumf %59, %60 : vector<1x8xf32>
    %c0_28 = arith.constant 0 : index
    %c64_29 = arith.constant 64 : index
    %62 = vector.load %arg2[%c0_28, %c64_29] : memref<1x512xf32, #tpu.memory_space<vmem>>, vector<1x8xf32>
    tpu.vector_store %arg2[%c0_28, %c64_29], %61 {strides = array<i32>} : memref<1x512xf32, #tpu.memory_space<vmem>>, vector<1x8xf32>,
    %c0_30 = arith.constant 0 : index
    %c288 = arith.constant 288 : index
    %63 = tpu.strided_load %arg1[%c0_30, %c288] {strides = array<i32: 1, 2>} : memref<1x2048xf32, #tpu.memory_space<vmem>>, vector<1x16xf32>
    %c0_31 = arith.constant 0 : index
    %c289 = arith.constant 289 : index
    %64 = tpu.strided_load %arg1[%c0_31, %c289] {strides = array<i32: 1, 2>} : memref<1x2048xf32, #tpu.memory_space<vmem>>, vector<1x16xf32>
    %65 = arith.maximumf %63, %64 : vector<1x16xf32>
    %66 = vector.extract_strided_slice %65 {offsets = [0, 0], sizes = [1, 8], strides = [1, 1]} : vector<1x16xf32> to vector<1x8xf32>
    %67 = vector.extract_strided_slice %65 {offsets = [0, 8], sizes = [1, 8], strides = [1, 1]} : vector<1x16xf32> to vector<1x8xf32>
    %68 = arith.maximumf %66, %67 : vector<1x8xf32>
    %c0_32 = arith.constant 0 : index
    %c72 = arith.constant 72 : index
    %69 = vector.load %arg2[%c0_32, %c72] : memref<1x512xf32, #tpu.memory_space<vmem>>, vector<1x8xf32>
    tpu.vector_store %arg2[%c0_32, %c72], %68 {strides = array<i32>} : memref<1x512xf32, #tpu.memory_space<vmem>>, vector<1x8xf32>,
    %c0_33 = arith.constant 0 : index
    %c320 = arith.constant 320 : index
    %70 = tpu.strided_load %arg1[%c0_33, %c320] {strides = array<i32: 1, 2>} : memref<1x2048xf32, #tpu.memory_space<vmem>>, vector<1x16xf32>
    %c0_34 = arith.constant 0 : index
    %c321 = arith.constant 321 : index
    %71 = tpu.strided_load %arg1[%c0_34, %c321] {strides = array<i32: 1, 2>} : memref<1x2048xf32, #tpu.memory_space<vmem>>, vector<1x16xf32>
    %72 = arith.maximumf %70, %71 : vector<1x16xf32>
    %73 = vector.extract_strided_slice %72 {offsets = [0, 0], sizes = [1, 8], strides = [1, 1]} : vector<1x16xf32> to vector<1x8xf32>
    %74 = vector.extract_strided_slice %72 {offsets = [0, 8], sizes = [1, 8], strides = [1, 1]} : vector<1x16xf32> to vector<1x8xf32>
    %75 = arith.maximumf %73, %74 : vector<1x8xf32>
    %c0_35 = arith.constant 0 : index
    %c80 = arith.constant 80 : index
    %76 = vector.load %arg2[%c0_35, %c80] : memref<1x512xf32, #tpu.memory_space<vmem>>, vector<1x8xf32>
    tpu.vector_store %arg2[%c0_35, %c80], %75 {strides = array<i32>} : memref<1x512xf32, #tpu.memory_space<vmem>>, vector<1x8xf32>,
    %c0_36 = arith.constant 0 : index
    %c352 = arith.constant 352 : index
    %77 = tpu.strided_load %arg1[%c0_36, %c352] {strides = array<i32: 1, 2>} : memref<1x2048xf32, #tpu.memory_space<vmem>>, vector<1x16xf32>
    %c0_37 = arith.constant 0 : index
    %c353 = arith.constant 353 : index
    %78 = tpu.strided_load %arg1[%c0_37, %c353] {strides = array<i32: 1, 2>} : memref<1x2048xf32, #tpu.memory_space<vmem>>, vector<1x16xf32>
    %79 = arith.maximumf %77, %78 : vector<1x16xf32>
    %80 = vector.extract_strided_slice %79 {offsets = [0, 0], sizes = [1, 8], strides = [1, 1]} : vector<1x16xf32> to vector<1x8xf32>
    %81 = vector.extract_strided_slice %79 {offsets = [0, 8], sizes = [1, 8], strides = [1, 1]} : vector<1x16xf32> to vector<1x8xf32>
    %82 = arith.maximumf %80, %81 : vector<1x8xf32>
    %c0_38 = arith.constant 0 : index
    %c88 = arith.constant 88 : index
    %83 = vector.load %arg2[%c0_38, %c88] : memref<1x512xf32, #tpu.memory_space<vmem>>, vector<1x8xf32>
    tpu.vector_store %arg2[%c0_38, %c88], %82 {strides = array<i32>} : memref<1x512xf32, #tpu.memory_space<vmem>>, vector<1x8xf32>,
    %c0_39 = arith.constant 0 : index
    %c384 = arith.constant 384 : index
    %84 = tpu.strided_load %arg1[%c0_39, %c384] {strides = array<i32: 1, 2>} : memref<1x2048xf32, #tpu.memory_space<vmem>>, vector<1x16xf32>
    %c0_40 = arith.constant 0 : index
    %c385 = arith.constant 385 : index
    %85 = tpu.strided_load %arg1[%c0_40, %c385] {strides = array<i32: 1, 2>} : memref<1x2048xf32, #tpu.memory_space<vmem>>, vector<1x16xf32>
    %86 = arith.maximumf %84, %85 : vector<1x16xf32>
    %87 = vector.extract_strided_slice %86 {offsets = [0, 0], sizes = [1, 8], strides = [1, 1]} : vector<1x16xf32> to vector<1x8xf32>
    %88 = vector.extract_strided_slice %86 {offsets = [0, 8], sizes = [1, 8], strides = [1, 1]} : vector<1x16xf32> to vector<1x8xf32>
    %89 = arith.maximumf %87, %88 : vector<1x8xf32>
    %c0_41 = arith.constant 0 : index
    %c96_42 = arith.constant 96 : index
    %90 = vector.load %arg2[%c0_41, %c96_42] : memref<1x512xf32, #tpu.memory_space<vmem>>, vector<1x8xf32>
    tpu.vector_store %arg2[%c0_41, %c96_42], %89 {strides = array<i32>} : memref<1x512xf32, #tpu.memory_space<vmem>>, vector<1x8xf32>,
    %c0_43 = arith.constant 0 : index
    %c416 = arith.constant 416 : index
    %91 = tpu.strided_load %arg1[%c0_43, %c416] {strides = array<i32: 1, 2>} : memref<1x2048xf32, #tpu.memory_space<vmem>>, vector<1x16xf32>
    %c0_44 = arith.constant 0 : index
    %c417 = arith.constant 417 : index
    %92 = tpu.strided_load %arg1[%c0_44, %c417] {strides = array<i32: 1, 2>} : memref<1x2048xf32, #tpu.memory_space<vmem>>, vector<1x16xf32>
    %93 = arith.maximumf %91, %92 : vector<1x16xf32>
    %94 = vector.extract_strided_slice %93 {offsets = [0, 0], sizes = [1, 8], strides = [1, 1]} : vector<1x16xf32> to vector<1x8xf32>
    %95 = vector.extract_strided_slice %93 {offsets = [0, 8], sizes = [1, 8], strides = [1, 1]} : vector<1x16xf32> to vector<1x8xf32>
    %96 = arith.maximumf %94, %95 : vector<1x8xf32>
    %c0_45 = arith.constant 0 : index
    %c104 = arith.constant 104 : index
    %97 = vector.load %arg2[%c0_45, %c104] : memref<1x512xf32, #tpu.memory_space<vmem>>, vector<1x8xf32>
    tpu.vector_store %arg2[%c0_45, %c104], %96 {strides = array<i32>} : memref<1x512xf32, #tpu.memory_space<vmem>>, vector<1x8xf32>,
    %c0_46 = arith.constant 0 : index
    %c448 = arith.constant 448 : index
    %98 = tpu.strided_load %arg1[%c0_46, %c448] {strides = array<i32: 1, 2>} : memref<1x2048xf32, #tpu.memory_space<vmem>>, vector<1x16xf32>
    %c0_47 = arith.constant 0 : index
    %c449 = arith.constant 449 : index
    %99 = tpu.strided_load %arg1[%c0_47, %c449] {strides = array<i32: 1, 2>} : memref<1x2048xf32, #tpu.memory_space<vmem>>, vector<1x16xf32>
    %100 = arith.maximumf %98, %99 : vector<1x16xf32>
    %101 = vector.extract_strided_slice %100 {offsets = [0, 0], sizes = [1, 8], strides = [1, 1]} : vector<1x16xf32> to vector<1x8xf32>
    %102 = vector.extract_strided_slice %100 {offsets = [0, 8], sizes = [1, 8], strides = [1, 1]} : vector<1x16xf32> to vector<1x8xf32>
    %103 = arith.maximumf %101, %102 : vector<1x8xf32>
    %c0_48 = arith.constant 0 : index
    %c112 = arith.constant 112 : index
    %104 = vector.load %arg2[%c0_48, %c112] : memref<1x512xf32, #tpu.memory_space<vmem>>, vector<1x8xf32>
    tpu.vector_store %arg2[%c0_48, %c112], %103 {strides = array<i32>} : memref<1x512xf32, #tpu.memory_space<vmem>>, vector<1x8xf32>,
    %c0_49 = arith.constant 0 : index
    %c480 = arith.constant 480 : index
    %105 = tpu.strided_load %arg1[%c0_49, %c480] {strides = array<i32: 1, 2>} : memref<1x2048xf32, #tpu.memory_space<vmem>>, vector<1x16xf32>
    %c0_50 = arith.constant 0 : index
    %c481 = arith.constant 481 : index
    %106 = tpu.strided_load %arg1[%c0_50, %c481] {strides = array<i32: 1, 2>} : memref<1x2048xf32, #tpu.memory_space<vmem>>, vector<1x16xf32>
    %107 = arith.maximumf %105, %106 : vector<1x16xf32>
    %108 = vector.extract_strided_slice %107 {offsets = [0, 0], sizes = [1, 8], strides = [1, 1]} : vector<1x16xf32> to vector<1x8xf32>
    %109 = vector.extract_strided_slice %107 {offsets = [0, 8], sizes = [1, 8], strides = [1, 1]} : vector<1x16xf32> to vector<1x8xf32>
    %110 = arith.maximumf %108, %109 : vector<1x8xf32>
    %c0_51 = arith.constant 0 : index
    %c120 = arith.constant 120 : index
    %111 = vector.load %arg2[%c0_51, %c120] : memref<1x512xf32, #tpu.memory_space<vmem>>, vector<1x8xf32>
    tpu.vector_store %arg2[%c0_51, %c120], %110 {strides = array<i32>} : memref<1x512xf32, #tpu.memory_space<vmem>>, vector<1x8xf32>,
    %c0_52 = arith.constant 0 : index
    %c512 = arith.constant 512 : index
    %112 = tpu.strided_load %arg1[%c0_52, %c512] {strides = array<i32: 1, 2>} : memref<1x2048xf32, #tpu.memory_space<vmem>>, vector<1x16xf32>
    %c0_53 = arith.constant 0 : index
    %c513 = arith.constant 513 : index
    %113 = tpu.strided_load %arg1[%c0_53, %c513] {strides = array<i32: 1, 2>} : memref<1x2048xf32, #tpu.memory_space<vmem>>, vector<1x16xf32>
    %114 = arith.maximumf %112, %113 : vector<1x16xf32>
    %115 = vector.extract_strided_slice %114 {offsets = [0, 0], sizes = [1, 8], strides = [1, 1]} : vector<1x16xf32> to vector<1x8xf32>
    %116 = vector.extract_strided_slice %114 {offsets = [0, 8], sizes = [1, 8], strides = [1, 1]} : vector<1x16xf32> to vector<1x8xf32>
    %117 = arith.maximumf %115, %116 : vector<1x8xf32>
    %c0_54 = arith.constant 0 : index
    %c128_55 = arith.constant 128 : index
    %118 = vector.load %arg2[%c0_54, %c128_55] : memref<1x512xf32, #tpu.memory_space<vmem>>, vector<1x8xf32>
    tpu.vector_store %arg2[%c0_54, %c128_55], %117 {strides = array<i32>} : memref<1x512xf32, #tpu.memory_space<vmem>>, vector<1x8xf32>,
    %c0_56 = arith.constant 0 : index
    %c544 = arith.constant 544 : index
    %119 = tpu.strided_load %arg1[%c0_56, %c544] {strides = array<i32: 1, 2>} : memref<1x2048xf32, #tpu.memory_space<vmem>>, vector<1x16xf32>
    %c0_57 = arith.constant 0 : index
    %c545 = arith.constant 545 : index
    %120 = tpu.strided_load %arg1[%c0_57, %c545] {strides = array<i32: 1, 2>} : memref<1x2048xf32, #tpu.memory_space<vmem>>, vector<1x16xf32>
    %121 = arith.maximumf %119, %120 : vector<1x16xf32>
    %122 = vector.extract_strided_slice %121 {offsets = [0, 0], sizes = [1, 8], strides = [1, 1]} : vector<1x16xf32> to vector<1x8xf32>
    %123 = vector.extract_strided_slice %121 {offsets = [0, 8], sizes = [1, 8], strides = [1, 1]} : vector<1x16xf32> to vector<1x8xf32>
    %124 = arith.maximumf %122, %123 : vector<1x8xf32>
    %c0_58 = arith.constant 0 : index
    %c136 = arith.constant 136 : index
    %125 = vector.load %arg2[%c0_58, %c136] : memref<1x512xf32, #tpu.memory_space<vmem>>, vector<1x8xf32>
    tpu.vector_store %arg2[%c0_58, %c136], %124 {strides = array<i32>} : memref<1x512xf32, #tpu.memory_space<vmem>>, vector<1x8xf32>,
    %c0_59 = arith.constant 0 : index
    %c576 = arith.constant 576 : index
    %126 = tpu.strided_load %arg1[%c0_59, %c576] {strides = array<i32: 1, 2>} : memref<1x2048xf32, #tpu.memory_space<vmem>>, vector<1x16xf32>
    %c0_60 = arith.constant 0 : index
    %c577 = arith.constant 577 : index
    %127 = tpu.strided_load %arg1[%c0_60, %c577] {strides = array<i32: 1, 2>} : memref<1x2048xf32, #tpu.memory_space<vmem>>, vector<1x16xf32>
    %128 = arith.maximumf %126, %127 : vector<1x16xf32>
    %129 = vector.extract_strided_slice %128 {offsets = [0, 0], sizes = [1, 8], strides = [1, 1]} : vector<1x16xf32> to vector<1x8xf32>
    %130 = vector.extract_strided_slice %128 {offsets = [0, 8], sizes = [1, 8], strides = [1, 1]} : vector<1x16xf32> to vector<1x8xf32>
    %131 = arith.maximumf %129, %130 : vector<1x8xf32>
    %c0_61 = arith.constant 0 : index
    %c144 = arith.constant 144 : index
    %132 = vector.load %arg2[%c0_61, %c144] : memref<1x512xf32, #tpu.memory_space<vmem>>, vector<1x8xf32>
    tpu.vector_store %arg2[%c0_61, %c144], %131 {strides = array<i32>} : memref<1x512xf32, #tpu.memory_space<vmem>>, vector<1x8xf32>,
    %c0_62 = arith.constant 0 : index
    %c608 = arith.constant 608 : index
    %133 = tpu.strided_load %arg1[%c0_62, %c608] {strides = array<i32: 1, 2>} : memref<1x2048xf32, #tpu.memory_space<vmem>>, vector<1x16xf32>
    %c0_63 = arith.constant 0 : index
    %c609 = arith.constant 609 : index
    %134 = tpu.strided_load %arg1[%c0_63, %c609] {strides = array<i32: 1, 2>} : memref<1x2048xf32, #tpu.memory_space<vmem>>, vector<1x16xf32>
    %135 = arith.maximumf %133, %134 : vector<1x16xf32>
    %136 = vector.extract_strided_slice %135 {offsets = [0, 0], sizes = [1, 8], strides = [1, 1]} : vector<1x16xf32> to vector<1x8xf32>
    %137 = vector.extract_strided_slice %135 {offsets = [0, 8], sizes = [1, 8], strides = [1, 1]} : vector<1x16xf32> to vector<1x8xf32>
    %138 = arith.maximumf %136, %137 : vector<1x8xf32>
    %c0_64 = arith.constant 0 : index
    %c152 = arith.constant 152 : index
    %139 = vector.load %arg2[%c0_64, %c152] : memref<1x512xf32, #tpu.memory_space<vmem>>, vector<1x8xf32>
    tpu.vector_store %arg2[%c0_64, %c152], %138 {strides = array<i32>} : memref<1x512xf32, #tpu.memory_space<vmem>>, vector<1x8xf32>,
    %c0_65 = arith.constant 0 : index
    %c640 = arith.constant 640 : index
    %140 = tpu.strided_load %arg1[%c0_65, %c640] {strides = array<i32: 1, 2>} : memref<1x2048xf32, #tpu.memory_space<vmem>>, vector<1x16xf32>
    %c0_66 = arith.constant 0 : index
    %c641 = arith.constant 641 : index
    %141 = tpu.strided_load %arg1[%c0_66, %c641] {strides = array<i32: 1, 2>} : memref<1x2048xf32, #tpu.memory_space<vmem>>, vector<1x16xf32>
    %142 = arith.maximumf %140, %141 : vector<1x16xf32>
    %143 = vector.extract_strided_slice %142 {offsets = [0, 0], sizes = [1, 8], strides = [1, 1]} : vector<1x16xf32> to vector<1x8xf32>
    %144 = vector.extract_strided_slice %142 {offsets = [0, 8], sizes = [1, 8], strides = [1, 1]} : vector<1x16xf32> to vector<1x8xf32>
    %145 = arith.maximumf %143, %144 : vector<1x8xf32>
    %c0_67 = arith.constant 0 : index
    %c160_68 = arith.constant 160 : index
    %146 = vector.load %arg2[%c0_67, %c160_68] : memref<1x512xf32, #tpu.memory_space<vmem>>, vector<1x8xf32>
    tpu.vector_store %arg2[%c0_67, %c160_68], %145 {strides = array<i32>} : memref<1x512xf32, #tpu.memory_space<vmem>>, vector<1x8xf32>,
    %c0_69 = arith.constant 0 : index
    %c672 = arith.constant 672 : index
    %147 = tpu.strided_load %arg1[%c0_69, %c672] {strides = array<i32: 1, 2>} : memref<1x2048xf32, #tpu.memory_space<vmem>>, vector<1x16xf32>
    %c0_70 = arith.constant 0 : index
    %c673 = arith.constant 673 : index
    %148 = tpu.strided_load %arg1[%c0_70, %c673] {strides = array<i32: 1, 2>} : memref<1x2048xf32, #tpu.memory_space<vmem>>, vector<1x16xf32>
    %149 = arith.maximumf %147, %148 : vector<1x16xf32>
    %150 = vector.extract_strided_slice %149 {offsets = [0, 0], sizes = [1, 8], strides = [1, 1]} : vector<1x16xf32> to vector<1x8xf32>
    %151 = vector.extract_strided_slice %149 {offsets = [0, 8], sizes = [1, 8], strides = [1, 1]} : vector<1x16xf32> to vector<1x8xf32>
    %152 = arith.maximumf %150, %151 : vector<1x8xf32>
    %c0_71 = arith.constant 0 : index
    %c168 = arith.constant 168 : index
    %153 = vector.load %arg2[%c0_71, %c168] : memref<1x512xf32, #tpu.memory_space<vmem>>, vector<1x8xf32>
    tpu.vector_store %arg2[%c0_71, %c168], %152 {strides = array<i32>} : memref<1x512xf32, #tpu.memory_space<vmem>>, vector<1x8xf32>,
    %c0_72 = arith.constant 0 : index
    %c704 = arith.constant 704 : index
    %154 = tpu.strided_load %arg1[%c0_72, %c704] {strides = array<i32: 1, 2>} : memref<1x2048xf32, #tpu.memory_space<vmem>>, vector<1x16xf32>
    %c0_73 = arith.constant 0 : index
    %c705 = arith.constant 705 : index
    %155 = tpu.strided_load %arg1[%c0_73, %c705] {strides = array<i32: 1, 2>} : memref<1x2048xf32, #tpu.memory_space<vmem>>, vector<1x16xf32>
    %156 = arith.maximumf %154, %155 : vector<1x16xf32>
    %157 = vector.extract_strided_slice %156 {offsets = [0, 0], sizes = [1, 8], strides = [1, 1]} : vector<1x16xf32> to vector<1x8xf32>
    %158 = vector.extract_strided_slice %156 {offsets = [0, 8], sizes = [1, 8], strides = [1, 1]} : vector<1x16xf32> to vector<1x8xf32>
    %159 = arith.maximumf %157, %158 : vector<1x8xf32>
    %c0_74 = arith.constant 0 : index
    %c176 = arith.constant 176 : index
    %160 = vector.load %arg2[%c0_74, %c176] : memref<1x512xf32, #tpu.memory_space<vmem>>, vector<1x8xf32>
    tpu.vector_store %arg2[%c0_74, %c176], %159 {strides = array<i32>} : memref<1x512xf32, #tpu.memory_space<vmem>>, vector<1x8xf32>,
    %c0_75 = arith.constant 0 : index
    %c736 = arith.constant 736 : index
    %161 = tpu.strided_load %arg1[%c0_75, %c736] {strides = array<i32: 1, 2>} : memref<1x2048xf32, #tpu.memory_space<vmem>>, vector<1x16xf32>
    %c0_76 = arith.constant 0 : index
    %c737 = arith.constant 737 : index
    %162 = tpu.strided_load %arg1[%c0_76, %c737] {strides = array<i32: 1, 2>} : memref<1x2048xf32, #tpu.memory_space<vmem>>, vector<1x16xf32>
    %163 = arith.maximumf %161, %162 : vector<1x16xf32>
    %164 = vector.extract_strided_slice %163 {offsets = [0, 0], sizes = [1, 8], strides = [1, 1]} : vector<1x16xf32> to vector<1x8xf32>
    %165 = vector.extract_strided_slice %163 {offsets = [0, 8], sizes = [1, 8], strides = [1, 1]} : vector<1x16xf32> to vector<1x8xf32>
    %166 = arith.maximumf %164, %165 : vector<1x8xf32>
    %c0_77 = arith.constant 0 : index
    %c184 = arith.constant 184 : index
    %167 = vector.load %arg2[%c0_77, %c184] : memref<1x512xf32, #tpu.memory_space<vmem>>, vector<1x8xf32>
    tpu.vector_store %arg2[%c0_77, %c184], %166 {strides = array<i32>} : memref<1x512xf32, #tpu.memory_space<vmem>>, vector<1x8xf32>,
    %c0_78 = arith.constant 0 : index
    %c768 = arith.constant 768 : index
    %168 = tpu.strided_load %arg1[%c0_78, %c768] {strides = array<i32: 1, 2>} : memref<1x2048xf32, #tpu.memory_space<vmem>>, vector<1x16xf32>
    %c0_79 = arith.constant 0 : index
    %c769 = arith.constant 769 : index
    %169 = tpu.strided_load %arg1[%c0_79, %c769] {strides = array<i32: 1, 2>} : memref<1x2048xf32, #tpu.memory_space<vmem>>, vector<1x16xf32>
    %170 = arith.maximumf %168, %169 : vector<1x16xf32>
    %171 = vector.extract_strided_slice %170 {offsets = [0, 0], sizes = [1, 8], strides = [1, 1]} : vector<1x16xf32> to vector<1x8xf32>
    %172 = vector.extract_strided_slice %170 {offsets = [0, 8], sizes = [1, 8], strides = [1, 1]} : vector<1x16xf32> to vector<1x8xf32>
    %173 = arith.maximumf %171, %172 : vector<1x8xf32>
    %c0_80 = arith.constant 0 : index
    %c192_81 = arith.constant 192 : index
    %174 = vector.load %arg2[%c0_80, %c192_81] : memref<1x512xf32, #tpu.memory_space<vmem>>, vector<1x8xf32>
    tpu.vector_store %arg2[%c0_80, %c192_81], %173 {strides = array<i32>} : memref<1x512xf32, #tpu.memory_space<vmem>>, vector<1x8xf32>,
    %c0_82 = arith.constant 0 : index
    %c800 = arith.constant 800 : index
    %175 = tpu.strided_load %arg1[%c0_82, %c800] {strides = array<i32: 1, 2>} : memref<1x2048xf32, #tpu.memory_space<vmem>>, vector<1x16xf32>
    %c0_83 = arith.constant 0 : index
    %c801 = arith.constant 801 : index
    %176 = tpu.strided_load %arg1[%c0_83, %c801] {strides = array<i32: 1, 2>} : memref<1x2048xf32, #tpu.memory_space<vmem>>, vector<1x16xf32>
    %177 = arith.maximumf %175, %176 : vector<1x16xf32>
    %178 = vector.extract_strided_slice %177 {offsets = [0, 0], sizes = [1, 8], strides = [1, 1]} : vector<1x16xf32> to vector<1x8xf32>
    %179 = vector.extract_strided_slice %177 {offsets = [0, 8], sizes = [1, 8], strides = [1, 1]} : vector<1x16xf32> to vector<1x8xf32>
    %180 = arith.maximumf %178, %179 : vector<1x8xf32>
    %c0_84 = arith.constant 0 : index
    %c200 = arith.constant 200 : index
    %181 = vector.load %arg2[%c0_84, %c200] : memref<1x512xf32, #tpu.memory_space<vmem>>, vector<1x8xf32>
    tpu.vector_store %arg2[%c0_84, %c200], %180 {strides = array<i32>} : memref<1x512xf32, #tpu.memory_space<vmem>>, vector<1x8xf32>,
    %c0_85 = arith.constant 0 : index
    %c832 = arith.constant 832 : index
    %182 = tpu.strided_load %arg1[%c0_85, %c832] {strides = array<i32: 1, 2>} : memref<1x2048xf32, #tpu.memory_space<vmem>>, vector<1x16xf32>
    %c0_86 = arith.constant 0 : index
    %c833 = arith.constant 833 : index
    %183 = tpu.strided_load %arg1[%c0_86, %c833] {strides = array<i32: 1, 2>} : memref<1x2048xf32, #tpu.memory_space<vmem>>, vector<1x16xf32>
    %184 = arith.maximumf %182, %183 : vector<1x16xf32>
    %185 = vector.extract_strided_slice %184 {offsets = [0, 0], sizes = [1, 8], strides = [1, 1]} : vector<1x16xf32> to vector<1x8xf32>
    %186 = vector.extract_strided_slice %184 {offsets = [0, 8], sizes = [1, 8], strides = [1, 1]} : vector<1x16xf32> to vector<1x8xf32>
    %187 = arith.maximumf %185, %186 : vector<1x8xf32>
    %c0_87 = arith.constant 0 : index
    %c208 = arith.constant 208 : index
    %188 = vector.load %arg2[%c0_87, %c208] : memref<1x512xf32, #tpu.memory_space<vmem>>, vector<1x8xf32>
    tpu.vector_store %arg2[%c0_87, %c208], %187 {strides = array<i32>} : memref<1x512xf32, #tpu.memory_space<vmem>>, vector<1x8xf32>,
    %c0_88 = arith.constant 0 : index
    %c864 = arith.constant 864 : index
    %189 = tpu.strided_load %arg1[%c0_88, %c864] {strides = array<i32: 1, 2>} : memref<1x2048xf32, #tpu.memory_space<vmem>>, vector<1x16xf32>
    %c0_89 = arith.constant 0 : index
    %c865 = arith.constant 865 : index
    %190 = tpu.strided_load %arg1[%c0_89, %c865] {strides = array<i32: 1, 2>} : memref<1x2048xf32, #tpu.memory_space<vmem>>, vector<1x16xf32>
    %191 = arith.maximumf %189, %190 : vector<1x16xf32>
    %192 = vector.extract_strided_slice %191 {offsets = [0, 0], sizes = [1, 8], strides = [1, 1]} : vector<1x16xf32> to vector<1x8xf32>
    %193 = vector.extract_strided_slice %191 {offsets = [0, 8], sizes = [1, 8], strides = [1, 1]} : vector<1x16xf32> to vector<1x8xf32>
    %194 = arith.maximumf %192, %193 : vector<1x8xf32>
    %c0_90 = arith.constant 0 : index
    %c216 = arith.constant 216 : index
    %195 = vector.load %arg2[%c0_90, %c216] : memref<1x512xf32, #tpu.memory_space<vmem>>, vector<1x8xf32>
    tpu.vector_store %arg2[%c0_90, %c216], %194 {strides = array<i32>} : memref<1x512xf32, #tpu.memory_space<vmem>>, vector<1x8xf32>,
    %c0_91 = arith.constant 0 : index
    %c896 = arith.constant 896 : index
    %196 = tpu.strided_load %arg1[%c0_91, %c896] {strides = array<i32: 1, 2>} : memref<1x2048xf32, #tpu.memory_space<vmem>>, vector<1x16xf32>
    %c0_92 = arith.constant 0 : index
    %c897 = arith.constant 897 : index
    %197 = tpu.strided_load %arg1[%c0_92, %c897] {strides = array<i32: 1, 2>} : memref<1x2048xf32, #tpu.memory_space<vmem>>, vector<1x16xf32>
    %198 = arith.maximumf %196, %197 : vector<1x16xf32>
    %199 = vector.extract_strided_slice %198 {offsets = [0, 0], sizes = [1, 8], strides = [1, 1]} : vector<1x16xf32> to vector<1x8xf32>
    %200 = vector.extract_strided_slice %198 {offsets = [0, 8], sizes = [1, 8], strides = [1, 1]} : vector<1x16xf32> to vector<1x8xf32>
    %201 = arith.maximumf %199, %200 : vector<1x8xf32>
    %c0_93 = arith.constant 0 : index
    %c224_94 = arith.constant 224 : index
    %202 = vector.load %arg2[%c0_93, %c224_94] : memref<1x512xf32, #tpu.memory_space<vmem>>, vector<1x8xf32>
    tpu.vector_store %arg2[%c0_93, %c224_94], %201 {strides = array<i32>} : memref<1x512xf32, #tpu.memory_space<vmem>>, vector<1x8xf32>,
    %c0_95 = arith.constant 0 : index
    %c928 = arith.constant 928 : index
    %203 = tpu.strided_load %arg1[%c0_95, %c928] {strides = array<i32: 1, 2>} : memref<1x2048xf32, #tpu.memory_space<vmem>>, vector<1x16xf32>
    %c0_96 = arith.constant 0 : index
    %c929 = arith.constant 929 : index
    %204 = tpu.strided_load %arg1[%c0_96, %c929] {strides = array<i32: 1, 2>} : memref<1x2048xf32, #tpu.memory_space<vmem>>, vector<1x16xf32>
    %205 = arith.maximumf %203, %204 : vector<1x16xf32>
    %206 = vector.extract_strided_slice %205 {offsets = [0, 0], sizes = [1, 8], strides = [1, 1]} : vector<1x16xf32> to vector<1x8xf32>
    %207 = vector.extract_strided_slice %205 {offsets = [0, 8], sizes = [1, 8], strides = [1, 1]} : vector<1x16xf32> to vector<1x8xf32>
    %208 = arith.maximumf %206, %207 : vector<1x8xf32>
    %c0_97 = arith.constant 0 : index
    %c232 = arith.constant 232 : index
    %209 = vector.load %arg2[%c0_97, %c232] : memref<1x512xf32, #tpu.memory_space<vmem>>, vector<1x8xf32>
    tpu.vector_store %arg2[%c0_97, %c232], %208 {strides = array<i32>} : memref<1x512xf32, #tpu.memory_space<vmem>>, vector<1x8xf32>,
    %c0_98 = arith.constant 0 : index
    %c960 = arith.constant 960 : index
    %210 = tpu.strided_load %arg1[%c0_98, %c960] {strides = array<i32: 1, 2>} : memref<1x2048xf32, #tpu.memory_space<vmem>>, vector<1x16xf32>
    %c0_99 = arith.constant 0 : index
    %c961 = arith.constant 961 : index
    %211 = tpu.strided_load %arg1[%c0_99, %c961] {strides = array<i32: 1, 2>} : memref<1x2048xf32, #tpu.memory_space<vmem>>, vector<1x16xf32>
    %212 = arith.maximumf %210, %211 : vector<1x16xf32>
    %213 = vector.extract_strided_slice %212 {offsets = [0, 0], sizes = [1, 8], strides = [1, 1]} : vector<1x16xf32> to vector<1x8xf32>
    %214 = vector.extract_strided_slice %212 {offsets = [0, 8], sizes = [1, 8], strides = [1, 1]} : vector<1x16xf32> to vector<1x8xf32>
    %215 = arith.maximumf %213, %214 : vector<1x8xf32>
    %c0_100 = arith.constant 0 : index
    %c240 = arith.constant 240 : index
    %216 = vector.load %arg2[%c0_100, %c240] : memref<1x512xf32, #tpu.memory_space<vmem>>, vector<1x8xf32>
    tpu.vector_store %arg2[%c0_100, %c240], %215 {strides = array<i32>} : memref<1x512xf32, #tpu.memory_space<vmem>>, vector<1x8xf32>,
    %c0_101 = arith.constant 0 : index
    %c992 = arith.constant 992 : index
    %217 = tpu.strided_load %arg1[%c0_101, %c992] {strides = array<i32: 1, 2>} : memref<1x2048xf32, #tpu.memory_space<vmem>>, vector<1x16xf32>
    %c0_102 = arith.constant 0 : index
    %c993 = arith.constant 993 : index
    %218 = tpu.strided_load %arg1[%c0_102, %c993] {strides = array<i32: 1, 2>} : memref<1x2048xf32, #tpu.memory_space<vmem>>, vector<1x16xf32>
    %219 = arith.maximumf %217, %218 : vector<1x16xf32>
    %220 = vector.extract_strided_slice %219 {offsets = [0, 0], sizes = [1, 8], strides = [1, 1]} : vector<1x16xf32> to vector<1x8xf32>
    %221 = vector.extract_strided_slice %219 {offsets = [0, 8], sizes = [1, 8], strides = [1, 1]} : vector<1x16xf32> to vector<1x8xf32>
    %222 = arith.maximumf %220, %221 : vector<1x8xf32>
    %c0_103 = arith.constant 0 : index
    %c248 = arith.constant 248 : index
    %223 = vector.load %arg2[%c0_103, %c248] : memref<1x512xf32, #tpu.memory_space<vmem>>, vector<1x8xf32>
    tpu.vector_store %arg2[%c0_103, %c248], %222 {strides = array<i32>} : memref<1x512xf32, #tpu.memory_space<vmem>>, vector<1x8xf32>,
    %c0_104 = arith.constant 0 : index
    %c1024 = arith.constant 1024 : index
    %224 = tpu.strided_load %arg1[%c0_104, %c1024] {strides = array<i32: 1, 2>} : memref<1x2048xf32, #tpu.memory_space<vmem>>, vector<1x16xf32>
    %c0_105 = arith.constant 0 : index
    %c1025 = arith.constant 1025 : index
    %225 = tpu.strided_load %arg1[%c0_105, %c1025] {strides = array<i32: 1, 2>} : memref<1x2048xf32, #tpu.memory_space<vmem>>, vector<1x16xf32>
    %226 = arith.maximumf %224, %225 : vector<1x16xf32>
    %227 = vector.extract_strided_slice %226 {offsets = [0, 0], sizes = [1, 8], strides = [1, 1]} : vector<1x16xf32> to vector<1x8xf32>
    %228 = vector.extract_strided_slice %226 {offsets = [0, 8], sizes = [1, 8], strides = [1, 1]} : vector<1x16xf32> to vector<1x8xf32>
    %229 = arith.maximumf %227, %228 : vector<1x8xf32>
    %c0_106 = arith.constant 0 : index
    %c256_107 = arith.constant 256 : index
    %230 = vector.load %arg2[%c0_106, %c256_107] : memref<1x512xf32, #tpu.memory_space<vmem>>, vector<1x8xf32>
    tpu.vector_store %arg2[%c0_106, %c256_107], %229 {strides = array<i32>} : memref<1x512xf32, #tpu.memory_space<vmem>>, vector<1x8xf32>,
    %c0_108 = arith.constant 0 : index
    %c1056 = arith.constant 1056 : index
    %231 = tpu.strided_load %arg1[%c0_108, %c1056] {strides = array<i32: 1, 2>} : memref<1x2048xf32, #tpu.memory_space<vmem>>, vector<1x16xf32>
    %c0_109 = arith.constant 0 : index
    %c1057 = arith.constant 1057 : index
    %232 = tpu.strided_load %arg1[%c0_109, %c1057] {strides = array<i32: 1, 2>} : memref<1x2048xf32, #tpu.memory_space<vmem>>, vector<1x16xf32>
    %233 = arith.maximumf %231, %232 : vector<1x16xf32>
    %234 = vector.extract_strided_slice %233 {offsets = [0, 0], sizes = [1, 8], strides = [1, 1]} : vector<1x16xf32> to vector<1x8xf32>
    %235 = vector.extract_strided_slice %233 {offsets = [0, 8], sizes = [1, 8], strides = [1, 1]} : vector<1x16xf32> to vector<1x8xf32>
    %236 = arith.maximumf %234, %235 : vector<1x8xf32>
    %c0_110 = arith.constant 0 : index
    %c264 = arith.constant 264 : index
    %237 = vector.load %arg2[%c0_110, %c264] : memref<1x512xf32, #tpu.memory_space<vmem>>, vector<1x8xf32>
    tpu.vector_store %arg2[%c0_110, %c264], %236 {strides = array<i32>} : memref<1x512xf32, #tpu.memory_space<vmem>>, vector<1x8xf32>,
    %c0_111 = arith.constant 0 : index
    %c1088 = arith.constant 1088 : index
    %238 = tpu.strided_load %arg1[%c0_111, %c1088] {strides = array<i32: 1, 2>} : memref<1x2048xf32, #tpu.memory_space<vmem>>, vector<1x16xf32>
    %c0_112 = arith.constant 0 : index
    %c1089 = arith.constant 1089 : index
    %239 = tpu.strided_load %arg1[%c0_112, %c1089] {strides = array<i32: 1, 2>} : memref<1x2048xf32, #tpu.memory_space<vmem>>, vector<1x16xf32>
    %240 = arith.maximumf %238, %239 : vector<1x16xf32>
    %241 = vector.extract_strided_slice %240 {offsets = [0, 0], sizes = [1, 8], strides = [1, 1]} : vector<1x16xf32> to vector<1x8xf32>
    %242 = vector.extract_strided_slice %240 {offsets = [0, 8], sizes = [1, 8], strides = [1, 1]} : vector<1x16xf32> to vector<1x8xf32>
    %243 = arith.maximumf %241, %242 : vector<1x8xf32>
    %c0_113 = arith.constant 0 : index
    %c272 = arith.constant 272 : index
    %244 = vector.load %arg2[%c0_113, %c272] : memref<1x512xf32, #tpu.memory_space<vmem>>, vector<1x8xf32>
    tpu.vector_store %arg2[%c0_113, %c272], %243 {strides = array<i32>} : memref<1x512xf32, #tpu.memory_space<vmem>>, vector<1x8xf32>,
    %c0_114 = arith.constant 0 : index
    %c1120 = arith.constant 1120 : index
    %245 = tpu.strided_load %arg1[%c0_114, %c1120] {strides = array<i32: 1, 2>} : memref<1x2048xf32, #tpu.memory_space<vmem>>, vector<1x16xf32>
    %c0_115 = arith.constant 0 : index
    %c1121 = arith.constant 1121 : index
    %246 = tpu.strided_load %arg1[%c0_115, %c1121] {strides = array<i32: 1, 2>} : memref<1x2048xf32, #tpu.memory_space<vmem>>, vector<1x16xf32>
    %247 = arith.maximumf %245, %246 : vector<1x16xf32>
    %248 = vector.extract_strided_slice %247 {offsets = [0, 0], sizes = [1, 8], strides = [1, 1]} : vector<1x16xf32> to vector<1x8xf32>
    %249 = vector.extract_strided_slice %247 {offsets = [0, 8], sizes = [1, 8], strides = [1, 1]} : vector<1x16xf32> to vector<1x8xf32>
    %250 = arith.maximumf %248, %249 : vector<1x8xf32>
    %c0_116 = arith.constant 0 : index
    %c280 = arith.constant 280 : index
    %251 = vector.load %arg2[%c0_116, %c280] : memref<1x512xf32, #tpu.memory_space<vmem>>, vector<1x8xf32>
    tpu.vector_store %arg2[%c0_116, %c280], %250 {strides = array<i32>} : memref<1x512xf32, #tpu.memory_space<vmem>>, vector<1x8xf32>,
    %c0_117 = arith.constant 0 : index
    %c1152 = arith.constant 1152 : index
    %252 = tpu.strided_load %arg1[%c0_117, %c1152] {strides = array<i32: 1, 2>} : memref<1x2048xf32, #tpu.memory_space<vmem>>, vector<1x16xf32>
    %c0_118 = arith.constant 0 : index
    %c1153 = arith.constant 1153 : index
    %253 = tpu.strided_load %arg1[%c0_118, %c1153] {strides = array<i32: 1, 2>} : memref<1x2048xf32, #tpu.memory_space<vmem>>, vector<1x16xf32>
    %254 = arith.maximumf %252, %253 : vector<1x16xf32>
    %255 = vector.extract_strided_slice %254 {offsets = [0, 0], sizes = [1, 8], strides = [1, 1]} : vector<1x16xf32> to vector<1x8xf32>
    %256 = vector.extract_strided_slice %254 {offsets = [0, 8], sizes = [1, 8], strides = [1, 1]} : vector<1x16xf32> to vector<1x8xf32>
    %257 = arith.maximumf %255, %256 : vector<1x8xf32>
    %c0_119 = arith.constant 0 : index
    %c288_120 = arith.constant 288 : index
    %258 = vector.load %arg2[%c0_119, %c288_120] : memref<1x512xf32, #tpu.memory_space<vmem>>, vector<1x8xf32>
    tpu.vector_store %arg2[%c0_119, %c288_120], %257 {strides = array<i32>} : memref<1x512xf32, #tpu.memory_space<vmem>>, vector<1x8xf32>,
    %c0_121 = arith.constant 0 : index
    %c1184 = arith.constant 1184 : index
    %259 = tpu.strided_load %arg1[%c0_121, %c1184] {strides = array<i32: 1, 2>} : memref<1x2048xf32, #tpu.memory_space<vmem>>, vector<1x16xf32>
    %c0_122 = arith.constant 0 : index
    %c1185 = arith.constant 1185 : index
    %260 = tpu.strided_load %arg1[%c0_122, %c1185] {strides = array<i32: 1, 2>} : memref<1x2048xf32, #tpu.memory_space<vmem>>, vector<1x16xf32>
    %261 = arith.maximumf %259, %260 : vector<1x16xf32>
    %262 = vector.extract_strided_slice %261 {offsets = [0, 0], sizes = [1, 8], strides = [1, 1]} : vector<1x16xf32> to vector<1x8xf32>
    %263 = vector.extract_strided_slice %261 {offsets = [0, 8], sizes = [1, 8], strides = [1, 1]} : vector<1x16xf32> to vector<1x8xf32>
    %264 = arith.maximumf %262, %263 : vector<1x8xf32>
    %c0_123 = arith.constant 0 : index
    %c296 = arith.constant 296 : index
    %265 = vector.load %arg2[%c0_123, %c296] : memref<1x512xf32, #tpu.memory_space<vmem>>, vector<1x8xf32>
    tpu.vector_store %arg2[%c0_123, %c296], %264 {strides = array<i32>} : memref<1x512xf32, #tpu.memory_space<vmem>>, vector<1x8xf32>,
    %c0_124 = arith.constant 0 : index
    %c1216 = arith.constant 1216 : index
    %266 = tpu.strided_load %arg1[%c0_124, %c1216] {strides = array<i32: 1, 2>} : memref<1x2048xf32, #tpu.memory_space<vmem>>, vector<1x16xf32>
    %c0_125 = arith.constant 0 : index
    %c1217 = arith.constant 1217 : index
    %267 = tpu.strided_load %arg1[%c0_125, %c1217] {strides = array<i32: 1, 2>} : memref<1x2048xf32, #tpu.memory_space<vmem>>, vector<1x16xf32>
    %268 = arith.maximumf %266, %267 : vector<1x16xf32>
    %269 = vector.extract_strided_slice %268 {offsets = [0, 0], sizes = [1, 8], strides = [1, 1]} : vector<1x16xf32> to vector<1x8xf32>
    %270 = vector.extract_strided_slice %268 {offsets = [0, 8], sizes = [1, 8], strides = [1, 1]} : vector<1x16xf32> to vector<1x8xf32>
    %271 = arith.maximumf %269, %270 : vector<1x8xf32>
    %c0_126 = arith.constant 0 : index
    %c304 = arith.constant 304 : index
    %272 = vector.load %arg2[%c0_126, %c304] : memref<1x512xf32, #tpu.memory_space<vmem>>, vector<1x8xf32>
    tpu.vector_store %arg2[%c0_126, %c304], %271 {strides = array<i32>} : memref<1x512xf32, #tpu.memory_space<vmem>>, vector<1x8xf32>,
    %c0_127 = arith.constant 0 : index
    %c1248 = arith.constant 1248 : index
    %273 = tpu.strided_load %arg1[%c0_127, %c1248] {strides = array<i32: 1, 2>} : memref<1x2048xf32, #tpu.memory_space<vmem>>, vector<1x16xf32>
    %c0_128 = arith.constant 0 : index
    %c1249 = arith.constant 1249 : index
    %274 = tpu.strided_load %arg1[%c0_128, %c1249] {strides = array<i32: 1, 2>} : memref<1x2048xf32, #tpu.memory_space<vmem>>, vector<1x16xf32>
    %275 = arith.maximumf %273, %274 : vector<1x16xf32>
    %276 = vector.extract_strided_slice %275 {offsets = [0, 0], sizes = [1, 8], strides = [1, 1]} : vector<1x16xf32> to vector<1x8xf32>
    %277 = vector.extract_strided_slice %275 {offsets = [0, 8], sizes = [1, 8], strides = [1, 1]} : vector<1x16xf32> to vector<1x8xf32>
    %278 = arith.maximumf %276, %277 : vector<1x8xf32>
    %c0_129 = arith.constant 0 : index
    %c312 = arith.constant 312 : index
    %279 = vector.load %arg2[%c0_129, %c312] : memref<1x512xf32, #tpu.memory_space<vmem>>, vector<1x8xf32>
    tpu.vector_store %arg2[%c0_129, %c312], %278 {strides = array<i32>} : memref<1x512xf32, #tpu.memory_space<vmem>>, vector<1x8xf32>,
    %c0_130 = arith.constant 0 : index
    %c1280 = arith.constant 1280 : index
    %280 = tpu.strided_load %arg1[%c0_130, %c1280] {strides = array<i32: 1, 2>} : memref<1x2048xf32, #tpu.memory_space<vmem>>, vector<1x16xf32>
    %c0_131 = arith.constant 0 : index
    %c1281 = arith.constant 1281 : index
    %281 = tpu.strided_load %arg1[%c0_131, %c1281] {strides = array<i32: 1, 2>} : memref<1x2048xf32, #tpu.memory_space<vmem>>, vector<1x16xf32>
    %282 = arith.maximumf %280, %281 : vector<1x16xf32>
    %283 = vector.extract_strided_slice %282 {offsets = [0, 0], sizes = [1, 8], strides = [1, 1]} : vector<1x16xf32> to vector<1x8xf32>
    %284 = vector.extract_strided_slice %282 {offsets = [0, 8], sizes = [1, 8], strides = [1, 1]} : vector<1x16xf32> to vector<1x8xf32>
    %285 = arith.maximumf %283, %284 : vector<1x8xf32>
    %c0_132 = arith.constant 0 : index
    %c320_133 = arith.constant 320 : index
    %286 = vector.load %arg2[%c0_132, %c320_133] : memref<1x512xf32, #tpu.memory_space<vmem>>, vector<1x8xf32>
    tpu.vector_store %arg2[%c0_132, %c320_133], %285 {strides = array<i32>} : memref<1x512xf32, #tpu.memory_space<vmem>>, vector<1x8xf32>,
    %c0_134 = arith.constant 0 : index
    %c1312 = arith.constant 1312 : index
    %287 = tpu.strided_load %arg1[%c0_134, %c1312] {strides = array<i32: 1, 2>} : memref<1x2048xf32, #tpu.memory_space<vmem>>, vector<1x16xf32>
    %c0_135 = arith.constant 0 : index
    %c1313 = arith.constant 1313 : index
    %288 = tpu.strided_load %arg1[%c0_135, %c1313] {strides = array<i32: 1, 2>} : memref<1x2048xf32, #tpu.memory_space<vmem>>, vector<1x16xf32>
    %289 = arith.maximumf %287, %288 : vector<1x16xf32>
    %290 = vector.extract_strided_slice %289 {offsets = [0, 0], sizes = [1, 8], strides = [1, 1]} : vector<1x16xf32> to vector<1x8xf32>
    %291 = vector.extract_strided_slice %289 {offsets = [0, 8], sizes = [1, 8], strides = [1, 1]} : vector<1x16xf32> to vector<1x8xf32>
    %292 = arith.maximumf %290, %291 : vector<1x8xf32>
    %c0_136 = arith.constant 0 : index
    %c328 = arith.constant 328 : index
    %293 = vector.load %arg2[%c0_136, %c328] : memref<1x512xf32, #tpu.memory_space<vmem>>, vector<1x8xf32>
    tpu.vector_store %arg2[%c0_136, %c328], %292 {strides = array<i32>} : memref<1x512xf32, #tpu.memory_space<vmem>>, vector<1x8xf32>,
    %c0_137 = arith.constant 0 : index
    %c1344 = arith.constant 1344 : index
    %294 = tpu.strided_load %arg1[%c0_137, %c1344] {strides = array<i32: 1, 2>} : memref<1x2048xf32, #tpu.memory_space<vmem>>, vector<1x16xf32>
    %c0_138 = arith.constant 0 : index
    %c1345 = arith.constant 1345 : index
    %295 = tpu.strided_load %arg1[%c0_138, %c1345] {strides = array<i32: 1, 2>} : memref<1x2048xf32, #tpu.memory_space<vmem>>, vector<1x16xf32>
    %296 = arith.maximumf %294, %295 : vector<1x16xf32>
    %297 = vector.extract_strided_slice %296 {offsets = [0, 0], sizes = [1, 8], strides = [1, 1]} : vector<1x16xf32> to vector<1x8xf32>
    %298 = vector.extract_strided_slice %296 {offsets = [0, 8], sizes = [1, 8], strides = [1, 1]} : vector<1x16xf32> to vector<1x8xf32>
    %299 = arith.maximumf %297, %298 : vector<1x8xf32>
    %c0_139 = arith.constant 0 : index
    %c336 = arith.constant 336 : index
    %300 = vector.load %arg2[%c0_139, %c336] : memref<1x512xf32, #tpu.memory_space<vmem>>, vector<1x8xf32>
    tpu.vector_store %arg2[%c0_139, %c336], %299 {strides = array<i32>} : memref<1x512xf32, #tpu.memory_space<vmem>>, vector<1x8xf32>,
    %c0_140 = arith.constant 0 : index
    %c1376 = arith.constant 1376 : index
    %301 = tpu.strided_load %arg1[%c0_140, %c1376] {strides = array<i32: 1, 2>} : memref<1x2048xf32, #tpu.memory_space<vmem>>, vector<1x16xf32>
    %c0_141 = arith.constant 0 : index
    %c1377 = arith.constant 1377 : index
    %302 = tpu.strided_load %arg1[%c0_141, %c1377] {strides = array<i32: 1, 2>} : memref<1x2048xf32, #tpu.memory_space<vmem>>, vector<1x16xf32>
    %303 = arith.maximumf %301, %302 : vector<1x16xf32>
    %304 = vector.extract_strided_slice %303 {offsets = [0, 0], sizes = [1, 8], strides = [1, 1]} : vector<1x16xf32> to vector<1x8xf32>
    %305 = vector.extract_strided_slice %303 {offsets = [0, 8], sizes = [1, 8], strides = [1, 1]} : vector<1x16xf32> to vector<1x8xf32>
    %306 = arith.maximumf %304, %305 : vector<1x8xf32>
    %c0_142 = arith.constant 0 : index
    %c344 = arith.constant 344 : index
    %307 = vector.load %arg2[%c0_142, %c344] : memref<1x512xf32, #tpu.memory_space<vmem>>, vector<1x8xf32>
    tpu.vector_store %arg2[%c0_142, %c344], %306 {strides = array<i32>} : memref<1x512xf32, #tpu.memory_space<vmem>>, vector<1x8xf32>,
    %c0_143 = arith.constant 0 : index
    %c1408 = arith.constant 1408 : index
    %308 = tpu.strided_load %arg1[%c0_143, %c1408] {strides = array<i32: 1, 2>} : memref<1x2048xf32, #tpu.memory_space<vmem>>, vector<1x16xf32>
    %c0_144 = arith.constant 0 : index
    %c1409 = arith.constant 1409 : index
    %309 = tpu.strided_load %arg1[%c0_144, %c1409] {strides = array<i32: 1, 2>} : memref<1x2048xf32, #tpu.memory_space<vmem>>, vector<1x16xf32>
    %310 = arith.maximumf %308, %309 : vector<1x16xf32>
    %311 = vector.extract_strided_slice %310 {offsets = [0, 0], sizes = [1, 8], strides = [1, 1]} : vector<1x16xf32> to vector<1x8xf32>
    %312 = vector.extract_strided_slice %310 {offsets = [0, 8], sizes = [1, 8], strides = [1, 1]} : vector<1x16xf32> to vector<1x8xf32>
    %313 = arith.maximumf %311, %312 : vector<1x8xf32>
    %c0_145 = arith.constant 0 : index
    %c352_146 = arith.constant 352 : index
    %314 = vector.load %arg2[%c0_145, %c352_146] : memref<1x512xf32, #tpu.memory_space<vmem>>, vector<1x8xf32>
    tpu.vector_store %arg2[%c0_145, %c352_146], %313 {strides = array<i32>} : memref<1x512xf32, #tpu.memory_space<vmem>>, vector<1x8xf32>,
    %c0_147 = arith.constant 0 : index
    %c1440 = arith.constant 1440 : index
    %315 = tpu.strided_load %arg1[%c0_147, %c1440] {strides = array<i32: 1, 2>} : memref<1x2048xf32, #tpu.memory_space<vmem>>, vector<1x16xf32>
    %c0_148 = arith.constant 0 : index
    %c1441 = arith.constant 1441 : index
    %316 = tpu.strided_load %arg1[%c0_148, %c1441] {strides = array<i32: 1, 2>} : memref<1x2048xf32, #tpu.memory_space<vmem>>, vector<1x16xf32>
    %317 = arith.maximumf %315, %316 : vector<1x16xf32>
    %318 = vector.extract_strided_slice %317 {offsets = [0, 0], sizes = [1, 8], strides = [1, 1]} : vector<1x16xf32> to vector<1x8xf32>
    %319 = vector.extract_strided_slice %317 {offsets = [0, 8], sizes = [1, 8], strides = [1, 1]} : vector<1x16xf32> to vector<1x8xf32>
    %320 = arith.maximumf %318, %319 : vector<1x8xf32>
    %c0_149 = arith.constant 0 : index
    %c360 = arith.constant 360 : index
    %321 = vector.load %arg2[%c0_149, %c360] : memref<1x512xf32, #tpu.memory_space<vmem>>, vector<1x8xf32>
    tpu.vector_store %arg2[%c0_149, %c360], %320 {strides = array<i32>} : memref<1x512xf32, #tpu.memory_space<vmem>>, vector<1x8xf32>,
    %c0_150 = arith.constant 0 : index
    %c1472 = arith.constant 1472 : index
    %322 = tpu.strided_load %arg1[%c0_150, %c1472] {strides = array<i32: 1, 2>} : memref<1x2048xf32, #tpu.memory_space<vmem>>, vector<1x16xf32>
    %c0_151 = arith.constant 0 : index
    %c1473 = arith.constant 1473 : index
    %323 = tpu.strided_load %arg1[%c0_151, %c1473] {strides = array<i32: 1, 2>} : memref<1x2048xf32, #tpu.memory_space<vmem>>, vector<1x16xf32>
    %324 = arith.maximumf %322, %323 : vector<1x16xf32>
    %325 = vector.extract_strided_slice %324 {offsets = [0, 0], sizes = [1, 8], strides = [1, 1]} : vector<1x16xf32> to vector<1x8xf32>
    %326 = vector.extract_strided_slice %324 {offsets = [0, 8], sizes = [1, 8], strides = [1, 1]} : vector<1x16xf32> to vector<1x8xf32>
    %327 = arith.maximumf %325, %326 : vector<1x8xf32>
    %c0_152 = arith.constant 0 : index
    %c368 = arith.constant 368 : index
    %328 = vector.load %arg2[%c0_152, %c368] : memref<1x512xf32, #tpu.memory_space<vmem>>, vector<1x8xf32>
    tpu.vector_store %arg2[%c0_152, %c368], %327 {strides = array<i32>} : memref<1x512xf32, #tpu.memory_space<vmem>>, vector<1x8xf32>,
    %c0_153 = arith.constant 0 : index
    %c1504 = arith.constant 1504 : index
    %329 = tpu.strided_load %arg1[%c0_153, %c1504] {strides = array<i32: 1, 2>} : memref<1x2048xf32, #tpu.memory_space<vmem>>, vector<1x16xf32>
    %c0_154 = arith.constant 0 : index
    %c1505 = arith.constant 1505 : index
    %330 = tpu.strided_load %arg1[%c0_154, %c1505] {strides = array<i32: 1, 2>} : memref<1x2048xf32, #tpu.memory_space<vmem>>, vector<1x16xf32>
    %331 = arith.maximumf %329, %330 : vector<1x16xf32>
    %332 = vector.extract_strided_slice %331 {offsets = [0, 0], sizes = [1, 8], strides = [1, 1]} : vector<1x16xf32> to vector<1x8xf32>
    %333 = vector.extract_strided_slice %331 {offsets = [0, 8], sizes = [1, 8], strides = [1, 1]} : vector<1x16xf32> to vector<1x8xf32>
    %334 = arith.maximumf %332, %333 : vector<1x8xf32>
    %c0_155 = arith.constant 0 : index
    %c376 = arith.constant 376 : index
    %335 = vector.load %arg2[%c0_155, %c376] : memref<1x512xf32, #tpu.memory_space<vmem>>, vector<1x8xf32>
    tpu.vector_store %arg2[%c0_155, %c376], %334 {strides = array<i32>} : memref<1x512xf32, #tpu.memory_space<vmem>>, vector<1x8xf32>,
    %c0_156 = arith.constant 0 : index
    %c1536 = arith.constant 1536 : index
    %336 = tpu.strided_load %arg1[%c0_156, %c1536] {strides = array<i32: 1, 2>} : memref<1x2048xf32, #tpu.memory_space<vmem>>, vector<1x16xf32>
    %c0_157 = arith.constant 0 : index
    %c1537 = arith.constant 1537 : index
    %337 = tpu.strided_load %arg1[%c0_157, %c1537] {strides = array<i32: 1, 2>} : memref<1x2048xf32, #tpu.memory_space<vmem>>, vector<1x16xf32>
    %338 = arith.maximumf %336, %337 : vector<1x16xf32>
    %339 = vector.extract_strided_slice %338 {offsets = [0, 0], sizes = [1, 8], strides = [1, 1]} : vector<1x16xf32> to vector<1x8xf32>
    %340 = vector.extract_strided_slice %338 {offsets = [0, 8], sizes = [1, 8], strides = [1, 1]} : vector<1x16xf32> to vector<1x8xf32>
    %341 = arith.maximumf %339, %340 : vector<1x8xf32>
    %c0_158 = arith.constant 0 : index
    %c384_159 = arith.constant 384 : index
    %342 = vector.load %arg2[%c0_158, %c384_159] : memref<1x512xf32, #tpu.memory_space<vmem>>, vector<1x8xf32>
    tpu.vector_store %arg2[%c0_158, %c384_159], %341 {strides = array<i32>} : memref<1x512xf32, #tpu.memory_space<vmem>>, vector<1x8xf32>,
    %c0_160 = arith.constant 0 : index
    %c1568 = arith.constant 1568 : index
    %343 = tpu.strided_load %arg1[%c0_160, %c1568] {strides = array<i32: 1, 2>} : memref<1x2048xf32, #tpu.memory_space<vmem>>, vector<1x16xf32>
    %c0_161 = arith.constant 0 : index
    %c1569 = arith.constant 1569 : index
    %344 = tpu.strided_load %arg1[%c0_161, %c1569] {strides = array<i32: 1, 2>} : memref<1x2048xf32, #tpu.memory_space<vmem>>, vector<1x16xf32>
    %345 = arith.maximumf %343, %344 : vector<1x16xf32>
    %346 = vector.extract_strided_slice %345 {offsets = [0, 0], sizes = [1, 8], strides = [1, 1]} : vector<1x16xf32> to vector<1x8xf32>
    %347 = vector.extract_strided_slice %345 {offsets = [0, 8], sizes = [1, 8], strides = [1, 1]} : vector<1x16xf32> to vector<1x8xf32>
    %348 = arith.maximumf %346, %347 : vector<1x8xf32>
    %c0_162 = arith.constant 0 : index
    %c392 = arith.constant 392 : index
    %349 = vector.load %arg2[%c0_162, %c392] : memref<1x512xf32, #tpu.memory_space<vmem>>, vector<1x8xf32>
    tpu.vector_store %arg2[%c0_162, %c392], %348 {strides = array<i32>} : memref<1x512xf32, #tpu.memory_space<vmem>>, vector<1x8xf32>,
    %c0_163 = arith.constant 0 : index
    %c1600 = arith.constant 1600 : index
    %350 = tpu.strided_load %arg1[%c0_163, %c1600] {strides = array<i32: 1, 2>} : memref<1x2048xf32, #tpu.memory_space<vmem>>, vector<1x16xf32>
    %c0_164 = arith.constant 0 : index
    %c1601 = arith.constant 1601 : index
    %351 = tpu.strided_load %arg1[%c0_164, %c1601] {strides = array<i32: 1, 2>} : memref<1x2048xf32, #tpu.memory_space<vmem>>, vector<1x16xf32>
    %352 = arith.maximumf %350, %351 : vector<1x16xf32>
    %353 = vector.extract_strided_slice %352 {offsets = [0, 0], sizes = [1, 8], strides = [1, 1]} : vector<1x16xf32> to vector<1x8xf32>
    %354 = vector.extract_strided_slice %352 {offsets = [0, 8], sizes = [1, 8], strides = [1, 1]} : vector<1x16xf32> to vector<1x8xf32>
    %355 = arith.maximumf %353, %354 : vector<1x8xf32>
    %c0_165 = arith.constant 0 : index
    %c400 = arith.constant 400 : index
    %356 = vector.load %arg2[%c0_165, %c400] : memref<1x512xf32, #tpu.memory_space<vmem>>, vector<1x8xf32>
    tpu.vector_store %arg2[%c0_165, %c400], %355 {strides = array<i32>} : memref<1x512xf32, #tpu.memory_space<vmem>>, vector<1x8xf32>,
    %c0_166 = arith.constant 0 : index
    %c1632 = arith.constant 1632 : index
    %357 = tpu.strided_load %arg1[%c0_166, %c1632] {strides = array<i32: 1, 2>} : memref<1x2048xf32, #tpu.memory_space<vmem>>, vector<1x16xf32>
    %c0_167 = arith.constant 0 : index
    %c1633 = arith.constant 1633 : index
    %358 = tpu.strided_load %arg1[%c0_167, %c1633] {strides = array<i32: 1, 2>} : memref<1x2048xf32, #tpu.memory_space<vmem>>, vector<1x16xf32>
    %359 = arith.maximumf %357, %358 : vector<1x16xf32>
    %360 = vector.extract_strided_slice %359 {offsets = [0, 0], sizes = [1, 8], strides = [1, 1]} : vector<1x16xf32> to vector<1x8xf32>
    %361 = vector.extract_strided_slice %359 {offsets = [0, 8], sizes = [1, 8], strides = [1, 1]} : vector<1x16xf32> to vector<1x8xf32>
    %362 = arith.maximumf %360, %361 : vector<1x8xf32>
    %c0_168 = arith.constant 0 : index
    %c408 = arith.constant 408 : index
    %363 = vector.load %arg2[%c0_168, %c408] : memref<1x512xf32, #tpu.memory_space<vmem>>, vector<1x8xf32>
    tpu.vector_store %arg2[%c0_168, %c408], %362 {strides = array<i32>} : memref<1x512xf32, #tpu.memory_space<vmem>>, vector<1x8xf32>,
    %c0_169 = arith.constant 0 : index
    %c1664 = arith.constant 1664 : index
    %364 = tpu.strided_load %arg1[%c0_169, %c1664] {strides = array<i32: 1, 2>} : memref<1x2048xf32, #tpu.memory_space<vmem>>, vector<1x16xf32>
    %c0_170 = arith.constant 0 : index
    %c1665 = arith.constant 1665 : index
    %365 = tpu.strided_load %arg1[%c0_170, %c1665] {strides = array<i32: 1, 2>} : memref<1x2048xf32, #tpu.memory_space<vmem>>, vector<1x16xf32>
    %366 = arith.maximumf %364, %365 : vector<1x16xf32>
    %367 = vector.extract_strided_slice %366 {offsets = [0, 0], sizes = [1, 8], strides = [1, 1]} : vector<1x16xf32> to vector<1x8xf32>
    %368 = vector.extract_strided_slice %366 {offsets = [0, 8], sizes = [1, 8], strides = [1, 1]} : vector<1x16xf32> to vector<1x8xf32>
    %369 = arith.maximumf %367, %368 : vector<1x8xf32>
    %c0_171 = arith.constant 0 : index
    %c416_172 = arith.constant 416 : index
    %370 = vector.load %arg2[%c0_171, %c416_172] : memref<1x512xf32, #tpu.memory_space<vmem>>, vector<1x8xf32>
    tpu.vector_store %arg2[%c0_171, %c416_172], %369 {strides = array<i32>} : memref<1x512xf32, #tpu.memory_space<vmem>>, vector<1x8xf32>,
    %c0_173 = arith.constant 0 : index
    %c1696 = arith.constant 1696 : index
    %371 = tpu.strided_load %arg1[%c0_173, %c1696] {strides = array<i32: 1, 2>} : memref<1x2048xf32, #tpu.memory_space<vmem>>, vector<1x16xf32>
    %c0_174 = arith.constant 0 : index
    %c1697 = arith.constant 1697 : index
    %372 = tpu.strided_load %arg1[%c0_174, %c1697] {strides = array<i32: 1, 2>} : memref<1x2048xf32, #tpu.memory_space<vmem>>, vector<1x16xf32>
    %373 = arith.maximumf %371, %372 : vector<1x16xf32>
    %374 = vector.extract_strided_slice %373 {offsets = [0, 0], sizes = [1, 8], strides = [1, 1]} : vector<1x16xf32> to vector<1x8xf32>
    %375 = vector.extract_strided_slice %373 {offsets = [0, 8], sizes = [1, 8], strides = [1, 1]} : vector<1x16xf32> to vector<1x8xf32>
    %376 = arith.maximumf %374, %375 : vector<1x8xf32>
    %c0_175 = arith.constant 0 : index
    %c424 = arith.constant 424 : index
    %377 = vector.load %arg2[%c0_175, %c424] : memref<1x512xf32, #tpu.memory_space<vmem>>, vector<1x8xf32>
    tpu.vector_store %arg2[%c0_175, %c424], %376 {strides = array<i32>} : memref<1x512xf32, #tpu.memory_space<vmem>>, vector<1x8xf32>,
    %c0_176 = arith.constant 0 : index
    %c1728 = arith.constant 1728 : index
    %378 = tpu.strided_load %arg1[%c0_176, %c1728] {strides = array<i32: 1, 2>} : memref<1x2048xf32, #tpu.memory_space<vmem>>, vector<1x16xf32>
    %c0_177 = arith.constant 0 : index
    %c1729 = arith.constant 1729 : index
    %379 = tpu.strided_load %arg1[%c0_177, %c1729] {strides = array<i32: 1, 2>} : memref<1x2048xf32, #tpu.memory_space<vmem>>, vector<1x16xf32>
    %380 = arith.maximumf %378, %379 : vector<1x16xf32>
    %381 = vector.extract_strided_slice %380 {offsets = [0, 0], sizes = [1, 8], strides = [1, 1]} : vector<1x16xf32> to vector<1x8xf32>
    %382 = vector.extract_strided_slice %380 {offsets = [0, 8], sizes = [1, 8], strides = [1, 1]} : vector<1x16xf32> to vector<1x8xf32>
    %383 = arith.maximumf %381, %382 : vector<1x8xf32>
    %c0_178 = arith.constant 0 : index
    %c432 = arith.constant 432 : index
    %384 = vector.load %arg2[%c0_178, %c432] : memref<1x512xf32, #tpu.memory_space<vmem>>, vector<1x8xf32>
    tpu.vector_store %arg2[%c0_178, %c432], %383 {strides = array<i32>} : memref<1x512xf32, #tpu.memory_space<vmem>>, vector<1x8xf32>,
    %c0_179 = arith.constant 0 : index
    %c1760 = arith.constant 1760 : index
    %385 = tpu.strided_load %arg1[%c0_179, %c1760] {strides = array<i32: 1, 2>} : memref<1x2048xf32, #tpu.memory_space<vmem>>, vector<1x16xf32>
    %c0_180 = arith.constant 0 : index
    %c1761 = arith.constant 1761 : index
    %386 = tpu.strided_load %arg1[%c0_180, %c1761] {strides = array<i32: 1, 2>} : memref<1x2048xf32, #tpu.memory_space<vmem>>, vector<1x16xf32>
    %387 = arith.maximumf %385, %386 : vector<1x16xf32>
    %388 = vector.extract_strided_slice %387 {offsets = [0, 0], sizes = [1, 8], strides = [1, 1]} : vector<1x16xf32> to vector<1x8xf32>
    %389 = vector.extract_strided_slice %387 {offsets = [0, 8], sizes = [1, 8], strides = [1, 1]} : vector<1x16xf32> to vector<1x8xf32>
    %390 = arith.maximumf %388, %389 : vector<1x8xf32>
    %c0_181 = arith.constant 0 : index
    %c440 = arith.constant 440 : index
    %391 = vector.load %arg2[%c0_181, %c440] : memref<1x512xf32, #tpu.memory_space<vmem>>, vector<1x8xf32>
    tpu.vector_store %arg2[%c0_181, %c440], %390 {strides = array<i32>} : memref<1x512xf32, #tpu.memory_space<vmem>>, vector<1x8xf32>,
    %c0_182 = arith.constant 0 : index
    %c1792 = arith.constant 1792 : index
    %392 = tpu.strided_load %arg1[%c0_182, %c1792] {strides = array<i32: 1, 2>} : memref<1x2048xf32, #tpu.memory_space<vmem>>, vector<1x16xf32>
    %c0_183 = arith.constant 0 : index
    %c1793 = arith.constant 1793 : index
    %393 = tpu.strided_load %arg1[%c0_183, %c1793] {strides = array<i32: 1, 2>} : memref<1x2048xf32, #tpu.memory_space<vmem>>, vector<1x16xf32>
    %394 = arith.maximumf %392, %393 : vector<1x16xf32>
    %395 = vector.extract_strided_slice %394 {offsets = [0, 0], sizes = [1, 8], strides = [1, 1]} : vector<1x16xf32> to vector<1x8xf32>
    %396 = vector.extract_strided_slice %394 {offsets = [0, 8], sizes = [1, 8], strides = [1, 1]} : vector<1x16xf32> to vector<1x8xf32>
    %397 = arith.maximumf %395, %396 : vector<1x8xf32>
    %c0_184 = arith.constant 0 : index
    %c448_185 = arith.constant 448 : index
    %398 = vector.load %arg2[%c0_184, %c448_185] : memref<1x512xf32, #tpu.memory_space<vmem>>, vector<1x8xf32>
    tpu.vector_store %arg2[%c0_184, %c448_185], %397 {strides = array<i32>} : memref<1x512xf32, #tpu.memory_space<vmem>>, vector<1x8xf32>,
    %c0_186 = arith.constant 0 : index
    %c1824 = arith.constant 1824 : index
    %399 = tpu.strided_load %arg1[%c0_186, %c1824] {strides = array<i32: 1, 2>} : memref<1x2048xf32, #tpu.memory_space<vmem>>, vector<1x16xf32>
    %c0_187 = arith.constant 0 : index
    %c1825 = arith.constant 1825 : index
    %400 = tpu.strided_load %arg1[%c0_187, %c1825] {strides = array<i32: 1, 2>} : memref<1x2048xf32, #tpu.memory_space<vmem>>, vector<1x16xf32>
    %401 = arith.maximumf %399, %400 : vector<1x16xf32>
    %402 = vector.extract_strided_slice %401 {offsets = [0, 0], sizes = [1, 8], strides = [1, 1]} : vector<1x16xf32> to vector<1x8xf32>
    %403 = vector.extract_strided_slice %401 {offsets = [0, 8], sizes = [1, 8], strides = [1, 1]} : vector<1x16xf32> to vector<1x8xf32>
    %404 = arith.maximumf %402, %403 : vector<1x8xf32>
    %c0_188 = arith.constant 0 : index
    %c456 = arith.constant 456 : index
    %405 = vector.load %arg2[%c0_188, %c456] : memref<1x512xf32, #tpu.memory_space<vmem>>, vector<1x8xf32>
    tpu.vector_store %arg2[%c0_188, %c456], %404 {strides = array<i32>} : memref<1x512xf32, #tpu.memory_space<vmem>>, vector<1x8xf32>,
    %c0_189 = arith.constant 0 : index
    %c1856 = arith.constant 1856 : index
    %406 = tpu.strided_load %arg1[%c0_189, %c1856] {strides = array<i32: 1, 2>} : memref<1x2048xf32, #tpu.memory_space<vmem>>, vector<1x16xf32>
    %c0_190 = arith.constant 0 : index
    %c1857 = arith.constant 1857 : index
    %407 = tpu.strided_load %arg1[%c0_190, %c1857] {strides = array<i32: 1, 2>} : memref<1x2048xf32, #tpu.memory_space<vmem>>, vector<1x16xf32>
    %408 = arith.maximumf %406, %407 : vector<1x16xf32>
    %409 = vector.extract_strided_slice %408 {offsets = [0, 0], sizes = [1, 8], strides = [1, 1]} : vector<1x16xf32> to vector<1x8xf32>
    %410 = vector.extract_strided_slice %408 {offsets = [0, 8], sizes = [1, 8], strides = [1, 1]} : vector<1x16xf32> to vector<1x8xf32>
    %411 = arith.maximumf %409, %410 : vector<1x8xf32>
    %c0_191 = arith.constant 0 : index
    %c464 = arith.constant 464 : index
    %412 = vector.load %arg2[%c0_191, %c464] : memref<1x512xf32, #tpu.memory_space<vmem>>, vector<1x8xf32>
    tpu.vector_store %arg2[%c0_191, %c464], %411 {strides = array<i32>} : memref<1x512xf32, #tpu.memory_space<vmem>>, vector<1x8xf32>,
    %c0_192 = arith.constant 0 : index
    %c1888 = arith.constant 1888 : index
    %413 = tpu.strided_load %arg1[%c0_192, %c1888] {strides = array<i32: 1, 2>} : memref<1x2048xf32, #tpu.memory_space<vmem>>, vector<1x16xf32>
    %c0_193 = arith.constant 0 : index
    %c1889 = arith.constant 1889 : index
    %414 = tpu.strided_load %arg1[%c0_193, %c1889] {strides = array<i32: 1, 2>} : memref<1x2048xf32, #tpu.memory_space<vmem>>, vector<1x16xf32>
    %415 = arith.maximumf %413, %414 : vector<1x16xf32>
    %416 = vector.extract_strided_slice %415 {offsets = [0, 0], sizes = [1, 8], strides = [1, 1]} : vector<1x16xf32> to vector<1x8xf32>
    %417 = vector.extract_strided_slice %415 {offsets = [0, 8], sizes = [1, 8], strides = [1, 1]} : vector<1x16xf32> to vector<1x8xf32>
    %418 = arith.maximumf %416, %417 : vector<1x8xf32>
    %c0_194 = arith.constant 0 : index
    %c472 = arith.constant 472 : index
    %419 = vector.load %arg2[%c0_194, %c472] : memref<1x512xf32, #tpu.memory_space<vmem>>, vector<1x8xf32>
    tpu.vector_store %arg2[%c0_194, %c472], %418 {strides = array<i32>} : memref<1x512xf32, #tpu.memory_space<vmem>>, vector<1x8xf32>,
    %c0_195 = arith.constant 0 : index
    %c1920 = arith.constant 1920 : index
    %420 = tpu.strided_load %arg1[%c0_195, %c1920] {strides = array<i32: 1, 2>} : memref<1x2048xf32, #tpu.memory_space<vmem>>, vector<1x16xf32>
    %c0_196 = arith.constant 0 : index
    %c1921 = arith.constant 1921 : index
    %421 = tpu.strided_load %arg1[%c0_196, %c1921] {strides = array<i32: 1, 2>} : memref<1x2048xf32, #tpu.memory_space<vmem>>, vector<1x16xf32>
    %422 = arith.maximumf %420, %421 : vector<1x16xf32>
    %423 = vector.extract_strided_slice %422 {offsets = [0, 0], sizes = [1, 8], strides = [1, 1]} : vector<1x16xf32> to vector<1x8xf32>
    %424 = vector.extract_strided_slice %422 {offsets = [0, 8], sizes = [1, 8], strides = [1, 1]} : vector<1x16xf32> to vector<1x8xf32>
    %425 = arith.maximumf %423, %424 : vector<1x8xf32>
    %c0_197 = arith.constant 0 : index
    %c480_198 = arith.constant 480 : index
    %426 = vector.load %arg2[%c0_197, %c480_198] : memref<1x512xf32, #tpu.memory_space<vmem>>, vector<1x8xf32>
    tpu.vector_store %arg2[%c0_197, %c480_198], %425 {strides = array<i32>} : memref<1x512xf32, #tpu.memory_space<vmem>>, vector<1x8xf32>,
    %c0_199 = arith.constant 0 : index
    %c1952 = arith.constant 1952 : index
    %427 = tpu.strided_load %arg1[%c0_199, %c1952] {strides = array<i32: 1, 2>} : memref<1x2048xf32, #tpu.memory_space<vmem>>, vector<1x16xf32>
    %c0_200 = arith.constant 0 : index
    %c1953 = arith.constant 1953 : index
    %428 = tpu.strided_load %arg1[%c0_200, %c1953] {strides = array<i32: 1, 2>} : memref<1x2048xf32, #tpu.memory_space<vmem>>, vector<1x16xf32>
    %429 = arith.maximumf %427, %428 : vector<1x16xf32>
    %430 = vector.extract_strided_slice %429 {offsets = [0, 0], sizes = [1, 8], strides = [1, 1]} : vector<1x16xf32> to vector<1x8xf32>
    %431 = vector.extract_strided_slice %429 {offsets = [0, 8], sizes = [1, 8], strides = [1, 1]} : vector<1x16xf32> to vector<1x8xf32>
    %432 = arith.maximumf %430, %431 : vector<1x8xf32>
    %c0_201 = arith.constant 0 : index
    %c488 = arith.constant 488 : index
    %433 = vector.load %arg2[%c0_201, %c488] : memref<1x512xf32, #tpu.memory_space<vmem>>, vector<1x8xf32>
    tpu.vector_store %arg2[%c0_201, %c488], %432 {strides = array<i32>} : memref<1x512xf32, #tpu.memory_space<vmem>>, vector<1x8xf32>,
    %c0_202 = arith.constant 0 : index
    %c1984 = arith.constant 1984 : index
    %434 = tpu.strided_load %arg1[%c0_202, %c1984] {strides = array<i32: 1, 2>} : memref<1x2048xf32, #tpu.memory_space<vmem>>, vector<1x16xf32>
    %c0_203 = arith.constant 0 : index
    %c1985 = arith.constant 1985 : index
    %435 = tpu.strided_load %arg1[%c0_203, %c1985] {strides = array<i32: 1, 2>} : memref<1x2048xf32, #tpu.memory_space<vmem>>, vector<1x16xf32>
    %436 = arith.maximumf %434, %435 : vector<1x16xf32>
    %437 = vector.extract_strided_slice %436 {offsets = [0, 0], sizes = [1, 8], strides = [1, 1]} : vector<1x16xf32> to vector<1x8xf32>
    %438 = vector.extract_strided_slice %436 {offsets = [0, 8], sizes = [1, 8], strides = [1, 1]} : vector<1x16xf32> to vector<1x8xf32>
    %439 = arith.maximumf %437, %438 : vector<1x8xf32>
    %c0_204 = arith.constant 0 : index
    %c496 = arith.constant 496 : index
    %440 = vector.load %arg2[%c0_204, %c496] : memref<1x512xf32, #tpu.memory_space<vmem>>, vector<1x8xf32>
    tpu.vector_store %arg2[%c0_204, %c496], %439 {strides = array<i32>} : memref<1x512xf32, #tpu.memory_space<vmem>>, vector<1x8xf32>,
    %c0_205 = arith.constant 0 : index
    %c2016 = arith.constant 2016 : index
    %441 = tpu.strided_load %arg1[%c0_205, %c2016] {strides = array<i32: 1, 2>} : memref<1x2048xf32, #tpu.memory_space<vmem>>, vector<1x16xf32>
    %c0_206 = arith.constant 0 : index
    %c2017 = arith.constant 2017 : index
    %442 = tpu.strided_load %arg1[%c0_206, %c2017] {strides = array<i32: 1, 2>} : memref<1x2048xf32, #tpu.memory_space<vmem>>, vector<1x16xf32>
    %443 = arith.maximumf %441, %442 : vector<1x16xf32>
    %444 = vector.extract_strided_slice %443 {offsets = [0, 0], sizes = [1, 8], strides = [1, 1]} : vector<1x16xf32> to vector<1x8xf32>
    %445 = vector.extract_strided_slice %443 {offsets = [0, 8], sizes = [1, 8], strides = [1, 1]} : vector<1x16xf32> to vector<1x8xf32>
    %446 = arith.maximumf %444, %445 : vector<1x8xf32>
    %c0_207 = arith.constant 0 : index
    %c504 = arith.constant 504 : index
    %447 = vector.load %arg2[%c0_207, %c504] : memref<1x512xf32, #tpu.memory_space<vmem>>, vector<1x8xf32>
    tpu.vector_store %arg2[%c0_207, %c504], %446 {strides = array<i32>} : memref<1x512xf32, #tpu.memory_space<vmem>>, vector<1x8xf32>,
    return
  }
  func.func @transform_0(%arg0: i32) -> (i32, i32) {
    %c0_i32 = arith.constant 0 : i32
    %c0_i32_0 = arith.constant 0 : i32
    return %arg0, %c0_i32 : i32, i32
  }
  func.func @transform_1(%arg0: i32) -> (i32, i32) {
    %c0_i32 = arith.constant 0 : i32
    %c0_i32_0 = arith.constant 0 : i32
    return %arg0, %c0_i32 : i32, i32
  }
}

module attributes {stable_mosaic.version = 11 : i64} {
  func.func @kernel(%arg0: i32, %arg1: memref<1x2048xf32, #tpu.memory_space<vmem>>, %arg2: memref<1x512xf32, #tpu.memory_space<vmem>>) attributes {dimension_semantics = [#tpu.dimension_semantics<parallel>], iteration_bounds = array<i64: 1>, scalar_prefetch = 0 : i64, scratch_operands = 0 : i64, tpu.core_type = #tpu.core_type<tc>, window_params = [{transform_indices = @transform_0, window_bounds = array<i64: 1, 2048>}, {transform_indices = @transform_1, window_bounds = array<i64: 1, 512>}]} {
    %c0 = arith.constant 0 : index
    %c0_0 = arith.constant 0 : index
    %0 = vector.load %arg1[%c0, %c0_0] : memref<1x2048xf32, #tpu.memory_space<vmem>>, vector<1x16xf32>
    %c0_1 = arith.constant 0 : index
    %c16 = arith.constant 16 : index
    %1 = vector.load %arg1[%c0_1, %c16] : memref<1x2048xf32, #tpu.memory_space<vmem>>, vector<1x16xf32>
    %2 = arith.maximumf %0, %1 : vector<1x16xf32>
    %3 = vector.shape_cast %2 : vector<1x16xf32> to vector<1x8x2xf32>
    %cst = arith.constant dense<0xFF800000> : vector<1x8xf32>
    %4 = vector.multi_reduction <maximumf>, %3, %cst [2] : vector<1x8x2xf32> to vector<1x8xf32>
    %c0_2 = arith.constant 0 : index
    %c0_3 = arith.constant 0 : index
    %5 = vector.load %arg2[%c0_2, %c0_3] : memref<1x512xf32, #tpu.memory_space<vmem>>, vector<1x8xf32>
    tpu.vector_store %arg2[%c0_2, %c0_3], %4 {strides = array<i32>} : memref<1x512xf32, #tpu.memory_space<vmem>>, vector<1x8xf32>,
    %c0_4 = arith.constant 0 : index
    %c32 = arith.constant 32 : index
    %6 = vector.load %arg1[%c0_4, %c32] : memref<1x2048xf32, #tpu.memory_space<vmem>>, vector<1x16xf32>
    %c0_5 = arith.constant 0 : index
    %c48 = arith.constant 48 : index
    %7 = vector.load %arg1[%c0_5, %c48] : memref<1x2048xf32, #tpu.memory_space<vmem>>, vector<1x16xf32>
    %8 = arith.maximumf %6, %7 : vector<1x16xf32>
    %9 = vector.shape_cast %8 : vector<1x16xf32> to vector<1x8x2xf32>
    %cst_6 = arith.constant dense<0xFF800000> : vector<1x8xf32>
    %10 = vector.multi_reduction <maximumf>, %9, %cst_6 [2] : vector<1x8x2xf32> to vector<1x8xf32>
    %c0_7 = arith.constant 0 : index
    %c8 = arith.constant 8 : index
    %11 = vector.load %arg2[%c0_7, %c8] : memref<1x512xf32, #tpu.memory_space<vmem>>, vector<1x8xf32>
    tpu.vector_store %arg2[%c0_7, %c8], %10 {strides = array<i32>} : memref<1x512xf32, #tpu.memory_space<vmem>>, vector<1x8xf32>,
    %c0_8 = arith.constant 0 : index
    %c64 = arith.constant 64 : index
    %12 = vector.load %arg1[%c0_8, %c64] : memref<1x2048xf32, #tpu.memory_space<vmem>>, vector<1x16xf32>
    %c0_9 = arith.constant 0 : index
    %c80 = arith.constant 80 : index
    %13 = vector.load %arg1[%c0_9, %c80] : memref<1x2048xf32, #tpu.memory_space<vmem>>, vector<1x16xf32>
    %14 = arith.maximumf %12, %13 : vector<1x16xf32>
    %15 = vector.shape_cast %14 : vector<1x16xf32> to vector<1x8x2xf32>
    %cst_10 = arith.constant dense<0xFF800000> : vector<1x8xf32>
    %16 = vector.multi_reduction <maximumf>, %15, %cst_10 [2] : vector<1x8x2xf32> to vector<1x8xf32>
    %c0_11 = arith.constant 0 : index
    %c16_12 = arith.constant 16 : index
    %17 = vector.load %arg2[%c0_11, %c16_12] : memref<1x512xf32, #tpu.memory_space<vmem>>, vector<1x8xf32>
    tpu.vector_store %arg2[%c0_11, %c16_12], %16 {strides = array<i32>} : memref<1x512xf32, #tpu.memory_space<vmem>>, vector<1x8xf32>,
    %c0_13 = arith.constant 0 : index
    %c96 = arith.constant 96 : index
    %18 = vector.load %arg1[%c0_13, %c96] : memref<1x2048xf32, #tpu.memory_space<vmem>>, vector<1x16xf32>
    %c0_14 = arith.constant 0 : index
    %c112 = arith.constant 112 : index
    %19 = vector.load %arg1[%c0_14, %c112] : memref<1x2048xf32, #tpu.memory_space<vmem>>, vector<1x16xf32>
    %20 = arith.maximumf %18, %19 : vector<1x16xf32>
    %21 = vector.shape_cast %20 : vector<1x16xf32> to vector<1x8x2xf32>
    %cst_15 = arith.constant dense<0xFF800000> : vector<1x8xf32>
    %22 = vector.multi_reduction <maximumf>, %21, %cst_15 [2] : vector<1x8x2xf32> to vector<1x8xf32>
    %c0_16 = arith.constant 0 : index
    %c24 = arith.constant 24 : index
    %23 = vector.load %arg2[%c0_16, %c24] : memref<1x512xf32, #tpu.memory_space<vmem>>, vector<1x8xf32>
    tpu.vector_store %arg2[%c0_16, %c24], %22 {strides = array<i32>} : memref<1x512xf32, #tpu.memory_space<vmem>>, vector<1x8xf32>,
    %c0_17 = arith.constant 0 : index
    %c128 = arith.constant 128 : index
    %24 = vector.load %arg1[%c0_17, %c128] : memref<1x2048xf32, #tpu.memory_space<vmem>>, vector<1x16xf32>
    %c0_18 = arith.constant 0 : index
    %c144 = arith.constant 144 : index
    %25 = vector.load %arg1[%c0_18, %c144] : memref<1x2048xf32, #tpu.memory_space<vmem>>, vector<1x16xf32>
    %26 = arith.maximumf %24, %25 : vector<1x16xf32>
    %27 = vector.shape_cast %26 : vector<1x16xf32> to vector<1x8x2xf32>
    %cst_19 = arith.constant dense<0xFF800000> : vector<1x8xf32>
    %28 = vector.multi_reduction <maximumf>, %27, %cst_19 [2] : vector<1x8x2xf32> to vector<1x8xf32>
    %c0_20 = arith.constant 0 : index
    %c32_21 = arith.constant 32 : index
    %29 = vector.load %arg2[%c0_20, %c32_21] : memref<1x512xf32, #tpu.memory_space<vmem>>, vector<1x8xf32>
    tpu.vector_store %arg2[%c0_20, %c32_21], %28 {strides = array<i32>} : memref<1x512xf32, #tpu.memory_space<vmem>>, vector<1x8xf32>,
    %c0_22 = arith.constant 0 : index
    %c160 = arith.constant 160 : index
    %30 = vector.load %arg1[%c0_22, %c160] : memref<1x2048xf32, #tpu.memory_space<vmem>>, vector<1x16xf32>
    %c0_23 = arith.constant 0 : index
    %c176 = arith.constant 176 : index
    %31 = vector.load %arg1[%c0_23, %c176] : memref<1x2048xf32, #tpu.memory_space<vmem>>, vector<1x16xf32>
    %32 = arith.maximumf %30, %31 : vector<1x16xf32>
    %33 = vector.shape_cast %32 : vector<1x16xf32> to vector<1x8x2xf32>
    %cst_24 = arith.constant dense<0xFF800000> : vector<1x8xf32>
    %34 = vector.multi_reduction <maximumf>, %33, %cst_24 [2] : vector<1x8x2xf32> to vector<1x8xf32>
    %c0_25 = arith.constant 0 : index
    %c40 = arith.constant 40 : index
    %35 = vector.load %arg2[%c0_25, %c40] : memref<1x512xf32, #tpu.memory_space<vmem>>, vector<1x8xf32>
    tpu.vector_store %arg2[%c0_25, %c40], %34 {strides = array<i32>} : memref<1x512xf32, #tpu.memory_space<vmem>>, vector<1x8xf32>,
    %c0_26 = arith.constant 0 : index
    %c192 = arith.constant 192 : index
    %36 = vector.load %arg1[%c0_26, %c192] : memref<1x2048xf32, #tpu.memory_space<vmem>>, vector<1x16xf32>
    %c0_27 = arith.constant 0 : index
    %c208 = arith.constant 208 : index
    %37 = vector.load %arg1[%c0_27, %c208] : memref<1x2048xf32, #tpu.memory_space<vmem>>, vector<1x16xf32>
    %38 = arith.maximumf %36, %37 : vector<1x16xf32>
    %39 = vector.shape_cast %38 : vector<1x16xf32> to vector<1x8x2xf32>
    %cst_28 = arith.constant dense<0xFF800000> : vector<1x8xf32>
    %40 = vector.multi_reduction <maximumf>, %39, %cst_28 [2] : vector<1x8x2xf32> to vector<1x8xf32>
    %c0_29 = arith.constant 0 : index
    %c48_30 = arith.constant 48 : index
    %41 = vector.load %arg2[%c0_29, %c48_30] : memref<1x512xf32, #tpu.memory_space<vmem>>, vector<1x8xf32>
    tpu.vector_store %arg2[%c0_29, %c48_30], %40 {strides = array<i32>} : memref<1x512xf32, #tpu.memory_space<vmem>>, vector<1x8xf32>,
    %c0_31 = arith.constant 0 : index
    %c224 = arith.constant 224 : index
    %42 = vector.load %arg1[%c0_31, %c224] : memref<1x2048xf32, #tpu.memory_space<vmem>>, vector<1x16xf32>
    %c0_32 = arith.constant 0 : index
    %c240 = arith.constant 240 : index
    %43 = vector.load %arg1[%c0_32, %c240] : memref<1x2048xf32, #tpu.memory_space<vmem>>, vector<1x16xf32>
    %44 = arith.maximumf %42, %43 : vector<1x16xf32>
    %45 = vector.shape_cast %44 : vector<1x16xf32> to vector<1x8x2xf32>
    %cst_33 = arith.constant dense<0xFF800000> : vector<1x8xf32>
    %46 = vector.multi_reduction <maximumf>, %45, %cst_33 [2] : vector<1x8x2xf32> to vector<1x8xf32>
    %c0_34 = arith.constant 0 : index
    %c56 = arith.constant 56 : index
    %47 = vector.load %arg2[%c0_34, %c56] : memref<1x512xf32, #tpu.memory_space<vmem>>, vector<1x8xf32>
    tpu.vector_store %arg2[%c0_34, %c56], %46 {strides = array<i32>} : memref<1x512xf32, #tpu.memory_space<vmem>>, vector<1x8xf32>,
    %c0_35 = arith.constant 0 : index
    %c256 = arith.constant 256 : index
    %48 = vector.load %arg1[%c0_35, %c256] : memref<1x2048xf32, #tpu.memory_space<vmem>>, vector<1x16xf32>
    %c0_36 = arith.constant 0 : index
    %c272 = arith.constant 272 : index
    %49 = vector.load %arg1[%c0_36, %c272] : memref<1x2048xf32, #tpu.memory_space<vmem>>, vector<1x16xf32>
    %50 = arith.maximumf %48, %49 : vector<1x16xf32>
    %51 = vector.shape_cast %50 : vector<1x16xf32> to vector<1x8x2xf32>
    %cst_37 = arith.constant dense<0xFF800000> : vector<1x8xf32>
    %52 = vector.multi_reduction <maximumf>, %51, %cst_37 [2] : vector<1x8x2xf32> to vector<1x8xf32>
    %c0_38 = arith.constant 0 : index
    %c64_39 = arith.constant 64 : index
    %53 = vector.load %arg2[%c0_38, %c64_39] : memref<1x512xf32, #tpu.memory_space<vmem>>, vector<1x8xf32>
    tpu.vector_store %arg2[%c0_38, %c64_39], %52 {strides = array<i32>} : memref<1x512xf32, #tpu.memory_space<vmem>>, vector<1x8xf32>,
    %c0_40 = arith.constant 0 : index
    %c288 = arith.constant 288 : index
    %54 = vector.load %arg1[%c0_40, %c288] : memref<1x2048xf32, #tpu.memory_space<vmem>>, vector<1x16xf32>
    %c0_41 = arith.constant 0 : index
    %c304 = arith.constant 304 : index
    %55 = vector.load %arg1[%c0_41, %c304] : memref<1x2048xf32, #tpu.memory_space<vmem>>, vector<1x16xf32>
    %56 = arith.maximumf %54, %55 : vector<1x16xf32>
    %57 = vector.shape_cast %56 : vector<1x16xf32> to vector<1x8x2xf32>
    %cst_42 = arith.constant dense<0xFF800000> : vector<1x8xf32>
    %58 = vector.multi_reduction <maximumf>, %57, %cst_42 [2] : vector<1x8x2xf32> to vector<1x8xf32>
    %c0_43 = arith.constant 0 : index
    %c72 = arith.constant 72 : index
    %59 = vector.load %arg2[%c0_43, %c72] : memref<1x512xf32, #tpu.memory_space<vmem>>, vector<1x8xf32>
    tpu.vector_store %arg2[%c0_43, %c72], %58 {strides = array<i32>} : memref<1x512xf32, #tpu.memory_space<vmem>>, vector<1x8xf32>,
    %c0_44 = arith.constant 0 : index
    %c320 = arith.constant 320 : index
    %60 = vector.load %arg1[%c0_44, %c320] : memref<1x2048xf32, #tpu.memory_space<vmem>>, vector<1x16xf32>
    %c0_45 = arith.constant 0 : index
    %c336 = arith.constant 336 : index
    %61 = vector.load %arg1[%c0_45, %c336] : memref<1x2048xf32, #tpu.memory_space<vmem>>, vector<1x16xf32>
    %62 = arith.maximumf %60, %61 : vector<1x16xf32>
    %63 = vector.shape_cast %62 : vector<1x16xf32> to vector<1x8x2xf32>
    %cst_46 = arith.constant dense<0xFF800000> : vector<1x8xf32>
    %64 = vector.multi_reduction <maximumf>, %63, %cst_46 [2] : vector<1x8x2xf32> to vector<1x8xf32>
    %c0_47 = arith.constant 0 : index
    %c80_48 = arith.constant 80 : index
    %65 = vector.load %arg2[%c0_47, %c80_48] : memref<1x512xf32, #tpu.memory_space<vmem>>, vector<1x8xf32>
    tpu.vector_store %arg2[%c0_47, %c80_48], %64 {strides = array<i32>} : memref<1x512xf32, #tpu.memory_space<vmem>>, vector<1x8xf32>,
    %c0_49 = arith.constant 0 : index
    %c352 = arith.constant 352 : index
    %66 = vector.load %arg1[%c0_49, %c352] : memref<1x2048xf32, #tpu.memory_space<vmem>>, vector<1x16xf32>
    %c0_50 = arith.constant 0 : index
    %c368 = arith.constant 368 : index
    %67 = vector.load %arg1[%c0_50, %c368] : memref<1x2048xf32, #tpu.memory_space<vmem>>, vector<1x16xf32>
    %68 = arith.maximumf %66, %67 : vector<1x16xf32>
    %69 = vector.shape_cast %68 : vector<1x16xf32> to vector<1x8x2xf32>
    %cst_51 = arith.constant dense<0xFF800000> : vector<1x8xf32>
    %70 = vector.multi_reduction <maximumf>, %69, %cst_51 [2] : vector<1x8x2xf32> to vector<1x8xf32>
    %c0_52 = arith.constant 0 : index
    %c88 = arith.constant 88 : index
    %71 = vector.load %arg2[%c0_52, %c88] : memref<1x512xf32, #tpu.memory_space<vmem>>, vector<1x8xf32>
    tpu.vector_store %arg2[%c0_52, %c88], %70 {strides = array<i32>} : memref<1x512xf32, #tpu.memory_space<vmem>>, vector<1x8xf32>,
    %c0_53 = arith.constant 0 : index
    %c384 = arith.constant 384 : index
    %72 = vector.load %arg1[%c0_53, %c384] : memref<1x2048xf32, #tpu.memory_space<vmem>>, vector<1x16xf32>
    %c0_54 = arith.constant 0 : index
    %c400 = arith.constant 400 : index
    %73 = vector.load %arg1[%c0_54, %c400] : memref<1x2048xf32, #tpu.memory_space<vmem>>, vector<1x16xf32>
    %74 = arith.maximumf %72, %73 : vector<1x16xf32>
    %75 = vector.shape_cast %74 : vector<1x16xf32> to vector<1x8x2xf32>
    %cst_55 = arith.constant dense<0xFF800000> : vector<1x8xf32>
    %76 = vector.multi_reduction <maximumf>, %75, %cst_55 [2] : vector<1x8x2xf32> to vector<1x8xf32>
    %c0_56 = arith.constant 0 : index
    %c96_57 = arith.constant 96 : index
    %77 = vector.load %arg2[%c0_56, %c96_57] : memref<1x512xf32, #tpu.memory_space<vmem>>, vector<1x8xf32>
    tpu.vector_store %arg2[%c0_56, %c96_57], %76 {strides = array<i32>} : memref<1x512xf32, #tpu.memory_space<vmem>>, vector<1x8xf32>,
    %c0_58 = arith.constant 0 : index
    %c416 = arith.constant 416 : index
    %78 = vector.load %arg1[%c0_58, %c416] : memref<1x2048xf32, #tpu.memory_space<vmem>>, vector<1x16xf32>
    %c0_59 = arith.constant 0 : index
    %c432 = arith.constant 432 : index
    %79 = vector.load %arg1[%c0_59, %c432] : memref<1x2048xf32, #tpu.memory_space<vmem>>, vector<1x16xf32>
    %80 = arith.maximumf %78, %79 : vector<1x16xf32>
    %81 = vector.shape_cast %80 : vector<1x16xf32> to vector<1x8x2xf32>
    %cst_60 = arith.constant dense<0xFF800000> : vector<1x8xf32>
    %82 = vector.multi_reduction <maximumf>, %81, %cst_60 [2] : vector<1x8x2xf32> to vector<1x8xf32>
    %c0_61 = arith.constant 0 : index
    %c104 = arith.constant 104 : index
    %83 = vector.load %arg2[%c0_61, %c104] : memref<1x512xf32, #tpu.memory_space<vmem>>, vector<1x8xf32>
    tpu.vector_store %arg2[%c0_61, %c104], %82 {strides = array<i32>} : memref<1x512xf32, #tpu.memory_space<vmem>>, vector<1x8xf32>,
    %c0_62 = arith.constant 0 : index
    %c448 = arith.constant 448 : index
    %84 = vector.load %arg1[%c0_62, %c448] : memref<1x2048xf32, #tpu.memory_space<vmem>>, vector<1x16xf32>
    %c0_63 = arith.constant 0 : index
    %c464 = arith.constant 464 : index
    %85 = vector.load %arg1[%c0_63, %c464] : memref<1x2048xf32, #tpu.memory_space<vmem>>, vector<1x16xf32>
    %86 = arith.maximumf %84, %85 : vector<1x16xf32>
    %87 = vector.shape_cast %86 : vector<1x16xf32> to vector<1x8x2xf32>
    %cst_64 = arith.constant dense<0xFF800000> : vector<1x8xf32>
    %88 = vector.multi_reduction <maximumf>, %87, %cst_64 [2] : vector<1x8x2xf32> to vector<1x8xf32>
    %c0_65 = arith.constant 0 : index
    %c112_66 = arith.constant 112 : index
    %89 = vector.load %arg2[%c0_65, %c112_66] : memref<1x512xf32, #tpu.memory_space<vmem>>, vector<1x8xf32>
    tpu.vector_store %arg2[%c0_65, %c112_66], %88 {strides = array<i32>} : memref<1x512xf32, #tpu.memory_space<vmem>>, vector<1x8xf32>,
    %c0_67 = arith.constant 0 : index
    %c480 = arith.constant 480 : index
    %90 = vector.load %arg1[%c0_67, %c480] : memref<1x2048xf32, #tpu.memory_space<vmem>>, vector<1x16xf32>
    %c0_68 = arith.constant 0 : index
    %c496 = arith.constant 496 : index
    %91 = vector.load %arg1[%c0_68, %c496] : memref<1x2048xf32, #tpu.memory_space<vmem>>, vector<1x16xf32>
    %92 = arith.maximumf %90, %91 : vector<1x16xf32>
    %93 = vector.shape_cast %92 : vector<1x16xf32> to vector<1x8x2xf32>
    %cst_69 = arith.constant dense<0xFF800000> : vector<1x8xf32>
    %94 = vector.multi_reduction <maximumf>, %93, %cst_69 [2] : vector<1x8x2xf32> to vector<1x8xf32>
    %c0_70 = arith.constant 0 : index
    %c120 = arith.constant 120 : index
    %95 = vector.load %arg2[%c0_70, %c120] : memref<1x512xf32, #tpu.memory_space<vmem>>, vector<1x8xf32>
    tpu.vector_store %arg2[%c0_70, %c120], %94 {strides = array<i32>} : memref<1x512xf32, #tpu.memory_space<vmem>>, vector<1x8xf32>,
    %c0_71 = arith.constant 0 : index
    %c512 = arith.constant 512 : index
    %96 = vector.load %arg1[%c0_71, %c512] : memref<1x2048xf32, #tpu.memory_space<vmem>>, vector<1x16xf32>
    %c0_72 = arith.constant 0 : index
    %c528 = arith.constant 528 : index
    %97 = vector.load %arg1[%c0_72, %c528] : memref<1x2048xf32, #tpu.memory_space<vmem>>, vector<1x16xf32>
    %98 = arith.maximumf %96, %97 : vector<1x16xf32>
    %99 = vector.shape_cast %98 : vector<1x16xf32> to vector<1x8x2xf32>
    %cst_73 = arith.constant dense<0xFF800000> : vector<1x8xf32>
    %100 = vector.multi_reduction <maximumf>, %99, %cst_73 [2] : vector<1x8x2xf32> to vector<1x8xf32>
    %c0_74 = arith.constant 0 : index
    %c128_75 = arith.constant 128 : index
    %101 = vector.load %arg2[%c0_74, %c128_75] : memref<1x512xf32, #tpu.memory_space<vmem>>, vector<1x8xf32>
    tpu.vector_store %arg2[%c0_74, %c128_75], %100 {strides = array<i32>} : memref<1x512xf32, #tpu.memory_space<vmem>>, vector<1x8xf32>,
    %c0_76 = arith.constant 0 : index
    %c544 = arith.constant 544 : index
    %102 = vector.load %arg1[%c0_76, %c544] : memref<1x2048xf32, #tpu.memory_space<vmem>>, vector<1x16xf32>
    %c0_77 = arith.constant 0 : index
    %c560 = arith.constant 560 : index
    %103 = vector.load %arg1[%c0_77, %c560] : memref<1x2048xf32, #tpu.memory_space<vmem>>, vector<1x16xf32>
    %104 = arith.maximumf %102, %103 : vector<1x16xf32>
    %105 = vector.shape_cast %104 : vector<1x16xf32> to vector<1x8x2xf32>
    %cst_78 = arith.constant dense<0xFF800000> : vector<1x8xf32>
    %106 = vector.multi_reduction <maximumf>, %105, %cst_78 [2] : vector<1x8x2xf32> to vector<1x8xf32>
    %c0_79 = arith.constant 0 : index
    %c136 = arith.constant 136 : index
    %107 = vector.load %arg2[%c0_79, %c136] : memref<1x512xf32, #tpu.memory_space<vmem>>, vector<1x8xf32>
    tpu.vector_store %arg2[%c0_79, %c136], %106 {strides = array<i32>} : memref<1x512xf32, #tpu.memory_space<vmem>>, vector<1x8xf32>,
    %c0_80 = arith.constant 0 : index
    %c576 = arith.constant 576 : index
    %108 = vector.load %arg1[%c0_80, %c576] : memref<1x2048xf32, #tpu.memory_space<vmem>>, vector<1x16xf32>
    %c0_81 = arith.constant 0 : index
    %c592 = arith.constant 592 : index
    %109 = vector.load %arg1[%c0_81, %c592] : memref<1x2048xf32, #tpu.memory_space<vmem>>, vector<1x16xf32>
    %110 = arith.maximumf %108, %109 : vector<1x16xf32>
    %111 = vector.shape_cast %110 : vector<1x16xf32> to vector<1x8x2xf32>
    %cst_82 = arith.constant dense<0xFF800000> : vector<1x8xf32>
    %112 = vector.multi_reduction <maximumf>, %111, %cst_82 [2] : vector<1x8x2xf32> to vector<1x8xf32>
    %c0_83 = arith.constant 0 : index
    %c144_84 = arith.constant 144 : index
    %113 = vector.load %arg2[%c0_83, %c144_84] : memref<1x512xf32, #tpu.memory_space<vmem>>, vector<1x8xf32>
    tpu.vector_store %arg2[%c0_83, %c144_84], %112 {strides = array<i32>} : memref<1x512xf32, #tpu.memory_space<vmem>>, vector<1x8xf32>,
    %c0_85 = arith.constant 0 : index
    %c608 = arith.constant 608 : index
    %114 = vector.load %arg1[%c0_85, %c608] : memref<1x2048xf32, #tpu.memory_space<vmem>>, vector<1x16xf32>
    %c0_86 = arith.constant 0 : index
    %c624 = arith.constant 624 : index
    %115 = vector.load %arg1[%c0_86, %c624] : memref<1x2048xf32, #tpu.memory_space<vmem>>, vector<1x16xf32>
    %116 = arith.maximumf %114, %115 : vector<1x16xf32>
    %117 = vector.shape_cast %116 : vector<1x16xf32> to vector<1x8x2xf32>
    %cst_87 = arith.constant dense<0xFF800000> : vector<1x8xf32>
    %118 = vector.multi_reduction <maximumf>, %117, %cst_87 [2] : vector<1x8x2xf32> to vector<1x8xf32>
    %c0_88 = arith.constant 0 : index
    %c152 = arith.constant 152 : index
    %119 = vector.load %arg2[%c0_88, %c152] : memref<1x512xf32, #tpu.memory_space<vmem>>, vector<1x8xf32>
    tpu.vector_store %arg2[%c0_88, %c152], %118 {strides = array<i32>} : memref<1x512xf32, #tpu.memory_space<vmem>>, vector<1x8xf32>,
    %c0_89 = arith.constant 0 : index
    %c640 = arith.constant 640 : index
    %120 = vector.load %arg1[%c0_89, %c640] : memref<1x2048xf32, #tpu.memory_space<vmem>>, vector<1x16xf32>
    %c0_90 = arith.constant 0 : index
    %c656 = arith.constant 656 : index
    %121 = vector.load %arg1[%c0_90, %c656] : memref<1x2048xf32, #tpu.memory_space<vmem>>, vector<1x16xf32>
    %122 = arith.maximumf %120, %121 : vector<1x16xf32>
    %123 = vector.shape_cast %122 : vector<1x16xf32> to vector<1x8x2xf32>
    %cst_91 = arith.constant dense<0xFF800000> : vector<1x8xf32>
    %124 = vector.multi_reduction <maximumf>, %123, %cst_91 [2] : vector<1x8x2xf32> to vector<1x8xf32>
    %c0_92 = arith.constant 0 : index
    %c160_93 = arith.constant 160 : index
    %125 = vector.load %arg2[%c0_92, %c160_93] : memref<1x512xf32, #tpu.memory_space<vmem>>, vector<1x8xf32>
    tpu.vector_store %arg2[%c0_92, %c160_93], %124 {strides = array<i32>} : memref<1x512xf32, #tpu.memory_space<vmem>>, vector<1x8xf32>,
    %c0_94 = arith.constant 0 : index
    %c672 = arith.constant 672 : index
    %126 = vector.load %arg1[%c0_94, %c672] : memref<1x2048xf32, #tpu.memory_space<vmem>>, vector<1x16xf32>
    %c0_95 = arith.constant 0 : index
    %c688 = arith.constant 688 : index
    %127 = vector.load %arg1[%c0_95, %c688] : memref<1x2048xf32, #tpu.memory_space<vmem>>, vector<1x16xf32>
    %128 = arith.maximumf %126, %127 : vector<1x16xf32>
    %129 = vector.shape_cast %128 : vector<1x16xf32> to vector<1x8x2xf32>
    %cst_96 = arith.constant dense<0xFF800000> : vector<1x8xf32>
    %130 = vector.multi_reduction <maximumf>, %129, %cst_96 [2] : vector<1x8x2xf32> to vector<1x8xf32>
    %c0_97 = arith.constant 0 : index
    %c168 = arith.constant 168 : index
    %131 = vector.load %arg2[%c0_97, %c168] : memref<1x512xf32, #tpu.memory_space<vmem>>, vector<1x8xf32>
    tpu.vector_store %arg2[%c0_97, %c168], %130 {strides = array<i32>} : memref<1x512xf32, #tpu.memory_space<vmem>>, vector<1x8xf32>,
    %c0_98 = arith.constant 0 : index
    %c704 = arith.constant 704 : index
    %132 = vector.load %arg1[%c0_98, %c704] : memref<1x2048xf32, #tpu.memory_space<vmem>>, vector<1x16xf32>
    %c0_99 = arith.constant 0 : index
    %c720 = arith.constant 720 : index
    %133 = vector.load %arg1[%c0_99, %c720] : memref<1x2048xf32, #tpu.memory_space<vmem>>, vector<1x16xf32>
    %134 = arith.maximumf %132, %133 : vector<1x16xf32>
    %135 = vector.shape_cast %134 : vector<1x16xf32> to vector<1x8x2xf32>
    %cst_100 = arith.constant dense<0xFF800000> : vector<1x8xf32>
    %136 = vector.multi_reduction <maximumf>, %135, %cst_100 [2] : vector<1x8x2xf32> to vector<1x8xf32>
    %c0_101 = arith.constant 0 : index
    %c176_102 = arith.constant 176 : index
    %137 = vector.load %arg2[%c0_101, %c176_102] : memref<1x512xf32, #tpu.memory_space<vmem>>, vector<1x8xf32>
    tpu.vector_store %arg2[%c0_101, %c176_102], %136 {strides = array<i32>} : memref<1x512xf32, #tpu.memory_space<vmem>>, vector<1x8xf32>,
    %c0_103 = arith.constant 0 : index
    %c736 = arith.constant 736 : index
    %138 = vector.load %arg1[%c0_103, %c736] : memref<1x2048xf32, #tpu.memory_space<vmem>>, vector<1x16xf32>
    %c0_104 = arith.constant 0 : index
    %c752 = arith.constant 752 : index
    %139 = vector.load %arg1[%c0_104, %c752] : memref<1x2048xf32, #tpu.memory_space<vmem>>, vector<1x16xf32>
    %140 = arith.maximumf %138, %139 : vector<1x16xf32>
    %141 = vector.shape_cast %140 : vector<1x16xf32> to vector<1x8x2xf32>
    %cst_105 = arith.constant dense<0xFF800000> : vector<1x8xf32>
    %142 = vector.multi_reduction <maximumf>, %141, %cst_105 [2] : vector<1x8x2xf32> to vector<1x8xf32>
    %c0_106 = arith.constant 0 : index
    %c184 = arith.constant 184 : index
    %143 = vector.load %arg2[%c0_106, %c184] : memref<1x512xf32, #tpu.memory_space<vmem>>, vector<1x8xf32>
    tpu.vector_store %arg2[%c0_106, %c184], %142 {strides = array<i32>} : memref<1x512xf32, #tpu.memory_space<vmem>>, vector<1x8xf32>,
    %c0_107 = arith.constant 0 : index
    %c768 = arith.constant 768 : index
    %144 = vector.load %arg1[%c0_107, %c768] : memref<1x2048xf32, #tpu.memory_space<vmem>>, vector<1x16xf32>
    %c0_108 = arith.constant 0 : index
    %c784 = arith.constant 784 : index
    %145 = vector.load %arg1[%c0_108, %c784] : memref<1x2048xf32, #tpu.memory_space<vmem>>, vector<1x16xf32>
    %146 = arith.maximumf %144, %145 : vector<1x16xf32>
    %147 = vector.shape_cast %146 : vector<1x16xf32> to vector<1x8x2xf32>
    %cst_109 = arith.constant dense<0xFF800000> : vector<1x8xf32>
    %148 = vector.multi_reduction <maximumf>, %147, %cst_109 [2] : vector<1x8x2xf32> to vector<1x8xf32>
    %c0_110 = arith.constant 0 : index
    %c192_111 = arith.constant 192 : index
    %149 = vector.load %arg2[%c0_110, %c192_111] : memref<1x512xf32, #tpu.memory_space<vmem>>, vector<1x8xf32>
    tpu.vector_store %arg2[%c0_110, %c192_111], %148 {strides = array<i32>} : memref<1x512xf32, #tpu.memory_space<vmem>>, vector<1x8xf32>,
    %c0_112 = arith.constant 0 : index
    %c800 = arith.constant 800 : index
    %150 = vector.load %arg1[%c0_112, %c800] : memref<1x2048xf32, #tpu.memory_space<vmem>>, vector<1x16xf32>
    %c0_113 = arith.constant 0 : index
    %c816 = arith.constant 816 : index
    %151 = vector.load %arg1[%c0_113, %c816] : memref<1x2048xf32, #tpu.memory_space<vmem>>, vector<1x16xf32>
    %152 = arith.maximumf %150, %151 : vector<1x16xf32>
    %153 = vector.shape_cast %152 : vector<1x16xf32> to vector<1x8x2xf32>
    %cst_114 = arith.constant dense<0xFF800000> : vector<1x8xf32>
    %154 = vector.multi_reduction <maximumf>, %153, %cst_114 [2] : vector<1x8x2xf32> to vector<1x8xf32>
    %c0_115 = arith.constant 0 : index
    %c200 = arith.constant 200 : index
    %155 = vector.load %arg2[%c0_115, %c200] : memref<1x512xf32, #tpu.memory_space<vmem>>, vector<1x8xf32>
    tpu.vector_store %arg2[%c0_115, %c200], %154 {strides = array<i32>} : memref<1x512xf32, #tpu.memory_space<vmem>>, vector<1x8xf32>,
    %c0_116 = arith.constant 0 : index
    %c832 = arith.constant 832 : index
    %156 = vector.load %arg1[%c0_116, %c832] : memref<1x2048xf32, #tpu.memory_space<vmem>>, vector<1x16xf32>
    %c0_117 = arith.constant 0 : index
    %c848 = arith.constant 848 : index
    %157 = vector.load %arg1[%c0_117, %c848] : memref<1x2048xf32, #tpu.memory_space<vmem>>, vector<1x16xf32>
    %158 = arith.maximumf %156, %157 : vector<1x16xf32>
    %159 = vector.shape_cast %158 : vector<1x16xf32> to vector<1x8x2xf32>
    %cst_118 = arith.constant dense<0xFF800000> : vector<1x8xf32>
    %160 = vector.multi_reduction <maximumf>, %159, %cst_118 [2] : vector<1x8x2xf32> to vector<1x8xf32>
    %c0_119 = arith.constant 0 : index
    %c208_120 = arith.constant 208 : index
    %161 = vector.load %arg2[%c0_119, %c208_120] : memref<1x512xf32, #tpu.memory_space<vmem>>, vector<1x8xf32>
    tpu.vector_store %arg2[%c0_119, %c208_120], %160 {strides = array<i32>} : memref<1x512xf32, #tpu.memory_space<vmem>>, vector<1x8xf32>,
    %c0_121 = arith.constant 0 : index
    %c864 = arith.constant 864 : index
    %162 = vector.load %arg1[%c0_121, %c864] : memref<1x2048xf32, #tpu.memory_space<vmem>>, vector<1x16xf32>
    %c0_122 = arith.constant 0 : index
    %c880 = arith.constant 880 : index
    %163 = vector.load %arg1[%c0_122, %c880] : memref<1x2048xf32, #tpu.memory_space<vmem>>, vector<1x16xf32>
    %164 = arith.maximumf %162, %163 : vector<1x16xf32>
    %165 = vector.shape_cast %164 : vector<1x16xf32> to vector<1x8x2xf32>
    %cst_123 = arith.constant dense<0xFF800000> : vector<1x8xf32>
    %166 = vector.multi_reduction <maximumf>, %165, %cst_123 [2] : vector<1x8x2xf32> to vector<1x8xf32>
    %c0_124 = arith.constant 0 : index
    %c216 = arith.constant 216 : index
    %167 = vector.load %arg2[%c0_124, %c216] : memref<1x512xf32, #tpu.memory_space<vmem>>, vector<1x8xf32>
    tpu.vector_store %arg2[%c0_124, %c216], %166 {strides = array<i32>} : memref<1x512xf32, #tpu.memory_space<vmem>>, vector<1x8xf32>,
    %c0_125 = arith.constant 0 : index
    %c896 = arith.constant 896 : index
    %168 = vector.load %arg1[%c0_125, %c896] : memref<1x2048xf32, #tpu.memory_space<vmem>>, vector<1x16xf32>
    %c0_126 = arith.constant 0 : index
    %c912 = arith.constant 912 : index
    %169 = vector.load %arg1[%c0_126, %c912] : memref<1x2048xf32, #tpu.memory_space<vmem>>, vector<1x16xf32>
    %170 = arith.maximumf %168, %169 : vector<1x16xf32>
    %171 = vector.shape_cast %170 : vector<1x16xf32> to vector<1x8x2xf32>
    %cst_127 = arith.constant dense<0xFF800000> : vector<1x8xf32>
    %172 = vector.multi_reduction <maximumf>, %171, %cst_127 [2] : vector<1x8x2xf32> to vector<1x8xf32>
    %c0_128 = arith.constant 0 : index
    %c224_129 = arith.constant 224 : index
    %173 = vector.load %arg2[%c0_128, %c224_129] : memref<1x512xf32, #tpu.memory_space<vmem>>, vector<1x8xf32>
    tpu.vector_store %arg2[%c0_128, %c224_129], %172 {strides = array<i32>} : memref<1x512xf32, #tpu.memory_space<vmem>>, vector<1x8xf32>,
    %c0_130 = arith.constant 0 : index
    %c928 = arith.constant 928 : index
    %174 = vector.load %arg1[%c0_130, %c928] : memref<1x2048xf32, #tpu.memory_space<vmem>>, vector<1x16xf32>
    %c0_131 = arith.constant 0 : index
    %c944 = arith.constant 944 : index
    %175 = vector.load %arg1[%c0_131, %c944] : memref<1x2048xf32, #tpu.memory_space<vmem>>, vector<1x16xf32>
    %176 = arith.maximumf %174, %175 : vector<1x16xf32>
    %177 = vector.shape_cast %176 : vector<1x16xf32> to vector<1x8x2xf32>
    %cst_132 = arith.constant dense<0xFF800000> : vector<1x8xf32>
    %178 = vector.multi_reduction <maximumf>, %177, %cst_132 [2] : vector<1x8x2xf32> to vector<1x8xf32>
    %c0_133 = arith.constant 0 : index
    %c232 = arith.constant 232 : index
    %179 = vector.load %arg2[%c0_133, %c232] : memref<1x512xf32, #tpu.memory_space<vmem>>, vector<1x8xf32>
    tpu.vector_store %arg2[%c0_133, %c232], %178 {strides = array<i32>} : memref<1x512xf32, #tpu.memory_space<vmem>>, vector<1x8xf32>,
    %c0_134 = arith.constant 0 : index
    %c960 = arith.constant 960 : index
    %180 = vector.load %arg1[%c0_134, %c960] : memref<1x2048xf32, #tpu.memory_space<vmem>>, vector<1x16xf32>
    %c0_135 = arith.constant 0 : index
    %c976 = arith.constant 976 : index
    %181 = vector.load %arg1[%c0_135, %c976] : memref<1x2048xf32, #tpu.memory_space<vmem>>, vector<1x16xf32>
    %182 = arith.maximumf %180, %181 : vector<1x16xf32>
    %183 = vector.shape_cast %182 : vector<1x16xf32> to vector<1x8x2xf32>
    %cst_136 = arith.constant dense<0xFF800000> : vector<1x8xf32>
    %184 = vector.multi_reduction <maximumf>, %183, %cst_136 [2] : vector<1x8x2xf32> to vector<1x8xf32>
    %c0_137 = arith.constant 0 : index
    %c240_138 = arith.constant 240 : index
    %185 = vector.load %arg2[%c0_137, %c240_138] : memref<1x512xf32, #tpu.memory_space<vmem>>, vector<1x8xf32>
    tpu.vector_store %arg2[%c0_137, %c240_138], %184 {strides = array<i32>} : memref<1x512xf32, #tpu.memory_space<vmem>>, vector<1x8xf32>,
    %c0_139 = arith.constant 0 : index
    %c992 = arith.constant 992 : index
    %186 = vector.load %arg1[%c0_139, %c992] : memref<1x2048xf32, #tpu.memory_space<vmem>>, vector<1x16xf32>
    %c0_140 = arith.constant 0 : index
    %c1008 = arith.constant 1008 : index
    %187 = vector.load %arg1[%c0_140, %c1008] : memref<1x2048xf32, #tpu.memory_space<vmem>>, vector<1x16xf32>
    %188 = arith.maximumf %186, %187 : vector<1x16xf32>
    %189 = vector.shape_cast %188 : vector<1x16xf32> to vector<1x8x2xf32>
    %cst_141 = arith.constant dense<0xFF800000> : vector<1x8xf32>
    %190 = vector.multi_reduction <maximumf>, %189, %cst_141 [2] : vector<1x8x2xf32> to vector<1x8xf32>
    %c0_142 = arith.constant 0 : index
    %c248 = arith.constant 248 : index
    %191 = vector.load %arg2[%c0_142, %c248] : memref<1x512xf32, #tpu.memory_space<vmem>>, vector<1x8xf32>
    tpu.vector_store %arg2[%c0_142, %c248], %190 {strides = array<i32>} : memref<1x512xf32, #tpu.memory_space<vmem>>, vector<1x8xf32>,
    %c0_143 = arith.constant 0 : index
    %c1024 = arith.constant 1024 : index
    %192 = vector.load %arg1[%c0_143, %c1024] : memref<1x2048xf32, #tpu.memory_space<vmem>>, vector<1x16xf32>
    %c0_144 = arith.constant 0 : index
    %c1040 = arith.constant 1040 : index
    %193 = vector.load %arg1[%c0_144, %c1040] : memref<1x2048xf32, #tpu.memory_space<vmem>>, vector<1x16xf32>
    %194 = arith.maximumf %192, %193 : vector<1x16xf32>
    %195 = vector.shape_cast %194 : vector<1x16xf32> to vector<1x8x2xf32>
    %cst_145 = arith.constant dense<0xFF800000> : vector<1x8xf32>
    %196 = vector.multi_reduction <maximumf>, %195, %cst_145 [2] : vector<1x8x2xf32> to vector<1x8xf32>
    %c0_146 = arith.constant 0 : index
    %c256_147 = arith.constant 256 : index
    %197 = vector.load %arg2[%c0_146, %c256_147] : memref<1x512xf32, #tpu.memory_space<vmem>>, vector<1x8xf32>
    tpu.vector_store %arg2[%c0_146, %c256_147], %196 {strides = array<i32>} : memref<1x512xf32, #tpu.memory_space<vmem>>, vector<1x8xf32>,
    %c0_148 = arith.constant 0 : index
    %c1056 = arith.constant 1056 : index
    %198 = vector.load %arg1[%c0_148, %c1056] : memref<1x2048xf32, #tpu.memory_space<vmem>>, vector<1x16xf32>
    %c0_149 = arith.constant 0 : index
    %c1072 = arith.constant 1072 : index
    %199 = vector.load %arg1[%c0_149, %c1072] : memref<1x2048xf32, #tpu.memory_space<vmem>>, vector<1x16xf32>
    %200 = arith.maximumf %198, %199 : vector<1x16xf32>
    %201 = vector.shape_cast %200 : vector<1x16xf32> to vector<1x8x2xf32>
    %cst_150 = arith.constant dense<0xFF800000> : vector<1x8xf32>
    %202 = vector.multi_reduction <maximumf>, %201, %cst_150 [2] : vector<1x8x2xf32> to vector<1x8xf32>
    %c0_151 = arith.constant 0 : index
    %c264 = arith.constant 264 : index
    %203 = vector.load %arg2[%c0_151, %c264] : memref<1x512xf32, #tpu.memory_space<vmem>>, vector<1x8xf32>
    tpu.vector_store %arg2[%c0_151, %c264], %202 {strides = array<i32>} : memref<1x512xf32, #tpu.memory_space<vmem>>, vector<1x8xf32>,
    %c0_152 = arith.constant 0 : index
    %c1088 = arith.constant 1088 : index
    %204 = vector.load %arg1[%c0_152, %c1088] : memref<1x2048xf32, #tpu.memory_space<vmem>>, vector<1x16xf32>
    %c0_153 = arith.constant 0 : index
    %c1104 = arith.constant 1104 : index
    %205 = vector.load %arg1[%c0_153, %c1104] : memref<1x2048xf32, #tpu.memory_space<vmem>>, vector<1x16xf32>
    %206 = arith.maximumf %204, %205 : vector<1x16xf32>
    %207 = vector.shape_cast %206 : vector<1x16xf32> to vector<1x8x2xf32>
    %cst_154 = arith.constant dense<0xFF800000> : vector<1x8xf32>
    %208 = vector.multi_reduction <maximumf>, %207, %cst_154 [2] : vector<1x8x2xf32> to vector<1x8xf32>
    %c0_155 = arith.constant 0 : index
    %c272_156 = arith.constant 272 : index
    %209 = vector.load %arg2[%c0_155, %c272_156] : memref<1x512xf32, #tpu.memory_space<vmem>>, vector<1x8xf32>
    tpu.vector_store %arg2[%c0_155, %c272_156], %208 {strides = array<i32>} : memref<1x512xf32, #tpu.memory_space<vmem>>, vector<1x8xf32>,
    %c0_157 = arith.constant 0 : index
    %c1120 = arith.constant 1120 : index
    %210 = vector.load %arg1[%c0_157, %c1120] : memref<1x2048xf32, #tpu.memory_space<vmem>>, vector<1x16xf32>
    %c0_158 = arith.constant 0 : index
    %c1136 = arith.constant 1136 : index
    %211 = vector.load %arg1[%c0_158, %c1136] : memref<1x2048xf32, #tpu.memory_space<vmem>>, vector<1x16xf32>
    %212 = arith.maximumf %210, %211 : vector<1x16xf32>
    %213 = vector.shape_cast %212 : vector<1x16xf32> to vector<1x8x2xf32>
    %cst_159 = arith.constant dense<0xFF800000> : vector<1x8xf32>
    %214 = vector.multi_reduction <maximumf>, %213, %cst_159 [2] : vector<1x8x2xf32> to vector<1x8xf32>
    %c0_160 = arith.constant 0 : index
    %c280 = arith.constant 280 : index
    %215 = vector.load %arg2[%c0_160, %c280] : memref<1x512xf32, #tpu.memory_space<vmem>>, vector<1x8xf32>
    tpu.vector_store %arg2[%c0_160, %c280], %214 {strides = array<i32>} : memref<1x512xf32, #tpu.memory_space<vmem>>, vector<1x8xf32>,
    %c0_161 = arith.constant 0 : index
    %c1152 = arith.constant 1152 : index
    %216 = vector.load %arg1[%c0_161, %c1152] : memref<1x2048xf32, #tpu.memory_space<vmem>>, vector<1x16xf32>
    %c0_162 = arith.constant 0 : index
    %c1168 = arith.constant 1168 : index
    %217 = vector.load %arg1[%c0_162, %c1168] : memref<1x2048xf32, #tpu.memory_space<vmem>>, vector<1x16xf32>
    %218 = arith.maximumf %216, %217 : vector<1x16xf32>
    %219 = vector.shape_cast %218 : vector<1x16xf32> to vector<1x8x2xf32>
    %cst_163 = arith.constant dense<0xFF800000> : vector<1x8xf32>
    %220 = vector.multi_reduction <maximumf>, %219, %cst_163 [2] : vector<1x8x2xf32> to vector<1x8xf32>
    %c0_164 = arith.constant 0 : index
    %c288_165 = arith.constant 288 : index
    %221 = vector.load %arg2[%c0_164, %c288_165] : memref<1x512xf32, #tpu.memory_space<vmem>>, vector<1x8xf32>
    tpu.vector_store %arg2[%c0_164, %c288_165], %220 {strides = array<i32>} : memref<1x512xf32, #tpu.memory_space<vmem>>, vector<1x8xf32>,
    %c0_166 = arith.constant 0 : index
    %c1184 = arith.constant 1184 : index
    %222 = vector.load %arg1[%c0_166, %c1184] : memref<1x2048xf32, #tpu.memory_space<vmem>>, vector<1x16xf32>
    %c0_167 = arith.constant 0 : index
    %c1200 = arith.constant 1200 : index
    %223 = vector.load %arg1[%c0_167, %c1200] : memref<1x2048xf32, #tpu.memory_space<vmem>>, vector<1x16xf32>
    %224 = arith.maximumf %222, %223 : vector<1x16xf32>
    %225 = vector.shape_cast %224 : vector<1x16xf32> to vector<1x8x2xf32>
    %cst_168 = arith.constant dense<0xFF800000> : vector<1x8xf32>
    %226 = vector.multi_reduction <maximumf>, %225, %cst_168 [2] : vector<1x8x2xf32> to vector<1x8xf32>
    %c0_169 = arith.constant 0 : index
    %c296 = arith.constant 296 : index
    %227 = vector.load %arg2[%c0_169, %c296] : memref<1x512xf32, #tpu.memory_space<vmem>>, vector<1x8xf32>
    tpu.vector_store %arg2[%c0_169, %c296], %226 {strides = array<i32>} : memref<1x512xf32, #tpu.memory_space<vmem>>, vector<1x8xf32>,
    %c0_170 = arith.constant 0 : index
    %c1216 = arith.constant 1216 : index
    %228 = vector.load %arg1[%c0_170, %c1216] : memref<1x2048xf32, #tpu.memory_space<vmem>>, vector<1x16xf32>
    %c0_171 = arith.constant 0 : index
    %c1232 = arith.constant 1232 : index
    %229 = vector.load %arg1[%c0_171, %c1232] : memref<1x2048xf32, #tpu.memory_space<vmem>>, vector<1x16xf32>
    %230 = arith.maximumf %228, %229 : vector<1x16xf32>
    %231 = vector.shape_cast %230 : vector<1x16xf32> to vector<1x8x2xf32>
    %cst_172 = arith.constant dense<0xFF800000> : vector<1x8xf32>
    %232 = vector.multi_reduction <maximumf>, %231, %cst_172 [2] : vector<1x8x2xf32> to vector<1x8xf32>
    %c0_173 = arith.constant 0 : index
    %c304_174 = arith.constant 304 : index
    %233 = vector.load %arg2[%c0_173, %c304_174] : memref<1x512xf32, #tpu.memory_space<vmem>>, vector<1x8xf32>
    tpu.vector_store %arg2[%c0_173, %c304_174], %232 {strides = array<i32>} : memref<1x512xf32, #tpu.memory_space<vmem>>, vector<1x8xf32>,
    %c0_175 = arith.constant 0 : index
    %c1248 = arith.constant 1248 : index
    %234 = vector.load %arg1[%c0_175, %c1248] : memref<1x2048xf32, #tpu.memory_space<vmem>>, vector<1x16xf32>
    %c0_176 = arith.constant 0 : index
    %c1264 = arith.constant 1264 : index
    %235 = vector.load %arg1[%c0_176, %c1264] : memref<1x2048xf32, #tpu.memory_space<vmem>>, vector<1x16xf32>
    %236 = arith.maximumf %234, %235 : vector<1x16xf32>
    %237 = vector.shape_cast %236 : vector<1x16xf32> to vector<1x8x2xf32>
    %cst_177 = arith.constant dense<0xFF800000> : vector<1x8xf32>
    %238 = vector.multi_reduction <maximumf>, %237, %cst_177 [2] : vector<1x8x2xf32> to vector<1x8xf32>
    %c0_178 = arith.constant 0 : index
    %c312 = arith.constant 312 : index
    %239 = vector.load %arg2[%c0_178, %c312] : memref<1x512xf32, #tpu.memory_space<vmem>>, vector<1x8xf32>
    tpu.vector_store %arg2[%c0_178, %c312], %238 {strides = array<i32>} : memref<1x512xf32, #tpu.memory_space<vmem>>, vector<1x8xf32>,
    %c0_179 = arith.constant 0 : index
    %c1280 = arith.constant 1280 : index
    %240 = vector.load %arg1[%c0_179, %c1280] : memref<1x2048xf32, #tpu.memory_space<vmem>>, vector<1x16xf32>
    %c0_180 = arith.constant 0 : index
    %c1296 = arith.constant 1296 : index
    %241 = vector.load %arg1[%c0_180, %c1296] : memref<1x2048xf32, #tpu.memory_space<vmem>>, vector<1x16xf32>
    %242 = arith.maximumf %240, %241 : vector<1x16xf32>
    %243 = vector.shape_cast %242 : vector<1x16xf32> to vector<1x8x2xf32>
    %cst_181 = arith.constant dense<0xFF800000> : vector<1x8xf32>
    %244 = vector.multi_reduction <maximumf>, %243, %cst_181 [2] : vector<1x8x2xf32> to vector<1x8xf32>
    %c0_182 = arith.constant 0 : index
    %c320_183 = arith.constant 320 : index
    %245 = vector.load %arg2[%c0_182, %c320_183] : memref<1x512xf32, #tpu.memory_space<vmem>>, vector<1x8xf32>
    tpu.vector_store %arg2[%c0_182, %c320_183], %244 {strides = array<i32>} : memref<1x512xf32, #tpu.memory_space<vmem>>, vector<1x8xf32>,
    %c0_184 = arith.constant 0 : index
    %c1312 = arith.constant 1312 : index
    %246 = vector.load %arg1[%c0_184, %c1312] : memref<1x2048xf32, #tpu.memory_space<vmem>>, vector<1x16xf32>
    %c0_185 = arith.constant 0 : index
    %c1328 = arith.constant 1328 : index
    %247 = vector.load %arg1[%c0_185, %c1328] : memref<1x2048xf32, #tpu.memory_space<vmem>>, vector<1x16xf32>
    %248 = arith.maximumf %246, %247 : vector<1x16xf32>
    %249 = vector.shape_cast %248 : vector<1x16xf32> to vector<1x8x2xf32>
    %cst_186 = arith.constant dense<0xFF800000> : vector<1x8xf32>
    %250 = vector.multi_reduction <maximumf>, %249, %cst_186 [2] : vector<1x8x2xf32> to vector<1x8xf32>
    %c0_187 = arith.constant 0 : index
    %c328 = arith.constant 328 : index
    %251 = vector.load %arg2[%c0_187, %c328] : memref<1x512xf32, #tpu.memory_space<vmem>>, vector<1x8xf32>
    tpu.vector_store %arg2[%c0_187, %c328], %250 {strides = array<i32>} : memref<1x512xf32, #tpu.memory_space<vmem>>, vector<1x8xf32>,
    %c0_188 = arith.constant 0 : index
    %c1344 = arith.constant 1344 : index
    %252 = vector.load %arg1[%c0_188, %c1344] : memref<1x2048xf32, #tpu.memory_space<vmem>>, vector<1x16xf32>
    %c0_189 = arith.constant 0 : index
    %c1360 = arith.constant 1360 : index
    %253 = vector.load %arg1[%c0_189, %c1360] : memref<1x2048xf32, #tpu.memory_space<vmem>>, vector<1x16xf32>
    %254 = arith.maximumf %252, %253 : vector<1x16xf32>
    %255 = vector.shape_cast %254 : vector<1x16xf32> to vector<1x8x2xf32>
    %cst_190 = arith.constant dense<0xFF800000> : vector<1x8xf32>
    %256 = vector.multi_reduction <maximumf>, %255, %cst_190 [2] : vector<1x8x2xf32> to vector<1x8xf32>
    %c0_191 = arith.constant 0 : index
    %c336_192 = arith.constant 336 : index
    %257 = vector.load %arg2[%c0_191, %c336_192] : memref<1x512xf32, #tpu.memory_space<vmem>>, vector<1x8xf32>
    tpu.vector_store %arg2[%c0_191, %c336_192], %256 {strides = array<i32>} : memref<1x512xf32, #tpu.memory_space<vmem>>, vector<1x8xf32>,
    %c0_193 = arith.constant 0 : index
    %c1376 = arith.constant 1376 : index
    %258 = vector.load %arg1[%c0_193, %c1376] : memref<1x2048xf32, #tpu.memory_space<vmem>>, vector<1x16xf32>
    %c0_194 = arith.constant 0 : index
    %c1392 = arith.constant 1392 : index
    %259 = vector.load %arg1[%c0_194, %c1392] : memref<1x2048xf32, #tpu.memory_space<vmem>>, vector<1x16xf32>
    %260 = arith.maximumf %258, %259 : vector<1x16xf32>
    %261 = vector.shape_cast %260 : vector<1x16xf32> to vector<1x8x2xf32>
    %cst_195 = arith.constant dense<0xFF800000> : vector<1x8xf32>
    %262 = vector.multi_reduction <maximumf>, %261, %cst_195 [2] : vector<1x8x2xf32> to vector<1x8xf32>
    %c0_196 = arith.constant 0 : index
    %c344 = arith.constant 344 : index
    %263 = vector.load %arg2[%c0_196, %c344] : memref<1x512xf32, #tpu.memory_space<vmem>>, vector<1x8xf32>
    tpu.vector_store %arg2[%c0_196, %c344], %262 {strides = array<i32>} : memref<1x512xf32, #tpu.memory_space<vmem>>, vector<1x8xf32>,
    %c0_197 = arith.constant 0 : index
    %c1408 = arith.constant 1408 : index
    %264 = vector.load %arg1[%c0_197, %c1408] : memref<1x2048xf32, #tpu.memory_space<vmem>>, vector<1x16xf32>
    %c0_198 = arith.constant 0 : index
    %c1424 = arith.constant 1424 : index
    %265 = vector.load %arg1[%c0_198, %c1424] : memref<1x2048xf32, #tpu.memory_space<vmem>>, vector<1x16xf32>
    %266 = arith.maximumf %264, %265 : vector<1x16xf32>
    %267 = vector.shape_cast %266 : vector<1x16xf32> to vector<1x8x2xf32>
    %cst_199 = arith.constant dense<0xFF800000> : vector<1x8xf32>
    %268 = vector.multi_reduction <maximumf>, %267, %cst_199 [2] : vector<1x8x2xf32> to vector<1x8xf32>
    %c0_200 = arith.constant 0 : index
    %c352_201 = arith.constant 352 : index
    %269 = vector.load %arg2[%c0_200, %c352_201] : memref<1x512xf32, #tpu.memory_space<vmem>>, vector<1x8xf32>
    tpu.vector_store %arg2[%c0_200, %c352_201], %268 {strides = array<i32>} : memref<1x512xf32, #tpu.memory_space<vmem>>, vector<1x8xf32>,
    %c0_202 = arith.constant 0 : index
    %c1440 = arith.constant 1440 : index
    %270 = vector.load %arg1[%c0_202, %c1440] : memref<1x2048xf32, #tpu.memory_space<vmem>>, vector<1x16xf32>
    %c0_203 = arith.constant 0 : index
    %c1456 = arith.constant 1456 : index
    %271 = vector.load %arg1[%c0_203, %c1456] : memref<1x2048xf32, #tpu.memory_space<vmem>>, vector<1x16xf32>
    %272 = arith.maximumf %270, %271 : vector<1x16xf32>
    %273 = vector.shape_cast %272 : vector<1x16xf32> to vector<1x8x2xf32>
    %cst_204 = arith.constant dense<0xFF800000> : vector<1x8xf32>
    %274 = vector.multi_reduction <maximumf>, %273, %cst_204 [2] : vector<1x8x2xf32> to vector<1x8xf32>
    %c0_205 = arith.constant 0 : index
    %c360 = arith.constant 360 : index
    %275 = vector.load %arg2[%c0_205, %c360] : memref<1x512xf32, #tpu.memory_space<vmem>>, vector<1x8xf32>
    tpu.vector_store %arg2[%c0_205, %c360], %274 {strides = array<i32>} : memref<1x512xf32, #tpu.memory_space<vmem>>, vector<1x8xf32>,
    %c0_206 = arith.constant 0 : index
    %c1472 = arith.constant 1472 : index
    %276 = vector.load %arg1[%c0_206, %c1472] : memref<1x2048xf32, #tpu.memory_space<vmem>>, vector<1x16xf32>
    %c0_207 = arith.constant 0 : index
    %c1488 = arith.constant 1488 : index
    %277 = vector.load %arg1[%c0_207, %c1488] : memref<1x2048xf32, #tpu.memory_space<vmem>>, vector<1x16xf32>
    %278 = arith.maximumf %276, %277 : vector<1x16xf32>
    %279 = vector.shape_cast %278 : vector<1x16xf32> to vector<1x8x2xf32>
    %cst_208 = arith.constant dense<0xFF800000> : vector<1x8xf32>
    %280 = vector.multi_reduction <maximumf>, %279, %cst_208 [2] : vector<1x8x2xf32> to vector<1x8xf32>
    %c0_209 = arith.constant 0 : index
    %c368_210 = arith.constant 368 : index
    %281 = vector.load %arg2[%c0_209, %c368_210] : memref<1x512xf32, #tpu.memory_space<vmem>>, vector<1x8xf32>
    tpu.vector_store %arg2[%c0_209, %c368_210], %280 {strides = array<i32>} : memref<1x512xf32, #tpu.memory_space<vmem>>, vector<1x8xf32>,
    %c0_211 = arith.constant 0 : index
    %c1504 = arith.constant 1504 : index
    %282 = vector.load %arg1[%c0_211, %c1504] : memref<1x2048xf32, #tpu.memory_space<vmem>>, vector<1x16xf32>
    %c0_212 = arith.constant 0 : index
    %c1520 = arith.constant 1520 : index
    %283 = vector.load %arg1[%c0_212, %c1520] : memref<1x2048xf32, #tpu.memory_space<vmem>>, vector<1x16xf32>
    %284 = arith.maximumf %282, %283 : vector<1x16xf32>
    %285 = vector.shape_cast %284 : vector<1x16xf32> to vector<1x8x2xf32>
    %cst_213 = arith.constant dense<0xFF800000> : vector<1x8xf32>
    %286 = vector.multi_reduction <maximumf>, %285, %cst_213 [2] : vector<1x8x2xf32> to vector<1x8xf32>
    %c0_214 = arith.constant 0 : index
    %c376 = arith.constant 376 : index
    %287 = vector.load %arg2[%c0_214, %c376] : memref<1x512xf32, #tpu.memory_space<vmem>>, vector<1x8xf32>
    tpu.vector_store %arg2[%c0_214, %c376], %286 {strides = array<i32>} : memref<1x512xf32, #tpu.memory_space<vmem>>, vector<1x8xf32>,
    %c0_215 = arith.constant 0 : index
    %c1536 = arith.constant 1536 : index
    %288 = vector.load %arg1[%c0_215, %c1536] : memref<1x2048xf32, #tpu.memory_space<vmem>>, vector<1x16xf32>
    %c0_216 = arith.constant 0 : index
    %c1552 = arith.constant 1552 : index
    %289 = vector.load %arg1[%c0_216, %c1552] : memref<1x2048xf32, #tpu.memory_space<vmem>>, vector<1x16xf32>
    %290 = arith.maximumf %288, %289 : vector<1x16xf32>
    %291 = vector.shape_cast %290 : vector<1x16xf32> to vector<1x8x2xf32>
    %cst_217 = arith.constant dense<0xFF800000> : vector<1x8xf32>
    %292 = vector.multi_reduction <maximumf>, %291, %cst_217 [2] : vector<1x8x2xf32> to vector<1x8xf32>
    %c0_218 = arith.constant 0 : index
    %c384_219 = arith.constant 384 : index
    %293 = vector.load %arg2[%c0_218, %c384_219] : memref<1x512xf32, #tpu.memory_space<vmem>>, vector<1x8xf32>
    tpu.vector_store %arg2[%c0_218, %c384_219], %292 {strides = array<i32>} : memref<1x512xf32, #tpu.memory_space<vmem>>, vector<1x8xf32>,
    %c0_220 = arith.constant 0 : index
    %c1568 = arith.constant 1568 : index
    %294 = vector.load %arg1[%c0_220, %c1568] : memref<1x2048xf32, #tpu.memory_space<vmem>>, vector<1x16xf32>
    %c0_221 = arith.constant 0 : index
    %c1584 = arith.constant 1584 : index
    %295 = vector.load %arg1[%c0_221, %c1584] : memref<1x2048xf32, #tpu.memory_space<vmem>>, vector<1x16xf32>
    %296 = arith.maximumf %294, %295 : vector<1x16xf32>
    %297 = vector.shape_cast %296 : vector<1x16xf32> to vector<1x8x2xf32>
    %cst_222 = arith.constant dense<0xFF800000> : vector<1x8xf32>
    %298 = vector.multi_reduction <maximumf>, %297, %cst_222 [2] : vector<1x8x2xf32> to vector<1x8xf32>
    %c0_223 = arith.constant 0 : index
    %c392 = arith.constant 392 : index
    %299 = vector.load %arg2[%c0_223, %c392] : memref<1x512xf32, #tpu.memory_space<vmem>>, vector<1x8xf32>
    tpu.vector_store %arg2[%c0_223, %c392], %298 {strides = array<i32>} : memref<1x512xf32, #tpu.memory_space<vmem>>, vector<1x8xf32>,
    %c0_224 = arith.constant 0 : index
    %c1600 = arith.constant 1600 : index
    %300 = vector.load %arg1[%c0_224, %c1600] : memref<1x2048xf32, #tpu.memory_space<vmem>>, vector<1x16xf32>
    %c0_225 = arith.constant 0 : index
    %c1616 = arith.constant 1616 : index
    %301 = vector.load %arg1[%c0_225, %c1616] : memref<1x2048xf32, #tpu.memory_space<vmem>>, vector<1x16xf32>
    %302 = arith.maximumf %300, %301 : vector<1x16xf32>
    %303 = vector.shape_cast %302 : vector<1x16xf32> to vector<1x8x2xf32>
    %cst_226 = arith.constant dense<0xFF800000> : vector<1x8xf32>
    %304 = vector.multi_reduction <maximumf>, %303, %cst_226 [2] : vector<1x8x2xf32> to vector<1x8xf32>
    %c0_227 = arith.constant 0 : index
    %c400_228 = arith.constant 400 : index
    %305 = vector.load %arg2[%c0_227, %c400_228] : memref<1x512xf32, #tpu.memory_space<vmem>>, vector<1x8xf32>
    tpu.vector_store %arg2[%c0_227, %c400_228], %304 {strides = array<i32>} : memref<1x512xf32, #tpu.memory_space<vmem>>, vector<1x8xf32>,
    %c0_229 = arith.constant 0 : index
    %c1632 = arith.constant 1632 : index
    %306 = vector.load %arg1[%c0_229, %c1632] : memref<1x2048xf32, #tpu.memory_space<vmem>>, vector<1x16xf32>
    %c0_230 = arith.constant 0 : index
    %c1648 = arith.constant 1648 : index
    %307 = vector.load %arg1[%c0_230, %c1648] : memref<1x2048xf32, #tpu.memory_space<vmem>>, vector<1x16xf32>
    %308 = arith.maximumf %306, %307 : vector<1x16xf32>
    %309 = vector.shape_cast %308 : vector<1x16xf32> to vector<1x8x2xf32>
    %cst_231 = arith.constant dense<0xFF800000> : vector<1x8xf32>
    %310 = vector.multi_reduction <maximumf>, %309, %cst_231 [2] : vector<1x8x2xf32> to vector<1x8xf32>
    %c0_232 = arith.constant 0 : index
    %c408 = arith.constant 408 : index
    %311 = vector.load %arg2[%c0_232, %c408] : memref<1x512xf32, #tpu.memory_space<vmem>>, vector<1x8xf32>
    tpu.vector_store %arg2[%c0_232, %c408], %310 {strides = array<i32>} : memref<1x512xf32, #tpu.memory_space<vmem>>, vector<1x8xf32>,
    %c0_233 = arith.constant 0 : index
    %c1664 = arith.constant 1664 : index
    %312 = vector.load %arg1[%c0_233, %c1664] : memref<1x2048xf32, #tpu.memory_space<vmem>>, vector<1x16xf32>
    %c0_234 = arith.constant 0 : index
    %c1680 = arith.constant 1680 : index
    %313 = vector.load %arg1[%c0_234, %c1680] : memref<1x2048xf32, #tpu.memory_space<vmem>>, vector<1x16xf32>
    %314 = arith.maximumf %312, %313 : vector<1x16xf32>
    %315 = vector.shape_cast %314 : vector<1x16xf32> to vector<1x8x2xf32>
    %cst_235 = arith.constant dense<0xFF800000> : vector<1x8xf32>
    %316 = vector.multi_reduction <maximumf>, %315, %cst_235 [2] : vector<1x8x2xf32> to vector<1x8xf32>
    %c0_236 = arith.constant 0 : index
    %c416_237 = arith.constant 416 : index
    %317 = vector.load %arg2[%c0_236, %c416_237] : memref<1x512xf32, #tpu.memory_space<vmem>>, vector<1x8xf32>
    tpu.vector_store %arg2[%c0_236, %c416_237], %316 {strides = array<i32>} : memref<1x512xf32, #tpu.memory_space<vmem>>, vector<1x8xf32>,
    %c0_238 = arith.constant 0 : index
    %c1696 = arith.constant 1696 : index
    %318 = vector.load %arg1[%c0_238, %c1696] : memref<1x2048xf32, #tpu.memory_space<vmem>>, vector<1x16xf32>
    %c0_239 = arith.constant 0 : index
    %c1712 = arith.constant 1712 : index
    %319 = vector.load %arg1[%c0_239, %c1712] : memref<1x2048xf32, #tpu.memory_space<vmem>>, vector<1x16xf32>
    %320 = arith.maximumf %318, %319 : vector<1x16xf32>
    %321 = vector.shape_cast %320 : vector<1x16xf32> to vector<1x8x2xf32>
    %cst_240 = arith.constant dense<0xFF800000> : vector<1x8xf32>
    %322 = vector.multi_reduction <maximumf>, %321, %cst_240 [2] : vector<1x8x2xf32> to vector<1x8xf32>
    %c0_241 = arith.constant 0 : index
    %c424 = arith.constant 424 : index
    %323 = vector.load %arg2[%c0_241, %c424] : memref<1x512xf32, #tpu.memory_space<vmem>>, vector<1x8xf32>
    tpu.vector_store %arg2[%c0_241, %c424], %322 {strides = array<i32>} : memref<1x512xf32, #tpu.memory_space<vmem>>, vector<1x8xf32>,
    %c0_242 = arith.constant 0 : index
    %c1728 = arith.constant 1728 : index
    %324 = vector.load %arg1[%c0_242, %c1728] : memref<1x2048xf32, #tpu.memory_space<vmem>>, vector<1x16xf32>
    %c0_243 = arith.constant 0 : index
    %c1744 = arith.constant 1744 : index
    %325 = vector.load %arg1[%c0_243, %c1744] : memref<1x2048xf32, #tpu.memory_space<vmem>>, vector<1x16xf32>
    %326 = arith.maximumf %324, %325 : vector<1x16xf32>
    %327 = vector.shape_cast %326 : vector<1x16xf32> to vector<1x8x2xf32>
    %cst_244 = arith.constant dense<0xFF800000> : vector<1x8xf32>
    %328 = vector.multi_reduction <maximumf>, %327, %cst_244 [2] : vector<1x8x2xf32> to vector<1x8xf32>
    %c0_245 = arith.constant 0 : index
    %c432_246 = arith.constant 432 : index
    %329 = vector.load %arg2[%c0_245, %c432_246] : memref<1x512xf32, #tpu.memory_space<vmem>>, vector<1x8xf32>
    tpu.vector_store %arg2[%c0_245, %c432_246], %328 {strides = array<i32>} : memref<1x512xf32, #tpu.memory_space<vmem>>, vector<1x8xf32>,
    %c0_247 = arith.constant 0 : index
    %c1760 = arith.constant 1760 : index
    %330 = vector.load %arg1[%c0_247, %c1760] : memref<1x2048xf32, #tpu.memory_space<vmem>>, vector<1x16xf32>
    %c0_248 = arith.constant 0 : index
    %c1776 = arith.constant 1776 : index
    %331 = vector.load %arg1[%c0_248, %c1776] : memref<1x2048xf32, #tpu.memory_space<vmem>>, vector<1x16xf32>
    %332 = arith.maximumf %330, %331 : vector<1x16xf32>
    %333 = vector.shape_cast %332 : vector<1x16xf32> to vector<1x8x2xf32>
    %cst_249 = arith.constant dense<0xFF800000> : vector<1x8xf32>
    %334 = vector.multi_reduction <maximumf>, %333, %cst_249 [2] : vector<1x8x2xf32> to vector<1x8xf32>
    %c0_250 = arith.constant 0 : index
    %c440 = arith.constant 440 : index
    %335 = vector.load %arg2[%c0_250, %c440] : memref<1x512xf32, #tpu.memory_space<vmem>>, vector<1x8xf32>
    tpu.vector_store %arg2[%c0_250, %c440], %334 {strides = array<i32>} : memref<1x512xf32, #tpu.memory_space<vmem>>, vector<1x8xf32>,
    %c0_251 = arith.constant 0 : index
    %c1792 = arith.constant 1792 : index
    %336 = vector.load %arg1[%c0_251, %c1792] : memref<1x2048xf32, #tpu.memory_space<vmem>>, vector<1x16xf32>
    %c0_252 = arith.constant 0 : index
    %c1808 = arith.constant 1808 : index
    %337 = vector.load %arg1[%c0_252, %c1808] : memref<1x2048xf32, #tpu.memory_space<vmem>>, vector<1x16xf32>
    %338 = arith.maximumf %336, %337 : vector<1x16xf32>
    %339 = vector.shape_cast %338 : vector<1x16xf32> to vector<1x8x2xf32>
    %cst_253 = arith.constant dense<0xFF800000> : vector<1x8xf32>
    %340 = vector.multi_reduction <maximumf>, %339, %cst_253 [2] : vector<1x8x2xf32> to vector<1x8xf32>
    %c0_254 = arith.constant 0 : index
    %c448_255 = arith.constant 448 : index
    %341 = vector.load %arg2[%c0_254, %c448_255] : memref<1x512xf32, #tpu.memory_space<vmem>>, vector<1x8xf32>
    tpu.vector_store %arg2[%c0_254, %c448_255], %340 {strides = array<i32>} : memref<1x512xf32, #tpu.memory_space<vmem>>, vector<1x8xf32>,
    %c0_256 = arith.constant 0 : index
    %c1824 = arith.constant 1824 : index
    %342 = vector.load %arg1[%c0_256, %c1824] : memref<1x2048xf32, #tpu.memory_space<vmem>>, vector<1x16xf32>
    %c0_257 = arith.constant 0 : index
    %c1840 = arith.constant 1840 : index
    %343 = vector.load %arg1[%c0_257, %c1840] : memref<1x2048xf32, #tpu.memory_space<vmem>>, vector<1x16xf32>
    %344 = arith.maximumf %342, %343 : vector<1x16xf32>
    %345 = vector.shape_cast %344 : vector<1x16xf32> to vector<1x8x2xf32>
    %cst_258 = arith.constant dense<0xFF800000> : vector<1x8xf32>
    %346 = vector.multi_reduction <maximumf>, %345, %cst_258 [2] : vector<1x8x2xf32> to vector<1x8xf32>
    %c0_259 = arith.constant 0 : index
    %c456 = arith.constant 456 : index
    %347 = vector.load %arg2[%c0_259, %c456] : memref<1x512xf32, #tpu.memory_space<vmem>>, vector<1x8xf32>
    tpu.vector_store %arg2[%c0_259, %c456], %346 {strides = array<i32>} : memref<1x512xf32, #tpu.memory_space<vmem>>, vector<1x8xf32>,
    %c0_260 = arith.constant 0 : index
    %c1856 = arith.constant 1856 : index
    %348 = vector.load %arg1[%c0_260, %c1856] : memref<1x2048xf32, #tpu.memory_space<vmem>>, vector<1x16xf32>
    %c0_261 = arith.constant 0 : index
    %c1872 = arith.constant 1872 : index
    %349 = vector.load %arg1[%c0_261, %c1872] : memref<1x2048xf32, #tpu.memory_space<vmem>>, vector<1x16xf32>
    %350 = arith.maximumf %348, %349 : vector<1x16xf32>
    %351 = vector.shape_cast %350 : vector<1x16xf32> to vector<1x8x2xf32>
    %cst_262 = arith.constant dense<0xFF800000> : vector<1x8xf32>
    %352 = vector.multi_reduction <maximumf>, %351, %cst_262 [2] : vector<1x8x2xf32> to vector<1x8xf32>
    %c0_263 = arith.constant 0 : index
    %c464_264 = arith.constant 464 : index
    %353 = vector.load %arg2[%c0_263, %c464_264] : memref<1x512xf32, #tpu.memory_space<vmem>>, vector<1x8xf32>
    tpu.vector_store %arg2[%c0_263, %c464_264], %352 {strides = array<i32>} : memref<1x512xf32, #tpu.memory_space<vmem>>, vector<1x8xf32>,
    %c0_265 = arith.constant 0 : index
    %c1888 = arith.constant 1888 : index
    %354 = vector.load %arg1[%c0_265, %c1888] : memref<1x2048xf32, #tpu.memory_space<vmem>>, vector<1x16xf32>
    %c0_266 = arith.constant 0 : index
    %c1904 = arith.constant 1904 : index
    %355 = vector.load %arg1[%c0_266, %c1904] : memref<1x2048xf32, #tpu.memory_space<vmem>>, vector<1x16xf32>
    %356 = arith.maximumf %354, %355 : vector<1x16xf32>
    %357 = vector.shape_cast %356 : vector<1x16xf32> to vector<1x8x2xf32>
    %cst_267 = arith.constant dense<0xFF800000> : vector<1x8xf32>
    %358 = vector.multi_reduction <maximumf>, %357, %cst_267 [2] : vector<1x8x2xf32> to vector<1x8xf32>
    %c0_268 = arith.constant 0 : index
    %c472 = arith.constant 472 : index
    %359 = vector.load %arg2[%c0_268, %c472] : memref<1x512xf32, #tpu.memory_space<vmem>>, vector<1x8xf32>
    tpu.vector_store %arg2[%c0_268, %c472], %358 {strides = array<i32>} : memref<1x512xf32, #tpu.memory_space<vmem>>, vector<1x8xf32>,
    %c0_269 = arith.constant 0 : index
    %c1920 = arith.constant 1920 : index
    %360 = vector.load %arg1[%c0_269, %c1920] : memref<1x2048xf32, #tpu.memory_space<vmem>>, vector<1x16xf32>
    %c0_270 = arith.constant 0 : index
    %c1936 = arith.constant 1936 : index
    %361 = vector.load %arg1[%c0_270, %c1936] : memref<1x2048xf32, #tpu.memory_space<vmem>>, vector<1x16xf32>
    %362 = arith.maximumf %360, %361 : vector<1x16xf32>
    %363 = vector.shape_cast %362 : vector<1x16xf32> to vector<1x8x2xf32>
    %cst_271 = arith.constant dense<0xFF800000> : vector<1x8xf32>
    %364 = vector.multi_reduction <maximumf>, %363, %cst_271 [2] : vector<1x8x2xf32> to vector<1x8xf32>
    %c0_272 = arith.constant 0 : index
    %c480_273 = arith.constant 480 : index
    %365 = vector.load %arg2[%c0_272, %c480_273] : memref<1x512xf32, #tpu.memory_space<vmem>>, vector<1x8xf32>
    tpu.vector_store %arg2[%c0_272, %c480_273], %364 {strides = array<i32>} : memref<1x512xf32, #tpu.memory_space<vmem>>, vector<1x8xf32>,
    %c0_274 = arith.constant 0 : index
    %c1952 = arith.constant 1952 : index
    %366 = vector.load %arg1[%c0_274, %c1952] : memref<1x2048xf32, #tpu.memory_space<vmem>>, vector<1x16xf32>
    %c0_275 = arith.constant 0 : index
    %c1968 = arith.constant 1968 : index
    %367 = vector.load %arg1[%c0_275, %c1968] : memref<1x2048xf32, #tpu.memory_space<vmem>>, vector<1x16xf32>
    %368 = arith.maximumf %366, %367 : vector<1x16xf32>
    %369 = vector.shape_cast %368 : vector<1x16xf32> to vector<1x8x2xf32>
    %cst_276 = arith.constant dense<0xFF800000> : vector<1x8xf32>
    %370 = vector.multi_reduction <maximumf>, %369, %cst_276 [2] : vector<1x8x2xf32> to vector<1x8xf32>
    %c0_277 = arith.constant 0 : index
    %c488 = arith.constant 488 : index
    %371 = vector.load %arg2[%c0_277, %c488] : memref<1x512xf32, #tpu.memory_space<vmem>>, vector<1x8xf32>
    tpu.vector_store %arg2[%c0_277, %c488], %370 {strides = array<i32>} : memref<1x512xf32, #tpu.memory_space<vmem>>, vector<1x8xf32>,
    %c0_278 = arith.constant 0 : index
    %c1984 = arith.constant 1984 : index
    %372 = vector.load %arg1[%c0_278, %c1984] : memref<1x2048xf32, #tpu.memory_space<vmem>>, vector<1x16xf32>
    %c0_279 = arith.constant 0 : index
    %c2000 = arith.constant 2000 : index
    %373 = vector.load %arg1[%c0_279, %c2000] : memref<1x2048xf32, #tpu.memory_space<vmem>>, vector<1x16xf32>
    %374 = arith.maximumf %372, %373 : vector<1x16xf32>
    %375 = vector.shape_cast %374 : vector<1x16xf32> to vector<1x8x2xf32>
    %cst_280 = arith.constant dense<0xFF800000> : vector<1x8xf32>
    %376 = vector.multi_reduction <maximumf>, %375, %cst_280 [2] : vector<1x8x2xf32> to vector<1x8xf32>
    %c0_281 = arith.constant 0 : index
    %c496_282 = arith.constant 496 : index
    %377 = vector.load %arg2[%c0_281, %c496_282] : memref<1x512xf32, #tpu.memory_space<vmem>>, vector<1x8xf32>
    tpu.vector_store %arg2[%c0_281, %c496_282], %376 {strides = array<i32>} : memref<1x512xf32, #tpu.memory_space<vmem>>, vector<1x8xf32>,
    %c0_283 = arith.constant 0 : index
    %c2016 = arith.constant 2016 : index
    %378 = vector.load %arg1[%c0_283, %c2016] : memref<1x2048xf32, #tpu.memory_space<vmem>>, vector<1x16xf32>
    %c0_284 = arith.constant 0 : index
    %c2032 = arith.constant 2032 : index
    %379 = vector.load %arg1[%c0_284, %c2032] : memref<1x2048xf32, #tpu.memory_space<vmem>>, vector<1x16xf32>
    %380 = arith.maximumf %378, %379 : vector<1x16xf32>
    %381 = vector.shape_cast %380 : vector<1x16xf32> to vector<1x8x2xf32>
    %cst_285 = arith.constant dense<0xFF800000> : vector<1x8xf32>
    %382 = vector.multi_reduction <maximumf>, %381, %cst_285 [2] : vector<1x8x2xf32> to vector<1x8xf32>
    %c0_286 = arith.constant 0 : index
    %c504 = arith.constant 504 : index
    %383 = vector.load %arg2[%c0_286, %c504] : memref<1x512xf32, #tpu.memory_space<vmem>>, vector<1x8xf32>
    tpu.vector_store %arg2[%c0_286, %c504], %382 {strides = array<i32>} : memref<1x512xf32, #tpu.memory_space<vmem>>, vector<1x8xf32>,
    return
  }
  func.func @transform_0(%arg0: i32) -> (i32, i32) {
    %c0_i32 = arith.constant 0 : i32
    %c0_i32_0 = arith.constant 0 : i32
    return %arg0, %c0_i32 : i32, i32
  }
  func.func @transform_1(%arg0: i32) -> (i32, i32) {
    %c0_i32 = arith.constant 0 : i32
    %c0_i32_0 = arith.constant 0 : i32
    return %arg0, %c0_i32 : i32, i32
  }
}

</mosaic_0001>

<bundles_post_ra>
// kernel: run.1
= control target key start
LH: loop header
LB: loop body
LE: loop exit
PB: predicated region body
PF: predicated region fallthrough
CT: control target
= control target key end

     0   :  { %s12318_s10 = smov 112   ;;  %s12319_s17 = smov 124   ;;  %vm79_vm0 = vcmask 15360   ;;  %s17189_s0 = inlined_call_operand.vmem [shape: f32[1,2048], index: 0, kind: input, shape index: {}]   ;;  %s17190_s1 = inlined_call_operand.vmem [shape: f32[1,512], index: 1, kind: output, shape index: {}]  }
   0x1   :  { %v8_v0 = vld [vmem:[%s17189_s0] sm:$0x1]  ;;  %v791_v4 = vld [vmem:[%s17189_s0 + $0x1] sm:$0x1]  ;;  %s12320_s18 = smov 126   ;;  %s12321_s19 = smov 122  }
   0x2   :  { %v194_v1 = vld [vmem:[%s17189_s0] sm:$0x1]  ;;  %10 = vrot.lane.b32.xlu0 %v8_v0, %s12318_s10  ;;  %s12322_s20 = smov 120   ;;  %s12323_s21 = smov 118   ;;  %v974_v15 = vld [vmem:[%s17189_s0 + $0x1] sm:$0x1] }
   0x3   :  { %196 = vrot.lane.b32.xlu1 %v194_v1, %s12318_s10  ;;  %v393_v2 = vld [vmem:[%s17189_s0] sm:$0x1]  ;;  %s12324_s22 = smov 116   ;;  %s12325_s23 = smov 114   ;;  %v1173_v42 = vld [vmem:[%s17189_s0 + $0x1] sm:$0x1] }
   0x4   :  { %v592_v3 = vld [vmem:[%s17189_s0] sm:$0x1]  ;;  %s12326_s24 = smov 96   ;;  %s12327_s25 = smov 32  }
   0x5   :  { %s12328_s26 = smov 64  }
   0x6   :  { %594 = vrot.lane.b32.xlu0 %v592_v3, %s12318_s10 }
   0x7   :  { %395 = vrot.lane.b32.xlu1 %v393_v2, %s12318_s10 }
   0xa   :  { %793 = vrot.lane.b32.xlu0 %v791_v4, %s12318_s10 }
  0x74   :  { %v11_v5 = vpop.permute.xlu0 %10 }
  0x75   :  { %v12361_v6 = vmax.f32 %v8_v0, %v11_v5  ;;  %v197_v7 = vpop.permute.xlu1 %196 }
  0x76   :  { %v199_v8 = vmax.f32 %v194_v1, %v197_v7 }
  0x77   :  { %17 = vrot.lane.b32.xlu1 %v12361_v6, %s12319_s17  ;;  %15 = vrot.lane.b32.xlu0 %v12361_v6, %s12320_s18 }
  0x78   :  { %v595_v11 = vpop.permute.xlu0 %594 }
  0x79   :  { %v396_v9 = vpop.permute.xlu1 %395  ;;  %v597_v12 = vmax.f32 %v592_v3, %v595_v11 }
  0x7a   :  { %v398_v10 = vmax.f32 %v393_v2, %v396_v9  ;;  %v12329_v2 = vmov 1966171168  }
  0x7b   :  { %19 = vrot.lane.b32.xlu1 %v12361_v6, %s12321_s19  ;;  %21 = vrot.lane.b32.xlu0 %v12361_v6, %s12322_s20  ;;  %v34_v3 = vunpack.c.l.s4 %v12329_v2 }
  0x7c   :  { %v794_v13 = vpop.permute.xlu0 %793 }
  0x7d   :  { %v12394_v14 = vmax.f32 %v791_v4, %v794_v13  ;;  %v17191_v4 = vlaneseq  ;;  %v35_v5 = vunpack.c.0.s8 %v34_v3 }
  0x7f   :  { %23 = vrot.lane.b32.xlu1 %v12361_v6, %s12323_s21  ;;  %25 = vrot.lane.b32.xlu0 %v12361_v6, %s12324_s22  ;;  %v12513_v7 = vshrl.u32 %v17191_v4, 7 }
  0x81   :  { %17300 = vst [vmem:[#allocation2_spill] sm:$0xff] %v12513_v7  ;;  %v12518_v9 = vsub.s32 %v35_v5, %v12513_v7 }
  0x83   :  { %27 = vrot.lane.b32.xlu1 %v12361_v6, %s12325_s23  ;;  %213 = vrot.lane.b32.xlu0 %v199_v8, %s12325_s23 }
  0x87   :  { %201 = vrot.lane.b32.xlu1 %v199_v8, %s12320_s18  ;;  %410 = vrot.lane.b32.xlu0 %v398_v10, %s12324_s22 }
  0x8b   :  { %203 = vrot.lane.b32.xlu1 %v199_v8, %s12319_s17  ;;  %599 = vrot.lane.b32.xlu0 %v597_v12, %s12320_s18 }
  0x8f   :  { %205 = vrot.lane.b32.xlu1 %v199_v8, %s12321_s19  ;;  %601 = vrot.lane.b32.xlu0 %v597_v12, %s12319_s17 }
  0x93   :  { %207 = vrot.lane.b32.xlu1 %v199_v8, %s12322_s20  ;;  %603 = vrot.lane.b32.xlu0 %v597_v12, %s12321_s19 }
  0x97   :  { %209 = vrot.lane.b32.xlu1 %v199_v8, %s12323_s21  ;;  %605 = vrot.lane.b32.xlu0 %v597_v12, %s12322_s20 }
  0x9b   :  { %211 = vrot.lane.b32.xlu1 %v199_v8, %s12324_s22  ;;  %607 = vrot.lane.b32.xlu0 %v597_v12, %s12323_s21 }
  0x9f   :  { %215 = vrot.lane.b32.xlu1 %v199_v8, %s12326_s24  ;;  %609 = vrot.lane.b32.xlu0 %v597_v12, %s12324_s22 }
  0xa3   :  { %400 = vrot.lane.b32.xlu1 %v398_v10, %s12320_s18  ;;  %613 = vrot.lane.b32.xlu0 %v597_v12, %s12327_s25 }
  0xa7   :  { %402 = vrot.lane.b32.xlu1 %v398_v10, %s12319_s17  ;;  %798 = vrot.lane.b32.xlu0 %v12394_v14, %s12320_s18 }
  0xab   :  { %404 = vrot.lane.b32.xlu1 %v398_v10, %s12321_s19  ;;  %800 = vrot.lane.b32.xlu0 %v12394_v14, %s12319_s17 }
  0xaf   :  { %406 = vrot.lane.b32.xlu1 %v398_v10, %s12322_s20  ;;  %802 = vrot.lane.b32.xlu0 %v12394_v14, %s12321_s19 }
  0xb3   :  { %408 = vrot.lane.b32.xlu1 %v398_v10, %s12323_s21  ;;  %804 = vrot.lane.b32.xlu0 %v12394_v14, %s12322_s20 }
  0xb7   :  { %412 = vrot.lane.b32.xlu1 %v398_v10, %s12325_s23  ;;  %806 = vrot.lane.b32.xlu0 %v12394_v14, %s12323_s21 }
  0xbb   :  { %414 = vrot.lane.b32.xlu1 %v398_v10, %s12328_s26  ;;  %808 = vrot.lane.b32.xlu0 %v12394_v14, %s12324_s22 }
  0xbf   :  { %611 = vrot.lane.b32.xlu1 %v597_v12, %s12325_s23  ;;  %810 = vrot.lane.b32.xlu0 %v12394_v14, %s12325_s23 }
  0xc3   :  { %976 = vrot.lane.b32.xlu1 %v974_v15, %s12318_s10 }
  0xe9   :  { %v12421_v16 = vpop.permute.xlu1 %17  ;;  %v12441_v35 = vpop.permute.xlu0 %15 }
  0xea   :  { %v29_v12 = vcombine.low %v12361_v6, %v12441_v35 }
  0xed   :  { %v12423_v17 = vpop.permute.xlu1 %19  ;;  %v12445_v38 = vpop.permute.xlu0 %21 }
  0xee   :  { %v30_v10 = vcombine.low %v12421_v16, %v12423_v17 }
  0xf1   :  { %v12425_v18 = vpop.permute.xlu1 %23  ;;  %v12449_v39 = vpop.permute.xlu0 %25 }
  0xf2   :  { %v31_v11 = vcombine.low %v12445_v38, %v12425_v18 }
  0xf5   :  { %v12427_v19 = vpop.permute.xlu1 %27  ;;  %v214_v40 = vpop.permute.xlu0 %213 }
  0xf6   :  { %v32_v8 = vcombine.low %v12449_v39, %v12427_v19  ;;  %v39_v19 = vrot.slane %v29_v12, %v12518_v9 }
  0xf8   :  { %v60_v13 = vrot.slane %v32_v8, %v12518_v9 }
  0xf9   :  { %v202_v20 = vpop.permute.xlu1 %201  ;;  %v411_v41 = vpop.permute.xlu0 %410 }
  0xfd   :  { %v204_v21 = vpop.permute.xlu1 %203  ;;  %v600_v43 = vpop.permute.xlu0 %599 }
 0x101   :  { %v206_v22 = vpop.permute.xlu1 %205  ;;  %v602_v44 = vpop.permute.xlu0 %601 }
 0x105   :  { %v208_v23 = vpop.permute.xlu1 %207  ;;  %v604_v45 = vpop.permute.xlu0 %603 }
 0x109   :  { %v210_v24 = vpop.permute.xlu1 %209  ;;  %v606_v46 = vpop.permute.xlu0 %605 }
 0x10d   :  { %v12429_v25 = vpop.permute.xlu1 %211  ;;  %v608_v47 = vpop.permute.xlu0 %607 }
 0x111   :  { %v12431_v26 = vpop.permute.xlu1 %215  ;;  %v610_v48 = vpop.permute.xlu0 %609 }
 0x115   :  { %v401_v27 = vpop.permute.xlu1 %400  ;;  %v12472_v49 = vpop.permute.xlu0 %613 }
 0x119   :  { %v403_v28 = vpop.permute.xlu1 %402  ;;  %v12474_v50 = vpop.permute.xlu0 %798 }
 0x11d   :  { %v405_v29 = vpop.permute.xlu1 %404  ;;  %v12476_v51 = vpop.permute.xlu0 %800 }
 0x121   :  { %v407_v30 = vpop.permute.xlu1 %406  ;;  %v12478_v52 = vpop.permute.xlu0 %802 }
 0x125   :  { %v12433_v31 = vpop.permute.xlu1 %408  ;;  %v12480_v53 = vpop.permute.xlu0 %804 }
 0x129   :  { %v12435_v32 = vpop.permute.xlu1 %412  ;;  %v12482_v54 = vpop.permute.xlu0 %806 }
 0x12d   :  { %v12437_v33 = vpop.permute.xlu1 %414  ;;  %v12484_v55 = vpop.permute.xlu0 %808 }
 0x131   :  { %v12439_v34 = vpop.permute.xlu1 %611  ;;  %v12486_v56 = vpop.permute.xlu0 %810 }
 0x135   :  { %v977_v36 = vpop.permute.xlu1 %976 }
 0x136   :  { %v979_v37 = vmax.f32 %v974_v15, %v977_v36  ;;  %v46_v15 = vrot.slane %v30_v10, %v12518_v9 }
 0x138   :  { %991 = vrot.lane.b32.xlu1 %v979_v37, %s12324_s22  ;;  %981 = vrot.lane.b32.xlu0 %v979_v37, %s12320_s18 }
 0x13c   :  { %995 = vrot.lane.b32.xlu1 %v979_v37, %s12326_s24  ;;  %983 = vrot.lane.b32.xlu0 %v979_v37, %s12319_s17 }
 0x140   :  { %217 = vrot.lane.b32.xlu1 %v202_v20, %s12326_s24  ;;  %985 = vrot.lane.b32.xlu0 %v979_v37, %s12321_s19  ;;  %v53_v20 = vrot.slane %v31_v11, %v12518_v9 }
 0x144   :  { %219 = vrot.lane.b32.xlu1 %v204_v21, %s12326_s24  ;;  %987 = vrot.lane.b32.xlu0 %v979_v37, %s12322_s20  ;;  %v62_v21 = vcombine.low %v53_v20, %v60_v13 }
 0x148   :  { %221 = vrot.lane.b32.xlu1 %v206_v22, %s12326_s24  ;;  %989 = vrot.lane.b32.xlu0 %v979_v37, %s12323_s21  ;;  %v61_v22 = vcombine.low %v39_v19, %v46_v15 }
 0x14a   :  { %v69_v16 = vrot.slane %v61_v22, %v12518_v9 }
 0x14c   :  { %223 = vrot.lane.b32.xlu1 %v208_v23, %s12326_s24  ;;  %993 = vrot.lane.b32.xlu0 %v979_v37, %s12325_s23  ;;  %v76_v23 = vrot.slane %v62_v21, %v12518_v9 }
 0x14e   :  { %v77_v17 = vcombine.low %v69_v16, %v76_v23 }
 0x150   :  { %225 = vrot.lane.b32.xlu1 %v210_v24, %s12326_s24  ;;  %1175 = vrot.lane.b32.xlu0 %v1173_v42, %s12318_s10  ;;  %v80_v18 = vsel %vm79_vm0, %v77_v17, -inf }
 0x154   :  { %229 = vrot.lane.b32.xlu1 %v214_v40, %s12326_s24 }
 0x158   :  { %416 = vrot.lane.b32.xlu1 %v401_v27, %s12328_s26 }
 0x15c   :  { %418 = vrot.lane.b32.xlu1 %v403_v28, %s12328_s26 }
 0x160   :  { %420 = vrot.lane.b32.xlu1 %v405_v29, %s12328_s26 }
 0x164   :  { %422 = vrot.lane.b32.xlu1 %v407_v30, %s12328_s26 }
 0x168   :  { %426 = vrot.lane.b32.xlu1 %v411_v41, %s12328_s26 }
 0x16c   :  { %621 = vrot.lane.b32.xlu1 %v606_v46, %s12327_s25 }
 0x170   :  { %625 = vrot.lane.b32.xlu1 %v610_v48, %s12327_s25 }
 0x1aa   :  { %v982_v57 = vpop.permute.xlu0 %981  ;;  %v992_v61 = vpop.permute.xlu1 %991 }
 0x1ae   :  { %v984_v58 = vpop.permute.xlu0 %983  ;;  %v12571_v46 = vpop.permute.xlu1 %995 }
 0x1af   :  { %999 = vrot.lane.b32.xlu1 %v984_v58, %s12326_s24 }
 0x1b2   :  { %v986_v59 = vpop.permute.xlu0 %985 }
 0x1b6   :  { %v988_v60 = vpop.permute.xlu0 %987 }
 0x1b7   :  { %1003 = vrot.lane.b32.xlu1 %v988_v60, %s12326_s24 }
 0x1ba   :  { %v990_v62 = vpop.permute.xlu0 %989 }
 0x1bb   :  { %1007 = vrot.lane.b32.xlu1 %v992_v61, %s12326_s24 }
 0x1be   :  { %v994_v63 = vpop.permute.xlu0 %993 }
 0x1c2   :  { %v1176_v0 = vpop.permute.xlu0 %1175 }
 0x1c3   :  { %v1178_v1 = vmax.f32 %v1173_v42, %v1176_v0 }
 0x1c5   :  { %1194 = vrot.lane.b32.xlu1 %v1178_v1, %s12328_s26  ;;  %1180 = vrot.lane.b32.xlu0 %v1178_v1, %s12320_s18 }
 0x1c9   :  { %1182 = vrot.lane.b32.xlu0 %v1178_v1, %s12319_s17 }
 0x1cd   :  { %1184 = vrot.lane.b32.xlu0 %v1178_v1, %s12321_s19 }
 0x1d1   :  { %1186 = vrot.lane.b32.xlu0 %v1178_v1, %s12322_s20 }
 0x1d5   :  { %227 = vrot.lane.b32.xlu0 %v12429_v25, %s12326_s24 }
 0x1d9   :  { %424 = vrot.lane.b32.xlu0 %v12433_v31, %s12328_s26 }
 0x1dd   :  { %428 = vrot.lane.b32.xlu0 %v12435_v32, %s12328_s26 }
 0x1e1   :  { %615 = vrot.lane.b32.xlu0 %v600_v43, %s12327_s25 }
 0x1e5   :  { %617 = vrot.lane.b32.xlu0 %v602_v44, %s12327_s25 }
 0x1e9   :  { %619 = vrot.lane.b32.xlu0 %v604_v45, %s12327_s25  ;;  %v1372_v45 = vld [vmem:[%s17189_s0 + $0x1] sm:$0x1] }
 0x1ed   :  { %623 = vrot.lane.b32.xlu0 %v608_v47, %s12327_s25  ;;  %v218_v47 = vpop.permute.xlu1 %217 }
 0x1f1   :  { %627 = vrot.lane.b32.xlu0 %v12439_v34, %s12327_s25  ;;  %v220_v48 = vpop.permute.xlu1 %219 }
 0x1f5   :  { %997 = vrot.lane.b32.xlu0 %v982_v57, %s12326_s24  ;;  %v222_v57 = vpop.permute.xlu1 %221 }
 0x1f6   :  { %v232_v17 = vcombine.low %v220_v48, %v222_v57 }
 0x1f9   :  { %1001 = vrot.lane.b32.xlu0 %v986_v59, %s12326_s24  ;;  %v224_v58 = vpop.permute.xlu1 %223 }
 0x1fd   :  { %1005 = vrot.lane.b32.xlu0 %v990_v62, %s12326_s24  ;;  %v226_v59 = vpop.permute.xlu1 %225 }
 0x201   :  { %1009 = vrot.lane.b32.xlu0 %v994_v63, %s12326_s24  ;;  %v230_v60 = vpop.permute.xlu1 %229 }
 0x205   :  { %v12573_v61 = vpop.permute.xlu1 %416 }
 0x209   :  { %v12575_v62 = vpop.permute.xlu1 %418 }
 0x20d   :  { %v12577_v63 = vpop.permute.xlu1 %420 }
 0x211   :  { %v12579_v0 = vpop.permute.xlu1 %422 }
 0x220   :  { %81 = vmax.xlane.f32.xlu0 %v80_v18  ;;  %v233_v18 = vcombine.low %v224_v58, %v226_v59 }
 0x236   :  { %1188 = vrot.lane.b32.xlu0 %v1178_v1, %s12323_s21 }
 0x237   :  { %v1181_v6 = vpop.permute.xlu0 %1180 }
 0x23a   :  { %1190 = vrot.lane.b32.xlu0 %v1178_v1, %s12324_s22 }
 0x23b   :  { %v1183_v24 = vpop.permute.xlu0 %1182 }
 0x23e   :  { %1192 = vrot.lane.b32.xlu0 %v1178_v1, %s12325_s23  ;;  %v12581_v1 = vpop.permute.xlu1 %426 }
 0x23f   :  { %v1185_v25 = vpop.permute.xlu0 %1184 }
 0x242   :  { %1196 = vrot.lane.b32.xlu0 %v1181_v6, %s12328_s26  ;;  %v12583_v2 = vpop.permute.xlu1 %621 }
 0x243   :  { %v1187_v27 = vpop.permute.xlu0 %1186 }
 0x246   :  { %1198 = vrot.lane.b32.xlu0 %v1183_v24, %s12328_s26  ;;  %v12585_v3 = vpop.permute.xlu1 %625  ;;  %v231_v24 = vcombine.low %v12431_v26, %v218_v47 }
 0x247   :  { %v228_v28 = vpop.permute.xlu0 %227 }
 0x248   :  { %v234_v16 = vcombine.low %v228_v28, %v230_v60  ;;  %v241_v28 = vrot.slane %v231_v24, %v12518_v9  ;;  %v812_v24 = vcombine.low %v12394_v14, %v12474_v50 }
 0x24a   :  { %1200 = vrot.lane.b32.xlu0 %v1185_v25, %s12328_s26  ;;  %v12587_v5 = vpop.permute.xlu1 %999  ;;  %v262_v25 = vrot.slane %v234_v16, %v12518_v9 }
 0x24b   :  { %v12540_v29 = vpop.permute.xlu0 %424 }
 0x24e   :  { %1202 = vrot.lane.b32.xlu0 %v1187_v27, %s12328_s26  ;;  %v12589_v8 = vpop.permute.xlu1 %1003 }
 0x24f   :  { %v12542_v30 = vpop.permute.xlu0 %428 }
 0x252   :  { %v12591_v10 = vpop.permute.xlu1 %1007 }
 0x253   :  { %v12544_v31 = vpop.permute.xlu0 %615 }
 0x256   :  { %v1195_v11 = vpop.permute.xlu1 %1194 }
 0x257   :  { %v12546_v32 = vpop.permute.xlu0 %617 }
 0x25b   :  { %v12548_v34 = vpop.permute.xlu0 %619 }
 0x25f   :  { %v12550_v35 = vpop.permute.xlu0 %623 }
 0x263   :  { %v12552_v36 = vpop.permute.xlu0 %627 }
 0x267   :  { %v12554_v37 = vpop.permute.xlu0 %997 }
 0x26b   :  { %v12556_v38 = vpop.permute.xlu0 %1001 }
 0x26f   :  { %v12558_v39 = vpop.permute.xlu0 %1005 }
 0x273   :  { %v12560_v40 = vpop.permute.xlu0 %1009 }
 0x2a9   :  { %v12562_v41 = vpop.xlane.xlu0 %81 }
 0x2ad   :  { %v1189_v42 = vpop.permute.xlu0 %1188 }
 0x2ae   :  { %1204 = vrot.lane.b32.xlu1 %v1189_v42, %s12328_s26  ;;  %v248_v42 = vrot.slane %v232_v17, %v12518_v9 }
 0x2b0   :  { %v263_v59 = vcombine.low %v241_v28, %v248_v42 }
 0x2b1   :  { %v1191_v43 = vpop.permute.xlu0 %1190 }
 0x2b2   :  { %1206 = vrot.lane.b32.xlu0 %v1191_v43, %s12328_s26  ;;  %v255_v43 = vrot.slane %v233_v18, %v12518_v9  ;;  %v814_v18 = vcombine.low %v12480_v53, %v12482_v54 }
 0x2b4   :  { %v264_v48 = vcombine.low %v255_v43, %v262_v25  ;;  %v836_v25 = vrot.slane %v814_v18, %v12518_v9  ;;  %v822_v43 = vrot.slane %v812_v24, %v12518_v9 }
 0x2b5   :  { %v1193_v44 = vpop.permute.xlu0 %1192 }
 0x2b6   :  { %1208 = vrot.lane.b32.xlu1 %v1193_v44, %s12328_s26 }
 0x2b9   :  { %v1197_v13 = vpop.permute.xlu0 %1196 }
 0x2ba   :  { %1374 = vrot.lane.b32.xlu1 %v1372_v45, %s12318_s10  ;;  %v1210_v57 = vcombine.low %v1195_v11, %v1197_v13 }
 0x2bc   :  { %v1220_v60 = vrot.slane %v1210_v57, %v12518_v9 }
 0x2bd   :  { %v1199_v20 = vpop.permute.xlu0 %1198 }
 0x2c1   :  { %v1201_v22 = vpop.permute.xlu0 %1200 }
 0x2c2   :  { %v1211_v44 = vcombine.low %v1199_v20, %v1201_v22 }
 0x2c4   :  { %v1227_v26 = vrot.slane %v1211_v44, %v12518_v9 }
 0x2c5   :  { %v1203_v23 = vpop.permute.xlu0 %1202 }
 0x2c6   :  { %v1242_v20 = vcombine.low %v1220_v60, %v1227_v26  ;;  %v1571_v26 = vld [vmem:[%s17189_s0 + $0x2] sm:$0x1] }
 0x2c8   :  { %v1250_v22 = vrot.slane %v1242_v20, %v12518_v9 }
 0x320   :  { %v1205_v12 = vpop.permute.xlu1 %1204 }
 0x324   :  { %v1207_v6 = vpop.permute.xlu0 %1206 }
 0x328   :  { %v1209_v15 = vpop.permute.xlu1 %1208 }
 0x329   :  { %v1213_v27 = vcombine.low %v1207_v6, %v1209_v15  ;;  %v813_v6 = vcombine.low %v12476_v51, %v12478_v52 }
 0x32b   :  { %v1241_v58 = vrot.slane %v1213_v27, %v12518_v9  ;;  %v829_v42 = vrot.slane %v813_v6, %v12518_v9 }
 0x32c   :  { %v1375_v19 = vpop.permute.xlu1 %1374 }
 0x32d   :  { %v1377_v21 = vmax.f32 %v1372_v45, %v1375_v19  ;;  %v1212_v45 = vcombine.low %v1203_v23, %v1205_v12  ;;  %v278_v12 = vrot.slane %v264_v48, %v12518_v9  ;;  %v271_v19 = vrot.slane %v263_v59, %v12518_v9 }
 0x32e   :  { %v433_v48 = vcombine.low %v12581_v1, %v12542_v30  ;;  %v432_v59 = vcombine.low %v12579_v0, %v12540_v29  ;;  %v632_v30 = vcombine.low %v12585_v3, %v12552_v36  ;;  %v630_v29 = vcombine.low %v12546_v32, %v12548_v34 }
 0x32f   :  { %1391 = vrot.lane.b32.xlu0 %v1377_v21, %s12325_s23  ;;  %1379 = vrot.lane.b32.xlu1 %v1377_v21, %s12320_s18  ;;  %v1234_v47 = vrot.slane %v1212_v45, %v12518_v9  ;;  %v279_v11 = vcombine.low %v271_v19, %v278_v12  ;;  %v844_v45 = vcombine.low %v822_v43, %v829_v42 }
 0x330   :  { %v461_v60 = vrot.slane %v433_v48, %v12518_v9  ;;  %v660_v36 = vrot.slane %v632_v30, %v12518_v9  ;;  %v1014_v3 = vcombine.low %v12591_v10, %v12560_v40  ;;  %v646_v12 = vrot.slane %v630_v29, %v12518_v9 }
 0x331   :  { %v1243_v15 = vcombine.low %v1234_v47, %v1241_v58  ;;  %v281_v23 = vsel %vm79_vm0, %v279_v11, -inf  ;;  %v852_v54 = vrot.slane %v844_v45, %v12518_v9  ;;  %v431_v58 = vcombine.low %v12575_v62, %v12577_v63 }
 0x332   :  { %v430_v47 = vcombine.low %v12437_v33, %v12573_v61  ;;  %v454_v62 = vrot.slane %v432_v59, %v12518_v9  ;;  %v631_v63 = vcombine.low %v12583_v2, %v12550_v35  ;;  %v629_v33 = vcombine.low %v12472_v49, %v12544_v31 }
 0x333   :  { %1381 = vrot.lane.b32.xlu1 %v1377_v21, %s12319_s17  ;;  %v1257_v13 = vrot.slane %v1243_v15, %v12518_v9  ;;  %v447_v1 = vrot.slane %v431_v58, %v12518_v9  ;;  %v1012_v32 = vcombine.low %v12587_v5, %v12556_v38  ;;  %v1013_v34 = vcombine.low %v12589_v8, %v12558_v39 }
 0x334   :  { %v440_v0 = vrot.slane %v430_v47, %v12518_v9  ;;  %v463_v61 = vcombine.low %v454_v62, %v461_v60  ;;  %v653_v20 = vrot.slane %v631_v63, %v12518_v9  ;;  %v639_v35 = vrot.slane %v629_v33, %v12518_v9 }
 0x335   :  { %v1258_v16 = vcombine.low %v1250_v22, %v1257_v13  ;;  %v1011_v31 = vcombine.low %v12571_v46, %v12554_v37  ;;  %v1042_v2 = vrot.slane %v1014_v3, %v12518_v9  ;;  %v1028_v19 = vrot.slane %v1012_v32, %v12518_v9 }
 0x336   :  { %v462_v15 = vcombine.low %v440_v0, %v447_v1  ;;  %v662_v49 = vcombine.low %v653_v20, %v660_v36  ;;  %v477_v40 = vrot.slane %v463_v61, %v12518_v9  ;;  %v661_v10 = vcombine.low %v639_v35, %v646_v12 }
 0x337   :  { %1383 = vrot.lane.b32.xlu1 %v1377_v21, %s12321_s19  ;;  %v1260_v17 = vsel %vm79_vm0, %v1258_v16, -inf  ;;  %v1035_v11 = vrot.slane %v1013_v34, %v12518_v9  ;;  %v1021_v5 = vrot.slane %v1011_v31, %v12518_v9 }
 0x338   :  { %v470_v38 = vrot.slane %v462_v15, %v12518_v9  ;;  %v676_v13 = vrot.slane %v662_v49, %v12518_v9  ;;  %v669_v37 = vrot.slane %v661_v10, %v12518_v9 }
 0x339   :  { %v1044_v39 = vcombine.low %v1035_v11, %v1042_v2  ;;  %v1043_v22 = vcombine.low %v1021_v5, %v1028_v19 }
 0x33a   :  { %v478_v8 = vcombine.low %v470_v38, %v477_v40 }
 0x33b   :  { %1385 = vrot.lane.b32.xlu1 %v1377_v21, %s12322_s20  ;;  %v1058_v16 = vrot.slane %v1044_v39, %v12518_v9 }
 0x33c   :  { %v480_v46 = vsel %vm79_vm0, %v478_v8, -inf }
 0x33f   :  { %1387 = vrot.lane.b32.xlu1 %v1377_v21, %s12323_s21 }
 0x343   :  { %1389 = vrot.lane.b32.xlu1 %v1377_v21, %s12324_s22 }
 0x347   :  { %1393 = vrot.lane.b32.xlu1 %v1377_v21, %s12327_s25  ;;  %v815_v21 = vcombine.low %v12484_v55, %v12486_v56 }
 0x349   :  { %v843_v27 = vrot.slane %v815_v21, %v12518_v9 }
 0x34b   :  { %v845_v44 = vcombine.low %v836_v25, %v843_v27 }
 0x34d   :  { %v859_v53 = vrot.slane %v845_v44, %v12518_v9 }
 0x34e   :  { %282 = vmax.xlane.f32.xlu0 %v281_v23  ;;  %v677_v23 = vcombine.low %v669_v37, %v676_v13  ;;  %v1754_v37 = vld [vmem:[%s17189_s0 + $0x2] sm:$0x1] }
 0x34f   :  { %v860_v55 = vcombine.low %v852_v54, %v859_v53 }
 0x350   :  { %v679_v18 = vsel %vm79_vm0, %v677_v23, -inf }
 0x351   :  { %v862_v51 = vsel %vm79_vm0, %v860_v55, -inf }
 0x352   :  { %1261 = vmax.xlane.f32.xlu0 %v1260_v17  ;;  %v1051_v17 = vrot.slane %v1043_v22, %v12518_v9 }
 0x354   :  { %v1059_v21 = vcombine.low %v1051_v17, %v1058_v16 }
 0x356   :  { %v1061_v6 = vsel %vm79_vm0, %v1059_v21, -inf }
 0x36b   :  { %863 = vmax.xlane.f32.xlu1 %v862_v51 }
 0x3a1   :  { %v1380_v52 = vpop.permute.xlu1 %1379  ;;  %v1392_v57 = vpop.permute.xlu0 %1391 }
 0x3a2   :  { %1395 = vrot.lane.b32.xlu1 %v1380_v52, %s12327_s25 }
 0x3a5   :  { %v1382_v14 = vpop.permute.xlu1 %1381 }
 0x3a6   :  { %1397 = vrot.lane.b32.xlu1 %v1382_v14, %s12327_s25 }
 0x3a9   :  { %v1384_v50 = vpop.permute.xlu1 %1383 }
 0x3ad   :  { %v1386_v56 = vpop.permute.xlu1 %1385 }
 0x3b1   :  { %v1388_v28 = vpop.permute.xlu1 %1387 }
 0x3b2   :  { %1403 = vrot.lane.b32.xlu0 %v1388_v28, %s12327_s25 }
 0x3b5   :  { %v1390_v24 = vpop.permute.xlu1 %1389 }
 0x3b6   :  { %1407 = vrot.lane.b32.xlu0 %v1392_v57, %s12327_s25 }
 0x3b9   :  { %v1394_v53 = vpop.permute.xlu1 %1393 }
 0x3ba   :  { %1573 = vrot.lane.b32.xlu0 %v1571_v26, %s12318_s10 }
 0x3ca   :  { %481 = vmax.xlane.f32.xlu1 %v480_v46 }
 0x3ce   :  { %680 = vmax.xlane.f32.xlu1 %v679_v18 }
 0x3d2   :  { %1062 = vmax.xlane.f32.xlu1 %v1061_v6 }
 0x3d7   :  { %v12687_v25 = vpop.xlane.xlu0 %282 }
 0x3db   :  { %v12689_v27 = vpop.xlane.xlu0 %1261 }
 0x3e3   :  { %1399 = vrot.lane.b32.xlu1 %v1384_v50, %s12327_s25 }
 0x3e7   :  { %1401 = vrot.lane.b32.xlu1 %v1386_v56, %s12327_s25 }
 0x3eb   :  { %1405 = vrot.lane.b32.xlu1 %v1390_v24, %s12327_s25 }
 0x3f4   :  { %v12697_v54 = vpop.xlane.xlu1 %863 }
 0x414   :  { %v1396_v55 = vpop.permute.xlu1 %1395 }
 0x415   :  { %v1409_v57 = vcombine.low %v1394_v53, %v1396_v55 }
 0x417   :  { %v1419_v47 = vrot.slane %v1409_v57, %v12518_v9 }
 0x418   :  { %v1398_v51 = vpop.permute.xlu1 %1397 }
 0x424   :  { %v1404_v42 = vpop.permute.xlu0 %1403 }
 0x428   :  { %v1408_v43 = vpop.permute.xlu0 %1407 }
 0x42c   :  { %v1574_v44 = vpop.permute.xlu0 %1573 }
 0x42d   :  { %v1576_v45 = vmax.f32 %v1571_v26, %v1574_v44 }
 0x42f   :  { %1578 = vrot.lane.b32.xlu0 %v1576_v45, %s12320_s18 }
 0x433   :  { %1580 = vrot.lane.b32.xlu0 %v1576_v45, %s12319_s17 }
 0x437   :  { %1582 = vrot.lane.b32.xlu0 %v1576_v45, %s12321_s19 }
 0x43b   :  { %1584 = vrot.lane.b32.xlu0 %v1576_v45, %s12322_s20 }
 0x43f   :  { %1586 = vrot.lane.b32.xlu0 %v1576_v45, %s12323_s21 }
 0x443   :  { %1588 = vrot.lane.b32.xlu0 %v1576_v45, %s12324_s22 }
 0x447   :  { %1590 = vrot.lane.b32.xlu0 %v1576_v45, %s12325_s23 }
 0x453   :  { %v12700_v52 = vpop.xlane.xlu1 %481 }
 0x457   :  { %v12702_v14 = vpop.xlane.xlu1 %680 }
 0x45b   :  { %v12704_v50 = vpop.xlane.xlu1 %1062 }
 0x45f   :  { %v1400_v56 = vpop.permute.xlu1 %1399 }
 0x460   :  { %v1410_v28 = vcombine.low %v1398_v51, %v1400_v56 }
 0x462   :  { %v1426_v58 = vrot.slane %v1410_v28, %v12518_v9 }
 0x463   :  { %v1402_v48 = vpop.permute.xlu1 %1401 }
 0x464   :  { %v1411_v59 = vcombine.low %v1402_v48, %v1404_v42  ;;  %v1441_v30 = vcombine.low %v1419_v47, %v1426_v58 }
 0x466   :  { %v1433_v1 = vrot.slane %v1411_v59, %v12518_v9  ;;  %v1449_v63 = vrot.slane %v1441_v30, %v12518_v9 }
 0x467   :  { %v1406_v26 = vpop.permute.xlu1 %1405 }
 0x468   :  { %v1412_v60 = vcombine.low %v1406_v26, %v1408_v43 }
 0x46a   :  { %v1440_v62 = vrot.slane %v1412_v60, %v12518_v9 }
 0x46c   :  { %v1442_v29 = vcombine.low %v1433_v1, %v1440_v62 }
 0x46e   :  { %v1456_v0 = vrot.slane %v1442_v29, %v12518_v9 }
 0x470   :  { %v1457_v33 = vcombine.low %v1449_v63, %v1456_v0 }
 0x472   :  { %v1459_v61 = vsel %vm79_vm0, %v1457_v33, -inf }
 0x473   :  { %1460 = vmax.xlane.f32.xlu1 %v1459_v61 }
 0x4a1   :  { %v1579_v36 = vpop.permute.xlu0 %1578 }
 0x4a2   :  { %v1592_v35 = vcombine.low %v1576_v45, %v1579_v36  ;;  %v1953_v45 = vld [vmem:[%s17189_s0 + $0x2] sm:$0x1] }
 0x4a4   :  { %v1602_v40 = vrot.slane %v1592_v35, %v12518_v9 }
 0x4a5   :  { %v1581_v3 = vpop.permute.xlu0 %1580 }
 0x4a9   :  { %v1583_v15 = vpop.permute.xlu0 %1582 }
 0x4aa   :  { %v1593_v32 = vcombine.low %v1581_v3, %v1583_v15 }
 0x4ac   :  { %v1609_v49 = vrot.slane %v1593_v32, %v12518_v9 }
 0x4ad   :  { %v1585_v12 = vpop.permute.xlu0 %1584 }
 0x4ae   :  { %v1624_v19 = vcombine.low %v1602_v40, %v1609_v49 }
 0x4b0   :  { %v1632_v39 = vrot.slane %v1624_v19, %v12518_v9 }
 0x4b1   :  { %v1587_v20 = vpop.permute.xlu0 %1586 }
 0x4b2   :  { %v1594_v31 = vcombine.low %v1585_v12, %v1587_v20 }
 0x4b4   :  { %v1616_v11 = vrot.slane %v1594_v31, %v12518_v9 }
 0x4b5   :  { %v1589_v34 = vpop.permute.xlu0 %1588 }
 0x4b9   :  { %v1591_v2 = vpop.permute.xlu0 %1590 }
 0x4ba   :  { %v1595_v10 = vcombine.low %v1589_v34, %v1591_v2 }
 0x4bc   :  { %v1623_v38 = vrot.slane %v1595_v10, %v12518_v9  ;;  %v2152_v10 = vld [vmem:[%s17189_s0 + $0x2] sm:$0x1] }
 0x4be   :  { %v1625_v5 = vcombine.low %v1616_v11, %v1623_v38 }
 0x4c0   :  { %v1639_v8 = vrot.slane %v1625_v5, %v12518_v9 }
 0x4c2   :  { %v1640_v13 = vcombine.low %v1632_v39, %v1639_v8 }
 0x4c4   :  { %v1642_v22 = vsel %vm79_vm0, %v1640_v13, -inf }
 0x4c5   :  { %1643 = vmax.xlane.f32.xlu1 %v1642_v22 }
 0x4d6   :  { %1756 = vrot.lane.b32.xlu1 %v1754_v37, %s12318_s10 }
 0x4fc   :  { %v12724_v46 = vpop.xlane.xlu1 %1460 }
 0x54e   :  { %v12726_v23 = vpop.xlane.xlu1 %1643 }
 0x552   :  { %v1757_v16 = vpop.permute.xlu1 %1756 }
 0x553   :  { %v1759_v17 = vmax.f32 %v1754_v37, %v1757_v16 }
 0x555   :  { %1769 = vrot.lane.b32.xlu1 %v1759_v17, %s12323_s21  ;;  %1761 = vrot.lane.b32.xlu0 %v1759_v17, %s12320_s18 }
 0x559   :  { %1773 = vrot.lane.b32.xlu1 %v1759_v17, %s12325_s23  ;;  %1763 = vrot.lane.b32.xlu0 %v1759_v17, %s12319_s17 }
 0x55d   :  { %1765 = vrot.lane.b32.xlu0 %v1759_v17, %s12321_s19 }
 0x561   :  { %1767 = vrot.lane.b32.xlu0 %v1759_v17, %s12322_s20 }
 0x565   :  { %1771 = vrot.lane.b32.xlu0 %v1759_v17, %s12324_s22 }
 0x569   :  { %1775 = vrot.lane.b32.xlu0 %v1759_v17, %s12326_s24 }
 0x5c7   :  { %v1762_v18 = vpop.permute.xlu0 %1761  ;;  %v1770_v24 = vpop.permute.xlu1 %1769 }
 0x5c8   :  { %1777 = vrot.lane.b32.xlu1 %v1762_v18, %s12326_s24 }
 0x5cb   :  { %v1764_v21 = vpop.permute.xlu0 %1763  ;;  %v1774_v43 = vpop.permute.xlu1 %1773 }
 0x5cc   :  { %1779 = vrot.lane.b32.xlu0 %v1764_v21, %s12326_s24 }
 0x5cf   :  { %v1766_v6 = vpop.permute.xlu0 %1765 }
 0x5d0   :  { %1781 = vrot.lane.b32.xlu1 %v1766_v6, %s12326_s24 }
 0x5d3   :  { %v1768_v42 = vpop.permute.xlu0 %1767 }
 0x5d4   :  { %1785 = vrot.lane.b32.xlu1 %v1770_v24, %s12326_s24  ;;  %1783 = vrot.lane.b32.xlu0 %v1768_v42, %s12326_s24 }
 0x5d7   :  { %v1772_v44 = vpop.permute.xlu0 %1771 }
 0x5d8   :  { %1789 = vrot.lane.b32.xlu1 %v1774_v43, %s12326_s24  ;;  %1787 = vrot.lane.b32.xlu0 %v1772_v44, %s12326_s24 }
 0x5db   :  { %v1776_v53 = vpop.permute.xlu0 %1775 }
 0x5dc   :  { %1955 = vrot.lane.b32.xlu1 %v1953_v45, %s12318_s10 }
 0x63a   :  { %v1778_v55 = vpop.permute.xlu1 %1777 }
 0x63b   :  { %v1791_v58 = vcombine.low %v1776_v53, %v1778_v55 }
 0x63d   :  { %v1801_v30 = vrot.slane %v1791_v58, %v12518_v9 }
 0x63e   :  { %v1780_v51 = vpop.permute.xlu0 %1779 }
 0x642   :  { %v1782_v56 = vpop.permute.xlu1 %1781 }
 0x643   :  { %v1792_v28 = vcombine.low %v1780_v51, %v1782_v56 }
 0x645   :  { %v1808_v59 = vrot.slane %v1792_v28, %v12518_v9 }
 0x646   :  { %v1786_v48 = vpop.permute.xlu1 %1785  ;;  %v1784_v57 = vpop.permute.xlu0 %1783 }
 0x647   :  { %v1793_v26 = vcombine.low %v1784_v57, %v1786_v48  ;;  %v1823_v62 = vcombine.low %v1801_v30, %v1808_v59  ;;  %v2351_v30 = vld [vmem:[%s17189_s0 + $0x3] sm:$0x1] }
 0x649   :  { %v1815_v29 = vrot.slane %v1793_v26, %v12518_v9  ;;  %v1831_v36 = vrot.slane %v1823_v62, %v12518_v9 }
 0x64a   :  { %v1790_v47 = vpop.permute.xlu1 %1789  ;;  %v1788_v60 = vpop.permute.xlu0 %1787 }
 0x64b   :  { %v1794_v1 = vcombine.low %v1788_v60, %v1790_v47 }
 0x64d   :  { %v1822_v63 = vrot.slane %v1794_v1, %v12518_v9 }
 0x64e   :  { %v1956_v0 = vpop.permute.xlu1 %1955 }
 0x64f   :  { %v1824_v33 = vcombine.low %v1815_v29, %v1822_v63  ;;  %v1958_v61 = vmax.f32 %v1953_v45, %v1956_v0 }
 0x651   :  { %1960 = vrot.lane.b32.xlu1 %v1958_v61, %s12320_s18  ;;  %v1838_v3 = vrot.slane %v1824_v33, %v12518_v9 }
 0x653   :  { %v1839_v15 = vcombine.low %v1831_v36, %v1838_v3 }
 0x655   :  { %1962 = vrot.lane.b32.xlu1 %v1958_v61, %s12319_s17  ;;  %v1841_v12 = vsel %vm79_vm0, %v1839_v15, -inf }
 0x656   :  { %1842 = vmax.xlane.f32.xlu0 %v1841_v12 }
 0x659   :  { %1964 = vrot.lane.b32.xlu1 %v1958_v61, %s12321_s19 }
 0x65d   :  { %1966 = vrot.lane.b32.xlu1 %v1958_v61, %s12322_s20 }
 0x661   :  { %1968 = vrot.lane.b32.xlu1 %v1958_v61, %s12323_s21 }
 0x665   :  { %1970 = vrot.lane.b32.xlu1 %v1958_v61, %s12324_s22 }
 0x669   :  { %1974 = vrot.lane.b32.xlu1 %v1958_v61, %s12328_s26 }
 0x66c   :  { %1972 = vrot.lane.b32.xlu0 %v1958_v61, %s12325_s23 }
 0x6c3   :  { %v1961_v20 = vpop.permute.xlu1 %1960 }
 0x6c4   :  { %1976 = vrot.lane.b32.xlu1 %v1961_v20, %s12328_s26 }
 0x6c7   :  { %v1963_v32 = vpop.permute.xlu1 %1962 }
 0x6c8   :  { %1978 = vrot.lane.b32.xlu1 %v1963_v32, %s12328_s26 }
 0x6cb   :  { %v1965_v34 = vpop.permute.xlu1 %1964 }
 0x6cc   :  { %1980 = vrot.lane.b32.xlu1 %v1965_v34, %s12328_s26 }
 0x6cf   :  { %v1967_v35 = vpop.permute.xlu1 %1966 }
 0x6d0   :  { %1982 = vrot.lane.b32.xlu1 %v1967_v35, %s12328_s26 }
 0x6d3   :  { %v1969_v49 = vpop.permute.xlu1 %1968 }
 0x6d4   :  { %1984 = vrot.lane.b32.xlu0 %v1969_v49, %s12328_s26 }
 0x6d7   :  { %v1971_v31 = vpop.permute.xlu1 %1970 }
 0x6d8   :  { %1986 = vrot.lane.b32.xlu1 %v1971_v31, %s12328_s26 }
 0x6db   :  { %v1975_v19 = vpop.permute.xlu1 %1974 }
 0x6df   :  { %v12768_v2 = vpop.xlane.xlu0 %1842 }
 0x6e3   :  { %v1973_v40 = vpop.permute.xlu0 %1972 }
 0x6e4   :  { %1988 = vrot.lane.b32.xlu0 %v1973_v40, %s12328_s26 }
 0x6e8   :  { %2154 = vrot.lane.b32.xlu0 %v2152_v10, %s12318_s10 }
 0x736   :  { %v1977_v11 = vpop.permute.xlu1 %1976 }
 0x737   :  { %v1990_v22 = vcombine.low %v1975_v19, %v1977_v11 }
 0x739   :  { %v2000_v21 = vrot.slane %v1990_v22, %v12518_v9 }
 0x73a   :  { %v1979_v38 = vpop.permute.xlu1 %1978 }
 0x73e   :  { %v1981_v5 = vpop.permute.xlu1 %1980 }
 0x73f   :  { %v1991_v39 = vcombine.low %v1979_v38, %v1981_v5 }
 0x741   :  { %v2007_v37 = vrot.slane %v1991_v39, %v12518_v9 }
 0x742   :  { %v1983_v8 = vpop.permute.xlu1 %1982 }
 0x743   :  { %v2022_v24 = vcombine.low %v2000_v21, %v2007_v37 }
 0x745   :  { %v2030_v55 = vrot.slane %v2022_v24, %v12518_v9 }
 0x746   :  { %v1985_v13 = vpop.permute.xlu0 %1984 }
 0x747   :  { %v1992_v16 = vcombine.low %v1983_v8, %v1985_v13  ;;  %v2534_v13 = vld [vmem:[%s17189_s0 + $0x3] sm:$0x1] }
 0x749   :  { %v2014_v42 = vrot.slane %v1992_v16, %v12518_v9 }
 0x74a   :  { %v1987_v17 = vpop.permute.xlu1 %1986 }
 0x756   :  { %v1989_v18 = vpop.permute.xlu0 %1988 }
 0x757   :  { %v1993_v6 = vcombine.low %v1987_v17, %v1989_v18 }
 0x759   :  { %v2021_v43 = vrot.slane %v1993_v6, %v12518_v9 }
 0x75a   :  { %v2155_v44 = vpop.permute.xlu0 %2154 }
 0x75b   :  { %v2023_v45 = vcombine.low %v2014_v42, %v2021_v43  ;;  %v2157_v53 = vmax.f32 %v2152_v10, %v2155_v44 }
 0x75d   :  { %2159 = vrot.lane.b32.xlu0 %v2157_v53, %s12320_s18  ;;  %v2037_v51 = vrot.slane %v2023_v45, %v12518_v9 }
 0x75f   :  { %v2038_v56 = vcombine.low %v2030_v55, %v2037_v51 }
 0x761   :  { %2161 = vrot.lane.b32.xlu0 %v2157_v53, %s12319_s17  ;;  %v2040_v28 = vsel %vm79_vm0, %v2038_v56, -inf }
 0x762   :  { %2041 = vmax.xlane.f32.xlu1 %v2040_v28 }
 0x765   :  { %2163 = vrot.lane.b32.xlu0 %v2157_v53, %s12321_s19 }
 0x769   :  { %2165 = vrot.lane.b32.xlu0 %v2157_v53, %s12322_s20 }
 0x76d   :  { %2167 = vrot.lane.b32.xlu0 %v2157_v53, %s12323_s21 }
 0x771   :  { %2169 = vrot.lane.b32.xlu0 %v2157_v53, %s12324_s22 }
 0x773   :  { %2173 = vrot.lane.b32.xlu1 %v2157_v53, %s12327_s25 }
 0x775   :  { %2171 = vrot.lane.b32.xlu0 %v2157_v53, %s12325_s23 }
 0x7cf   :  { %v2160_v48 = vpop.permute.xlu0 %2159 }
 0x7d0   :  { %2175 = vrot.lane.b32.xlu0 %v2160_v48, %s12327_s25 }
 0x7d3   :  { %v2162_v57 = vpop.permute.xlu0 %2161 }
 0x7d4   :  { %2177 = vrot.lane.b32.xlu0 %v2162_v57, %s12327_s25 }
 0x7d7   :  { %v2164_v58 = vpop.permute.xlu0 %2163 }
 0x7d8   :  { %2179 = vrot.lane.b32.xlu0 %v2164_v58, %s12327_s25 }
 0x7db   :  { %v2166_v59 = vpop.permute.xlu0 %2165 }
 0x7dc   :  { %2181 = vrot.lane.b32.xlu0 %v2166_v59, %s12327_s25 }
 0x7df   :  { %v2168_v26 = vpop.permute.xlu0 %2167 }
 0x7e0   :  { %2183 = vrot.lane.b32.xlu1 %v2168_v26, %s12327_s25 }
 0x7e3   :  { %v2170_v47 = vpop.permute.xlu0 %2169 }
 0x7e4   :  { %2185 = vrot.lane.b32.xlu0 %v2170_v47, %s12327_s25 }
 0x7e7   :  { %v2172_v60 = vpop.permute.xlu0 %2171 }
 0x7e8   :  { %2187 = vrot.lane.b32.xlu1 %v2172_v60, %s12327_s25 }
 0x7eb   :  { %v12801_v29 = vpop.xlane.xlu1 %2041 }
 0x7ec   :  { %2353 = vrot.lane.b32.xlu1 %v2351_v30, %s12318_s10 }
 0x7ef   :  { %v2174_v0 = vpop.permute.xlu1 %2173 }
 0x842   :  { %v2176_v1 = vpop.permute.xlu0 %2175 }
 0x843   :  { %v2189_v3 = vcombine.low %v2174_v0, %v2176_v1 }
 0x845   :  { %v2199_v34 = vrot.slane %v2189_v3, %v12518_v9 }
 0x846   :  { %v2178_v62 = vpop.permute.xlu0 %2177 }
 0x84a   :  { %v2180_v63 = vpop.permute.xlu0 %2179 }
 0x84b   :  { %v2190_v33 = vcombine.low %v2178_v62, %v2180_v63 }
 0x84d   :  { %v2206_v15 = vrot.slane %v2190_v33, %v12518_v9 }
 0x84e   :  { %v2182_v61 = vpop.permute.xlu0 %2181 }
 0x84f   :  { %v2221_v49 = vcombine.low %v2199_v34, %v2206_v15 }
 0x851   :  { %v2229_v38 = vrot.slane %v2221_v49, %v12518_v9 }
 0x852   :  { %v2184_v36 = vpop.permute.xlu1 %2183 }
 0x853   :  { %v2191_v12 = vcombine.low %v2182_v61, %v2184_v36  ;;  %v2733_v61 = vld [vmem:[%s17189_s0 + $0x3] sm:$0x1] }
 0x855   :  { %v2213_v31 = vrot.slane %v2191_v12, %v12518_v9 }
 0x856   :  { %v2186_v20 = vpop.permute.xlu0 %2185 }
 0x85a   :  { %v2188_v32 = vpop.permute.xlu1 %2187 }
 0x85b   :  { %v2192_v35 = vcombine.low %v2186_v20, %v2188_v32 }
 0x85d   :  { %v2220_v40 = vrot.slane %v2192_v35, %v12518_v9 }
 0x85e   :  { %v2354_v10 = vpop.permute.xlu1 %2353 }
 0x85f   :  { %v2222_v19 = vcombine.low %v2213_v31, %v2220_v40  ;;  %v2356_v11 = vmax.f32 %v2351_v30, %v2354_v10 }
 0x861   :  { %2358 = vrot.lane.b32.xlu1 %v2356_v11, %s12320_s18  ;;  %v2236_v5 = vrot.slane %v2222_v19, %v12518_v9 }
 0x863   :  { %v2237_v39 = vcombine.low %v2229_v38, %v2236_v5 }
 0x865   :  { %2360 = vrot.lane.b32.xlu1 %v2356_v11, %s12319_s17  ;;  %v2239_v8 = vsel %vm79_vm0, %v2237_v39, -inf }
 0x866   :  { %2240 = vmax.xlane.f32.xlu0 %v2239_v8 }
 0x869   :  { %2362 = vrot.lane.b32.xlu1 %v2356_v11, %s12321_s19 }
 0x86d   :  { %2364 = vrot.lane.b32.xlu1 %v2356_v11, %s12322_s20 }
 0x871   :  { %2366 = vrot.lane.b32.xlu1 %v2356_v11, %s12323_s21 }
 0x875   :  { %2368 = vrot.lane.b32.xlu1 %v2356_v11, %s12324_s22 }
 0x87c   :  { %2370 = vrot.lane.b32.xlu0 %v2356_v11, %s12325_s23 }
 0x880   :  { %2536 = vrot.lane.b32.xlu0 %v2534_v13, %s12318_s10 }
 0x8d3   :  { %v2359_v22 = vpop.permute.xlu1 %2358 }
 0x8d4   :  { %v2372_v24 = vcombine.low %v2356_v11, %v2359_v22 }
 0x8d6   :  { %v2382_v53 = vrot.slane %v2372_v24, %v12518_v9 }
 0x8d7   :  { %v2361_v37 = vpop.permute.xlu1 %2360 }
 0x8db   :  { %v2363_v16 = vpop.permute.xlu1 %2362 }
 0x8dc   :  { %v2373_v21 = vcombine.low %v2361_v37, %v2363_v16 }
 0x8de   :  { %v2389_v42 = vrot.slane %v2373_v21, %v12518_v9 }
 0x8df   :  { %v2365_v17 = vpop.permute.xlu1 %2364 }
 0x8e0   :  { %v2404_v51 = vcombine.low %v2382_v53, %v2389_v42 }
 0x8e2   :  { %v2412_v59 = vrot.slane %v2404_v51, %v12518_v9 }
 0x8e3   :  { %v2367_v18 = vpop.permute.xlu1 %2366 }
 0x8e4   :  { %v2374_v43 = vcombine.low %v2365_v17, %v2367_v18 }
 0x8e6   :  { %v2396_v56 = vrot.slane %v2374_v43, %v12518_v9 }
 0x8e7   :  { %v2369_v44 = vpop.permute.xlu1 %2368 }
 0x8ef   :  { %v12821_v6 = vpop.xlane.xlu0 %2240 }
 0x8f3   :  { %v2371_v45 = vpop.permute.xlu0 %2370 }
 0x8f4   :  { %v2375_v55 = vcombine.low %v2369_v44, %v2371_v45 }
 0x8f6   :  { %v2403_v28 = vrot.slane %v2375_v55, %v12518_v9 }
 0x8f7   :  { %v2537_v48 = vpop.permute.xlu0 %2536 }
 0x8f8   :  { %v2405_v57 = vcombine.low %v2396_v56, %v2403_v28  ;;  %v2539_v58 = vmax.f32 %v2534_v13, %v2537_v48  ;;  %v2932_v28 = vld [vmem:[%s17189_s0 + $0x3] sm:$0x1] }
 0x8fa   :  { %2541 = vrot.lane.b32.xlu0 %v2539_v58, %s12320_s18  ;;  %v2419_v26 = vrot.slane %v2405_v57, %v12518_v9 }
 0x8fc   :  { %v2420_v47 = vcombine.low %v2412_v59, %v2419_v26 }
 0x8fe   :  { %2543 = vrot.lane.b32.xlu0 %v2539_v58, %s12319_s17  ;;  %v2422_v60 = vsel %vm79_vm0, %v2420_v47, -inf }
 0x8ff   :  { %2423 = vmax.xlane.f32.xlu1 %v2422_v60 }
 0x902   :  { %2545 = vrot.lane.b32.xlu0 %v2539_v58, %s12321_s19 }
 0x906   :  { %2549 = vrot.lane.b32.xlu0 %v2539_v58, %s12323_s21 }
 0x90a   :  { %2551 = vrot.lane.b32.xlu0 %v2539_v58, %s12324_s22 }
 0x90e   :  { %2553 = vrot.lane.b32.xlu0 %v2539_v58, %s12325_s23 }
 0x910   :  { %2547 = vrot.lane.b32.xlu1 %v2539_v58, %s12322_s20 }
 0x912   :  { %2555 = vrot.lane.b32.xlu0 %v2539_v58, %s12326_s24 }
 0x96c   :  { %v2542_v30 = vpop.permute.xlu0 %2541 }
 0x96d   :  { %2557 = vrot.lane.b32.xlu1 %v2542_v30, %s12326_s24 }
 0x970   :  { %v2544_v1 = vpop.permute.xlu0 %2543 }
 0x971   :  { %2559 = vrot.lane.b32.xlu0 %v2544_v1, %s12326_s24 }
 0x974   :  { %v2546_v62 = vpop.permute.xlu0 %2545 }
 0x975   :  { %2561 = vrot.lane.b32.xlu1 %v2546_v62, %s12326_s24 }
 0x978   :  { %v2550_v63 = vpop.permute.xlu0 %2549 }
 0x979   :  { %2565 = vrot.lane.b32.xlu1 %v2550_v63, %s12326_s24 }
 0x97c   :  { %v2552_v0 = vpop.permute.xlu0 %2551 }
 0x980   :  { %v2554_v33 = vpop.permute.xlu0 %2553 }
 0x981   :  { %2569 = vrot.lane.b32.xlu1 %v2554_v33, %s12326_s24 }
 0x984   :  { %v2556_v34 = vpop.permute.xlu0 %2555 }
 0x985   :  { %2735 = vrot.lane.b32.xlu1 %v2733_v61, %s12318_s10 }
 0x988   :  { %v12847_v36 = vpop.xlane.xlu1 %2423 }
 0x98c   :  { %v2548_v3 = vpop.permute.xlu1 %2547 }
 0x98d   :  { %2563 = vrot.lane.b32.xlu0 %v2548_v3, %s12326_s24 }
 0x991   :  { %2567 = vrot.lane.b32.xlu0 %v2552_v0, %s12326_s24 }
 0x9df   :  { %v2558_v15 = vpop.permute.xlu1 %2557 }
 0x9e0   :  { %v2571_v19 = vcombine.low %v2556_v34, %v2558_v15 }
 0x9e2   :  { %v2581_v39 = vrot.slane %v2571_v19, %v12518_v9 }
 0x9e3   :  { %v2560_v31 = vpop.permute.xlu0 %2559 }
 0x9e7   :  { %v2562_v12 = vpop.permute.xlu1 %2561 }
 0x9e8   :  { %v2572_v40 = vcombine.low %v2560_v31, %v2562_v12 }
 0x9ea   :  { %v2588_v11 = vrot.slane %v2572_v40, %v12518_v9 }
 0x9eb   :  { %v2566_v20 = vpop.permute.xlu1 %2565 }
 0x9ec   :  { %v2603_v13 = vcombine.low %v2581_v39, %v2588_v11 }
 0x9ee   :  { %v2611_v17 = vrot.slane %v2603_v13, %v12518_v9  ;;  %v3131_v13 = vld [vmem:[%s17189_s0 + $0x4] sm:$0x1] }
 0x9f3   :  { %v2570_v32 = vpop.permute.xlu1 %2569 }
 0x9f7   :  { %v2736_v35 = vpop.permute.xlu1 %2735 }
 0x9f8   :  { %v2738_v49 = vmax.f32 %v2733_v61, %v2736_v35 }
 0x9fa   :  { %2740 = vrot.lane.b32.xlu1 %v2738_v49, %s12320_s18 }
 0x9fe   :  { %2742 = vrot.lane.b32.xlu1 %v2738_v49, %s12319_s17 }
 0x9ff   :  { %v2564_v10 = vpop.permute.xlu0 %2563 }
 0xa00   :  { %v2573_v38 = vcombine.low %v2564_v10, %v2566_v20 }
 0xa02   :  { %2744 = vrot.lane.b32.xlu1 %v2738_v49, %s12321_s19  ;;  %v2595_v22 = vrot.slane %v2573_v38, %v12518_v9 }
 0xa03   :  { %v2568_v5 = vpop.permute.xlu0 %2567 }
 0xa04   :  { %v2574_v8 = vcombine.low %v2568_v5, %v2570_v32 }
 0xa06   :  { %v2602_v37 = vrot.slane %v2574_v8, %v12518_v9  ;;  %2746 = vrot.lane.b32.xlu1 %v2738_v49, %s12322_s20 }
 0xa08   :  { %v2604_v16 = vcombine.low %v2595_v22, %v2602_v37 }
 0xa0a   :  { %2748 = vrot.lane.b32.xlu1 %v2738_v49, %s12323_s21  ;;  %v2618_v18 = vrot.slane %v2604_v16, %v12518_v9 }
 0xa0c   :  { %v2619_v21 = vcombine.low %v2611_v17, %v2618_v18 }
 0xa0e   :  { %v2621_v24 = vsel %vm79_vm0, %v2619_v21, -inf  ;;  %2750 = vrot.lane.b32.xlu1 %v2738_v49, %s12324_s22 }
 0xa0f   :  { %2622 = vmax.xlane.f32.xlu0 %v2621_v24 }
 0xa12   :  { %2754 = vrot.lane.b32.xlu1 %v2738_v49, %s12328_s26 }
 0xa25   :  { %2752 = vrot.lane.b32.xlu0 %v2738_v49, %s12325_s23 }
 0xa6c   :  { %v2741_v42 = vpop.permute.xlu1 %2740 }
 0xa6d   :  { %2756 = vrot.lane.b32.xlu1 %v2741_v42, %s12328_s26 }
 0xa70   :  { %v2743_v43 = vpop.permute.xlu1 %2742 }
 0xa71   :  { %2758 = vrot.lane.b32.xlu1 %v2743_v43, %s12328_s26 }
 0xa74   :  { %v2745_v44 = vpop.permute.xlu1 %2744 }
 0xa75   :  { %2760 = vrot.lane.b32.xlu1 %v2745_v44, %s12328_s26 }
 0xa78   :  { %v2747_v45 = vpop.permute.xlu1 %2746 }
 0xa79   :  { %2762 = vrot.lane.b32.xlu1 %v2747_v45, %s12328_s26 }
 0xa7c   :  { %v2749_v53 = vpop.permute.xlu1 %2748 }
 0xa7d   :  { %2764 = vrot.lane.b32.xlu0 %v2749_v53, %s12328_s26 }
 0xa80   :  { %v2751_v55 = vpop.permute.xlu1 %2750 }
 0xa81   :  { %2766 = vrot.lane.b32.xlu1 %v2751_v55, %s12328_s26 }
 0xa84   :  { %v2755_v48 = vpop.permute.xlu1 %2754 }
 0xa98   :  { %v12872_v51 = vpop.xlane.xlu0 %2622 }
 0xa9c   :  { %v2753_v56 = vpop.permute.xlu0 %2752 }
 0xa9d   :  { %2768 = vrot.lane.b32.xlu0 %v2753_v56, %s12328_s26 }
 0xaa1   :  { %2934 = vrot.lane.b32.xlu0 %v2932_v28, %s12318_s10 }
 0xadf   :  { %v2757_v57 = vpop.permute.xlu1 %2756 }
 0xae0   :  { %v2770_v30 = vcombine.low %v2755_v48, %v2757_v57 }
 0xae2   :  { %v2780_v33 = vrot.slane %v2770_v30, %v12518_v9 }
 0xae3   :  { %v2759_v58 = vpop.permute.xlu1 %2758 }
 0xae7   :  { %v2761_v59 = vpop.permute.xlu1 %2760 }
 0xae8   :  { %v2771_v47 = vcombine.low %v2759_v58, %v2761_v59 }
 0xaea   :  { %v2787_v1 = vrot.slane %v2771_v47, %v12518_v9 }
 0xaeb   :  { %v2763_v26 = vpop.permute.xlu1 %2762 }
 0xaec   :  { %v2802_v3 = vcombine.low %v2780_v33, %v2787_v1 }
 0xaee   :  { %v2810_v35 = vrot.slane %v2802_v3, %v12518_v9 }
 0xaef   :  { %v2765_v60 = vpop.permute.xlu0 %2764 }
 0xaf0   :  { %v2772_v62 = vcombine.low %v2763_v26, %v2765_v60 }
 0xaf2   :  { %v2794_v15 = vrot.slane %v2772_v62, %v12518_v9 }
 0xaf3   :  { %v2767_v63 = vpop.permute.xlu1 %2766 }
 0xb0f   :  { %v2769_v0 = vpop.permute.xlu0 %2768 }
 0xb10   :  { %v2773_v61 = vcombine.low %v2767_v63, %v2769_v0  ;;  %v3310_v63 = vld [vmem:[%s17189_s0 + $0x4] sm:$0x1] }
 0xb12   :  { %v2801_v12 = vrot.slane %v2773_v61, %v12518_v9 }
 0xb13   :  { %v2935_v20 = vpop.permute.xlu0 %2934 }
 0xb14   :  { %v2803_v32 = vcombine.low %v2794_v15, %v2801_v12  ;;  %v2937_v34 = vmax.f32 %v2932_v28, %v2935_v20 }
 0xb16   :  { %2939 = vrot.lane.b32.xlu0 %v2937_v34, %s12320_s18  ;;  %v2817_v49 = vrot.slane %v2803_v32, %v12518_v9 }
 0xb18   :  { %v2818_v31 = vcombine.low %v2810_v35, %v2817_v49 }
 0xb1a   :  { %2941 = vrot.lane.b32.xlu0 %v2937_v34, %s12319_s17  ;;  %v2820_v40 = vsel %vm79_vm0, %v2818_v31, -inf }
 0xb1b   :  { %2821 = vmax.xlane.f32.xlu1 %v2820_v40 }
 0xb1e   :  { %2943 = vrot.lane.b32.xlu0 %v2937_v34, %s12321_s19 }
 0xb22   :  { %2945 = vrot.lane.b32.xlu0 %v2937_v34, %s12322_s20 }
 0xb26   :  { %2947 = vrot.lane.b32.xlu0 %v2937_v34, %s12323_s21 }
 0xb2a   :  { %2949 = vrot.lane.b32.xlu0 %v2937_v34, %s12324_s22 }
 0xb2c   :  { %2953 = vrot.lane.b32.xlu1 %v2937_v34, %s12327_s25 }
 0xb2e   :  { %2951 = vrot.lane.b32.xlu0 %v2937_v34, %s12325_s23 }
 0xb88   :  { %v2940_v10 = vpop.permute.xlu0 %2939 }
 0xb89   :  { %2955 = vrot.lane.b32.xlu0 %v2940_v10, %s12327_s25 }
 0xb8c   :  { %v2942_v19 = vpop.permute.xlu0 %2941 }
 0xb8d   :  { %2957 = vrot.lane.b32.xlu0 %v2942_v19, %s12327_s25 }
 0xb90   :  { %v2944_v11 = vpop.permute.xlu0 %2943 }
 0xb91   :  { %2959 = vrot.lane.b32.xlu0 %v2944_v11, %s12327_s25 }
 0xb94   :  { %v2946_v38 = vpop.permute.xlu0 %2945 }
 0xb95   :  { %2961 = vrot.lane.b32.xlu0 %v2946_v38, %s12327_s25 }
 0xb98   :  { %v2948_v5 = vpop.permute.xlu0 %2947 }
 0xb99   :  { %2963 = vrot.lane.b32.xlu1 %v2948_v5, %s12327_s25 }
 0xb9c   :  { %v2950_v39 = vpop.permute.xlu0 %2949 }
 0xb9d   :  { %2965 = vrot.lane.b32.xlu0 %v2950_v39, %s12327_s25 }
 0xba0   :  { %v2952_v8 = vpop.permute.xlu0 %2951 }
 0xba1   :  { %2967 = vrot.lane.b32.xlu1 %v2952_v8, %s12327_s25 }
 0xba4   :  { %v12905_v16 = vpop.xlane.xlu1 %2821 }
 0xba5   :  { %3133 = vrot.lane.b32.xlu1 %v3131_v13, %s12318_s10 }
 0xba8   :  { %v2954_v18 = vpop.permute.xlu1 %2953 }
 0xbfb   :  { %v2956_v22 = vpop.permute.xlu0 %2955 }
 0xbfc   :  { %v2969_v43 = vcombine.low %v2954_v18, %v2956_v22 }
 0xbfe   :  { %v2979_v56 = vrot.slane %v2969_v43, %v12518_v9 }
 0xbff   :  { %v2958_v37 = vpop.permute.xlu0 %2957 }
 0xc03   :  { %v2960_v17 = vpop.permute.xlu0 %2959 }
 0xc04   :  { %v2970_v21 = vcombine.low %v2958_v37, %v2960_v17 }
 0xc06   :  { %v2986_v44 = vrot.slane %v2970_v21, %v12518_v9 }
 0xc07   :  { %v2962_v24 = vpop.permute.xlu0 %2961 }
 0xc08   :  { %v3001_v48 = vcombine.low %v2979_v56, %v2986_v44 }
 0xc0a   :  { %v3009_v60 = vrot.slane %v3001_v48, %v12518_v9 }
 0xc0b   :  { %v2964_v42 = vpop.permute.xlu1 %2963 }
 0xc0c   :  { %v2971_v45 = vcombine.low %v2962_v24, %v2964_v42 }
 0xc0e   :  { %v2993_v57 = vrot.slane %v2971_v45, %v12518_v9  ;;  %v3505_v45 = vld [vmem:[%s17189_s0 + $0x4] sm:$0x1] }
 0xc0f   :  { %v2966_v53 = vpop.permute.xlu0 %2965 }
 0xc13   :  { %v2968_v55 = vpop.permute.xlu1 %2967 }
 0xc14   :  { %v2972_v28 = vcombine.low %v2966_v53, %v2968_v55 }
 0xc16   :  { %v3000_v58 = vrot.slane %v2972_v28, %v12518_v9 }
 0xc17   :  { %v3134_v59 = vpop.permute.xlu1 %3133 }
 0xc18   :  { %v3002_v26 = vcombine.low %v2993_v57, %v3000_v58  ;;  %v3136_v47 = vmax.f32 %v3131_v13, %v3134_v59 }
 0xc1a   :  { %3138 = vrot.lane.b32.xlu1 %v3136_v47, %s12320_s18  ;;  %v3016_v30 = vrot.slane %v3002_v26, %v12518_v9 }
 0xc1c   :  { %v3017_v1 = vcombine.low %v3009_v60, %v3016_v30 }
 0xc1e   :  { %3140 = vrot.lane.b32.xlu1 %v3136_v47, %s12319_s17  ;;  %v3019_v62 = vsel %vm79_vm0, %v3017_v1, -inf }
 0xc1f   :  { %3020 = vmax.xlane.f32.xlu0 %v3019_v62 }
 0xc22   :  { %3142 = vrot.lane.b32.xlu1 %v3136_v47, %s12321_s19 }
 0xc26   :  { %3144 = vrot.lane.b32.xlu1 %v3136_v47, %s12322_s20 }
 0xc2a   :  { %3146 = vrot.lane.b32.xlu1 %v3136_v47, %s12323_s21 }
 0xc2e   :  { %3148 = vrot.lane.b32.xlu1 %v3136_v47, %s12324_s22 }
 0xc35   :  { %3150 = vrot.lane.b32.xlu0 %v3136_v47, %s12325_s23 }
 0xc39   :  { %3312 = vrot.lane.b32.xlu0 %v3310_v63, %s12318_s10 }
 0xc8c   :  { %v3139_v0 = vpop.permute.xlu1 %3138 }
 0xc8d   :  { %v3152_v32 = vcombine.low %v3136_v47, %v3139_v0 }
 0xc8f   :  { %v3162_v40 = vrot.slane %v3152_v32, %v12518_v9 }
 0xc90   :  { %v3141_v33 = vpop.permute.xlu1 %3140 }
 0xc94   :  { %v3143_v61 = vpop.permute.xlu1 %3142 }
 0xc95   :  { %v3153_v12 = vcombine.low %v3141_v33, %v3143_v61 }
 0xc97   :  { %v3169_v34 = vrot.slane %v3153_v12, %v12518_v9 }
 0xc98   :  { %v3145_v3 = vpop.permute.xlu1 %3144 }
 0xc99   :  { %v3184_v19 = vcombine.low %v3162_v40, %v3169_v34 }
 0xc9b   :  { %v3192_v13 = vrot.slane %v3184_v19, %v12518_v9 }
 0xc9c   :  { %v3147_v15 = vpop.permute.xlu1 %3146 }
 0xc9d   :  { %v3154_v35 = vcombine.low %v3145_v3, %v3147_v15 }
 0xc9f   :  { %v3176_v11 = vrot.slane %v3154_v35, %v12518_v9 }
 0xca0   :  { %v3149_v49 = vpop.permute.xlu1 %3148 }
 0xca8   :  { %v12925_v20 = vpop.xlane.xlu0 %3020 }
 0xca9   :  { %17301 = vst [vmem:[#allocation3_spill] sm:$0xff] %v12925_v20 }
 0xcac   :  { %v3151_v31 = vpop.permute.xlu0 %3150 }
 0xcad   :  { %v3155_v10 = vcombine.low %v3149_v49, %v3151_v31 }
 0xcaf   :  { %v3183_v38 = vrot.slane %v3155_v10, %v12518_v9 }
 0xcb0   :  { %v3313_v5 = vpop.permute.xlu0 %3312 }
 0xcb1   :  { %v3185_v39 = vcombine.low %v3176_v11, %v3183_v38  ;;  %v3315_v8 = vmax.f32 %v3310_v63, %v3313_v5 }
 0xcb3   :  { %3317 = vrot.lane.b32.xlu0 %v3315_v8, %s12320_s18  ;;  %v3199_v22 = vrot.slane %v3185_v39, %v12518_v9 }
 0xcb5   :  { %v3200_v37 = vcombine.low %v3192_v13, %v3199_v22  ;;  %v3700_v13 = vld [vmem:[%s17189_s0 + $0x4] sm:$0x1] }
 0xcb7   :  { %3319 = vrot.lane.b32.xlu0 %v3315_v8, %s12319_s17  ;;  %v3202_v17 = vsel %vm79_vm0, %v3200_v37, -inf }
 0xcb8   :  { %3203 = vmax.xlane.f32.xlu1 %v3202_v17 }
 0xcbb   :  { %3321 = vrot.lane.b32.xlu0 %v3315_v8, %s12321_s19 }
 0xcbf   :  { %3325 = vrot.lane.b32.xlu0 %v3315_v8, %s12323_s21 }
 0xcc3   :  { %3327 = vrot.lane.b32.xlu0 %v3315_v8, %s12324_s22 }
 0xcc7   :  { %3329 = vrot.lane.b32.xlu0 %v3315_v8, %s12325_s23 }
 0xcc9   :  { %3323 = vrot.lane.b32.xlu1 %v3315_v8, %s12322_s20 }
 0xccb   :  { %3331 = vrot.lane.b32.xlu0 %v3315_v8, %s12326_s24 }
 0xd25   :  { %v3318_v18 = vpop.permute.xlu0 %3317 }
 0xd26   :  { %3333 = vrot.lane.b32.xlu1 %v3318_v18, %s12326_s24 }
 0xd29   :  { %v3320_v21 = vpop.permute.xlu0 %3319 }
 0xd2a   :  { %3335 = vrot.lane.b32.xlu0 %v3320_v21, %s12326_s24 }
 0xd2d   :  { %v3322_v24 = vpop.permute.xlu0 %3321 }
 0xd2e   :  { %3337 = vrot.lane.b32.xlu1 %v3322_v24, %s12326_s24 }
 0xd31   :  { %v3326_v42 = vpop.permute.xlu0 %3325 }
 0xd32   :  { %3341 = vrot.lane.b32.xlu1 %v3326_v42, %s12326_s24 }
 0xd35   :  { %v3328_v43 = vpop.permute.xlu0 %3327 }
 0xd39   :  { %v3330_v44 = vpop.permute.xlu0 %3329 }
 0xd3a   :  { %3345 = vrot.lane.b32.xlu1 %v3330_v44, %s12326_s24 }
 0xd3d   :  { %v3332_v58 = vpop.permute.xlu0 %3331 }
 0xd3e   :  { %3507 = vrot.lane.b32.xlu1 %v3505_v45, %s12318_s10 }
 0xd41   :  { %v12951_v53 = vpop.xlane.xlu1 %3203 }
 0xd42   :  { %17302 = vst [vmem:[#allocation4_spill] sm:$0xff] %v12951_v53 }
 0xd45   :  { %v3324_v55 = vpop.permute.xlu1 %3323 }
 0xd46   :  { %3339 = vrot.lane.b32.xlu0 %v3324_v55, %s12326_s24 }
 0xd4a   :  { %3343 = vrot.lane.b32.xlu0 %v3328_v43, %s12326_s24 }
 0xd98   :  { %v3334_v56 = vpop.permute.xlu1 %3333 }
 0xd99   :  { %v3347_v1 = vcombine.low %v3332_v58, %v3334_v56 }
 0xd9b   :  { %v3357_v33 = vrot.slane %v3347_v1, %v12518_v9 }
 0xd9c   :  { %v3336_v47 = vpop.permute.xlu0 %3335 }
 0xda0   :  { %v3338_v28 = vpop.permute.xlu1 %3337 }
 0xda1   :  { %v3348_v60 = vcombine.low %v3336_v47, %v3338_v28 }
 0xda3   :  { %v3364_v62 = vrot.slane %v3348_v60, %v12518_v9 }
 0xda4   :  { %v3342_v48 = vpop.permute.xlu1 %3341 }
 0xda5   :  { %v3379_v3 = vcombine.low %v3357_v33, %v3364_v62 }
 0xda7   :  { %v3387_v34 = vrot.slane %v3379_v3, %v12518_v9 }
 0xdac   :  { %v3346_v57 = vpop.permute.xlu1 %3345 }
 0xdb0   :  { %v3508_v59 = vpop.permute.xlu1 %3507 }
 0xdb1   :  { %v3510_v26 = vmax.f32 %v3505_v45, %v3508_v59 }
 0xdb3   :  { %3512 = vrot.lane.b32.xlu1 %v3510_v26, %s12320_s18 }
 0xdb7   :  { %3514 = vrot.lane.b32.xlu1 %v3510_v26, %s12319_s17 }
 0xdb8   :  { %v3340_v30 = vpop.permute.xlu0 %3339 }
 0xdb9   :  { %v3349_v63 = vcombine.low %v3340_v30, %v3342_v48 }
 0xdbb   :  { %3516 = vrot.lane.b32.xlu1 %v3510_v26, %s12321_s19  ;;  %v3371_v15 = vrot.slane %v3349_v63, %v12518_v9 }
 0xdbc   :  { %v3344_v0 = vpop.permute.xlu0 %3343 }
 0xdbd   :  { %v3350_v61 = vcombine.low %v3344_v0, %v3346_v57 }
 0xdbf   :  { %v3378_v12 = vrot.slane %v3350_v61, %v12518_v9  ;;  %3518 = vrot.lane.b32.xlu1 %v3510_v26, %s12322_s20 }
 0xdc1   :  { %v3380_v32 = vcombine.low %v3371_v15, %v3378_v12 }
 0xdc3   :  { %3520 = vrot.lane.b32.xlu1 %v3510_v26, %s12323_s21  ;;  %v3394_v35 = vrot.slane %v3380_v32, %v12518_v9 }
 0xdc5   :  { %v3395_v49 = vcombine.low %v3387_v34, %v3394_v35  ;;  %v3895_v34 = vld [vmem:[%s17189_s0 + $0x5] sm:$0x1] }
 0xdc7   :  { %v3397_v31 = vsel %vm79_vm0, %v3395_v49, -inf  ;;  %3522 = vrot.lane.b32.xlu1 %v3510_v26, %s12324_s22 }
 0xdc8   :  { %3398 = vmax.xlane.f32.xlu0 %v3397_v31 }
 0xdcb   :  { %3526 = vrot.lane.b32.xlu1 %v3510_v26, %s12328_s26 }
 0xdde   :  { %3524 = vrot.lane.b32.xlu0 %v3510_v26, %s12325_s23 }
 0xe25   :  { %v3513_v40 = vpop.permute.xlu1 %3512 }
 0xe26   :  { %3528 = vrot.lane.b32.xlu1 %v3513_v40, %s12328_s26 }
 0xe29   :  { %v3515_v10 = vpop.permute.xlu1 %3514 }
 0xe2a   :  { %3530 = vrot.lane.b32.xlu1 %v3515_v10, %s12328_s26 }
 0xe2d   :  { %v3517_v19 = vpop.permute.xlu1 %3516 }
 0xe2e   :  { %3532 = vrot.lane.b32.xlu1 %v3517_v19, %s12328_s26 }
 0xe31   :  { %v3519_v11 = vpop.permute.xlu1 %3518 }
 0xe32   :  { %3534 = vrot.lane.b32.xlu1 %v3519_v11, %s12328_s26 }
 0xe35   :  { %v3521_v38 = vpop.permute.xlu1 %3520 }
 0xe36   :  { %3536 = vrot.lane.b32.xlu0 %v3521_v38, %s12328_s26 }
 0xe39   :  { %v3523_v5 = vpop.permute.xlu1 %3522 }
 0xe3a   :  { %3538 = vrot.lane.b32.xlu1 %v3523_v5, %s12328_s26 }
 0xe3d   :  { %v3527_v22 = vpop.permute.xlu1 %3526 }
 0xe51   :  { %v12976_v39 = vpop.xlane.xlu0 %3398 }
 0xe52   :  { %17303 = vst [vmem:[#allocation5_spill] sm:$0xff] %v12976_v39 }
 0xe55   :  { %v3525_v8 = vpop.permute.xlu0 %3524 }
 0xe56   :  { %3540 = vrot.lane.b32.xlu0 %v3525_v8, %s12328_s26 }
 0xe5a   :  { %3702 = vrot.lane.b32.xlu0 %v3700_v13, %s12318_s10 }
 0xe98   :  { %v3529_v37 = vpop.permute.xlu1 %3528 }
 0xe99   :  { %v3542_v43 = vcombine.low %v3527_v22, %v3529_v37 }
 0xe9b   :  { %v3552_v28 = vrot.slane %v3542_v43, %v12518_v9 }
 0xe9c   :  { %v3531_v17 = vpop.permute.xlu1 %3530 }
 0xea0   :  { %v3533_v18 = vpop.permute.xlu1 %3532 }
 0xea1   :  { %v3543_v24 = vcombine.low %v3531_v17, %v3533_v18 }
 0xea3   :  { %v3559_v44 = vrot.slane %v3543_v24, %v12518_v9 }
 0xea4   :  { %v3535_v21 = vpop.permute.xlu1 %3534 }
 0xea5   :  { %v3574_v57 = vcombine.low %v3552_v28, %v3559_v44 }
 0xea7   :  { %v3582_v30 = vrot.slane %v3574_v57, %v12518_v9  ;;  %v4074_v57 = vld [vmem:[%s17189_s0 + $0x5] sm:$0x1] }
 0xea8   :  { %v3537_v42 = vpop.permute.xlu0 %3536 }
 0xea9   :  { %v3544_v45 = vcombine.low %v3535_v21, %v3537_v42 }
 0xeab   :  { %v3566_v58 = vrot.slane %v3544_v45, %v12518_v9 }
 0xeac   :  { %v3539_v55 = vpop.permute.xlu1 %3538 }
 0xec8   :  { %v3541_v56 = vpop.permute.xlu0 %3540 }
 0xec9   :  { %v3545_v48 = vcombine.low %v3539_v55, %v3541_v56 }
 0xecb   :  { %v3573_v59 = vrot.slane %v3545_v48, %v12518_v9 }
 0xecc   :  { %v3703_v26 = vpop.permute.xlu0 %3702 }
 0xecd   :  { %v3575_v47 = vcombine.low %v3566_v58, %v3573_v59  ;;  %v3705_v60 = vmax.f32 %v3700_v13, %v3703_v26 }
 0xecf   :  { %3707 = vrot.lane.b32.xlu0 %v3705_v60, %s12320_s18  ;;  %v3589_v1 = vrot.slane %v3575_v47, %v12518_v9 }
 0xed1   :  { %v3590_v62 = vcombine.low %v3582_v30, %v3589_v1 }
 0xed3   :  { %3709 = vrot.lane.b32.xlu0 %v3705_v60, %s12319_s17  ;;  %v3592_v63 = vsel %vm79_vm0, %v3590_v62, -inf }
 0xed4   :  { %3593 = vmax.xlane.f32.xlu1 %v3592_v63 }
 0xed7   :  { %3711 = vrot.lane.b32.xlu0 %v3705_v60, %s12321_s19 }
 0xedb   :  { %3713 = vrot.lane.b32.xlu0 %v3705_v60, %s12322_s20 }
 0xedf   :  { %3715 = vrot.lane.b32.xlu0 %v3705_v60, %s12323_s21 }
 0xee3   :  { %3717 = vrot.lane.b32.xlu0 %v3705_v60, %s12324_s22 }
 0xee5   :  { %3721 = vrot.lane.b32.xlu1 %v3705_v60, %s12327_s25 }
 0xee7   :  { %3719 = vrot.lane.b32.xlu0 %v3705_v60, %s12325_s23 }
 0xf41   :  { %v3708_v0 = vpop.permute.xlu0 %3707 }
 0xf42   :  { %3723 = vrot.lane.b32.xlu0 %v3708_v0, %s12327_s25 }
 0xf45   :  { %v3710_v33 = vpop.permute.xlu0 %3709 }
 0xf46   :  { %3725 = vrot.lane.b32.xlu0 %v3710_v33, %s12327_s25 }
 0xf49   :  { %v3712_v61 = vpop.permute.xlu0 %3711 }
 0xf4a   :  { %3727 = vrot.lane.b32.xlu0 %v3712_v61, %s12327_s25 }
 0xf4d   :  { %v3714_v3 = vpop.permute.xlu0 %3713 }
 0xf4e   :  { %3729 = vrot.lane.b32.xlu0 %v3714_v3, %s12327_s25 }
 0xf51   :  { %v3716_v15 = vpop.permute.xlu0 %3715 }
 0xf52   :  { %3731 = vrot.lane.b32.xlu1 %v3716_v15, %s12327_s25 }
 0xf55   :  { %v3718_v12 = vpop.permute.xlu0 %3717 }
 0xf56   :  { %3733 = vrot.lane.b32.xlu0 %v3718_v12, %s12327_s25 }
 0xf59   :  { %v3720_v32 = vpop.permute.xlu0 %3719 }
 0xf5a   :  { %3735 = vrot.lane.b32.xlu1 %v3720_v32, %s12327_s25 }
 0xf5d   :  { %v13009_v31 = vpop.xlane.xlu1 %3593 }
 0xf5e   :  { %3897 = vrot.lane.b32.xlu1 %v3895_v34, %s12318_s10  ;;  %17304 = vst [vmem:[#allocation6_spill] sm:$0xff] %v13009_v31 }
 0xf61   :  { %v3722_v10 = vpop.permute.xlu1 %3721 }
 0xfb4   :  { %v3724_v35 = vpop.permute.xlu0 %3723 }
 0xfb5   :  { %v3737_v5 = vcombine.low %v3722_v10, %v3724_v35 }
 0xfb7   :  { %v3747_v17 = vrot.slane %v3737_v5, %v12518_v9 }
 0xfb8   :  { %v3726_v49 = vpop.permute.xlu0 %3725 }
 0xfbc   :  { %v3728_v40 = vpop.permute.xlu0 %3727 }
 0xfbd   :  { %v3738_v19 = vcombine.low %v3726_v49, %v3728_v40 }
 0xfbf   :  { %v3754_v8 = vrot.slane %v3738_v19, %v12518_v9 }
 0xfc0   :  { %v3730_v11 = vpop.permute.xlu0 %3729 }
 0xfc1   :  { %v3769_v21 = vcombine.low %v3747_v17, %v3754_v8 }
 0xfc3   :  { %v3777_v55 = vrot.slane %v3769_v21, %v12518_v9 }
 0xfc4   :  { %v3732_v38 = vpop.permute.xlu1 %3731 }
 0xfc5   :  { %v3739_v13 = vcombine.low %v3730_v11, %v3732_v38 }
 0xfc7   :  { %v3761_v24 = vrot.slane %v3739_v13, %v12518_v9 }
 0xfc8   :  { %v3734_v22 = vpop.permute.xlu0 %3733 }
 0xfcc   :  { %v3736_v37 = vpop.permute.xlu1 %3735 }
 0xfcd   :  { %v3740_v18 = vcombine.low %v3734_v22, %v3736_v37 }
 0xfcf   :  { %v3768_v42 = vrot.slane %v3740_v18, %v12518_v9  ;;  %v4269_v18 = vld [vmem:[%s17189_s0 + $0x5] sm:$0x1] }
 0xfd0   :  { %v3898_v43 = vpop.permute.xlu1 %3897 }
 0xfd1   :  { %v3770_v44 = vcombine.low %v3761_v24, %v3768_v42  ;;  %v3900_v45 = vmax.f32 %v3895_v34, %v3898_v43 }
 0xfd3   :  { %3902 = vrot.lane.b32.xlu1 %v3900_v45, %s12320_s18  ;;  %v3784_v56 = vrot.slane %v3770_v44, %v12518_v9 }
 0xfd5   :  { %v3785_v28 = vcombine.low %v3777_v55, %v3784_v56 }
 0xfd7   :  { %3904 = vrot.lane.b32.xlu1 %v3900_v45, %s12319_s17  ;;  %v3787_v48 = vsel %vm79_vm0, %v3785_v28, -inf }
 0xfd8   :  { %3788 = vmax.xlane.f32.xlu0 %v3787_v48 }
 0xfdb   :  { %3906 = vrot.lane.b32.xlu1 %v3900_v45, %s12321_s19 }
 0xfdf   :  { %3908 = vrot.lane.b32.xlu1 %v3900_v45, %s12322_s20 }
 0xfe3   :  { %3910 = vrot.lane.b32.xlu1 %v3900_v45, %s12323_s21 }
 0xfe7   :  { %3912 = vrot.lane.b32.xlu1 %v3900_v45, %s12324_s22 }
 0xfee   :  { %3914 = vrot.lane.b32.xlu0 %v3900_v45, %s12325_s23 }
 0xff2   :  { %4076 = vrot.lane.b32.xlu0 %v4074_v57, %s12318_s10 }
0x1045   :  { %v3903_v58 = vpop.permute.xlu1 %3902 }
0x1046   :  { %v3916_v62 = vcombine.low %v3900_v45, %v3903_v58 }
0x1048   :  { %v3926_v3 = vrot.slane %v3916_v62, %v12518_v9 }
0x1049   :  { %v3905_v59 = vpop.permute.xlu1 %3904 }
0x104d   :  { %v3907_v26 = vpop.permute.xlu1 %3906 }
0x104e   :  { %v3917_v30 = vcombine.low %v3905_v59, %v3907_v26 }
0x1050   :  { %v3933_v63 = vrot.slane %v3917_v30, %v12518_v9 }
0x1051   :  { %v3909_v47 = vpop.permute.xlu1 %3908 }
0x1052   :  { %v3948_v12 = vcombine.low %v3926_v3, %v3933_v63 }
0x1054   :  { %v3956_v10 = vrot.slane %v3948_v12, %v12518_v9 }
0x1055   :  { %v3911_v60 = vpop.permute.xlu1 %3910 }
0x1056   :  { %v3918_v0 = vcombine.low %v3909_v47, %v3911_v60 }
0x1058   :  { %v3940_v32 = vrot.slane %v3918_v0, %v12518_v9 }
0x1059   :  { %v3913_v33 = vpop.permute.xlu1 %3912 }
0x1061   :  { %v13029_v1 = vpop.xlane.xlu0 %3788 }
0x1062   :  { %17305 = vst [vmem:[#allocation7_spill] sm:$0xff] %v13029_v1 }
0x1065   :  { %v3915_v61 = vpop.permute.xlu0 %3914 }
0x1066   :  { %v3919_v15 = vcombine.low %v3913_v33, %v3915_v61 }
0x1068   :  { %v3947_v34 = vrot.slane %v3919_v15, %v12518_v9 }
0x1069   :  { %v4077_v35 = vpop.permute.xlu0 %4076 }
0x106a   :  { %v3949_v49 = vcombine.low %v3940_v32, %v3947_v34  ;;  %v4079_v40 = vmax.f32 %v4074_v57, %v4077_v35 }
0x106c   :  { %4081 = vrot.lane.b32.xlu0 %v4079_v40, %s12320_s18  ;;  %v3963_v19 = vrot.slane %v3949_v49, %v12518_v9 }
0x106e   :  { %v3964_v11 = vcombine.low %v3956_v10, %v3963_v19 }
0x1070   :  { %4083 = vrot.lane.b32.xlu0 %v4079_v40, %s12319_s17  ;;  %v3966_v38 = vsel %vm79_vm0, %v3964_v11, -inf }
0x1071   :  { %3967 = vmax.xlane.f32.xlu1 %v3966_v38 }
0x1074   :  { %4085 = vrot.lane.b32.xlu0 %v4079_v40, %s12321_s19 }
0x1078   :  { %4089 = vrot.lane.b32.xlu0 %v4079_v40, %s12323_s21 }
0x107c   :  { %4091 = vrot.lane.b32.xlu0 %v4079_v40, %s12324_s22 }
0x1080   :  { %4093 = vrot.lane.b32.xlu0 %v4079_v40, %s12325_s23 }
0x1082   :  { %4087 = vrot.lane.b32.xlu1 %v4079_v40, %s12322_s20 }
0x1084   :  { %4095 = vrot.lane.b32.xlu0 %v4079_v40, %s12326_s24 }
0x10de   :  { %v4082_v5 = vpop.permute.xlu0 %4081 }
0x10df   :  { %4097 = vrot.lane.b32.xlu1 %v4082_v5, %s12326_s24  ;;  %v4464_v5 = vld [vmem:[%s17189_s0 + $0x5] sm:$0x1] }
0x10e2   :  { %v4084_v8 = vpop.permute.xlu0 %4083 }
0x10e3   :  { %4099 = vrot.lane.b32.xlu0 %v4084_v8, %s12326_s24 }
0x10e6   :  { %v4086_v13 = vpop.permute.xlu0 %4085 }
0x10e7   :  { %4101 = vrot.lane.b32.xlu1 %v4086_v13, %s12326_s24 }
0x10ea   :  { %v4090_v22 = vpop.permute.xlu0 %4089 }
0x10eb   :  { %4105 = vrot.lane.b32.xlu1 %v4090_v22, %s12326_s24 }
0x10ee   :  { %v4092_v37 = vpop.permute.xlu0 %4091 }
0x10f2   :  { %v4094_v17 = vpop.permute.xlu0 %4093 }
0x10f3   :  { %4109 = vrot.lane.b32.xlu1 %v4094_v17, %s12326_s24 }
0x10f6   :  { %v4096_v55 = vpop.permute.xlu0 %4095 }
0x10f7   :  { %4271 = vrot.lane.b32.xlu1 %v4269_v18, %s12318_s10 }
0x10fa   :  { %v13055_v21 = vpop.xlane.xlu1 %3967 }
0x10fb   :  { %17306 = vst [vmem:[#allocation8_spill] sm:$0xff] %v13055_v21 }
0x10fe   :  { %v4088_v24 = vpop.permute.xlu1 %4087 }
0x10ff   :  { %4103 = vrot.lane.b32.xlu0 %v4088_v24, %s12326_s24 }
0x1103   :  { %4107 = vrot.lane.b32.xlu0 %v4092_v37, %s12326_s24 }
0x1151   :  { %v4098_v42 = vpop.permute.xlu1 %4097 }
0x1152   :  { %v4111_v59 = vcombine.low %v4096_v55, %v4098_v42 }
0x1154   :  { %v4121_v30 = vrot.slane %v4111_v59, %v12518_v9 }
0x1155   :  { %v4100_v48 = vpop.permute.xlu0 %4099 }
0x1159   :  { %v4102_v43 = vpop.permute.xlu1 %4101 }
0x115a   :  { %v4112_v57 = vcombine.low %v4100_v48, %v4102_v43 }
0x115c   :  { %v4128_v26 = vrot.slane %v4112_v57, %v12518_v9 }
0x115d   :  { %v4106_v44 = vpop.permute.xlu1 %4105 }
0x115e   :  { %v4143_v63 = vcombine.low %v4121_v30, %v4128_v26 }
0x1160   :  { %v4151_v3 = vrot.slane %v4143_v63, %v12518_v9 }
0x1165   :  { %v4110_v45 = vpop.permute.xlu1 %4109 }
0x1169   :  { %v4272_v56 = vpop.permute.xlu1 %4271 }
0x116a   :  { %v4274_v28 = vmax.f32 %v4269_v18, %v4272_v56 }
0x116c   :  { %4276 = vrot.lane.b32.xlu1 %v4274_v28, %s12320_s18 }
0x1170   :  { %4278 = vrot.lane.b32.xlu1 %v4274_v28, %s12319_s17 }
0x1171   :  { %v4104_v58 = vpop.permute.xlu0 %4103 }
0x1172   :  { %v4113_v47 = vcombine.low %v4104_v58, %v4106_v44 }
0x1174   :  { %4280 = vrot.lane.b32.xlu1 %v4274_v28, %s12321_s19  ;;  %v4135_v0 = vrot.slane %v4113_v47, %v12518_v9 }
0x1175   :  { %v4108_v60 = vpop.permute.xlu0 %4107 }
0x1176   :  { %v4114_v62 = vcombine.low %v4108_v60, %v4110_v45 }
0x1178   :  { %v4142_v33 = vrot.slane %v4114_v62, %v12518_v9  ;;  %4282 = vrot.lane.b32.xlu1 %v4274_v28, %s12322_s20 }
0x117a   :  { %v4144_v61 = vcombine.low %v4135_v0, %v4142_v33 }
0x117c   :  { %4284 = vrot.lane.b32.xlu1 %v4274_v28, %s12323_s21  ;;  %v4158_v15 = vrot.slane %v4144_v61, %v12518_v9 }
0x117e   :  { %v4159_v12 = vcombine.low %v4151_v3, %v4158_v15 }
0x1180   :  { %v4161_v32 = vsel %vm79_vm0, %v4159_v12, -inf  ;;  %4286 = vrot.lane.b32.xlu1 %v4274_v28, %s12324_s22 }
0x1181   :  { %4162 = vmax.xlane.f32.xlu0 %v4161_v32 }
0x1184   :  { %4290 = vrot.lane.b32.xlu1 %v4274_v28, %s12328_s26 }
0x1197   :  { %4288 = vrot.lane.b32.xlu0 %v4274_v28, %s12325_s23 }
0x11de   :  { %v4277_v34 = vpop.permute.xlu1 %4276 }
0x11df   :  { %4292 = vrot.lane.b32.xlu1 %v4277_v34, %s12328_s26  ;;  %v4659_v34 = vld [vmem:[%s17189_s0 + $0x6] sm:$0x1] }
0x11e2   :  { %v4279_v35 = vpop.permute.xlu1 %4278 }
0x11e3   :  { %4294 = vrot.lane.b32.xlu1 %v4279_v35, %s12328_s26 }
0x11e6   :  { %v4281_v49 = vpop.permute.xlu1 %4280 }
0x11e7   :  { %4296 = vrot.lane.b32.xlu1 %v4281_v49, %s12328_s26 }
0x11ea   :  { %v4283_v40 = vpop.permute.xlu1 %4282 }
0x11eb   :  { %4298 = vrot.lane.b32.xlu1 %v4283_v40, %s12328_s26 }
0x11ee   :  { %v4285_v10 = vpop.permute.xlu1 %4284 }
0x11ef   :  { %4300 = vrot.lane.b32.xlu0 %v4285_v10, %s12328_s26 }
0x11f2   :  { %v4287_v19 = vpop.permute.xlu1 %4286 }
0x11f3   :  { %4302 = vrot.lane.b32.xlu1 %v4287_v19, %s12328_s26 }
0x11f6   :  { %v4291_v8 = vpop.permute.xlu1 %4290 }
0x120a   :  { %v13080_v11 = vpop.xlane.xlu0 %4162 }
0x120b   :  { %17307 = vst [vmem:[#allocation9_spill] sm:$0xff] %v13080_v11 }
0x120e   :  { %v4289_v38 = vpop.permute.xlu0 %4288 }
0x120f   :  { %4304 = vrot.lane.b32.xlu0 %v4289_v38, %s12328_s26 }
0x1213   :  { %4466 = vrot.lane.b32.xlu0 %v4464_v5, %s12318_s10 }
0x1251   :  { %v4293_v13 = vpop.permute.xlu1 %4292 }
0x1252   :  { %v4306_v42 = vcombine.low %v4291_v8, %v4293_v13 }
0x1254   :  { %v4316_v56 = vrot.slane %v4306_v42, %v12518_v9 }
0x1255   :  { %v4295_v22 = vpop.permute.xlu1 %4294 }
0x1259   :  { %v4297_v37 = vpop.permute.xlu1 %4296 }
0x125a   :  { %v4307_v18 = vcombine.low %v4295_v22, %v4297_v37 }
0x125c   :  { %v4323_v43 = vrot.slane %v4307_v18, %v12518_v9 }
0x125d   :  { %v4299_v17 = vpop.permute.xlu1 %4298 }
0x125e   :  { %v4338_v48 = vcombine.low %v4316_v56, %v4323_v43 }
0x1260   :  { %v4346_v60 = vrot.slane %v4338_v48, %v12518_v9 }
0x1261   :  { %v4301_v24 = vpop.permute.xlu0 %4300 }
0x1262   :  { %v4308_v44 = vcombine.low %v4299_v17, %v4301_v24 }
0x1264   :  { %v4330_v57 = vrot.slane %v4308_v44, %v12518_v9 }
0x1265   :  { %v4303_v45 = vpop.permute.xlu1 %4302 }
0x1281   :  { %v4305_v55 = vpop.permute.xlu0 %4304 }
0x1282   :  { %v4309_v28 = vcombine.low %v4303_v45, %v4305_v55 }
0x1284   :  { %v4337_v58 = vrot.slane %v4309_v28, %v12518_v9 }
0x1285   :  { %v4467_v59 = vpop.permute.xlu0 %4466 }
0x1286   :  { %v4339_v26 = vcombine.low %v4330_v57, %v4337_v58  ;;  %v4469_v47 = vmax.f32 %v4464_v5, %v4467_v59 }
0x1288   :  { %4471 = vrot.lane.b32.xlu0 %v4469_v47, %s12320_s18  ;;  %v4353_v30 = vrot.slane %v4339_v26, %v12518_v9  ;;  %v4838_v26 = vld [vmem:[%s17189_s0 + $0x6] sm:$0x1] }
0x128a   :  { %v4354_v62 = vcombine.low %v4346_v60, %v4353_v30 }
0x128c   :  { %4473 = vrot.lane.b32.xlu0 %v4469_v47, %s12319_s17  ;;  %v4356_v63 = vsel %vm79_vm0, %v4354_v62, -inf }
0x128d   :  { %4357 = vmax.xlane.f32.xlu1 %v4356_v63 }
0x1290   :  { %4475 = vrot.lane.b32.xlu0 %v4469_v47, %s12321_s19 }
0x1294   :  { %4477 = vrot.lane.b32.xlu0 %v4469_v47, %s12322_s20 }
0x1298   :  { %4479 = vrot.lane.b32.xlu0 %v4469_v47, %s12323_s21 }
0x129c   :  { %4481 = vrot.lane.b32.xlu0 %v4469_v47, %s12324_s22 }
0x129e   :  { %4485 = vrot.lane.b32.xlu1 %v4469_v47, %s12327_s25 }
0x12a0   :  { %4483 = vrot.lane.b32.xlu0 %v4469_v47, %s12325_s23 }
0x12fa   :  { %v4472_v0 = vpop.permute.xlu0 %4471 }
0x12fb   :  { %4487 = vrot.lane.b32.xlu0 %v4472_v0, %s12327_s25 }
0x12fe   :  { %v4474_v33 = vpop.permute.xlu0 %4473 }
0x12ff   :  { %4489 = vrot.lane.b32.xlu0 %v4474_v33, %s12327_s25 }
0x1302   :  { %v4476_v61 = vpop.permute.xlu0 %4475 }
0x1303   :  { %4491 = vrot.lane.b32.xlu0 %v4476_v61, %s12327_s25 }
0x1306   :  { %v4478_v3 = vpop.permute.xlu0 %4477 }
0x1307   :  { %4493 = vrot.lane.b32.xlu0 %v4478_v3, %s12327_s25 }
0x130a   :  { %v4480_v15 = vpop.permute.xlu0 %4479 }
0x130b   :  { %4495 = vrot.lane.b32.xlu1 %v4480_v15, %s12327_s25 }
0x130e   :  { %v4482_v12 = vpop.permute.xlu0 %4481 }
0x130f   :  { %4497 = vrot.lane.b32.xlu0 %v4482_v12, %s12327_s25 }
0x1312   :  { %v4484_v32 = vpop.permute.xlu0 %4483 }
0x1313   :  { %4499 = vrot.lane.b32.xlu1 %v4484_v32, %s12327_s25 }
0x1316   :  { %v13113_v40 = vpop.xlane.xlu1 %4357 }
0x1317   :  { %4661 = vrot.lane.b32.xlu1 %v4659_v34, %s12318_s10  ;;  %17308 = vst [vmem:[#allocation10_spill] sm:$0xff] %v13113_v40 }
0x131a   :  { %v4486_v19 = vpop.permute.xlu1 %4485 }
0x136d   :  { %v4488_v35 = vpop.permute.xlu0 %4487 }
0x136e   :  { %v4501_v13 = vcombine.low %v4486_v19, %v4488_v35 }
0x1370   :  { %v4511_v24 = vrot.slane %v4501_v13, %v12518_v9 }
0x1371   :  { %v4490_v49 = vpop.permute.xlu0 %4489 }
0x1375   :  { %v4492_v10 = vpop.permute.xlu0 %4491 }
0x1376   :  { %v4502_v38 = vcombine.low %v4490_v49, %v4492_v10 }
0x1378   :  { %v4518_v22 = vrot.slane %v4502_v38, %v12518_v9 }
0x1379   :  { %v4494_v5 = vpop.permute.xlu0 %4493 }
0x137a   :  { %v4533_v43 = vcombine.low %v4511_v24, %v4518_v22 }
0x137c   :  { %v4541_v48 = vrot.slane %v4533_v43, %v12518_v9 }
0x137d   :  { %v4496_v8 = vpop.permute.xlu1 %4495 }
0x137e   :  { %v4503_v37 = vcombine.low %v4494_v5, %v4496_v8 }
0x1380   :  { %v4525_v44 = vrot.slane %v4503_v37, %v12518_v9 }
0x1381   :  { %v4498_v17 = vpop.permute.xlu0 %4497 }
0x1385   :  { %v4500_v18 = vpop.permute.xlu1 %4499 }
0x1386   :  { %v4504_v42 = vcombine.low %v4498_v17, %v4500_v18 }
0x1388   :  { %v4532_v45 = vrot.slane %v4504_v42, %v12518_v9 }
0x1389   :  { %v4662_v55 = vpop.permute.xlu1 %4661 }
0x138a   :  { %v4534_v56 = vcombine.low %v4525_v44, %v4532_v45  ;;  %v4664_v28 = vmax.f32 %v4659_v34, %v4662_v55  ;;  %v5033_v55 = vld [vmem:[%s17189_s0 + $0x6] sm:$0x1] }
0x138c   :  { %4666 = vrot.lane.b32.xlu1 %v4664_v28, %s12320_s18  ;;  %v4548_v57 = vrot.slane %v4534_v56, %v12518_v9 }
0x138e   :  { %v4549_v58 = vcombine.low %v4541_v48, %v4548_v57 }
0x1390   :  { %4668 = vrot.lane.b32.xlu1 %v4664_v28, %s12319_s17  ;;  %v4551_v59 = vsel %vm79_vm0, %v4549_v58, -inf }
0x1391   :  { %4552 = vmax.xlane.f32.xlu0 %v4551_v59 }
0x1394   :  { %4670 = vrot.lane.b32.xlu1 %v4664_v28, %s12321_s19 }
0x1398   :  { %4672 = vrot.lane.b32.xlu1 %v4664_v28, %s12322_s20 }
0x139c   :  { %4674 = vrot.lane.b32.xlu1 %v4664_v28, %s12323_s21 }
0x13a0   :  { %4676 = vrot.lane.b32.xlu1 %v4664_v28, %s12324_s22 }
0x13a7   :  { %4678 = vrot.lane.b32.xlu0 %v4664_v28, %s12325_s23 }
0x13ab   :  { %4840 = vrot.lane.b32.xlu0 %v4838_v26, %s12318_s10 }
0x13fe   :  { %v4667_v47 = vpop.permute.xlu1 %4666 }
0x13ff   :  { %v4680_v61 = vcombine.low %v4664_v28, %v4667_v47 }
0x1401   :  { %v4690_v34 = vrot.slane %v4680_v61, %v12518_v9 }
0x1402   :  { %v4669_v60 = vpop.permute.xlu1 %4668 }
0x1406   :  { %v4671_v30 = vpop.permute.xlu1 %4670 }
0x1407   :  { %v4681_v0 = vcombine.low %v4669_v60, %v4671_v30 }
0x1409   :  { %v4697_v3 = vrot.slane %v4681_v0, %v12518_v9 }
0x140a   :  { %v4673_v62 = vpop.permute.xlu1 %4672 }
0x140b   :  { %v4712_v49 = vcombine.low %v4690_v34, %v4697_v3 }
0x140d   :  { %v4720_v13 = vrot.slane %v4712_v49, %v12518_v9 }
0x140e   :  { %v4675_v63 = vpop.permute.xlu1 %4674 }
0x140f   :  { %v4682_v15 = vcombine.low %v4673_v62, %v4675_v63 }
0x1411   :  { %v4704_v10 = vrot.slane %v4682_v15, %v12518_v9 }
0x1412   :  { %v4677_v12 = vpop.permute.xlu1 %4676 }
0x141a   :  { %v13133_v33 = vpop.xlane.xlu0 %4552 }
0x141b   :  { %17309 = vst [vmem:[#allocation11_spill] sm:$0xff] %v13133_v33 }
0x141e   :  { %v4679_v32 = vpop.permute.xlu0 %4678 }
0x141f   :  { %v4683_v35 = vcombine.low %v4677_v12, %v4679_v32 }
0x1421   :  { %v4711_v19 = vrot.slane %v4683_v35, %v12518_v9 }
0x1422   :  { %v4841_v38 = vpop.permute.xlu0 %4840 }
0x1423   :  { %v4713_v5 = vcombine.low %v4704_v10, %v4711_v19  ;;  %v4843_v8 = vmax.f32 %v4838_v26, %v4841_v38 }
0x1425   :  { %4845 = vrot.lane.b32.xlu0 %v4843_v8, %s12320_s18  ;;  %v4727_v22 = vrot.slane %v4713_v5, %v12518_v9 }
0x1427   :  { %v4728_v37 = vcombine.low %v4720_v13, %v4727_v22 }
0x1429   :  { %4847 = vrot.lane.b32.xlu0 %v4843_v8, %s12319_s17  ;;  %v4730_v17 = vsel %vm79_vm0, %v4728_v37, -inf }
0x142a   :  { %4731 = vmax.xlane.f32.xlu1 %v4730_v17 }
0x142d   :  { %4849 = vrot.lane.b32.xlu0 %v4843_v8, %s12321_s19 }
0x1431   :  { %4853 = vrot.lane.b32.xlu0 %v4843_v8, %s12323_s21 }
0x1435   :  { %4855 = vrot.lane.b32.xlu0 %v4843_v8, %s12324_s22 }
0x1439   :  { %4857 = vrot.lane.b32.xlu0 %v4843_v8, %s12325_s23 }
0x143b   :  { %4851 = vrot.lane.b32.xlu1 %v4843_v8, %s12322_s20 }
0x143d   :  { %4859 = vrot.lane.b32.xlu0 %v4843_v8, %s12326_s24 }
0x1497   :  { %v4846_v18 = vpop.permute.xlu0 %4845 }
0x1498   :  { %4861 = vrot.lane.b32.xlu1 %v4846_v18, %s12326_s24 }
0x149b   :  { %v4848_v24 = vpop.permute.xlu0 %4847 }
0x149c   :  { %4863 = vrot.lane.b32.xlu0 %v4848_v24, %s12326_s24 }
0x149f   :  { %v4850_v42 = vpop.permute.xlu0 %4849 }
0x14a0   :  { %4865 = vrot.lane.b32.xlu1 %v4850_v42, %s12326_s24 }
0x14a3   :  { %v4854_v43 = vpop.permute.xlu0 %4853 }
0x14a4   :  { %4869 = vrot.lane.b32.xlu1 %v4854_v43, %s12326_s24 }
0x14a7   :  { %v4856_v44 = vpop.permute.xlu0 %4855 }
0x14ab   :  { %v4858_v45 = vpop.permute.xlu0 %4857 }
0x14ac   :  { %4873 = vrot.lane.b32.xlu1 %v4858_v45, %s12326_s24 }
0x14af   :  { %v4860_v26 = vpop.permute.xlu0 %4859 }
0x14b0   :  { %5035 = vrot.lane.b32.xlu1 %v5033_v55, %s12318_s10 }
0x14b3   :  { %v13159_v56 = vpop.xlane.xlu1 %4731 }
0x14b4   :  { %17310 = vst [vmem:[#allocation12_spill] sm:$0xff] %v13159_v56 }
0x14b7   :  { %v4852_v28 = vpop.permute.xlu1 %4851 }
0x14b8   :  { %4867 = vrot.lane.b32.xlu0 %v4852_v28, %s12326_s24 }
0x14bc   :  { %4871 = vrot.lane.b32.xlu0 %v4856_v44, %s12326_s24  ;;  %v5228_v44 = vld [vmem:[%s17189_s0 + $0x6] sm:$0x1] }
0x150a   :  { %v4862_v48 = vpop.permute.xlu1 %4861 }
0x150b   :  { %v4875_v0 = vcombine.low %v4860_v26, %v4862_v48 }
0x150d   :  { %v4885_v12 = vrot.slane %v4875_v0, %v12518_v9 }
0x150e   :  { %v4864_v30 = vpop.permute.xlu0 %4863 }
0x1512   :  { %v4866_v57 = vpop.permute.xlu1 %4865 }
0x1513   :  { %v4876_v62 = vcombine.low %v4864_v30, %v4866_v57 }
0x1515   :  { %v4892_v61 = vrot.slane %v4876_v62, %v12518_v9 }
0x1516   :  { %v4870_v58 = vpop.permute.xlu1 %4869 }
0x1517   :  { %v4907_v34 = vcombine.low %v4885_v12, %v4892_v61 }
0x1519   :  { %v4915_v19 = vrot.slane %v4907_v34, %v12518_v9 }
0x151e   :  { %v4874_v59 = vpop.permute.xlu1 %4873 }
0x1522   :  { %v5036_v47 = vpop.permute.xlu1 %5035 }
0x1523   :  { %v5038_v60 = vmax.f32 %v5033_v55, %v5036_v47 }
0x1525   :  { %5040 = vrot.lane.b32.xlu1 %v5038_v60, %s12320_s18 }
0x1529   :  { %5042 = vrot.lane.b32.xlu1 %v5038_v60, %s12319_s17 }
0x152a   :  { %v4868_v63 = vpop.permute.xlu0 %4867 }
0x152b   :  { %v4877_v3 = vcombine.low %v4868_v63, %v4870_v58 }
0x152d   :  { %5044 = vrot.lane.b32.xlu1 %v5038_v60, %s12321_s19  ;;  %v4899_v35 = vrot.slane %v4877_v3, %v12518_v9 }
0x152e   :  { %v4872_v15 = vpop.permute.xlu0 %4871 }
0x152f   :  { %v4878_v32 = vcombine.low %v4872_v15, %v4874_v59 }
0x1531   :  { %v4906_v49 = vrot.slane %v4878_v32, %v12518_v9  ;;  %5046 = vrot.lane.b32.xlu1 %v5038_v60, %s12322_s20 }
0x1533   :  { %v4908_v10 = vcombine.low %v4899_v35, %v4906_v49 }
0x1535   :  { %5048 = vrot.lane.b32.xlu1 %v5038_v60, %s12323_s21  ;;  %v4922_v38 = vrot.slane %v4908_v10, %v12518_v9 }
0x1537   :  { %v4923_v5 = vcombine.low %v4915_v19, %v4922_v38 }
0x1539   :  { %v4925_v8 = vsel %vm79_vm0, %v4923_v5, -inf  ;;  %5050 = vrot.lane.b32.xlu1 %v5038_v60, %s12324_s22 }
0x153a   :  { %4926 = vmax.xlane.f32.xlu0 %v4925_v8 }
0x153d   :  { %5054 = vrot.lane.b32.xlu1 %v5038_v60, %s12328_s26 }
0x1550   :  { %5052 = vrot.lane.b32.xlu0 %v5038_v60, %s12325_s23 }
0x1597   :  { %v5041_v13 = vpop.permute.xlu1 %5040 }
0x1598   :  { %5056 = vrot.lane.b32.xlu1 %v5041_v13, %s12328_s26 }
0x159b   :  { %v5043_v22 = vpop.permute.xlu1 %5042 }
0x159c   :  { %5058 = vrot.lane.b32.xlu1 %v5043_v22, %s12328_s26 }
0x159f   :  { %v5045_v37 = vpop.permute.xlu1 %5044 }
0x15a0   :  { %5060 = vrot.lane.b32.xlu1 %v5045_v37, %s12328_s26 }
0x15a3   :  { %v5047_v17 = vpop.permute.xlu1 %5046 }
0x15a4   :  { %5062 = vrot.lane.b32.xlu1 %v5047_v17, %s12328_s26 }
0x15a7   :  { %v5049_v18 = vpop.permute.xlu1 %5048 }
0x15a8   :  { %5064 = vrot.lane.b32.xlu0 %v5049_v18, %s12328_s26  ;;  %v5423_v18 = vld [vmem:[%s17189_s0 + $0x7] sm:$0x1] }
0x15ab   :  { %v5051_v24 = vpop.permute.xlu1 %5050 }
0x15ac   :  { %5066 = vrot.lane.b32.xlu1 %v5051_v24, %s12328_s26 }
0x15af   :  { %v5055_v45 = vpop.permute.xlu1 %5054 }
0x15c3   :  { %v13184_v42 = vpop.xlane.xlu0 %4926 }
0x15c4   :  { %17311 = vst [vmem:[#allocation13_spill] sm:$0xff] %v13184_v42 }
0x15c7   :  { %v5053_v43 = vpop.permute.xlu0 %5052 }
0x15c8   :  { %5068 = vrot.lane.b32.xlu0 %v5053_v43, %s12328_s26 }
0x15cc   :  { %5230 = vrot.lane.b32.xlu0 %v5228_v44, %s12318_s10 }
0x160a   :  { %v5057_v55 = vpop.permute.xlu1 %5056 }
0x160b   :  { %v5070_v26 = vcombine.low %v5055_v45, %v5057_v55 }
0x160d   :  { %v5080_v63 = vrot.slane %v5070_v26, %v12518_v9 }
0x160e   :  { %v5059_v28 = vpop.permute.xlu1 %5058 }
0x1612   :  { %v5061_v48 = vpop.permute.xlu1 %5060 }
0x1613   :  { %v5071_v58 = vcombine.low %v5059_v28, %v5061_v48 }
0x1615   :  { %v5087_v47 = vrot.slane %v5071_v58, %v12518_v9 }
0x1616   :  { %v5063_v57 = vpop.permute.xlu1 %5062 }
0x1617   :  { %v5102_v61 = vcombine.low %v5080_v63, %v5087_v47 }
0x1619   :  { %v5110_v35 = vrot.slane %v5102_v61, %v12518_v9 }
0x161a   :  { %v5065_v59 = vpop.permute.xlu0 %5064 }
0x161b   :  { %v5072_v60 = vcombine.low %v5063_v57, %v5065_v59 }
0x161d   :  { %v5094_v3 = vrot.slane %v5072_v60, %v12518_v9 }
0x161e   :  { %v5067_v30 = vpop.permute.xlu1 %5066 }
0x163a   :  { %v5069_v62 = vpop.permute.xlu0 %5068 }
0x163b   :  { %v5073_v0 = vcombine.low %v5067_v30, %v5069_v62 }
0x163d   :  { %v5101_v15 = vrot.slane %v5073_v0, %v12518_v9 }
0x163e   :  { %v5231_v12 = vpop.permute.xlu0 %5230 }
0x163f   :  { %v5103_v32 = vcombine.low %v5094_v3, %v5101_v15  ;;  %v5233_v34 = vmax.f32 %v5228_v44, %v5231_v12 }
0x1641   :  { %5235 = vrot.lane.b32.xlu0 %v5233_v34, %s12320_s18  ;;  %v5117_v49 = vrot.slane %v5103_v32, %v12518_v9 }
0x1643   :  { %v5118_v10 = vcombine.low %v5110_v35, %v5117_v49 }
0x1645   :  { %5237 = vrot.lane.b32.xlu0 %v5233_v34, %s12319_s17  ;;  %v5120_v19 = vsel %vm79_vm0, %v5118_v10, -inf  ;;  %v5602_v10 = vld [vmem:[%s17189_s0 + $0x7] sm:$0x1] }
0x1646   :  { %5121 = vmax.xlane.f32.xlu1 %v5120_v19 }
0x1649   :  { %5239 = vrot.lane.b32.xlu0 %v5233_v34, %s12321_s19 }
0x164d   :  { %5241 = vrot.lane.b32.xlu0 %v5233_v34, %s12322_s20 }
0x1651   :  { %5243 = vrot.lane.b32.xlu0 %v5233_v34, %s12323_s21 }
0x1655   :  { %5245 = vrot.lane.b32.xlu0 %v5233_v34, %s12324_s22 }
0x1657   :  { %5249 = vrot.lane.b32.xlu1 %v5233_v34, %s12327_s25 }
0x1659   :  { %5247 = vrot.lane.b32.xlu0 %v5233_v34, %s12325_s23 }
0x16b3   :  { %v5236_v38 = vpop.permute.xlu0 %5235 }
0x16b4   :  { %5251 = vrot.lane.b32.xlu0 %v5236_v38, %s12327_s25 }
0x16b7   :  { %v5238_v5 = vpop.permute.xlu0 %5237 }
0x16b8   :  { %5253 = vrot.lane.b32.xlu0 %v5238_v5, %s12327_s25 }
0x16bb   :  { %v5240_v8 = vpop.permute.xlu0 %5239 }
0x16bc   :  { %5255 = vrot.lane.b32.xlu0 %v5240_v8, %s12327_s25 }
0x16bf   :  { %v5242_v13 = vpop.permute.xlu0 %5241 }
0x16c0   :  { %5257 = vrot.lane.b32.xlu0 %v5242_v13, %s12327_s25 }
0x16c3   :  { %v5244_v22 = vpop.permute.xlu0 %5243 }
0x16c4   :  { %5259 = vrot.lane.b32.xlu1 %v5244_v22, %s12327_s25 }
0x16c7   :  { %v5246_v37 = vpop.permute.xlu0 %5245 }
0x16c8   :  { %5261 = vrot.lane.b32.xlu0 %v5246_v37, %s12327_s25 }
0x16cb   :  { %v5248_v17 = vpop.permute.xlu0 %5247 }
0x16cc   :  { %5263 = vrot.lane.b32.xlu1 %v5248_v17, %s12327_s25 }
0x16cf   :  { %v13217_v44 = vpop.xlane.xlu1 %5121 }
0x16d0   :  { %5425 = vrot.lane.b32.xlu1 %v5423_v18, %s12318_s10  ;;  %17312 = vst [vmem:[#allocation14_spill] sm:$0xff] %v13217_v44 }
0x16d3   :  { %v5250_v55 = vpop.permute.xlu1 %5249 }
0x1726   :  { %v5252_v24 = vpop.permute.xlu0 %5251 }
0x1727   :  { %v5265_v58 = vcombine.low %v5250_v55, %v5252_v24 }
0x1729   :  { %v5275_v30 = vrot.slane %v5265_v58, %v12518_v9 }
0x172a   :  { %v5254_v43 = vpop.permute.xlu0 %5253 }
0x172e   :  { %v5256_v45 = vpop.permute.xlu0 %5255 }
0x172f   :  { %v5266_v28 = vcombine.low %v5254_v43, %v5256_v45 }
0x1731   :  { %v5282_v59 = vrot.slane %v5266_v28, %v12518_v9 }
0x1732   :  { %v5258_v48 = vpop.permute.xlu0 %5257 }
0x1733   :  { %v5297_v63 = vcombine.low %v5275_v30, %v5282_v59 }
0x1735   :  { %v5305_v32 = vrot.slane %v5297_v63, %v12518_v9 }
0x1736   :  { %v5260_v57 = vpop.permute.xlu1 %5259 }
0x1737   :  { %v5267_v26 = vcombine.low %v5258_v48, %v5260_v57 }
0x1739   :  { %v5289_v0 = vrot.slane %v5267_v26, %v12518_v9 }
0x173a   :  { %v5262_v47 = vpop.permute.xlu0 %5261 }
0x173e   :  { %v5264_v60 = vpop.permute.xlu1 %5263 }
0x173f   :  { %v5268_v62 = vcombine.low %v5262_v47, %v5264_v60 }
0x1741   :  { %v5296_v61 = vrot.slane %v5268_v62, %v12518_v9 }
0x1742   :  { %v5426_v3 = vpop.permute.xlu1 %5425 }
0x1743   :  { %v5298_v15 = vcombine.low %v5289_v0, %v5296_v61  ;;  %v5428_v12 = vmax.f32 %v5423_v18, %v5426_v3 }
0x1745   :  { %5430 = vrot.lane.b32.xlu1 %v5428_v12, %s12320_s18  ;;  %v5312_v34 = vrot.slane %v5298_v15, %v12518_v9 }
0x1747   :  { %v5313_v35 = vcombine.low %v5305_v32, %v5312_v34  ;;  %v5797_v34 = vld [vmem:[%s17189_s0 + $0x7] sm:$0x1] }
0x1749   :  { %5432 = vrot.lane.b32.xlu1 %v5428_v12, %s12319_s17  ;;  %v5315_v49 = vsel %vm79_vm0, %v5313_v35, -inf }
0x174a   :  { %5316 = vmax.xlane.f32.xlu0 %v5315_v49 }
0x174d   :  { %5434 = vrot.lane.b32.xlu1 %v5428_v12, %s12321_s19 }
0x1751   :  { %5436 = vrot.lane.b32.xlu1 %v5428_v12, %s12322_s20 }
0x1755   :  { %5438 = vrot.lane.b32.xlu1 %v5428_v12, %s12323_s21 }
0x1759   :  { %5440 = vrot.lane.b32.xlu1 %v5428_v12, %s12324_s22 }
0x1760   :  { %5442 = vrot.lane.b32.xlu0 %v5428_v12, %s12325_s23 }
0x1764   :  { %5604 = vrot.lane.b32.xlu0 %v5602_v10, %s12318_s10 }
0x17b7   :  { %v5431_v19 = vpop.permute.xlu1 %5430 }
0x17b8   :  { %v5444_v17 = vcombine.low %v5428_v12, %v5431_v19 }
0x17ba   :  { %v5454_v55 = vrot.slane %v5444_v17, %v12518_v9 }
0x17bb   :  { %v5433_v38 = vpop.permute.xlu1 %5432 }
0x17bf   :  { %v5435_v5 = vpop.permute.xlu1 %5434 }
0x17c0   :  { %v5445_v22 = vcombine.low %v5433_v38, %v5435_v5 }
0x17c2   :  { %v5461_v18 = vrot.slane %v5445_v22, %v12518_v9 }
0x17c3   :  { %v5437_v8 = vpop.permute.xlu1 %5436 }
0x17c4   :  { %v5476_v48 = vcombine.low %v5454_v55, %v5461_v18 }
0x17c6   :  { %v5484_v60 = vrot.slane %v5476_v48, %v12518_v9 }
0x17c7   :  { %v5439_v13 = vpop.permute.xlu1 %5438 }
0x17c8   :  { %v5446_v24 = vcombine.low %v5437_v8, %v5439_v13 }
0x17ca   :  { %v5468_v57 = vrot.slane %v5446_v24, %v12518_v9 }
0x17cb   :  { %v5441_v43 = vpop.permute.xlu1 %5440 }
0x17d3   :  { %v13237_v37 = vpop.xlane.xlu0 %5316 }
0x17d4   :  { %17313 = vst [vmem:[#allocation15_spill] sm:$0xff] %v13237_v37 }
0x17d7   :  { %v5443_v45 = vpop.permute.xlu0 %5442 }
0x17d8   :  { %v5447_v28 = vcombine.low %v5441_v43, %v5443_v45 }
0x17da   :  { %v5475_v58 = vrot.slane %v5447_v28, %v12518_v9 }
0x17db   :  { %v5605_v59 = vpop.permute.xlu0 %5604 }
0x17dc   :  { %v5477_v26 = vcombine.low %v5468_v57, %v5475_v58  ;;  %v5607_v47 = vmax.f32 %v5602_v10, %v5605_v59 }
0x17de   :  { %5609 = vrot.lane.b32.xlu0 %v5607_v47, %s12320_s18  ;;  %v5491_v30 = vrot.slane %v5477_v26, %v12518_v9 }
0x17e0   :  { %v5492_v62 = vcombine.low %v5484_v60, %v5491_v30 }
0x17e2   :  { %5611 = vrot.lane.b32.xlu0 %v5607_v47, %s12319_s17  ;;  %v5494_v63 = vsel %vm79_vm0, %v5492_v62, -inf }
0x17e3   :  { %5495 = vmax.xlane.f32.xlu1 %v5494_v63 }
0x17e6   :  { %5613 = vrot.lane.b32.xlu0 %v5607_v47, %s12321_s19 }
0x17ea   :  { %5617 = vrot.lane.b32.xlu0 %v5607_v47, %s12323_s21 }
0x17ee   :  { %5619 = vrot.lane.b32.xlu0 %v5607_v47, %s12324_s22 }
0x17f2   :  { %5621 = vrot.lane.b32.xlu0 %v5607_v47, %s12325_s23 }
0x17f4   :  { %5615 = vrot.lane.b32.xlu1 %v5607_v47, %s12322_s20 }
0x17f6   :  { %5623 = vrot.lane.b32.xlu0 %v5607_v47, %s12326_s24 }
0x1850   :  { %v5610_v0 = vpop.permute.xlu0 %5609 }
0x1851   :  { %5625 = vrot.lane.b32.xlu1 %v5610_v0, %s12326_s24 }
0x1854   :  { %v5612_v61 = vpop.permute.xlu0 %5611 }
0x1855   :  { %5627 = vrot.lane.b32.xlu0 %v5612_v61, %s12326_s24 }
0x1858   :  { %v5614_v3 = vpop.permute.xlu0 %5613 }
0x1859   :  { %5629 = vrot.lane.b32.xlu1 %v5614_v3, %s12326_s24 }
0x185c   :  { %v5618_v15 = vpop.permute.xlu0 %5617 }
0x185d   :  { %5633 = vrot.lane.b32.xlu1 %v5618_v15, %s12326_s24 }
0x1860   :  { %v5620_v12 = vpop.permute.xlu0 %5619 }
0x1864   :  { %v5622_v32 = vpop.permute.xlu0 %5621 }
0x1865   :  { %5637 = vrot.lane.b32.xlu1 %v5622_v32, %s12326_s24 }
0x1868   :  { %v5624_v8 = vpop.permute.xlu0 %5623 }
0x1869   :  { %5799 = vrot.lane.b32.xlu1 %v5797_v34, %s12318_s10 }
0x186c   :  { %v13263_v35 = vpop.xlane.xlu1 %5495 }
0x186d   :  { %17314 = vst [vmem:[#allocation16_spill] sm:$0xff] %v13263_v35 }
0x1870   :  { %v5616_v49 = vpop.permute.xlu1 %5615 }
0x1871   :  { %5631 = vrot.lane.b32.xlu0 %v5616_v49, %s12326_s24 }
0x1875   :  { %5635 = vrot.lane.b32.xlu0 %v5620_v12, %s12326_s24 }
0x18c3   :  { %v5626_v10 = vpop.permute.xlu1 %5625 }
0x18c4   :  { %v5639_v43 = vcombine.low %v5624_v8, %v5626_v10  ;;  %v5992_v10 = vld [vmem:[%s17189_s0 + $0x7] sm:$0x1] }
0x18c6   :  { %v5649_v48 = vrot.slane %v5639_v43, %v12518_v9 }
0x18c7   :  { %v5628_v17 = vpop.permute.xlu0 %5627 }
0x18cb   :  { %v5630_v19 = vpop.permute.xlu1 %5629 }
0x18cc   :  { %v5640_v18 = vcombine.low %v5628_v17, %v5630_v19 }
0x18ce   :  { %v5656_v45 = vrot.slane %v5640_v18, %v12518_v9 }
0x18cf   :  { %v5634_v38 = vpop.permute.xlu1 %5633 }
0x18d0   :  { %v5671_v58 = vcombine.low %v5649_v48, %v5656_v45 }
0x18d2   :  { %v5679_v60 = vrot.slane %v5671_v58, %v12518_v9 }
0x18d7   :  { %v5638_v5 = vpop.permute.xlu1 %5637 }
0x18db   :  { %v5800_v13 = vpop.permute.xlu1 %5799 }
0x18dc   :  { %v5802_v22 = vmax.f32 %v5797_v34, %v5800_v13 }
0x18de   :  { %5804 = vrot.lane.b32.xlu1 %v5802_v22, %s12320_s18 }
0x18e2   :  { %5806 = vrot.lane.b32.xlu1 %v5802_v22, %s12319_s17 }
0x18e3   :  { %v5632_v24 = vpop.permute.xlu0 %5631 }
0x18e4   :  { %v5641_v55 = vcombine.low %v5632_v24, %v5634_v38 }
0x18e6   :  { %5808 = vrot.lane.b32.xlu1 %v5802_v22, %s12321_s19  ;;  %v5663_v59 = vrot.slane %v5641_v55, %v12518_v9 }
0x18e7   :  { %v5636_v28 = vpop.permute.xlu0 %5635 }
0x18e8   :  { %v5642_v57 = vcombine.low %v5636_v28, %v5638_v5 }
0x18ea   :  { %v5670_v26 = vrot.slane %v5642_v57, %v12518_v9  ;;  %5810 = vrot.lane.b32.xlu1 %v5802_v22, %s12322_s20 }
0x18ec   :  { %v5672_v47 = vcombine.low %v5663_v59, %v5670_v26 }
0x18ee   :  { %5812 = vrot.lane.b32.xlu1 %v5802_v22, %s12323_s21  ;;  %v5686_v30 = vrot.slane %v5672_v47, %v12518_v9 }
0x18f0   :  { %v5687_v62 = vcombine.low %v5679_v60, %v5686_v30 }
0x18f2   :  { %v5689_v63 = vsel %vm79_vm0, %v5687_v62, -inf  ;;  %5814 = vrot.lane.b32.xlu1 %v5802_v22, %s12324_s22 }
0x18f3   :  { %5690 = vmax.xlane.f32.xlu0 %v5689_v63 }
0x18f6   :  { %5818 = vrot.lane.b32.xlu1 %v5802_v22, %s12328_s26 }
0x1909   :  { %5816 = vrot.lane.b32.xlu0 %v5802_v22, %s12325_s23 }
0x1950   :  { %v5805_v0 = vpop.permute.xlu1 %5804 }
0x1951   :  { %5820 = vrot.lane.b32.xlu1 %v5805_v0, %s12328_s26 }
0x1954   :  { %v5807_v61 = vpop.permute.xlu1 %5806 }
0x1955   :  { %5822 = vrot.lane.b32.xlu1 %v5807_v61, %s12328_s26 }
0x1958   :  { %v5809_v3 = vpop.permute.xlu1 %5808 }
0x1959   :  { %5824 = vrot.lane.b32.xlu1 %v5809_v3, %s12328_s26 }
0x195c   :  { %v5811_v15 = vpop.permute.xlu1 %5810 }
0x195d   :  { %5826 = vrot.lane.b32.xlu1 %v5811_v15, %s12328_s26 }
0x1960   :  { %v5813_v12 = vpop.permute.xlu1 %5812 }
0x1961   :  { %5828 = vrot.lane.b32.xlu0 %v5813_v12, %s12328_s26 }
0x1964   :  { %v5815_v32 = vpop.permute.xlu1 %5814 }
0x1965   :  { %5830 = vrot.lane.b32.xlu1 %v5815_v32, %s12328_s26 }
0x1968   :  { %v5819_v19 = vpop.permute.xlu1 %5818 }
0x197c   :  { %v13288_v34 = vpop.xlane.xlu0 %5690 }
0x197d   :  { %17315 = vst [vmem:[#allocation17_spill] sm:$0xff] %v13288_v34 }
0x1980   :  { %v5817_v49 = vpop.permute.xlu0 %5816 }
0x1981   :  { %5832 = vrot.lane.b32.xlu0 %v5817_v49, %s12328_s26 }
0x1985   :  { %5994 = vrot.lane.b32.xlu0 %v5992_v10, %s12318_s10 }
0x19c3   :  { %v5821_v38 = vpop.permute.xlu1 %5820 }
0x19c4   :  { %v5834_v18 = vcombine.low %v5819_v19, %v5821_v38  ;;  %v6187_v19 = vld [vmem:[%s17189_s0 + $0x8] sm:$0x1] }
0x19c6   :  { %v5844_v28 = vrot.slane %v5834_v18, %v12518_v9 }
0x19c7   :  { %v5823_v5 = vpop.permute.xlu1 %5822 }
0x19cb   :  { %v5825_v8 = vpop.permute.xlu1 %5824 }
0x19cc   :  { %v5835_v22 = vcombine.low %v5823_v5, %v5825_v8 }
0x19ce   :  { %v5851_v24 = vrot.slane %v5835_v22, %v12518_v9 }
0x19cf   :  { %v5827_v13 = vpop.permute.xlu1 %5826 }
0x19d0   :  { %v5866_v57 = vcombine.low %v5844_v28, %v5851_v24 }
0x19d2   :  { %v5874_v30 = vrot.slane %v5866_v57, %v12518_v9 }
0x19d3   :  { %v5829_v17 = vpop.permute.xlu0 %5828 }
0x19d4   :  { %v5836_v43 = vcombine.low %v5827_v13, %v5829_v17 }
0x19d6   :  { %v5858_v58 = vrot.slane %v5836_v43, %v12518_v9 }
0x19d7   :  { %v5831_v45 = vpop.permute.xlu1 %5830 }
0x19f3   :  { %v5833_v55 = vpop.permute.xlu0 %5832 }
0x19f4   :  { %v5837_v48 = vcombine.low %v5831_v45, %v5833_v55 }
0x19f6   :  { %v5865_v59 = vrot.slane %v5837_v48, %v12518_v9 }
0x19f7   :  { %v5995_v26 = vpop.permute.xlu0 %5994 }
0x19f8   :  { %v5867_v47 = vcombine.low %v5858_v58, %v5865_v59  ;;  %v5997_v60 = vmax.f32 %v5992_v10, %v5995_v26 }
0x19fa   :  { %5999 = vrot.lane.b32.xlu0 %v5997_v60, %s12320_s18  ;;  %v5881_v62 = vrot.slane %v5867_v47, %v12518_v9 }
0x19fc   :  { %v5882_v63 = vcombine.low %v5874_v30, %v5881_v62 }
0x19fe   :  { %6001 = vrot.lane.b32.xlu0 %v5997_v60, %s12319_s17  ;;  %v5884_v0 = vsel %vm79_vm0, %v5882_v63, -inf }
0x19ff   :  { %5885 = vmax.xlane.f32.xlu1 %v5884_v0 }
0x1a02   :  { %6003 = vrot.lane.b32.xlu0 %v5997_v60, %s12321_s19 }
0x1a06   :  { %6005 = vrot.lane.b32.xlu0 %v5997_v60, %s12322_s20 }
0x1a0a   :  { %6007 = vrot.lane.b32.xlu0 %v5997_v60, %s12323_s21 }
0x1a0e   :  { %6009 = vrot.lane.b32.xlu0 %v5997_v60, %s12324_s22 }
0x1a10   :  { %6013 = vrot.lane.b32.xlu1 %v5997_v60, %s12327_s25 }
0x1a12   :  { %6011 = vrot.lane.b32.xlu0 %v5997_v60, %s12325_s23 }
0x1a6c   :  { %v6000_v61 = vpop.permute.xlu0 %5999 }
0x1a6d   :  { %6015 = vrot.lane.b32.xlu0 %v6000_v61, %s12327_s25 }
0x1a70   :  { %v6002_v3 = vpop.permute.xlu0 %6001 }
0x1a71   :  { %6017 = vrot.lane.b32.xlu0 %v6002_v3, %s12327_s25 }
0x1a74   :  { %v6004_v15 = vpop.permute.xlu0 %6003 }
0x1a75   :  { %6019 = vrot.lane.b32.xlu0 %v6004_v15, %s12327_s25  ;;  %v6366_v15 = vld [vmem:[%s17189_s0 + $0x8] sm:$0x1] }
0x1a78   :  { %v6006_v12 = vpop.permute.xlu0 %6005 }
0x1a79   :  { %6021 = vrot.lane.b32.xlu0 %v6006_v12, %s12327_s25 }
0x1a7c   :  { %v6008_v32 = vpop.permute.xlu0 %6007 }
0x1a7d   :  { %6023 = vrot.lane.b32.xlu1 %v6008_v32, %s12327_s25 }
0x1a80   :  { %v6010_v49 = vpop.permute.xlu0 %6009 }
0x1a81   :  { %6025 = vrot.lane.b32.xlu0 %v6010_v49, %s12327_s25 }
0x1a84   :  { %v6012_v10 = vpop.permute.xlu0 %6011 }
0x1a85   :  { %6027 = vrot.lane.b32.xlu1 %v6012_v10, %s12327_s25 }
0x1a88   :  { %v13321_v8 = vpop.xlane.xlu1 %5885 }
0x1a89   :  { %6189 = vrot.lane.b32.xlu1 %v6187_v19, %s12318_s10  ;;  %17316 = vst [vmem:[#allocation18_spill] sm:$0xff] %v13321_v8 }
0x1a8c   :  { %v6014_v22 = vpop.permute.xlu1 %6013 }
0x1adf   :  { %v6016_v38 = vpop.permute.xlu0 %6015 }
0x1ae0   :  { %v6029_v43 = vcombine.low %v6014_v22, %v6016_v38 }
0x1ae2   :  { %v6039_v57 = vrot.slane %v6029_v43, %v12518_v9 }
0x1ae3   :  { %v6018_v5 = vpop.permute.xlu0 %6017 }
0x1ae7   :  { %v6020_v13 = vpop.permute.xlu0 %6019 }
0x1ae8   :  { %v6030_v17 = vcombine.low %v6018_v5, %v6020_v13 }
0x1aea   :  { %v6046_v45 = vrot.slane %v6030_v17, %v12518_v9 }
0x1aeb   :  { %v6022_v18 = vpop.permute.xlu0 %6021 }
0x1aec   :  { %v6061_v59 = vcombine.low %v6039_v57, %v6046_v45 }
0x1aee   :  { %v6069_v63 = vrot.slane %v6061_v59, %v12518_v9 }
0x1aef   :  { %v6024_v24 = vpop.permute.xlu1 %6023 }
0x1af0   :  { %v6031_v55 = vcombine.low %v6022_v18, %v6024_v24 }
0x1af2   :  { %v6053_v26 = vrot.slane %v6031_v55, %v12518_v9 }
0x1af3   :  { %v6026_v28 = vpop.permute.xlu0 %6025 }
0x1af7   :  { %v6028_v48 = vpop.permute.xlu1 %6027 }
0x1af8   :  { %v6032_v58 = vcombine.low %v6026_v28, %v6028_v48 }
0x1afa   :  { %v6060_v47 = vrot.slane %v6032_v58, %v12518_v9 }
0x1afb   :  { %v6190_v60 = vpop.permute.xlu1 %6189 }
0x1afc   :  { %v6062_v30 = vcombine.low %v6053_v26, %v6060_v47  ;;  %v6192_v62 = vmax.f32 %v6187_v19, %v6190_v60 }
0x1afe   :  { %6194 = vrot.lane.b32.xlu1 %v6192_v62, %s12320_s18  ;;  %v6076_v0 = vrot.slane %v6062_v30, %v12518_v9 }
0x1b00   :  { %v6077_v61 = vcombine.low %v6069_v63, %v6076_v0 }
0x1b02   :  { %6196 = vrot.lane.b32.xlu1 %v6192_v62, %s12319_s17  ;;  %v6079_v3 = vsel %vm79_vm0, %v6077_v61, -inf }
0x1b03   :  { %6080 = vmax.xlane.f32.xlu0 %v6079_v3 }
0x1b06   :  { %6198 = vrot.lane.b32.xlu1 %v6192_v62, %s12321_s19 }
0x1b0a   :  { %6200 = vrot.lane.b32.xlu1 %v6192_v62, %s12322_s20 }
0x1b0e   :  { %6202 = vrot.lane.b32.xlu1 %v6192_v62, %s12323_s21 }
0x1b12   :  { %6204 = vrot.lane.b32.xlu1 %v6192_v62, %s12324_s22 }
0x1b19   :  { %6206 = vrot.lane.b32.xlu0 %v6192_v62, %s12325_s23 }
0x1b1d   :  { %6368 = vrot.lane.b32.xlu0 %v6366_v15, %s12318_s10 }
0x1b70   :  { %v6195_v12 = vpop.permute.xlu1 %6194 }
0x1b71   :  { %v6208_v13 = vcombine.low %v6192_v62, %v6195_v12  ;;  %v6561_v12 = vld [vmem:[%s17189_s0 + $0x8] sm:$0x1] }
0x1b73   :  { %v6218_v43 = vrot.slane %v6208_v13, %v12518_v9 }
0x1b74   :  { %v6197_v32 = vpop.permute.xlu1 %6196 }
0x1b78   :  { %v6199_v49 = vpop.permute.xlu1 %6198 }
0x1b79   :  { %v6209_v38 = vcombine.low %v6197_v32, %v6199_v49 }
0x1b7b   :  { %v6225_v22 = vrot.slane %v6209_v38, %v12518_v9 }
0x1b7c   :  { %v6201_v10 = vpop.permute.xlu1 %6200 }
0x1b7d   :  { %v6240_v55 = vcombine.low %v6218_v43, %v6225_v22 }
0x1b7f   :  { %v6248_v26 = vrot.slane %v6240_v55, %v12518_v9 }
0x1b80   :  { %v6203_v19 = vpop.permute.xlu1 %6202 }
0x1b81   :  { %v6210_v17 = vcombine.low %v6201_v10, %v6203_v19 }
0x1b83   :  { %v6232_v28 = vrot.slane %v6210_v17, %v12518_v9 }
0x1b84   :  { %v6205_v18 = vpop.permute.xlu1 %6204 }
0x1b8c   :  { %v13341_v5 = vpop.xlane.xlu0 %6080 }
0x1b8d   :  { %17317 = vst [vmem:[#allocation19_spill] sm:$0xff] %v13341_v5 }
0x1b90   :  { %v6207_v24 = vpop.permute.xlu0 %6206 }
0x1b91   :  { %v6211_v45 = vcombine.low %v6205_v18, %v6207_v24 }
0x1b93   :  { %v6239_v48 = vrot.slane %v6211_v45, %v12518_v9 }
0x1b94   :  { %v6369_v57 = vpop.permute.xlu0 %6368 }
0x1b95   :  { %v6241_v58 = vcombine.low %v6232_v28, %v6239_v48  ;;  %v6371_v59 = vmax.f32 %v6366_v15, %v6369_v57 }
0x1b97   :  { %6373 = vrot.lane.b32.xlu0 %v6371_v59, %s12320_s18  ;;  %v6255_v47 = vrot.slane %v6241_v58, %v12518_v9 }
0x1b99   :  { %v6256_v60 = vcombine.low %v6248_v26, %v6255_v47 }
0x1b9b   :  { %6375 = vrot.lane.b32.xlu0 %v6371_v59, %s12319_s17  ;;  %v6258_v30 = vsel %vm79_vm0, %v6256_v60, -inf }
0x1b9c   :  { %6259 = vmax.xlane.f32.xlu1 %v6258_v30 }
0x1b9f   :  { %6377 = vrot.lane.b32.xlu0 %v6371_v59, %s12321_s19 }
0x1ba3   :  { %6381 = vrot.lane.b32.xlu0 %v6371_v59, %s12323_s21 }
0x1ba7   :  { %6383 = vrot.lane.b32.xlu0 %v6371_v59, %s12324_s22 }
0x1bab   :  { %6385 = vrot.lane.b32.xlu0 %v6371_v59, %s12325_s23 }
0x1bad   :  { %6379 = vrot.lane.b32.xlu1 %v6371_v59, %s12322_s20 }
0x1baf   :  { %6387 = vrot.lane.b32.xlu0 %v6371_v59, %s12326_s24 }
0x1c09   :  { %v6374_v62 = vpop.permute.xlu0 %6373 }
0x1c0a   :  { %6389 = vrot.lane.b32.xlu1 %v6374_v62, %s12326_s24 }
0x1c0d   :  { %v6376_v63 = vpop.permute.xlu0 %6375 }
0x1c0e   :  { %6391 = vrot.lane.b32.xlu0 %v6376_v63, %s12326_s24 }
0x1c11   :  { %v6378_v0 = vpop.permute.xlu0 %6377 }
0x1c12   :  { %6393 = vrot.lane.b32.xlu1 %v6378_v0, %s12326_s24 }
0x1c15   :  { %v6382_v61 = vpop.permute.xlu0 %6381 }
0x1c16   :  { %6397 = vrot.lane.b32.xlu1 %v6382_v61, %s12326_s24 }
0x1c19   :  { %v6384_v3 = vpop.permute.xlu0 %6383 }
0x1c1d   :  { %v6386_v15 = vpop.permute.xlu0 %6385 }
0x1c1e   :  { %6401 = vrot.lane.b32.xlu1 %v6386_v15, %s12326_s24 }
0x1c21   :  { %v6388_v22 = vpop.permute.xlu0 %6387 }
0x1c22   :  { %6563 = vrot.lane.b32.xlu1 %v6561_v12, %s12318_s10 }
0x1c25   :  { %v13367_v32 = vpop.xlane.xlu1 %6259 }
0x1c26   :  { %17318 = vst [vmem:[#allocation20_spill] sm:$0xff] %v13367_v32 }
0x1c29   :  { %v6380_v49 = vpop.permute.xlu1 %6379 }
0x1c2a   :  { %6395 = vrot.lane.b32.xlu0 %v6380_v49, %s12326_s24 }
0x1c2e   :  { %6399 = vrot.lane.b32.xlu0 %v6384_v3, %s12326_s24 }
0x1c7c   :  { %v6390_v10 = vpop.permute.xlu1 %6389 }
0x1c7d   :  { %v6403_v55 = vcombine.low %v6388_v22, %v6390_v10  ;;  %v6756_v22 = vld [vmem:[%s17189_s0 + $0x8] sm:$0x1] }
0x1c7f   :  { %v6413_v58 = vrot.slane %v6403_v55, %v12518_v9 }
0x1c80   :  { %v6392_v24 = vpop.permute.xlu0 %6391 }
0x1c84   :  { %v6394_v19 = vpop.permute.xlu1 %6393 }
0x1c85   :  { %v6404_v43 = vcombine.low %v6392_v24, %v6394_v19 }
0x1c87   :  { %v6420_v28 = vrot.slane %v6404_v43, %v12518_v9 }
0x1c88   :  { %v6398_v38 = vpop.permute.xlu1 %6397 }
0x1c89   :  { %v6435_v26 = vcombine.low %v6413_v58, %v6420_v28 }
0x1c8b   :  { %v6443_v62 = vrot.slane %v6435_v26, %v12518_v9 }
0x1c90   :  { %v6402_v13 = vpop.permute.xlu1 %6401 }
0x1c94   :  { %v6564_v17 = vpop.permute.xlu1 %6563 }
0x1c95   :  { %v6566_v18 = vmax.f32 %v6561_v12, %v6564_v17 }
0x1c97   :  { %6568 = vrot.lane.b32.xlu1 %v6566_v18, %s12320_s18 }
0x1c9b   :  { %6570 = vrot.lane.b32.xlu1 %v6566_v18, %s12319_s17 }
0x1c9c   :  { %v6396_v45 = vpop.permute.xlu0 %6395 }
0x1c9d   :  { %v6405_v48 = vcombine.low %v6396_v45, %v6398_v38 }
0x1c9f   :  { %6572 = vrot.lane.b32.xlu1 %v6566_v18, %s12321_s19  ;;  %v6427_v47 = vrot.slane %v6405_v48, %v12518_v9 }
0x1ca0   :  { %v6400_v57 = vpop.permute.xlu0 %6399 }
0x1ca1   :  { %v6406_v59 = vcombine.low %v6400_v57, %v6402_v13 }
0x1ca3   :  { %v6434_v60 = vrot.slane %v6406_v59, %v12518_v9  ;;  %6574 = vrot.lane.b32.xlu1 %v6566_v18, %s12322_s20 }
0x1ca5   :  { %v6436_v30 = vcombine.low %v6427_v47, %v6434_v60 }
0x1ca7   :  { %6576 = vrot.lane.b32.xlu1 %v6566_v18, %s12323_s21  ;;  %v6450_v63 = vrot.slane %v6436_v30, %v12518_v9 }
0x1ca9   :  { %v6451_v0 = vcombine.low %v6443_v62, %v6450_v63 }
0x1cab   :  { %v6453_v61 = vsel %vm79_vm0, %v6451_v0, -inf  ;;  %6578 = vrot.lane.b32.xlu1 %v6566_v18, %s12324_s22 }
0x1cac   :  { %6454 = vmax.xlane.f32.xlu0 %v6453_v61 }
0x1caf   :  { %6582 = vrot.lane.b32.xlu1 %v6566_v18, %s12328_s26 }
0x1cc2   :  { %6580 = vrot.lane.b32.xlu0 %v6566_v18, %s12325_s23 }
0x1d09   :  { %v6569_v3 = vpop.permute.xlu1 %6568 }
0x1d0a   :  { %6584 = vrot.lane.b32.xlu1 %v6569_v3, %s12328_s26 }
0x1d0d   :  { %v6571_v15 = vpop.permute.xlu1 %6570 }
0x1d0e   :  { %6586 = vrot.lane.b32.xlu1 %v6571_v15, %s12328_s26 }
0x1d11   :  { %v6573_v12 = vpop.permute.xlu1 %6572 }
0x1d12   :  { %6588 = vrot.lane.b32.xlu1 %v6573_v12, %s12328_s26 }
0x1d15   :  { %v6575_v49 = vpop.permute.xlu1 %6574 }
0x1d16   :  { %6590 = vrot.lane.b32.xlu1 %v6575_v49, %s12328_s26 }
0x1d19   :  { %v6577_v10 = vpop.permute.xlu1 %6576 }
0x1d1a   :  { %6592 = vrot.lane.b32.xlu0 %v6577_v10, %s12328_s26 }
0x1d1d   :  { %v6579_v19 = vpop.permute.xlu1 %6578 }
0x1d1e   :  { %6594 = vrot.lane.b32.xlu1 %v6579_v19, %s12328_s26 }
0x1d21   :  { %v6583_v17 = vpop.permute.xlu1 %6582 }
0x1d35   :  { %v13392_v38 = vpop.xlane.xlu0 %6454 }
0x1d36   :  { %17319 = vst [vmem:[#allocation21_spill] sm:$0xff] %v13392_v38 }
0x1d39   :  { %v6581_v13 = vpop.permute.xlu0 %6580 }
0x1d3a   :  { %6596 = vrot.lane.b32.xlu0 %v6581_v13, %s12328_s26 }
0x1d3e   :  { %6758 = vrot.lane.b32.xlu0 %v6756_v22, %s12318_s10 }
0x1d7c   :  { %v6585_v18 = vpop.permute.xlu1 %6584 }
0x1d7d   :  { %v6598_v48 = vcombine.low %v6583_v17, %v6585_v18 }
0x1d7f   :  { %v6608_v47 = vrot.slane %v6598_v48, %v12518_v9 }
0x1d80   :  { %v6587_v24 = vpop.permute.xlu1 %6586 }
0x1d84   :  { %v6589_v43 = vpop.permute.xlu1 %6588 }
0x1d85   :  { %v6599_v55 = vcombine.low %v6587_v24, %v6589_v43 }
0x1d87   :  { %v6615_v57 = vrot.slane %v6599_v55, %v12518_v9 }
0x1d88   :  { %v6591_v45 = vpop.permute.xlu1 %6590 }
0x1d89   :  { %v6630_v30 = vcombine.low %v6608_v47, %v6615_v57 }
0x1d8b   :  { %v6638_v15 = vrot.slane %v6630_v30, %v12518_v9 }
0x1d8c   :  { %v6593_v28 = vpop.permute.xlu0 %6592 }
0x1d8d   :  { %v6600_v58 = vcombine.low %v6591_v45, %v6593_v28  ;;  %v6951_v45 = vld [vmem:[%s17189_s0 + $0x9] sm:$0x1] }
0x1d8f   :  { %v6622_v62 = vrot.slane %v6600_v58, %v12518_v9 }
0x1d90   :  { %v6595_v59 = vpop.permute.xlu1 %6594 }
0x1dac   :  { %v6597_v26 = vpop.permute.xlu0 %6596 }
0x1dad   :  { %v6601_v60 = vcombine.low %v6595_v59, %v6597_v26 }
0x1daf   :  { %v6629_v63 = vrot.slane %v6601_v60, %v12518_v9 }
0x1db0   :  { %v6759_v0 = vpop.permute.xlu0 %6758 }
0x1db1   :  { %v6631_v61 = vcombine.low %v6622_v62, %v6629_v63  ;;  %v6761_v3 = vmax.f32 %v6756_v22, %v6759_v0 }
0x1db3   :  { %6763 = vrot.lane.b32.xlu0 %v6761_v3, %s12320_s18  ;;  %v6645_v12 = vrot.slane %v6631_v61, %v12518_v9 }
0x1db5   :  { %v6646_v49 = vcombine.low %v6638_v15, %v6645_v12 }
0x1db7   :  { %6765 = vrot.lane.b32.xlu0 %v6761_v3, %s12319_s17  ;;  %v6648_v10 = vsel %vm79_vm0, %v6646_v49, -inf }
0x1db8   :  { %6649 = vmax.xlane.f32.xlu1 %v6648_v10 }
0x1dbb   :  { %6767 = vrot.lane.b32.xlu0 %v6761_v3, %s12321_s19 }
0x1dbf   :  { %6769 = vrot.lane.b32.xlu0 %v6761_v3, %s12322_s20 }
0x1dc3   :  { %6771 = vrot.lane.b32.xlu0 %v6761_v3, %s12323_s21 }
0x1dc7   :  { %6773 = vrot.lane.b32.xlu0 %v6761_v3, %s12324_s22 }
0x1dc9   :  { %6777 = vrot.lane.b32.xlu1 %v6761_v3, %s12327_s25 }
0x1dcb   :  { %6775 = vrot.lane.b32.xlu0 %v6761_v3, %s12325_s23 }
0x1e25   :  { %v6764_v19 = vpop.permute.xlu0 %6763 }
0x1e26   :  { %6779 = vrot.lane.b32.xlu0 %v6764_v19, %s12327_s25 }
0x1e29   :  { %v6766_v13 = vpop.permute.xlu0 %6765 }
0x1e2a   :  { %6781 = vrot.lane.b32.xlu0 %v6766_v13, %s12327_s25 }
0x1e2d   :  { %v6768_v22 = vpop.permute.xlu0 %6767 }
0x1e2e   :  { %6783 = vrot.lane.b32.xlu0 %v6768_v22, %s12327_s25 }
0x1e31   :  { %v6770_v17 = vpop.permute.xlu0 %6769 }
0x1e32   :  { %6785 = vrot.lane.b32.xlu0 %v6770_v17, %s12327_s25 }
0x1e35   :  { %v6772_v18 = vpop.permute.xlu0 %6771 }
0x1e36   :  { %6787 = vrot.lane.b32.xlu1 %v6772_v18, %s12327_s25 }
0x1e39   :  { %v6774_v24 = vpop.permute.xlu0 %6773 }
0x1e3a   :  { %6789 = vrot.lane.b32.xlu0 %v6774_v24, %s12327_s25 }
0x1e3d   :  { %v6776_v43 = vpop.permute.xlu0 %6775 }
0x1e3e   :  { %6791 = vrot.lane.b32.xlu1 %v6776_v43, %s12327_s25  ;;  %v7130_v43 = vld [vmem:[%s17189_s0 + $0x9] sm:$0x1] }
0x1e41   :  { %v13425_v48 = vpop.xlane.xlu1 %6649 }
0x1e42   :  { %6953 = vrot.lane.b32.xlu1 %v6951_v45, %s12318_s10  ;;  %17320 = vst [vmem:[#allocation22_spill] sm:$0xff] %v13425_v48 }
0x1e45   :  { %v6778_v58 = vpop.permute.xlu1 %6777 }
0x1e98   :  { %v6780_v55 = vpop.permute.xlu0 %6779 }
0x1e99   :  { %v6793_v60 = vcombine.low %v6778_v58, %v6780_v55 }
0x1e9b   :  { %v6803_v61 = vrot.slane %v6793_v60, %v12518_v9 }
0x1e9c   :  { %v6782_v28 = vpop.permute.xlu0 %6781 }
0x1ea0   :  { %v6784_v57 = vpop.permute.xlu0 %6783 }
0x1ea1   :  { %v6794_v59 = vcombine.low %v6782_v28, %v6784_v57 }
0x1ea3   :  { %v6810_v30 = vrot.slane %v6794_v59, %v12518_v9 }
0x1ea4   :  { %v6786_v26 = vpop.permute.xlu0 %6785 }
0x1ea5   :  { %v6825_v15 = vcombine.low %v6803_v61, %v6810_v30 }
0x1ea7   :  { %v6833_v22 = vrot.slane %v6825_v15, %v12518_v9 }
0x1ea8   :  { %v6788_v47 = vpop.permute.xlu1 %6787 }
0x1ea9   :  { %v6795_v62 = vcombine.low %v6786_v26, %v6788_v47 }
0x1eab   :  { %v6817_v12 = vrot.slane %v6795_v62, %v12518_v9 }
0x1eac   :  { %v6790_v63 = vpop.permute.xlu0 %6789 }
0x1eb0   :  { %v6792_v0 = vpop.permute.xlu1 %6791 }
0x1eb1   :  { %v6796_v3 = vcombine.low %v6790_v63, %v6792_v0 }
0x1eb3   :  { %v6824_v49 = vrot.slane %v6796_v3, %v12518_v9 }
0x1eb4   :  { %v6954_v10 = vpop.permute.xlu1 %6953 }
0x1eb5   :  { %v6826_v19 = vcombine.low %v6817_v12, %v6824_v49  ;;  %v6956_v13 = vmax.f32 %v6951_v45, %v6954_v10 }
0x1eb7   :  { %6958 = vrot.lane.b32.xlu1 %v6956_v13, %s12320_s18  ;;  %v6840_v17 = vrot.slane %v6826_v19, %v12518_v9 }
0x1eb9   :  { %v6841_v18 = vcombine.low %v6833_v22, %v6840_v17 }
0x1ebb   :  { %6960 = vrot.lane.b32.xlu1 %v6956_v13, %s12319_s17  ;;  %v6843_v24 = vsel %vm79_vm0, %v6841_v18, -inf }
0x1ebc   :  { %6844 = vmax.xlane.f32.xlu0 %v6843_v24 }
0x1ebf   :  { %6962 = vrot.lane.b32.xlu1 %v6956_v13, %s12321_s19 }
0x1ec3   :  { %6964 = vrot.lane.b32.xlu1 %v6956_v13, %s12322_s20 }
0x1ec7   :  { %6966 = vrot.lane.b32.xlu1 %v6956_v13, %s12323_s21 }
0x1ecb   :  { %6968 = vrot.lane.b32.xlu1 %v6956_v13, %s12324_s22 }
0x1ed2   :  { %6970 = vrot.lane.b32.xlu0 %v6956_v13, %s12325_s23 }
0x1ed6   :  { %7132 = vrot.lane.b32.xlu0 %v7130_v43, %s12318_s10 }
0x1f29   :  { %v6959_v45 = vpop.permute.xlu1 %6958 }
0x1f2a   :  { %v6972_v47 = vcombine.low %v6956_v13, %v6959_v45 }
0x1f2c   :  { %v6982_v0 = vrot.slane %v6972_v47, %v12518_v9 }
0x1f2d   :  { %v6961_v55 = vpop.permute.xlu1 %6960 }
0x1f31   :  { %v6963_v28 = vpop.permute.xlu1 %6962 }
0x1f32   :  { %v6973_v59 = vcombine.low %v6961_v55, %v6963_v28 }
0x1f34   :  { %v6989_v60 = vrot.slane %v6973_v59, %v12518_v9 }
0x1f35   :  { %v6965_v57 = vpop.permute.xlu1 %6964 }
0x1f36   :  { %v7004_v3 = vcombine.low %v6982_v0, %v6989_v60 }
0x1f38   :  { %v7012_v13 = vrot.slane %v7004_v3, %v12518_v9 }
0x1f39   :  { %v6967_v58 = vpop.permute.xlu1 %6966 }
0x1f3a   :  { %v6974_v30 = vcombine.low %v6965_v57, %v6967_v58  ;;  %v7325_v58 = vld [vmem:[%s17189_s0 + $0x9] sm:$0x1] }
0x1f3c   :  { %v6996_v15 = vrot.slane %v6974_v30, %v12518_v9 }
0x1f3d   :  { %v6969_v62 = vpop.permute.xlu1 %6968 }
0x1f45   :  { %v13445_v26 = vpop.xlane.xlu0 %6844 }
0x1f46   :  { %17321 = vst [vmem:[#allocation23_spill] sm:$0xff] %v13445_v26 }
0x1f49   :  { %v6971_v63 = vpop.permute.xlu0 %6970 }
0x1f4a   :  { %v6975_v61 = vcombine.low %v6969_v62, %v6971_v63 }
0x1f4c   :  { %v7003_v12 = vrot.slane %v6975_v61, %v12518_v9 }
0x1f4d   :  { %v7133_v49 = vpop.permute.xlu0 %7132 }
0x1f4e   :  { %v7005_v10 = vcombine.low %v6996_v15, %v7003_v12  ;;  %v7135_v19 = vmax.f32 %v7130_v43, %v7133_v49 }
0x1f50   :  { %7137 = vrot.lane.b32.xlu0 %v7135_v19, %s12320_s18  ;;  %v7019_v22 = vrot.slane %v7005_v10, %v12518_v9 }
0x1f52   :  { %v7020_v17 = vcombine.low %v7012_v13, %v7019_v22 }
0x1f54   :  { %7139 = vrot.lane.b32.xlu0 %v7135_v19, %s12319_s17  ;;  %v7022_v18 = vsel %vm79_vm0, %v7020_v17, -inf }
0x1f55   :  { %7023 = vmax.xlane.f32.xlu1 %v7022_v18 }
0x1f58   :  { %7141 = vrot.lane.b32.xlu0 %v7135_v19, %s12321_s19 }
0x1f5c   :  { %7145 = vrot.lane.b32.xlu0 %v7135_v19, %s12323_s21 }
0x1f60   :  { %7147 = vrot.lane.b32.xlu0 %v7135_v19, %s12324_s22 }
0x1f64   :  { %7149 = vrot.lane.b32.xlu0 %v7135_v19, %s12325_s23 }
0x1f66   :  { %7143 = vrot.lane.b32.xlu1 %v7135_v19, %s12322_s20 }
0x1f68   :  { %7151 = vrot.lane.b32.xlu0 %v7135_v19, %s12326_s24 }
0x1fc2   :  { %v7138_v24 = vpop.permute.xlu0 %7137 }
0x1fc3   :  { %7153 = vrot.lane.b32.xlu1 %v7138_v24, %s12326_s24 }
0x1fc6   :  { %v7140_v43 = vpop.permute.xlu0 %7139 }
0x1fc7   :  { %7155 = vrot.lane.b32.xlu0 %v7140_v43, %s12326_s24 }
0x1fca   :  { %v7142_v45 = vpop.permute.xlu0 %7141 }
0x1fcb   :  { %7157 = vrot.lane.b32.xlu1 %v7142_v45, %s12326_s24 }
0x1fce   :  { %v7146_v55 = vpop.permute.xlu0 %7145 }
0x1fcf   :  { %7161 = vrot.lane.b32.xlu1 %v7146_v55, %s12326_s24 }
0x1fd2   :  { %v7148_v28 = vpop.permute.xlu0 %7147 }
0x1fd6   :  { %v7150_v57 = vpop.permute.xlu0 %7149 }
0x1fd7   :  { %7165 = vrot.lane.b32.xlu1 %v7150_v57, %s12326_s24 }
0x1fda   :  { %v7152_v0 = vpop.permute.xlu0 %7151 }
0x1fdb   :  { %7327 = vrot.lane.b32.xlu1 %v7325_v58, %s12318_s10 }
0x1fde   :  { %v13471_v59 = vpop.xlane.xlu1 %7023 }
0x1fdf   :  { %17322 = vst [vmem:[#allocation24_spill] sm:$0xff] %v13471_v59 }
0x1fe2   :  { %v7144_v47 = vpop.permute.xlu1 %7143 }
0x1fe3   :  { %7159 = vrot.lane.b32.xlu0 %v7144_v47, %s12326_s24 }
0x1fe7   :  { %7163 = vrot.lane.b32.xlu0 %v7148_v28, %s12326_s24 }
0x2035   :  { %v7154_v60 = vpop.permute.xlu1 %7153 }
0x2036   :  { %v7167_v10 = vcombine.low %v7152_v0, %v7154_v60 }
0x2038   :  { %v7177_v17 = vrot.slane %v7167_v10, %v12518_v9 }
0x2039   :  { %v7156_v15 = vpop.permute.xlu0 %7155 }
0x203d   :  { %v7158_v30 = vpop.permute.xlu1 %7157 }
0x203e   :  { %v7168_v12 = vcombine.low %v7156_v15, %v7158_v30 }
0x2040   :  { %v7184_v19 = vrot.slane %v7168_v12, %v12518_v9  ;;  %v7520_v12 = vld [vmem:[%s17189_s0 + $0x9] sm:$0x1] }
0x2041   :  { %v7162_v62 = vpop.permute.xlu1 %7161 }
0x2042   :  { %v7199_v24 = vcombine.low %v7177_v17, %v7184_v19 }
0x2044   :  { %v7207_v28 = vrot.slane %v7199_v24, %v12518_v9 }
0x2049   :  { %v7166_v63 = vpop.permute.xlu1 %7165 }
0x204d   :  { %v7328_v61 = vpop.permute.xlu1 %7327 }
0x204e   :  { %v7330_v3 = vmax.f32 %v7325_v58, %v7328_v61 }
0x2050   :  { %7332 = vrot.lane.b32.xlu1 %v7330_v3, %s12320_s18 }
0x2054   :  { %7334 = vrot.lane.b32.xlu1 %v7330_v3, %s12319_s17 }
0x2055   :  { %v7160_v49 = vpop.permute.xlu0 %7159 }
0x2056   :  { %v7169_v13 = vcombine.low %v7160_v49, %v7162_v62 }
0x2058   :  { %7336 = vrot.lane.b32.xlu1 %v7330_v3, %s12321_s19  ;;  %v7191_v43 = vrot.slane %v7169_v13, %v12518_v9 }
0x2059   :  { %v7164_v22 = vpop.permute.xlu0 %7163 }
0x205a   :  { %v7170_v18 = vcombine.low %v7164_v22, %v7166_v63 }
0x205c   :  { %v7198_v45 = vrot.slane %v7170_v18, %v12518_v9  ;;  %7338 = vrot.lane.b32.xlu1 %v7330_v3, %s12322_s20 }
0x205e   :  { %v7200_v55 = vcombine.low %v7191_v43, %v7198_v45 }
0x2060   :  { %7340 = vrot.lane.b32.xlu1 %v7330_v3, %s12323_s21  ;;  %v7214_v57 = vrot.slane %v7200_v55, %v12518_v9 }
0x2062   :  { %v7215_v58 = vcombine.low %v7207_v28, %v7214_v57 }
0x2064   :  { %v7217_v47 = vsel %vm79_vm0, %v7215_v58, -inf  ;;  %7342 = vrot.lane.b32.xlu1 %v7330_v3, %s12324_s22 }
0x2065   :  { %7218 = vmax.xlane.f32.xlu0 %v7217_v47 }
0x2068   :  { %7346 = vrot.lane.b32.xlu1 %v7330_v3, %s12328_s26 }
0x207b   :  { %7344 = vrot.lane.b32.xlu0 %v7330_v3, %s12325_s23 }
0x20c2   :  { %v7333_v60 = vpop.permute.xlu1 %7332 }
0x20c3   :  { %7348 = vrot.lane.b32.xlu1 %v7333_v60, %s12328_s26 }
0x20c6   :  { %v7335_v30 = vpop.permute.xlu1 %7334 }
0x20c7   :  { %7350 = vrot.lane.b32.xlu1 %v7335_v30, %s12328_s26 }
0x20ca   :  { %v7337_v62 = vpop.permute.xlu1 %7336 }
0x20cb   :  { %7352 = vrot.lane.b32.xlu1 %v7337_v62, %s12328_s26 }
0x20ce   :  { %v7339_v63 = vpop.permute.xlu1 %7338 }
0x20cf   :  { %7354 = vrot.lane.b32.xlu1 %v7339_v63, %s12328_s26 }
0x20d2   :  { %v7341_v0 = vpop.permute.xlu1 %7340 }
0x20d3   :  { %7356 = vrot.lane.b32.xlu0 %v7341_v0, %s12328_s26 }
0x20d6   :  { %v7343_v61 = vpop.permute.xlu1 %7342 }
0x20d7   :  { %7358 = vrot.lane.b32.xlu1 %v7343_v61, %s12328_s26 }
0x20da   :  { %v7347_v49 = vpop.permute.xlu1 %7346 }
0x20ee   :  { %v13496_v15 = vpop.xlane.xlu0 %7218 }
0x20ef   :  { %17323 = vst [vmem:[#allocation25_spill] sm:$0xff] %v13496_v15 }
0x20f2   :  { %v7345_v3 = vpop.permute.xlu0 %7344 }
0x20f3   :  { %7360 = vrot.lane.b32.xlu0 %v7345_v3, %s12328_s26 }
0x20f7   :  { %7522 = vrot.lane.b32.xlu0 %v7520_v12, %s12318_s10 }
0x2135   :  { %v7349_v10 = vpop.permute.xlu1 %7348 }
0x2136   :  { %v7362_v24 = vcombine.low %v7347_v49, %v7349_v10 }
0x2138   :  { %v7372_v57 = vrot.slane %v7362_v24, %v12518_v9 }
0x2139   :  { %v7351_v19 = vpop.permute.xlu1 %7350 }
0x213d   :  { %v7353_v13 = vpop.permute.xlu1 %7352 }
0x213e   :  { %v7363_v17 = vcombine.low %v7351_v19, %v7353_v13 }
0x2140   :  { %v7379_v43 = vrot.slane %v7363_v17, %v12518_v9 }
0x2141   :  { %v7355_v22 = vpop.permute.xlu1 %7354 }
0x2142   :  { %v7394_v47 = vcombine.low %v7372_v57, %v7379_v43  ;;  %v7715_v43 = vld [vmem:[%s17189_s0 + $0xa] sm:$0x1] }
0x2144   :  { %v7402_v61 = vrot.slane %v7394_v47, %v12518_v9 }
0x2145   :  { %v7357_v18 = vpop.permute.xlu0 %7356 }
0x2146   :  { %v7364_v45 = vcombine.low %v7355_v22, %v7357_v18 }
0x2148   :  { %v7386_v60 = vrot.slane %v7364_v45, %v12518_v9 }
0x2149   :  { %v7359_v55 = vpop.permute.xlu1 %7358 }
0x2165   :  { %v7361_v28 = vpop.permute.xlu0 %7360 }
0x2166   :  { %v7365_v58 = vcombine.low %v7359_v55, %v7361_v28 }
0x2168   :  { %v7393_v30 = vrot.slane %v7365_v58, %v12518_v9 }
0x2169   :  { %v7523_v62 = vpop.permute.xlu0 %7522 }
0x216a   :  { %v7395_v63 = vcombine.low %v7386_v60, %v7393_v30  ;;  %v7525_v0 = vmax.f32 %v7520_v12, %v7523_v62 }
0x216c   :  { %7527 = vrot.lane.b32.xlu0 %v7525_v0, %s12320_s18  ;;  %v7409_v3 = vrot.slane %v7395_v63, %v12518_v9 }
0x216e   :  { %v7410_v49 = vcombine.low %v7402_v61, %v7409_v3 }
0x2170   :  { %7529 = vrot.lane.b32.xlu0 %v7525_v0, %s12319_s17  ;;  %v7412_v10 = vsel %vm79_vm0, %v7410_v49, -inf }
0x2171   :  { %7413 = vmax.xlane.f32.xlu1 %v7412_v10 }
0x2174   :  { %7531 = vrot.lane.b32.xlu0 %v7525_v0, %s12321_s19 }
0x2178   :  { %7533 = vrot.lane.b32.xlu0 %v7525_v0, %s12322_s20 }
0x217c   :  { %7535 = vrot.lane.b32.xlu0 %v7525_v0, %s12323_s21 }
0x2180   :  { %7537 = vrot.lane.b32.xlu0 %v7525_v0, %s12324_s22 }
0x2182   :  { %7541 = vrot.lane.b32.xlu1 %v7525_v0, %s12327_s25 }
0x2184   :  { %7539 = vrot.lane.b32.xlu0 %v7525_v0, %s12325_s23 }
0x21de   :  { %v7528_v12 = vpop.permute.xlu0 %7527 }
0x21df   :  { %7543 = vrot.lane.b32.xlu0 %v7528_v12, %s12327_s25 }
0x21e2   :  { %v7530_v19 = vpop.permute.xlu0 %7529 }
0x21e3   :  { %7545 = vrot.lane.b32.xlu0 %v7530_v19, %s12327_s25 }
0x21e6   :  { %v7532_v13 = vpop.permute.xlu0 %7531 }
0x21e7   :  { %7547 = vrot.lane.b32.xlu0 %v7532_v13, %s12327_s25 }
0x21ea   :  { %v7534_v22 = vpop.permute.xlu0 %7533 }
0x21eb   :  { %7549 = vrot.lane.b32.xlu0 %v7534_v22, %s12327_s25 }
0x21ee   :  { %v7536_v17 = vpop.permute.xlu0 %7535 }
0x21ef   :  { %7551 = vrot.lane.b32.xlu1 %v7536_v17, %s12327_s25 }
0x21f2   :  { %v7538_v18 = vpop.permute.xlu0 %7537 }
0x21f3   :  { %7553 = vrot.lane.b32.xlu0 %v7538_v18, %s12327_s25 }
0x21f6   :  { %v7540_v24 = vpop.permute.xlu0 %7539 }
0x21f7   :  { %7555 = vrot.lane.b32.xlu1 %v7540_v24, %s12327_s25 }
0x21fa   :  { %v13529_v28 = vpop.xlane.xlu1 %7413 }
0x21fb   :  { %7717 = vrot.lane.b32.xlu1 %v7715_v43, %s12318_s10  ;;  %17324 = vst [vmem:[#allocation26_spill] sm:$0xff] %v13529_v28 }
0x21fe   :  { %v7542_v58 = vpop.permute.xlu1 %7541 }
0x2251   :  { %v7544_v45 = vpop.permute.xlu0 %7543 }
0x2252   :  { %v7557_v62 = vcombine.low %v7542_v58, %v7544_v45 }
0x2254   :  { %v7567_v49 = vrot.slane %v7557_v62, %v12518_v9 }
0x2255   :  { %v7546_v55 = vpop.permute.xlu0 %7545 }
0x2259   :  { %v7548_v57 = vpop.permute.xlu0 %7547 }
0x225a   :  { %v7558_v47 = vcombine.low %v7546_v55, %v7548_v57 }
0x225c   :  { %v7574_v63 = vrot.slane %v7558_v47, %v12518_v9 }
0x225d   :  { %v7550_v60 = vpop.permute.xlu0 %7549 }
0x225e   :  { %v7589_v12 = vcombine.low %v7567_v49, %v7574_v63 }
0x2260   :  { %v7597_v24 = vrot.slane %v7589_v12, %v12518_v9 }
0x2261   :  { %v7552_v30 = vpop.permute.xlu1 %7551 }
0x2262   :  { %v7559_v0 = vcombine.low %v7550_v60, %v7552_v30 }
0x2264   :  { %v7581_v19 = vrot.slane %v7559_v0, %v12518_v9 }
0x2265   :  { %v7554_v61 = vpop.permute.xlu0 %7553 }
0x2269   :  { %v7556_v3 = vpop.permute.xlu1 %7555 }
0x226a   :  { %v7560_v10 = vcombine.low %v7554_v61, %v7556_v3 }
0x226c   :  { %v7588_v13 = vrot.slane %v7560_v10, %v12518_v9 }
0x226d   :  { %v7718_v22 = vpop.permute.xlu1 %7717 }
0x226e   :  { %v7590_v17 = vcombine.low %v7581_v19, %v7588_v13  ;;  %v7720_v18 = vmax.f32 %v7715_v43, %v7718_v22  ;;  %v7894_v43 = vld [vmem:[%s17189_s0 + $0xa] sm:$0x1] }
0x2270   :  { %7722 = vrot.lane.b32.xlu1 %v7720_v18, %s12320_s18  ;;  %v7604_v45 = vrot.slane %v7590_v17, %v12518_v9 }
0x2272   :  { %v7605_v55 = vcombine.low %v7597_v24, %v7604_v45 }
0x2274   :  { %7724 = vrot.lane.b32.xlu1 %v7720_v18, %s12319_s17  ;;  %v7607_v57 = vsel %vm79_vm0, %v7605_v55, -inf }
0x2275   :  { %7608 = vmax.xlane.f32.xlu0 %v7607_v57 }
0x2278   :  { %7726 = vrot.lane.b32.xlu1 %v7720_v18, %s12321_s19 }
0x227c   :  { %7728 = vrot.lane.b32.xlu1 %v7720_v18, %s12322_s20 }
0x2280   :  { %7730 = vrot.lane.b32.xlu1 %v7720_v18, %s12323_s21 }
0x2284   :  { %7732 = vrot.lane.b32.xlu1 %v7720_v18, %s12324_s22 }
0x228b   :  { %7734 = vrot.lane.b32.xlu0 %v7720_v18, %s12325_s23 }
0x228f   :  { %7896 = vrot.lane.b32.xlu0 %v7894_v43, %s12318_s10 }
0x22e2   :  { %v7723_v58 = vpop.permute.xlu1 %7722 }
0x22e3   :  { %v7736_v61 = vcombine.low %v7720_v18, %v7723_v58 }
0x22e5   :  { %v7746_v19 = vrot.slane %v7736_v61, %v12518_v9 }
0x22e6   :  { %v7725_v47 = vpop.permute.xlu1 %7724 }
0x22ea   :  { %v7727_v60 = vpop.permute.xlu1 %7726 }
0x22eb   :  { %v7737_v63 = vcombine.low %v7725_v47, %v7727_v60 }
0x22ed   :  { %v7753_v3 = vrot.slane %v7737_v63, %v12518_v9 }
0x22ee   :  { %v7729_v30 = vpop.permute.xlu1 %7728 }
0x22ef   :  { %v7768_v22 = vcombine.low %v7746_v19, %v7753_v3 }
0x22f1   :  { %v7776_v18 = vrot.slane %v7768_v22, %v12518_v9 }
0x22f2   :  { %v7731_v62 = vpop.permute.xlu1 %7730 }
0x22f3   :  { %v7738_v49 = vcombine.low %v7729_v30, %v7731_v62 }
0x22f5   :  { %v7760_v17 = vrot.slane %v7738_v49, %v12518_v9  ;;  %v8089_v49 = vld [vmem:[%s17189_s0 + $0xa] sm:$0x1] }
0x22f6   :  { %v7733_v10 = vpop.permute.xlu1 %7732 }
0x22fe   :  { %v13549_v0 = vpop.xlane.xlu0 %7608 }
0x22ff   :  { %17325 = vst [vmem:[#allocation27_spill] sm:$0xff] %v13549_v0 }
0x2302   :  { %v7735_v12 = vpop.permute.xlu0 %7734 }
0x2303   :  { %v7739_v13 = vcombine.low %v7733_v10, %v7735_v12 }
0x2305   :  { %v7767_v24 = vrot.slane %v7739_v13, %v12518_v9 }
0x2306   :  { %v7897_v45 = vpop.permute.xlu0 %7896 }
0x2307   :  { %v7769_v55 = vcombine.low %v7760_v17, %v7767_v24  ;;  %v7899_v57 = vmax.f32 %v7894_v43, %v7897_v45 }
0x2309   :  { %7901 = vrot.lane.b32.xlu0 %v7899_v57, %s12320_s18  ;;  %v7783_v58 = vrot.slane %v7769_v55, %v12518_v9 }
0x230b   :  { %v7784_v47 = vcombine.low %v7776_v18, %v7783_v58 }
0x230d   :  { %7903 = vrot.lane.b32.xlu0 %v7899_v57, %s12319_s17  ;;  %v7786_v60 = vsel %vm79_vm0, %v7784_v47, -inf }
0x230e   :  { %7787 = vmax.xlane.f32.xlu1 %v7786_v60 }
0x2311   :  { %7905 = vrot.lane.b32.xlu0 %v7899_v57, %s12321_s19 }
0x2315   :  { %7909 = vrot.lane.b32.xlu0 %v7899_v57, %s12323_s21 }
0x2319   :  { %7911 = vrot.lane.b32.xlu0 %v7899_v57, %s12324_s22 }
0x231d   :  { %7913 = vrot.lane.b32.xlu0 %v7899_v57, %s12325_s23 }
0x231f   :  { %7907 = vrot.lane.b32.xlu1 %v7899_v57, %s12322_s20 }
0x2321   :  { %7915 = vrot.lane.b32.xlu0 %v7899_v57, %s12326_s24 }
0x237b   :  { %v7902_v43 = vpop.permute.xlu0 %7901 }
0x237c   :  { %7917 = vrot.lane.b32.xlu1 %v7902_v43, %s12326_s24 }
0x237f   :  { %v7904_v30 = vpop.permute.xlu0 %7903 }
0x2380   :  { %7919 = vrot.lane.b32.xlu0 %v7904_v30, %s12326_s24 }
0x2383   :  { %v7906_v62 = vpop.permute.xlu0 %7905 }
0x2384   :  { %7921 = vrot.lane.b32.xlu1 %v7906_v62, %s12326_s24 }
0x2387   :  { %v7910_v63 = vpop.permute.xlu0 %7909 }
0x2388   :  { %7925 = vrot.lane.b32.xlu1 %v7910_v63, %s12326_s24 }
0x238b   :  { %v7912_v61 = vpop.permute.xlu0 %7911 }
0x238f   :  { %v7914_v3 = vpop.permute.xlu0 %7913 }
0x2390   :  { %7929 = vrot.lane.b32.xlu1 %v7914_v3, %s12326_s24 }
0x2393   :  { %v7916_v24 = vpop.permute.xlu0 %7915 }
0x2394   :  { %8091 = vrot.lane.b32.xlu1 %v8089_v49, %s12318_s10 }
0x2397   :  { %v13575_v10 = vpop.xlane.xlu1 %7787 }
0x2398   :  { %17326 = vst [vmem:[#allocation28_spill] sm:$0xff] %v13575_v10 }
0x239b   :  { %v7908_v12 = vpop.permute.xlu1 %7907 }
0x239c   :  { %7923 = vrot.lane.b32.xlu0 %v7908_v12, %s12326_s24 }
0x23a0   :  { %7927 = vrot.lane.b32.xlu0 %v7912_v61, %s12326_s24 }
0x23ee   :  { %v7918_v19 = vpop.permute.xlu1 %7917 }
0x23ef   :  { %v7931_v47 = vcombine.low %v7916_v24, %v7918_v19 }
0x23f1   :  { %v7941_v62 = vrot.slane %v7931_v47, %v12518_v9 }
0x23f2   :  { %v7920_v57 = vpop.permute.xlu0 %7919 }
0x23f6   :  { %v7922_v13 = vpop.permute.xlu1 %7921 }
0x23f7   :  { %v7932_v18 = vcombine.low %v7920_v57, %v7922_v13 }
0x23f9   :  { %v7948_v60 = vrot.slane %v7932_v18, %v12518_v9 }
0x23fa   :  { %v7926_v22 = vpop.permute.xlu1 %7925 }
0x23fb   :  { %v7963_v61 = vcombine.low %v7941_v62, %v7948_v60 }
0x23fd   :  { %v7971_v19 = vrot.slane %v7963_v61, %v12518_v9 }
0x2402   :  { %v7930_v17 = vpop.permute.xlu1 %7929 }
0x2406   :  { %v8092_v45 = vpop.permute.xlu1 %8091 }
0x2407   :  { %v8094_v55 = vmax.f32 %v8089_v49, %v8092_v45 }
0x2409   :  { %8096 = vrot.lane.b32.xlu1 %v8094_v55, %s12320_s18 }
0x240d   :  { %8098 = vrot.lane.b32.xlu1 %v8094_v55, %s12319_s17 }
0x240e   :  { %v7924_v58 = vpop.permute.xlu0 %7923 }
0x240f   :  { %v7933_v43 = vcombine.low %v7924_v58, %v7926_v22 }
0x2411   :  { %8100 = vrot.lane.b32.xlu1 %v8094_v55, %s12321_s19  ;;  %v7955_v3 = vrot.slane %v7933_v43, %v12518_v9  ;;  %v8284_v43 = vld [vmem:[%s17189_s0 + $0xa] sm:$0x1] }
0x2412   :  { %v7928_v30 = vpop.permute.xlu0 %7927 }
0x2413   :  { %v7934_v63 = vcombine.low %v7928_v30, %v7930_v17 }
0x2415   :  { %v7962_v49 = vrot.slane %v7934_v63, %v12518_v9  ;;  %8102 = vrot.lane.b32.xlu1 %v8094_v55, %s12322_s20 }
0x2417   :  { %v7964_v12 = vcombine.low %v7955_v3, %v7962_v49 }
0x2419   :  { %8104 = vrot.lane.b32.xlu1 %v8094_v55, %s12323_s21  ;;  %v7978_v13 = vrot.slane %v7964_v12, %v12518_v9 }
0x241b   :  { %v7979_v22 = vcombine.low %v7971_v19, %v7978_v13 }
0x241d   :  { %v7981_v24 = vsel %vm79_vm0, %v7979_v22, -inf  ;;  %8106 = vrot.lane.b32.xlu1 %v8094_v55, %s12324_s22 }
0x241e   :  { %7982 = vmax.xlane.f32.xlu0 %v7981_v24 }
0x2421   :  { %8110 = vrot.lane.b32.xlu1 %v8094_v55, %s12328_s26 }
0x2434   :  { %8108 = vrot.lane.b32.xlu0 %v8094_v55, %s12325_s23 }
0x247b   :  { %v8097_v17 = vpop.permute.xlu1 %8096 }
0x247c   :  { %8112 = vrot.lane.b32.xlu1 %v8097_v17, %s12328_s26 }
0x247f   :  { %v8099_v45 = vpop.permute.xlu1 %8098 }
0x2480   :  { %8114 = vrot.lane.b32.xlu1 %v8099_v45, %s12328_s26 }
0x2483   :  { %v8101_v57 = vpop.permute.xlu1 %8100 }
0x2484   :  { %8116 = vrot.lane.b32.xlu1 %v8101_v57, %s12328_s26 }
0x2487   :  { %v8103_v18 = vpop.permute.xlu1 %8102 }
0x2488   :  { %8118 = vrot.lane.b32.xlu1 %v8103_v18, %s12328_s26 }
0x248b   :  { %v8105_v58 = vpop.permute.xlu1 %8104 }
0x248c   :  { %8120 = vrot.lane.b32.xlu0 %v8105_v58, %s12328_s26 }
0x248f   :  { %v8107_v47 = vpop.permute.xlu1 %8106 }
0x2490   :  { %8122 = vrot.lane.b32.xlu1 %v8107_v47, %s12328_s26 }
0x2493   :  { %v8111_v30 = vpop.permute.xlu1 %8110 }
0x24a7   :  { %v13600_v60 = vpop.xlane.xlu0 %7982 }
0x24a8   :  { %17327 = vst [vmem:[#allocation29_spill] sm:$0xff] %v13600_v60 }
0x24ab   :  { %v8109_v55 = vpop.permute.xlu0 %8108 }
0x24ac   :  { %8124 = vrot.lane.b32.xlu0 %v8109_v55, %s12328_s26 }
0x24b0   :  { %8286 = vrot.lane.b32.xlu0 %v8284_v43, %s12318_s10 }
0x24ee   :  { %v8113_v62 = vpop.permute.xlu1 %8112 }
0x24ef   :  { %v8126_v19 = vcombine.low %v8111_v30, %v8113_v62 }
0x24f1   :  { %v8136_v45 = vrot.slane %v8126_v19, %v12518_v9 }
0x24f2   :  { %v8115_v63 = vpop.permute.xlu1 %8114 }
0x24f6   :  { %v8117_v61 = vpop.permute.xlu1 %8116 }
0x24f7   :  { %v8127_v49 = vcombine.low %v8115_v63, %v8117_v61 }
0x24f9   :  { %v8143_v13 = vrot.slane %v8127_v49, %v12518_v9 }
0x24fa   :  { %v8119_v3 = vpop.permute.xlu1 %8118 }
0x24fb   :  { %v8158_v18 = vcombine.low %v8136_v45, %v8143_v13 }
0x24fd   :  { %v8166_v30 = vrot.slane %v8158_v18, %v12518_v9 }
0x24fe   :  { %v8121_v12 = vpop.permute.xlu0 %8120 }
0x24ff   :  { %v8128_v22 = vcombine.low %v8119_v3, %v8121_v12 }
0x2501   :  { %v8150_v58 = vrot.slane %v8128_v22, %v12518_v9 }
0x2502   :  { %v8123_v24 = vpop.permute.xlu1 %8122 }
0x251e   :  { %v8125_v17 = vpop.permute.xlu0 %8124 }
0x251f   :  { %v8129_v57 = vcombine.low %v8123_v24, %v8125_v17 }
0x2521   :  { %v8157_v47 = vrot.slane %v8129_v57, %v12518_v9 }
0x2522   :  { %v8287_v55 = vpop.permute.xlu0 %8286 }
0x2523   :  { %v8159_v4 = vcombine.low %v8150_v58, %v8157_v47  ;;  %v8289_v60 = vmax.f32 %v8284_v43, %v8287_v55 }
0x2525   :  { %8291 = vrot.lane.b32.xlu0 %v8289_v60, %s12320_s18  ;;  %v8173_v62 = vrot.slane %v8159_v4, %v12518_v9 }
0x2527   :  { %v8174_v63 = vcombine.low %v8166_v30, %v8173_v62 }
0x2529   :  { %8293 = vrot.lane.b32.xlu0 %v8289_v60, %s12319_s17  ;;  %v8176_v61 = vsel %vm79_vm0, %v8174_v63, -inf }
0x252a   :  { %8177 = vmax.xlane.f32.xlu1 %v8176_v61 }
0x252d   :  { %8295 = vrot.lane.b32.xlu0 %v8289_v60, %s12321_s19 }
0x2531   :  { %8297 = vrot.lane.b32.xlu0 %v8289_v60, %s12322_s20 }
0x2535   :  { %8299 = vrot.lane.b32.xlu0 %v8289_v60, %s12323_s21 }
0x2539   :  { %8301 = vrot.lane.b32.xlu0 %v8289_v60, %s12324_s22 }
0x253b   :  { %8305 = vrot.lane.b32.xlu1 %v8289_v60, %s12327_s25 }
0x253d   :  { %8303 = vrot.lane.b32.xlu0 %v8289_v60, %s12325_s23  ;;  %v8479_v60 = vld [vmem:[%s17189_s0 + $0xb] sm:$0x1] }
0x2597   :  { %v8292_v43 = vpop.permute.xlu0 %8291 }
0x2598   :  { %8307 = vrot.lane.b32.xlu0 %v8292_v43, %s12327_s25 }
0x259b   :  { %v8294_v4 = vpop.permute.xlu0 %8293 }
0x259c   :  { %8309 = vrot.lane.b32.xlu0 %v8294_v4, %s12327_s25 }
0x259f   :  { %v8296_v3 = vpop.permute.xlu0 %8295 }
0x25a0   :  { %8311 = vrot.lane.b32.xlu0 %v8296_v3, %s12327_s25 }
0x25a3   :  { %v8298_v49 = vpop.permute.xlu0 %8297 }
0x25a4   :  { %8313 = vrot.lane.b32.xlu0 %v8298_v49, %s12327_s25 }
0x25a7   :  { %v8300_v12 = vpop.permute.xlu0 %8299 }
0x25a8   :  { %8315 = vrot.lane.b32.xlu1 %v8300_v12, %s12327_s25 }
0x25ab   :  { %v8302_v19 = vpop.permute.xlu0 %8301 }
0x25ac   :  { %8317 = vrot.lane.b32.xlu0 %v8302_v19, %s12327_s25 }
0x25af   :  { %v8304_v13 = vpop.permute.xlu0 %8303 }
0x25b0   :  { %8319 = vrot.lane.b32.xlu1 %v8304_v13, %s12327_s25 }
0x25b3   :  { %v13633_v17 = vpop.xlane.xlu1 %8177 }
0x25b4   :  { %8481 = vrot.lane.b32.xlu1 %v8479_v60, %s12318_s10  ;;  %17328 = vst [vmem:[#allocation30_spill] sm:$0xff] %v13633_v17 }
0x25b7   :  { %v8306_v57 = vpop.permute.xlu1 %8305 }
0x260a   :  { %v8308_v22 = vpop.permute.xlu0 %8307 }
0x260b   :  { %v8321_v55 = vcombine.low %v8306_v57, %v8308_v22 }
0x260d   :  { %v8331_v43 = vrot.slane %v8321_v55, %v12518_v9 }
0x260e   :  { %v8310_v24 = vpop.permute.xlu0 %8309 }
0x2612   :  { %v8312_v45 = vpop.permute.xlu0 %8311 }
0x2613   :  { %v8322_v18 = vcombine.low %v8310_v24, %v8312_v45 }
0x2615   :  { %v8338_v30 = vrot.slane %v8322_v18, %v12518_v9 }
0x2616   :  { %v8314_v58 = vpop.permute.xlu0 %8313 }
0x2617   :  { %v8353_v3 = vcombine.low %v8331_v43, %v8338_v30 }
0x2619   :  { %v8361_v22 = vrot.slane %v8353_v3, %v12518_v9 }
0x261a   :  { %v8316_v47 = vpop.permute.xlu1 %8315 }
0x261b   :  { %v8323_v62 = vcombine.low %v8314_v58, %v8316_v47 }
0x261d   :  { %v8345_v49 = vrot.slane %v8323_v62, %v12518_v9 }
0x261e   :  { %v8318_v63 = vpop.permute.xlu0 %8317 }
0x2622   :  { %v8320_v61 = vpop.permute.xlu1 %8319 }
0x2623   :  { %v8324_v4 = vcombine.low %v8318_v63, %v8320_v61 }
0x2625   :  { %v8352_v12 = vrot.slane %v8324_v4, %v12518_v9 }
0x2626   :  { %v8482_v19 = vpop.permute.xlu1 %8481 }
0x2627   :  { %v8354_v13 = vcombine.low %v8345_v49, %v8352_v12  ;;  %v8484_v17 = vmax.f32 %v8479_v60, %v8482_v19  ;;  %v8658_v60 = vld [vmem:[%s17189_s0 + $0xb] sm:$0x1] }
0x2629   :  { %8486 = vrot.lane.b32.xlu1 %v8484_v17, %s12320_s18  ;;  %v8368_v24 = vrot.slane %v8354_v13, %v12518_v9 }
0x262b   :  { %v8369_v45 = vcombine.low %v8361_v22, %v8368_v24 }
0x262d   :  { %8488 = vrot.lane.b32.xlu1 %v8484_v17, %s12319_s17  ;;  %v8371_v57 = vsel %vm79_vm0, %v8369_v45, -inf }
0x262e   :  { %8372 = vmax.xlane.f32.xlu0 %v8371_v57 }
0x2631   :  { %8490 = vrot.lane.b32.xlu1 %v8484_v17, %s12321_s19 }
0x2635   :  { %8492 = vrot.lane.b32.xlu1 %v8484_v17, %s12322_s20 }
0x2639   :  { %8494 = vrot.lane.b32.xlu1 %v8484_v17, %s12323_s21 }
0x263d   :  { %8496 = vrot.lane.b32.xlu1 %v8484_v17, %s12324_s22 }
0x2644   :  { %8498 = vrot.lane.b32.xlu0 %v8484_v17, %s12325_s23 }
0x2648   :  { %8660 = vrot.lane.b32.xlu0 %v8658_v60, %s12318_s10 }
0x269b   :  { %v8487_v18 = vpop.permute.xlu1 %8486 }
0x269c   :  { %v8500_v61 = vcombine.low %v8484_v17, %v8487_v18 }
0x269e   :  { %v8510_v12 = vrot.slane %v8500_v61, %v12518_v9 }
0x269f   :  { %v8489_v58 = vpop.permute.xlu1 %8488 }
0x26a3   :  { %v8491_v47 = vpop.permute.xlu1 %8490 }
0x26a4   :  { %v8501_v62 = vcombine.low %v8489_v58, %v8491_v47 }
0x26a6   :  { %v8517_v43 = vrot.slane %v8501_v62, %v12518_v9 }
0x26a7   :  { %v8493_v55 = vpop.permute.xlu1 %8492 }
0x26a8   :  { %v8532_v13 = vcombine.low %v8510_v12, %v8517_v43 }
0x26aa   :  { %v8540_v17 = vrot.slane %v8532_v13, %v12518_v9 }
0x26ab   :  { %v8495_v30 = vpop.permute.xlu1 %8494 }
0x26ac   :  { %v8502_v4 = vcombine.low %v8493_v55, %v8495_v30 }
0x26ae   :  { %v8524_v22 = vrot.slane %v8502_v4, %v12518_v9 }
0x26af   :  { %v8497_v3 = vpop.permute.xlu1 %8496 }
0x26b7   :  { %v13653_v63 = vpop.xlane.xlu0 %8372 }
0x26b8   :  { %17329 = vst [vmem:[#allocation31_spill] sm:$0xff] %v13653_v63 }
0x26bb   :  { %v8499_v49 = vpop.permute.xlu0 %8498 }
0x26bc   :  { %v8503_v19 = vcombine.low %v8497_v3, %v8499_v49 }
0x26be   :  { %v8531_v24 = vrot.slane %v8503_v19, %v12518_v9 }
0x26bf   :  { %v8661_v45 = vpop.permute.xlu0 %8660 }
0x26c0   :  { %v8533_v57 = vcombine.low %v8524_v22, %v8531_v24  ;;  %v8663_v10 = vmax.f32 %v8658_v60, %v8661_v45 }
0x26c2   :  { %8665 = vrot.lane.b32.xlu0 %v8663_v10, %s12320_s18  ;;  %v8547_v18 = vrot.slane %v8533_v57, %v12518_v9 }
0x26c4   :  { %v8548_v58 = vcombine.low %v8540_v17, %v8547_v18 }
0x26c6   :  { %8667 = vrot.lane.b32.xlu0 %v8663_v10, %s12319_s17  ;;  %v8550_v47 = vsel %vm79_vm0, %v8548_v58, -inf }
0x26c7   :  { %8551 = vmax.xlane.f32.xlu1 %v8550_v47 }
0x26ca   :  { %8669 = vrot.lane.b32.xlu0 %v8663_v10, %s12321_s19 }
0x26ce   :  { %8673 = vrot.lane.b32.xlu0 %v8663_v10, %s12323_s21 }
0x26d2   :  { %8675 = vrot.lane.b32.xlu0 %v8663_v10, %s12324_s22 }
0x26d6   :  { %8677 = vrot.lane.b32.xlu0 %v8663_v10, %s12325_s23 }
0x26d8   :  { %8671 = vrot.lane.b32.xlu1 %v8663_v10, %s12322_s20 }
0x26da   :  { %8679 = vrot.lane.b32.xlu0 %v8663_v10, %s12326_s24  ;;  %v8853_v10 = vld [vmem:[%s17189_s0 + $0xb] sm:$0x1] }
0x2734   :  { %v8666_v60 = vpop.permute.xlu0 %8665 }
0x2735   :  { %8681 = vrot.lane.b32.xlu1 %v8666_v60, %s12326_s24 }
0x2738   :  { %v8668_v55 = vpop.permute.xlu0 %8667 }
0x2739   :  { %8683 = vrot.lane.b32.xlu0 %v8668_v55, %s12326_s24 }
0x273c   :  { %v8670_v30 = vpop.permute.xlu0 %8669 }
0x273d   :  { %8685 = vrot.lane.b32.xlu1 %v8670_v30, %s12326_s24 }
0x2740   :  { %v8674_v62 = vpop.permute.xlu0 %8673 }
0x2741   :  { %8689 = vrot.lane.b32.xlu1 %v8674_v62, %s12326_s24 }
0x2744   :  { %v8676_v61 = vpop.permute.xlu0 %8675 }
0x2748   :  { %v8678_v43 = vpop.permute.xlu0 %8677 }
0x2749   :  { %8693 = vrot.lane.b32.xlu1 %v8678_v43, %s12326_s24 }
0x274c   :  { %v8680_v22 = vpop.permute.xlu0 %8679 }
0x274d   :  { %8855 = vrot.lane.b32.xlu1 %v8853_v10, %s12318_s10 }
0x2750   :  { %v13679_v4 = vpop.xlane.xlu1 %8551 }
0x2751   :  { %17330 = vst [vmem:[#allocation32_spill] sm:$0xff] %v13679_v4 }
0x2754   :  { %v8672_v3 = vpop.permute.xlu1 %8671 }
0x2755   :  { %8687 = vrot.lane.b32.xlu0 %v8672_v3, %s12326_s24 }
0x2759   :  { %8691 = vrot.lane.b32.xlu0 %v8676_v61, %s12326_s24 }
0x27a7   :  { %v8682_v49 = vpop.permute.xlu1 %8681 }
0x27a8   :  { %v8695_v58 = vcombine.low %v8680_v22, %v8682_v49 }
0x27aa   :  { %v8705_v30 = vrot.slane %v8695_v58, %v12518_v9 }
0x27ab   :  { %v8684_v57 = vpop.permute.xlu0 %8683 }
0x27af   :  { %v8686_v12 = vpop.permute.xlu1 %8685 }
0x27b0   :  { %v8696_v17 = vcombine.low %v8684_v57, %v8686_v12 }
0x27b2   :  { %v8712_v47 = vrot.slane %v8696_v17, %v12518_v9 }
0x27b3   :  { %v8690_v19 = vpop.permute.xlu1 %8689 }
0x27b4   :  { %v8727_v61 = vcombine.low %v8705_v30, %v8712_v47 }
0x27b6   :  { %v8735_v49 = vrot.slane %v8727_v61, %v12518_v9 }
0x27bb   :  { %v8694_v13 = vpop.permute.xlu1 %8693 }
0x27bf   :  { %v8856_v24 = vpop.permute.xlu1 %8855 }
0x27c0   :  { %v8858_v45 = vmax.f32 %v8853_v10, %v8856_v24 }
0x27c2   :  { %8860 = vrot.lane.b32.xlu1 %v8858_v45, %s12320_s18 }
0x27c6   :  { %8862 = vrot.lane.b32.xlu1 %v8858_v45, %s12319_s17 }
0x27c7   :  { %v8688_v18 = vpop.permute.xlu0 %8687 }
0x27c8   :  { %v8697_v60 = vcombine.low %v8688_v18, %v8690_v19 }
0x27ca   :  { %8864 = vrot.lane.b32.xlu1 %v8858_v45, %s12321_s19  ;;  %v8719_v43 = vrot.slane %v8697_v60, %v12518_v9  ;;  %v9048_v60 = vld [vmem:[%s17189_s0 + $0xb] sm:$0x1] }
0x27cb   :  { %v8692_v55 = vpop.permute.xlu0 %8691 }
0x27cc   :  { %v8698_v62 = vcombine.low %v8692_v55, %v8694_v13 }
0x27ce   :  { %v8726_v10 = vrot.slane %v8698_v62, %v12518_v9  ;;  %8866 = vrot.lane.b32.xlu1 %v8858_v45, %s12322_s20 }
0x27d0   :  { %v8728_v3 = vcombine.low %v8719_v43, %v8726_v10 }
0x27d2   :  { %8868 = vrot.lane.b32.xlu1 %v8858_v45, %s12323_s21  ;;  %v8742_v12 = vrot.slane %v8728_v3, %v12518_v9 }
0x27d4   :  { %v8743_v19 = vcombine.low %v8735_v49, %v8742_v12 }
0x27d6   :  { %v8745_v22 = vsel %vm79_vm0, %v8743_v19, -inf  ;;  %8870 = vrot.lane.b32.xlu1 %v8858_v45, %s12324_s22 }
0x27d7   :  { %8746 = vmax.xlane.f32.xlu0 %v8745_v22 }
0x27da   :  { %8874 = vrot.lane.b32.xlu1 %v8858_v45, %s12328_s26 }
0x27ed   :  { %8872 = vrot.lane.b32.xlu0 %v8858_v45, %s12325_s23 }
0x2834   :  { %v8861_v13 = vpop.permute.xlu1 %8860 }
0x2835   :  { %8876 = vrot.lane.b32.xlu1 %v8861_v13, %s12328_s26 }
0x2838   :  { %v8863_v24 = vpop.permute.xlu1 %8862 }
0x2839   :  { %8878 = vrot.lane.b32.xlu1 %v8863_v24, %s12328_s26 }
0x283c   :  { %v8865_v57 = vpop.permute.xlu1 %8864 }
0x283d   :  { %8880 = vrot.lane.b32.xlu1 %v8865_v57, %s12328_s26 }
0x2840   :  { %v8867_v17 = vpop.permute.xlu1 %8866 }
0x2841   :  { %8882 = vrot.lane.b32.xlu1 %v8867_v17, %s12328_s26 }
0x2844   :  { %v8869_v18 = vpop.permute.xlu1 %8868 }
0x2845   :  { %8884 = vrot.lane.b32.xlu0 %v8869_v18, %s12328_s26 }
0x2848   :  { %v8871_v58 = vpop.permute.xlu1 %8870 }
0x2849   :  { %8886 = vrot.lane.b32.xlu1 %v8871_v58, %s12328_s26 }
0x284c   :  { %v8875_v55 = vpop.permute.xlu1 %8874 }
0x2860   :  { %v13704_v47 = vpop.xlane.xlu0 %8746 }
0x2861   :  { %17331 = vst [vmem:[#allocation33_spill] sm:$0xff] %v13704_v47 }
0x2864   :  { %v8873_v45 = vpop.permute.xlu0 %8872 }
0x2865   :  { %8888 = vrot.lane.b32.xlu0 %v8873_v45, %s12328_s26 }
0x2869   :  { %9050 = vrot.lane.b32.xlu0 %v9048_v60, %s12318_s10 }
0x28a7   :  { %v8877_v30 = vpop.permute.xlu1 %8876 }
0x28a8   :  { %v8890_v49 = vcombine.low %v8875_v55, %v8877_v30 }
0x28aa   :  { %v8900_v24 = vrot.slane %v8890_v49, %v12518_v9 }
0x28ab   :  { %v8879_v62 = vpop.permute.xlu1 %8878 }
0x28af   :  { %v8881_v61 = vpop.permute.xlu1 %8880 }
0x28b0   :  { %v8891_v10 = vcombine.low %v8879_v62, %v8881_v61 }
0x28b2   :  { %v8907_v12 = vrot.slane %v8891_v10, %v12518_v9 }
0x28b3   :  { %v8883_v43 = vpop.permute.xlu1 %8882 }
0x28b4   :  { %v8922_v17 = vcombine.low %v8900_v24, %v8907_v12 }
0x28b6   :  { %v8930_v55 = vrot.slane %v8922_v17, %v12518_v9 }
0x28b7   :  { %v8885_v3 = vpop.permute.xlu0 %8884 }
0x28b8   :  { %v8892_v19 = vcombine.low %v8883_v43, %v8885_v3 }
0x28ba   :  { %v8914_v18 = vrot.slane %v8892_v19, %v12518_v9 }
0x28bb   :  { %v8887_v22 = vpop.permute.xlu1 %8886 }
0x28d7   :  { %v8889_v13 = vpop.permute.xlu0 %8888 }
0x28d8   :  { %v8893_v57 = vcombine.low %v8887_v22, %v8889_v13 }
0x28da   :  { %v8921_v58 = vrot.slane %v8893_v57, %v12518_v9 }
0x28db   :  { %v9051_v45 = vpop.permute.xlu0 %9050 }
0x28dc   :  { %v8923_v47 = vcombine.low %v8914_v18, %v8921_v58  ;;  %v9053_v4 = vmax.f32 %v9048_v60, %v9051_v45 }
0x28de   :  { %9055 = vrot.lane.b32.xlu0 %v9053_v4, %s12320_s18  ;;  %v8937_v30 = vrot.slane %v8923_v47, %v12518_v9 }
0x28e0   :  { %v8938_v62 = vcombine.low %v8930_v55, %v8937_v30 }
0x28e2   :  { %9057 = vrot.lane.b32.xlu0 %v9053_v4, %s12319_s17  ;;  %v8940_v61 = vsel %vm79_vm0, %v8938_v62, -inf }
0x28e3   :  { %8941 = vmax.xlane.f32.xlu1 %v8940_v61 }
0x28e6   :  { %9059 = vrot.lane.b32.xlu0 %v9053_v4, %s12321_s19 }
0x28ea   :  { %9061 = vrot.lane.b32.xlu0 %v9053_v4, %s12322_s20 }
0x28ee   :  { %9063 = vrot.lane.b32.xlu0 %v9053_v4, %s12323_s21 }
0x28f2   :  { %9065 = vrot.lane.b32.xlu0 %v9053_v4, %s12324_s22 }
0x28f4   :  { %9069 = vrot.lane.b32.xlu1 %v9053_v4, %s12327_s25 }
0x28f6   :  { %9067 = vrot.lane.b32.xlu0 %v9053_v4, %s12325_s23  ;;  %v9243_v4 = vld [vmem:[%s17189_s0 + $0xc] sm:$0x1] }
0x2950   :  { %v9056_v60 = vpop.permute.xlu0 %9055 }
0x2951   :  { %9071 = vrot.lane.b32.xlu0 %v9056_v60, %s12327_s25 }
0x2954   :  { %v9058_v47 = vpop.permute.xlu0 %9057 }
0x2955   :  { %9073 = vrot.lane.b32.xlu0 %v9058_v47, %s12327_s25 }
0x2958   :  { %v9060_v43 = vpop.permute.xlu0 %9059 }
0x2959   :  { %9075 = vrot.lane.b32.xlu0 %v9060_v43, %s12327_s25 }
0x295c   :  { %v9062_v10 = vpop.permute.xlu0 %9061 }
0x295d   :  { %9077 = vrot.lane.b32.xlu0 %v9062_v10, %s12327_s25 }
0x2960   :  { %v9064_v3 = vpop.permute.xlu0 %9063 }
0x2961   :  { %9079 = vrot.lane.b32.xlu1 %v9064_v3, %s12327_s25 }
0x2964   :  { %v9066_v49 = vpop.permute.xlu0 %9065 }
0x2965   :  { %9081 = vrot.lane.b32.xlu0 %v9066_v49, %s12327_s25 }
0x2968   :  { %v9068_v12 = vpop.permute.xlu0 %9067 }
0x2969   :  { %9083 = vrot.lane.b32.xlu1 %v9068_v12, %s12327_s25 }
0x296c   :  { %v13737_v13 = vpop.xlane.xlu1 %8941 }
0x296d   :  { %9245 = vrot.lane.b32.xlu1 %v9243_v4, %s12318_s10  ;;  %17332 = vst [vmem:[#allocation34_spill] sm:$0xff] %v13737_v13 }
0x2970   :  { %v9070_v57 = vpop.permute.xlu1 %9069 }
0x29c3   :  { %v9072_v19 = vpop.permute.xlu0 %9071 }
0x29c4   :  { %v9085_v45 = vcombine.low %v9070_v57, %v9072_v19 }
0x29c6   :  { %v9095_v60 = vrot.slane %v9085_v45, %v12518_v9 }
0x29c7   :  { %v9074_v22 = vpop.permute.xlu0 %9073 }
0x29cb   :  { %v9076_v24 = vpop.permute.xlu0 %9075 }
0x29cc   :  { %v9086_v17 = vcombine.low %v9074_v22, %v9076_v24 }
0x29ce   :  { %v9102_v55 = vrot.slane %v9086_v17, %v12518_v9 }
0x29cf   :  { %v9078_v18 = vpop.permute.xlu0 %9077 }
0x29d0   :  { %v9117_v43 = vcombine.low %v9095_v60, %v9102_v55 }
0x29d2   :  { %v9125_v19 = vrot.slane %v9117_v43, %v12518_v9 }
0x29d3   :  { %v9080_v58 = vpop.permute.xlu1 %9079 }
0x29d4   :  { %v9087_v30 = vcombine.low %v9078_v18, %v9080_v58 }
0x29d6   :  { %v9109_v10 = vrot.slane %v9087_v30, %v12518_v9 }
0x29d7   :  { %v9082_v62 = vpop.permute.xlu0 %9081 }
0x29db   :  { %v9084_v61 = vpop.permute.xlu1 %9083 }
0x29dc   :  { %v9088_v47 = vcombine.low %v9082_v62, %v9084_v61 }
0x29de   :  { %v9116_v3 = vrot.slane %v9088_v47, %v12518_v9 }
0x29df   :  { %v9246_v49 = vpop.permute.xlu1 %9245 }
0x29e0   :  { %v9118_v12 = vcombine.low %v9109_v10, %v9116_v3  ;;  %v9248_v13 = vmax.f32 %v9243_v4, %v9246_v49  ;;  %v9422_v4 = vld [vmem:[%s17189_s0 + $0xc] sm:$0x1] }
0x29e2   :  { %9250 = vrot.lane.b32.xlu1 %v9248_v13, %s12320_s18  ;;  %v9132_v22 = vrot.slane %v9118_v12, %v12518_v9 }
0x29e4   :  { %v9133_v24 = vcombine.low %v9125_v19, %v9132_v22 }
0x29e6   :  { %9252 = vrot.lane.b32.xlu1 %v9248_v13, %s12319_s17  ;;  %v9135_v57 = vsel %vm79_vm0, %v9133_v24, -inf }
0x29e7   :  { %9136 = vmax.xlane.f32.xlu0 %v9135_v57 }
0x29ea   :  { %9254 = vrot.lane.b32.xlu1 %v9248_v13, %s12321_s19 }
0x29ee   :  { %9256 = vrot.lane.b32.xlu1 %v9248_v13, %s12322_s20 }
0x29f2   :  { %9258 = vrot.lane.b32.xlu1 %v9248_v13, %s12323_s21 }
0x29f6   :  { %9260 = vrot.lane.b32.xlu1 %v9248_v13, %s12324_s22 }
0x29fd   :  { %9262 = vrot.lane.b32.xlu0 %v9248_v13, %s12325_s23 }
0x2a01   :  { %9424 = vrot.lane.b32.xlu0 %v9422_v4, %s12318_s10 }
0x2a54   :  { %v9251_v17 = vpop.permute.xlu1 %9250 }
0x2a55   :  { %v9264_v61 = vcombine.low %v9248_v13, %v9251_v17 }
0x2a57   :  { %v9274_v3 = vrot.slane %v9264_v61, %v12518_v9 }
0x2a58   :  { %v9253_v18 = vpop.permute.xlu1 %9252 }
0x2a5c   :  { %v9255_v58 = vpop.permute.xlu1 %9254 }
0x2a5d   :  { %v9265_v30 = vcombine.low %v9253_v18, %v9255_v58 }
0x2a5f   :  { %v9281_v60 = vrot.slane %v9265_v30, %v12518_v9 }
0x2a60   :  { %v9257_v45 = vpop.permute.xlu1 %9256 }
0x2a61   :  { %v9296_v12 = vcombine.low %v9274_v3, %v9281_v60 }
0x2a63   :  { %v9304_v13 = vrot.slane %v9296_v12, %v12518_v9 }
0x2a64   :  { %v9259_v55 = vpop.permute.xlu1 %9258 }
0x2a65   :  { %v9266_v47 = vcombine.low %v9257_v45, %v9259_v55 }
0x2a67   :  { %v9288_v19 = vrot.slane %v9266_v47, %v12518_v9 }
0x2a68   :  { %v9261_v43 = vpop.permute.xlu1 %9260 }
0x2a70   :  { %v13757_v62 = vpop.xlane.xlu0 %9136 }
0x2a71   :  { %17333 = vst [vmem:[#allocation35_spill] sm:$0xff] %v13757_v62 }
0x2a74   :  { %v9263_v10 = vpop.permute.xlu0 %9262 }
0x2a75   :  { %v9267_v49 = vcombine.low %v9261_v43, %v9263_v10 }
0x2a77   :  { %v9295_v22 = vrot.slane %v9267_v49, %v12518_v9 }
0x2a78   :  { %v9425_v24 = vpop.permute.xlu0 %9424 }
0x2a79   :  { %v9297_v57 = vcombine.low %v9288_v19, %v9295_v22  ;;  %v9427_v63 = vmax.f32 %v9422_v4, %v9425_v24 }
0x2a7b   :  { %9429 = vrot.lane.b32.xlu0 %v9427_v63, %s12320_s18  ;;  %v9311_v17 = vrot.slane %v9297_v57, %v12518_v9 }
0x2a7d   :  { %v9312_v18 = vcombine.low %v9304_v13, %v9311_v17 }
0x2a7f   :  { %9431 = vrot.lane.b32.xlu0 %v9427_v63, %s12319_s17  ;;  %v9314_v58 = vsel %vm79_vm0, %v9312_v18, -inf }
0x2a80   :  { %9315 = vmax.xlane.f32.xlu1 %v9314_v58 }
0x2a83   :  { %9433 = vrot.lane.b32.xlu0 %v9427_v63, %s12321_s19 }
0x2a87   :  { %9437 = vrot.lane.b32.xlu0 %v9427_v63, %s12323_s21 }
0x2a8b   :  { %9439 = vrot.lane.b32.xlu0 %v9427_v63, %s12324_s22 }
0x2a8f   :  { %9441 = vrot.lane.b32.xlu0 %v9427_v63, %s12325_s23 }
0x2a91   :  { %9435 = vrot.lane.b32.xlu1 %v9427_v63, %s12322_s20 }
0x2a93   :  { %9443 = vrot.lane.b32.xlu0 %v9427_v63, %s12326_s24  ;;  %v9617_v63 = vld [vmem:[%s17189_s0 + $0xc] sm:$0x1] }
0x2aed   :  { %v9430_v4 = vpop.permute.xlu0 %9429 }
0x2aee   :  { %9445 = vrot.lane.b32.xlu1 %v9430_v4, %s12326_s24 }
0x2af1   :  { %v9432_v45 = vpop.permute.xlu0 %9431 }
0x2af2   :  { %9447 = vrot.lane.b32.xlu0 %v9432_v45, %s12326_s24 }
0x2af5   :  { %v9434_v55 = vpop.permute.xlu0 %9433 }
0x2af6   :  { %9449 = vrot.lane.b32.xlu1 %v9434_v55, %s12326_s24 }
0x2af9   :  { %v9438_v30 = vpop.permute.xlu0 %9437 }
0x2afa   :  { %9453 = vrot.lane.b32.xlu1 %v9438_v30, %s12326_s24 }
0x2afd   :  { %v9440_v61 = vpop.permute.xlu0 %9439 }
0x2b01   :  { %v9442_v60 = vpop.permute.xlu0 %9441 }
0x2b02   :  { %9457 = vrot.lane.b32.xlu1 %v9442_v60, %s12326_s24 }
0x2b05   :  { %v9444_v19 = vpop.permute.xlu0 %9443 }
0x2b06   :  { %9619 = vrot.lane.b32.xlu1 %v9617_v63, %s12318_s10 }
0x2b09   :  { %v13783_v47 = vpop.xlane.xlu1 %9315 }
0x2b0a   :  { %17334 = vst [vmem:[#allocation36_spill] sm:$0xff] %v13783_v47 }
0x2b0d   :  { %v9436_v43 = vpop.permute.xlu1 %9435 }
0x2b0e   :  { %9451 = vrot.lane.b32.xlu0 %v9436_v43, %s12326_s24 }
0x2b12   :  { %9455 = vrot.lane.b32.xlu0 %v9440_v61, %s12326_s24 }
0x2b60   :  { %v9446_v10 = vpop.permute.xlu1 %9445 }
0x2b61   :  { %v9459_v18 = vcombine.low %v9444_v19, %v9446_v10 }
0x2b63   :  { %v9469_v55 = vrot.slane %v9459_v18, %v12518_v9 }
0x2b64   :  { %v9448_v57 = vpop.permute.xlu0 %9447 }
0x2b68   :  { %v9450_v3 = vpop.permute.xlu1 %9449 }
0x2b69   :  { %v9460_v13 = vcombine.low %v9448_v57, %v9450_v3 }
0x2b6b   :  { %v9476_v58 = vrot.slane %v9460_v13, %v12518_v9 }
0x2b6c   :  { %v9454_v49 = vpop.permute.xlu1 %9453 }
0x2b6d   :  { %v9491_v61 = vcombine.low %v9469_v55, %v9476_v58 }
0x2b6f   :  { %v9499_v10 = vrot.slane %v9491_v61, %v12518_v9 }
0x2b74   :  { %v9458_v12 = vpop.permute.xlu1 %9457 }
0x2b78   :  { %v9620_v22 = vpop.permute.xlu1 %9619 }
0x2b79   :  { %v9622_v24 = vmax.f32 %v9617_v63, %v9620_v22 }
0x2b7b   :  { %9624 = vrot.lane.b32.xlu1 %v9622_v24, %s12320_s18 }
0x2b7f   :  { %9626 = vrot.lane.b32.xlu1 %v9622_v24, %s12319_s17 }
0x2b80   :  { %v9452_v17 = vpop.permute.xlu0 %9451 }
0x2b81   :  { %v9461_v4 = vcombine.low %v9452_v17, %v9454_v49 }
0x2b83   :  { %9628 = vrot.lane.b32.xlu1 %v9622_v24, %s12321_s19  ;;  %v9483_v60 = vrot.slane %v9461_v4, %v12518_v9  ;;  %v9812_v4 = vld [vmem:[%s17189_s0 + $0xc] sm:$0x1] }
0x2b84   :  { %v9456_v45 = vpop.permute.xlu0 %9455 }
0x2b85   :  { %v9462_v30 = vcombine.low %v9456_v45, %v9458_v12 }
0x2b87   :  { %v9490_v63 = vrot.slane %v9462_v30, %v12518_v9  ;;  %9630 = vrot.lane.b32.xlu1 %v9622_v24, %s12322_s20 }
0x2b89   :  { %v9492_v43 = vcombine.low %v9483_v60, %v9490_v63 }
0x2b8b   :  { %9632 = vrot.lane.b32.xlu1 %v9622_v24, %s12323_s21  ;;  %v9506_v3 = vrot.slane %v9492_v43, %v12518_v9 }
0x2b8d   :  { %v9507_v49 = vcombine.low %v9499_v10, %v9506_v3 }
0x2b8f   :  { %v9509_v19 = vsel %vm79_vm0, %v9507_v49, -inf  ;;  %9634 = vrot.lane.b32.xlu1 %v9622_v24, %s12324_s22 }
0x2b90   :  { %9510 = vmax.xlane.f32.xlu0 %v9509_v19 }
0x2b93   :  { %9638 = vrot.lane.b32.xlu1 %v9622_v24, %s12328_s26 }
0x2ba6   :  { %9636 = vrot.lane.b32.xlu0 %v9622_v24, %s12325_s23 }
0x2bed   :  { %v9625_v12 = vpop.permute.xlu1 %9624 }
0x2bee   :  { %9640 = vrot.lane.b32.xlu1 %v9625_v12, %s12328_s26 }
0x2bf1   :  { %v9627_v22 = vpop.permute.xlu1 %9626 }
0x2bf2   :  { %9642 = vrot.lane.b32.xlu1 %v9627_v22, %s12328_s26 }
0x2bf5   :  { %v9629_v57 = vpop.permute.xlu1 %9628 }
0x2bf6   :  { %9644 = vrot.lane.b32.xlu1 %v9629_v57, %s12328_s26 }
0x2bf9   :  { %v9631_v13 = vpop.permute.xlu1 %9630 }
0x2bfa   :  { %9646 = vrot.lane.b32.xlu1 %v9631_v13, %s12328_s26 }
0x2bfd   :  { %v9633_v17 = vpop.permute.xlu1 %9632 }
0x2bfe   :  { %9648 = vrot.lane.b32.xlu0 %v9633_v17, %s12328_s26 }
0x2c01   :  { %v9635_v18 = vpop.permute.xlu1 %9634 }
0x2c02   :  { %9650 = vrot.lane.b32.xlu1 %v9635_v18, %s12328_s26 }
0x2c05   :  { %v9639_v45 = vpop.permute.xlu1 %9638 }
0x2c19   :  { %v13808_v58 = vpop.xlane.xlu0 %9510 }
0x2c1a   :  { %17335 = vst [vmem:[#allocation37_spill] sm:$0xff] %v13808_v58 }
0x2c1d   :  { %v9637_v24 = vpop.permute.xlu0 %9636 }
0x2c1e   :  { %9652 = vrot.lane.b32.xlu0 %v9637_v24, %s12328_s26 }
0x2c22   :  { %9814 = vrot.lane.b32.xlu0 %v9812_v4, %s12318_s10 }
0x2c60   :  { %v9641_v55 = vpop.permute.xlu1 %9640 }
0x2c61   :  { %v9654_v10 = vcombine.low %v9639_v45, %v9641_v55 }
0x2c63   :  { %v9664_v22 = vrot.slane %v9654_v10, %v12518_v9 }
0x2c64   :  { %v9643_v30 = vpop.permute.xlu1 %9642 }
0x2c68   :  { %v9645_v61 = vpop.permute.xlu1 %9644 }
0x2c69   :  { %v9655_v63 = vcombine.low %v9643_v30, %v9645_v61 }
0x2c6b   :  { %v9671_v3 = vrot.slane %v9655_v63, %v12518_v9 }
0x2c6c   :  { %v9647_v60 = vpop.permute.xlu1 %9646 }
0x2c6d   :  { %v9686_v13 = vcombine.low %v9664_v22, %v9671_v3 }
0x2c6f   :  { %v9694_v45 = vrot.slane %v9686_v13, %v12518_v9 }
0x2c70   :  { %v9649_v43 = vpop.permute.xlu0 %9648 }
0x2c71   :  { %v9656_v49 = vcombine.low %v9647_v60, %v9649_v43 }
0x2c73   :  { %v9678_v17 = vrot.slane %v9656_v49, %v12518_v9 }
0x2c74   :  { %v9651_v19 = vpop.permute.xlu1 %9650 }
0x2c90   :  { %v9653_v12 = vpop.permute.xlu0 %9652 }
0x2c91   :  { %v9657_v57 = vcombine.low %v9651_v19, %v9653_v12 }
0x2c93   :  { %v9685_v18 = vrot.slane %v9657_v57, %v12518_v9 }
0x2c94   :  { %v9815_v24 = vpop.permute.xlu0 %9814 }
0x2c95   :  { %v9687_v58 = vcombine.low %v9678_v17, %v9685_v18  ;;  %v9817_v47 = vmax.f32 %v9812_v4, %v9815_v24 }
0x2c97   :  { %9819 = vrot.lane.b32.xlu0 %v9817_v47, %s12320_s18  ;;  %v9701_v55 = vrot.slane %v9687_v58, %v12518_v9 }
0x2c99   :  { %v9702_v30 = vcombine.low %v9694_v45, %v9701_v55 }
0x2c9b   :  { %9821 = vrot.lane.b32.xlu0 %v9817_v47, %s12319_s17  ;;  %v9704_v61 = vsel %vm79_vm0, %v9702_v30, -inf }
0x2c9c   :  { %9705 = vmax.xlane.f32.xlu1 %v9704_v61 }
0x2c9f   :  { %9823 = vrot.lane.b32.xlu0 %v9817_v47, %s12321_s19 }
0x2ca3   :  { %9825 = vrot.lane.b32.xlu0 %v9817_v47, %s12322_s20 }
0x2ca7   :  { %9827 = vrot.lane.b32.xlu0 %v9817_v47, %s12323_s21 }
0x2cab   :  { %9829 = vrot.lane.b32.xlu0 %v9817_v47, %s12324_s22 }
0x2cad   :  { %9833 = vrot.lane.b32.xlu1 %v9817_v47, %s12327_s25 }
0x2caf   :  { %9831 = vrot.lane.b32.xlu0 %v9817_v47, %s12325_s23  ;;  %v10007_v47 = vld [vmem:[%s17189_s0 + $0xd] sm:$0x1] }
0x2d09   :  { %v9820_v4 = vpop.permute.xlu0 %9819 }
0x2d0a   :  { %9835 = vrot.lane.b32.xlu0 %v9820_v4, %s12327_s25 }
0x2d0d   :  { %v9822_v58 = vpop.permute.xlu0 %9821 }
0x2d0e   :  { %9837 = vrot.lane.b32.xlu0 %v9822_v58, %s12327_s25 }
0x2d11   :  { %v9824_v60 = vpop.permute.xlu0 %9823 }
0x2d12   :  { %9839 = vrot.lane.b32.xlu0 %v9824_v60, %s12327_s25 }
0x2d15   :  { %v9826_v63 = vpop.permute.xlu0 %9825 }
0x2d16   :  { %9841 = vrot.lane.b32.xlu0 %v9826_v63, %s12327_s25 }
0x2d19   :  { %v9828_v43 = vpop.permute.xlu0 %9827 }
0x2d1a   :  { %9843 = vrot.lane.b32.xlu1 %v9828_v43, %s12327_s25 }
0x2d1d   :  { %v9830_v10 = vpop.permute.xlu0 %9829 }
0x2d1e   :  { %9845 = vrot.lane.b32.xlu0 %v9830_v10, %s12327_s25 }
0x2d21   :  { %v9832_v3 = vpop.permute.xlu0 %9831 }
0x2d22   :  { %9847 = vrot.lane.b32.xlu1 %v9832_v3, %s12327_s25 }
0x2d25   :  { %v13841_v12 = vpop.xlane.xlu1 %9705 }
0x2d26   :  { %10009 = vrot.lane.b32.xlu1 %v10007_v47, %s12318_s10  ;;  %17336 = vst [vmem:[#allocation38_spill] sm:$0xff] %v13841_v12 }
0x2d29   :  { %v9834_v57 = vpop.permute.xlu1 %9833 }
0x2d7c   :  { %v9836_v49 = vpop.permute.xlu0 %9835 }
0x2d7d   :  { %v9849_v24 = vcombine.low %v9834_v57, %v9836_v49 }
0x2d7f   :  { %v9859_v4 = vrot.slane %v9849_v24, %v12518_v9 }
0x2d80   :  { %v9838_v19 = vpop.permute.xlu0 %9837 }
0x2d84   :  { %v9840_v22 = vpop.permute.xlu0 %9839 }
0x2d85   :  { %v9850_v13 = vcombine.low %v9838_v19, %v9840_v22 }
0x2d87   :  { %v9866_v45 = vrot.slane %v9850_v13, %v12518_v9 }
0x2d88   :  { %v9842_v17 = vpop.permute.xlu0 %9841 }
0x2d89   :  { %v9881_v60 = vcombine.low %v9859_v4, %v9866_v45 }
0x2d8b   :  { %v9889_v49 = vrot.slane %v9881_v60, %v12518_v9 }
0x2d8c   :  { %v9844_v18 = vpop.permute.xlu1 %9843 }
0x2d8d   :  { %v9851_v55 = vcombine.low %v9842_v17, %v9844_v18 }
0x2d8f   :  { %v9873_v63 = vrot.slane %v9851_v55, %v12518_v9 }
0x2d90   :  { %v9846_v30 = vpop.permute.xlu0 %9845 }
0x2d94   :  { %v9848_v61 = vpop.permute.xlu1 %9847 }
0x2d95   :  { %v9852_v58 = vcombine.low %v9846_v30, %v9848_v61 }
0x2d97   :  { %v9880_v43 = vrot.slane %v9852_v58, %v12518_v9 }
0x2d98   :  { %v10010_v10 = vpop.permute.xlu1 %10009 }
0x2d99   :  { %v9882_v3 = vcombine.low %v9873_v63, %v9880_v43  ;;  %v10012_v12 = vmax.f32 %v10007_v47, %v10010_v10  ;;  %v10186_v47 = vld [vmem:[%s17189_s0 + $0xd] sm:$0x1] }
0x2d9b   :  { %10014 = vrot.lane.b32.xlu1 %v10012_v12, %s12320_s18  ;;  %v9896_v19 = vrot.slane %v9882_v3, %v12518_v9 }
0x2d9d   :  { %v9897_v22 = vcombine.low %v9889_v49, %v9896_v19 }
0x2d9f   :  { %10016 = vrot.lane.b32.xlu1 %v10012_v12, %s12319_s17  ;;  %v9899_v57 = vsel %vm79_vm0, %v9897_v22, -inf }
0x2da0   :  { %9900 = vmax.xlane.f32.xlu0 %v9899_v57 }
0x2da3   :  { %10018 = vrot.lane.b32.xlu1 %v10012_v12, %s12321_s19 }
0x2da7   :  { %10020 = vrot.lane.b32.xlu1 %v10012_v12, %s12322_s20 }
0x2dab   :  { %10022 = vrot.lane.b32.xlu1 %v10012_v12, %s12323_s21 }
0x2daf   :  { %10024 = vrot.lane.b32.xlu1 %v10012_v12, %s12324_s22 }
0x2db6   :  { %10026 = vrot.lane.b32.xlu0 %v10012_v12, %s12325_s23 }
0x2dba   :  { %10188 = vrot.lane.b32.xlu0 %v10186_v47, %s12318_s10 }
0x2e0d   :  { %v10015_v13 = vpop.permute.xlu1 %10014 }
0x2e0e   :  { %v10028_v61 = vcombine.low %v10012_v12, %v10015_v13 }
0x2e10   :  { %v10038_v43 = vrot.slane %v10028_v61, %v12518_v9 }
0x2e11   :  { %v10017_v17 = vpop.permute.xlu1 %10016 }
0x2e15   :  { %v10019_v18 = vpop.permute.xlu1 %10018 }
0x2e16   :  { %v10029_v55 = vcombine.low %v10017_v17, %v10019_v18 }
0x2e18   :  { %v10045_v4 = vrot.slane %v10029_v55, %v12518_v9 }
0x2e19   :  { %v10021_v24 = vpop.permute.xlu1 %10020 }
0x2e1a   :  { %v10060_v3 = vcombine.low %v10038_v43, %v10045_v4 }
0x2e1c   :  { %v10068_v12 = vrot.slane %v10060_v3, %v12518_v9 }
0x2e1d   :  { %v10023_v45 = vpop.permute.xlu1 %10022 }
0x2e1e   :  { %v10030_v58 = vcombine.low %v10021_v24, %v10023_v45 }
0x2e20   :  { %v10052_v49 = vrot.slane %v10030_v58, %v12518_v9 }
0x2e21   :  { %v10025_v60 = vpop.permute.xlu1 %10024 }
0x2e29   :  { %v13861_v30 = vpop.xlane.xlu0 %9900 }
0x2e2a   :  { %17337 = vst [vmem:[#allocation39_spill] sm:$0xff] %v13861_v30 }
0x2e2d   :  { %v10027_v63 = vpop.permute.xlu0 %10026 }
0x2e2e   :  { %v10031_v10 = vcombine.low %v10025_v60, %v10027_v63 }
0x2e30   :  { %v10059_v19 = vrot.slane %v10031_v10, %v12518_v9 }
0x2e31   :  { %v10189_v22 = vpop.permute.xlu0 %10188 }
0x2e32   :  { %v10061_v57 = vcombine.low %v10052_v49, %v10059_v19  ;;  %v10191_v62 = vmax.f32 %v10186_v47, %v10189_v22 }
0x2e34   :  { %10193 = vrot.lane.b32.xlu0 %v10191_v62, %s12320_s18  ;;  %v10075_v13 = vrot.slane %v10061_v57, %v12518_v9 }
0x2e36   :  { %v10076_v17 = vcombine.low %v10068_v12, %v10075_v13 }
0x2e38   :  { %10195 = vrot.lane.b32.xlu0 %v10191_v62, %s12319_s17  ;;  %v10078_v18 = vsel %vm79_vm0, %v10076_v17, -inf }
0x2e39   :  { %10079 = vmax.xlane.f32.xlu1 %v10078_v18 }
0x2e3c   :  { %10197 = vrot.lane.b32.xlu0 %v10191_v62, %s12321_s19 }
0x2e40   :  { %10201 = vrot.lane.b32.xlu0 %v10191_v62, %s12323_s21 }
0x2e44   :  { %10203 = vrot.lane.b32.xlu0 %v10191_v62, %s12324_s22 }
0x2e48   :  { %10205 = vrot.lane.b32.xlu0 %v10191_v62, %s12325_s23 }
0x2e4a   :  { %10199 = vrot.lane.b32.xlu1 %v10191_v62, %s12322_s20 }
0x2e4c   :  { %10207 = vrot.lane.b32.xlu0 %v10191_v62, %s12326_s24  ;;  %v10381_v62 = vld [vmem:[%s17189_s0 + $0xd] sm:$0x1] }
0x2ea6   :  { %v10194_v47 = vpop.permute.xlu0 %10193 }
0x2ea7   :  { %10209 = vrot.lane.b32.xlu1 %v10194_v47, %s12326_s24 }
0x2eaa   :  { %v10196_v24 = vpop.permute.xlu0 %10195 }
0x2eab   :  { %10211 = vrot.lane.b32.xlu0 %v10196_v24, %s12326_s24 }
0x2eae   :  { %v10198_v45 = vpop.permute.xlu0 %10197 }
0x2eaf   :  { %10213 = vrot.lane.b32.xlu1 %v10198_v45, %s12326_s24 }
0x2eb2   :  { %v10202_v55 = vpop.permute.xlu0 %10201 }
0x2eb3   :  { %10217 = vrot.lane.b32.xlu1 %v10202_v55, %s12326_s24 }
0x2eb6   :  { %v10204_v61 = vpop.permute.xlu0 %10203 }
0x2eba   :  { %v10206_v4 = vpop.permute.xlu0 %10205 }
0x2ebb   :  { %10221 = vrot.lane.b32.xlu1 %v10206_v4, %s12326_s24 }
0x2ebe   :  { %v10208_v49 = vpop.permute.xlu0 %10207 }
0x2ebf   :  { %10383 = vrot.lane.b32.xlu1 %v10381_v62, %s12318_s10 }
0x2ec2   :  { %v13887_v58 = vpop.xlane.xlu1 %10079 }
0x2ec3   :  { %17338 = vst [vmem:[#allocation40_spill] sm:$0xff] %v13887_v58 }
0x2ec6   :  { %v10200_v60 = vpop.permute.xlu1 %10199 }
0x2ec7   :  { %10215 = vrot.lane.b32.xlu0 %v10200_v60, %s12326_s24 }
0x2ecb   :  { %10219 = vrot.lane.b32.xlu0 %v10204_v61, %s12326_s24 }
0x2f19   :  { %v10210_v63 = vpop.permute.xlu1 %10209 }
0x2f1a   :  { %v10223_v17 = vcombine.low %v10208_v49, %v10210_v63 }
0x2f1c   :  { %v10233_v45 = vrot.slane %v10223_v17, %v12518_v9 }
0x2f1d   :  { %v10212_v57 = vpop.permute.xlu0 %10211 }
0x2f21   :  { %v10214_v43 = vpop.permute.xlu1 %10213 }
0x2f22   :  { %v10224_v12 = vcombine.low %v10212_v57, %v10214_v43 }
0x2f24   :  { %v10240_v18 = vrot.slane %v10224_v12, %v12518_v9 }
0x2f25   :  { %v10218_v10 = vpop.permute.xlu1 %10217 }
0x2f26   :  { %v10255_v61 = vcombine.low %v10233_v45, %v10240_v18 }
0x2f28   :  { %v10263_v63 = vrot.slane %v10255_v61, %v12518_v9 }
0x2f2d   :  { %v10222_v3 = vpop.permute.xlu1 %10221 }
0x2f31   :  { %v10384_v19 = vpop.permute.xlu1 %10383 }
0x2f32   :  { %v10386_v22 = vmax.f32 %v10381_v62, %v10384_v19 }
0x2f34   :  { %10388 = vrot.lane.b32.xlu1 %v10386_v22, %s12320_s18 }
0x2f38   :  { %10390 = vrot.lane.b32.xlu1 %v10386_v22, %s12319_s17 }
0x2f39   :  { %v10216_v13 = vpop.permute.xlu0 %10215 }
0x2f3a   :  { %v10225_v47 = vcombine.low %v10216_v13, %v10218_v10 }
0x2f3c   :  { %10392 = vrot.lane.b32.xlu1 %v10386_v22, %s12321_s19  ;;  %v10247_v4 = vrot.slane %v10225_v47, %v12518_v9  ;;  %v10576_v47 = vld [vmem:[%s17189_s0 + $0xd] sm:$0x1] }
0x2f3d   :  { %v10220_v24 = vpop.permute.xlu0 %10219 }
0x2f3e   :  { %v10226_v55 = vcombine.low %v10220_v24, %v10222_v3 }
0x2f40   :  { %v10254_v62 = vrot.slane %v10226_v55, %v12518_v9  ;;  %10394 = vrot.lane.b32.xlu1 %v10386_v22, %s12322_s20 }
0x2f42   :  { %v10256_v60 = vcombine.low %v10247_v4, %v10254_v62 }
0x2f44   :  { %10396 = vrot.lane.b32.xlu1 %v10386_v22, %s12323_s21  ;;  %v10270_v43 = vrot.slane %v10256_v60, %v12518_v9 }
0x2f46   :  { %v10271_v10 = vcombine.low %v10263_v63, %v10270_v43 }
0x2f48   :  { %v10273_v49 = vsel %vm79_vm0, %v10271_v10, -inf  ;;  %10398 = vrot.lane.b32.xlu1 %v10386_v22, %s12324_s22 }
0x2f49   :  { %10274 = vmax.xlane.f32.xlu0 %v10273_v49 }
0x2f4c   :  { %10402 = vrot.lane.b32.xlu1 %v10386_v22, %s12328_s26 }
0x2f5f   :  { %10400 = vrot.lane.b32.xlu0 %v10386_v22, %s12325_s23 }
0x2fa6   :  { %v10389_v3 = vpop.permute.xlu1 %10388 }
0x2fa7   :  { %10404 = vrot.lane.b32.xlu1 %v10389_v3, %s12328_s26 }
0x2faa   :  { %v10391_v19 = vpop.permute.xlu1 %10390 }
0x2fab   :  { %10406 = vrot.lane.b32.xlu1 %v10391_v19, %s12328_s26 }
0x2fae   :  { %v10393_v57 = vpop.permute.xlu1 %10392 }
0x2faf   :  { %10408 = vrot.lane.b32.xlu1 %v10393_v57, %s12328_s26 }
0x2fb2   :  { %v10395_v12 = vpop.permute.xlu1 %10394 }
0x2fb3   :  { %10410 = vrot.lane.b32.xlu1 %v10395_v12, %s12328_s26 }
0x2fb6   :  { %v10397_v13 = vpop.permute.xlu1 %10396 }
0x2fb7   :  { %10412 = vrot.lane.b32.xlu0 %v10397_v13, %s12328_s26 }
0x2fba   :  { %v10399_v17 = vpop.permute.xlu1 %10398 }
0x2fbb   :  { %10414 = vrot.lane.b32.xlu1 %v10399_v17, %s12328_s26 }
0x2fbe   :  { %v10403_v24 = vpop.permute.xlu1 %10402 }
0x2fd2   :  { %v13912_v18 = vpop.xlane.xlu0 %10274 }
0x2fd3   :  { %17339 = vst [vmem:[#allocation41_spill] sm:$0xff] %v13912_v18 }
0x2fd6   :  { %v10401_v22 = vpop.permute.xlu0 %10400 }
0x2fd7   :  { %10416 = vrot.lane.b32.xlu0 %v10401_v22, %s12328_s26 }
0x2fdb   :  { %10578 = vrot.lane.b32.xlu0 %v10576_v47, %s12318_s10 }
0x3019   :  { %v10405_v45 = vpop.permute.xlu1 %10404 }
0x301a   :  { %v10418_v63 = vcombine.low %v10403_v24, %v10405_v45 }
0x301c   :  { %v10428_v19 = vrot.slane %v10418_v63, %v12518_v9 }
0x301d   :  { %v10407_v55 = vpop.permute.xlu1 %10406 }
0x3021   :  { %v10409_v61 = vpop.permute.xlu1 %10408 }
0x3022   :  { %v10419_v62 = vcombine.low %v10407_v55, %v10409_v61 }
0x3024   :  { %v10435_v43 = vrot.slane %v10419_v62, %v12518_v9 }
0x3025   :  { %v10411_v4 = vpop.permute.xlu1 %10410 }
0x3026   :  { %v10450_v12 = vcombine.low %v10428_v19, %v10435_v43 }
0x3028   :  { %v10458_v24 = vrot.slane %v10450_v12, %v12518_v9 }
0x3029   :  { %v10413_v60 = vpop.permute.xlu0 %10412 }
0x302a   :  { %v10420_v10 = vcombine.low %v10411_v4, %v10413_v60 }
0x302c   :  { %v10442_v13 = vrot.slane %v10420_v10, %v12518_v9 }
0x302d   :  { %v10415_v49 = vpop.permute.xlu1 %10414 }
0x3049   :  { %v10417_v3 = vpop.permute.xlu0 %10416 }
0x304a   :  { %v10421_v57 = vcombine.low %v10415_v49, %v10417_v3 }
0x304c   :  { %v10449_v17 = vrot.slane %v10421_v57, %v12518_v9 }
0x304d   :  { %v10579_v22 = vpop.permute.xlu0 %10578 }
0x304e   :  { %v10451_v18 = vcombine.low %v10442_v13, %v10449_v17  ;;  %v10581_v58 = vmax.f32 %v10576_v47, %v10579_v22 }
0x3050   :  { %10583 = vrot.lane.b32.xlu0 %v10581_v58, %s12320_s18  ;;  %v10465_v45 = vrot.slane %v10451_v18, %v12518_v9 }
0x3052   :  { %v10466_v55 = vcombine.low %v10458_v24, %v10465_v45 }
0x3054   :  { %10585 = vrot.lane.b32.xlu0 %v10581_v58, %s12319_s17  ;;  %v10468_v61 = vsel %vm79_vm0, %v10466_v55, -inf }
0x3055   :  { %10469 = vmax.xlane.f32.xlu1 %v10468_v61 }
0x3058   :  { %10587 = vrot.lane.b32.xlu0 %v10581_v58, %s12321_s19 }
0x305c   :  { %10589 = vrot.lane.b32.xlu0 %v10581_v58, %s12322_s20 }
0x3060   :  { %10591 = vrot.lane.b32.xlu0 %v10581_v58, %s12323_s21 }
0x3064   :  { %10593 = vrot.lane.b32.xlu0 %v10581_v58, %s12324_s22 }
0x3066   :  { %10597 = vrot.lane.b32.xlu1 %v10581_v58, %s12327_s25 }
0x3068   :  { %10595 = vrot.lane.b32.xlu0 %v10581_v58, %s12325_s23  ;;  %v10771_v58 = vld [vmem:[%s17189_s0 + $0xe] sm:$0x1] }
0x30c2   :  { %v10584_v47 = vpop.permute.xlu0 %10583 }
0x30c3   :  { %10599 = vrot.lane.b32.xlu0 %v10584_v47, %s12327_s25 }
0x30c6   :  { %v10586_v18 = vpop.permute.xlu0 %10585 }
0x30c7   :  { %10601 = vrot.lane.b32.xlu0 %v10586_v18, %s12327_s25 }
0x30ca   :  { %v10588_v4 = vpop.permute.xlu0 %10587 }
0x30cb   :  { %10603 = vrot.lane.b32.xlu0 %v10588_v4, %s12327_s25 }
0x30ce   :  { %v10590_v62 = vpop.permute.xlu0 %10589 }
0x30cf   :  { %10605 = vrot.lane.b32.xlu0 %v10590_v62, %s12327_s25 }
0x30d2   :  { %v10592_v60 = vpop.permute.xlu0 %10591 }
0x30d3   :  { %10607 = vrot.lane.b32.xlu1 %v10592_v60, %s12327_s25 }
0x30d6   :  { %v10594_v63 = vpop.permute.xlu0 %10593 }
0x30d7   :  { %10609 = vrot.lane.b32.xlu0 %v10594_v63, %s12327_s25 }
0x30da   :  { %v10596_v43 = vpop.permute.xlu0 %10595 }
0x30db   :  { %10611 = vrot.lane.b32.xlu1 %v10596_v43, %s12327_s25 }
0x30de   :  { %v13945_v3 = vpop.xlane.xlu1 %10469 }
0x30df   :  { %10773 = vrot.lane.b32.xlu1 %v10771_v58, %s12318_s10  ;;  %17340 = vst [vmem:[#allocation42_spill] sm:$0xff] %v13945_v3 }
0x30e2   :  { %v10598_v57 = vpop.permute.xlu1 %10597 }
0x3135   :  { %v10600_v10 = vpop.permute.xlu0 %10599 }
0x3136   :  { %v10613_v22 = vcombine.low %v10598_v57, %v10600_v10 }
0x3138   :  { %v10623_v47 = vrot.slane %v10613_v22, %v12518_v9 }
0x3139   :  { %v10602_v49 = vpop.permute.xlu0 %10601 }
0x313d   :  { %v10604_v19 = vpop.permute.xlu0 %10603 }
0x313e   :  { %v10614_v12 = vcombine.low %v10602_v49, %v10604_v19 }
0x3140   :  { %v10630_v24 = vrot.slane %v10614_v12, %v12518_v9 }
0x3141   :  { %v10606_v13 = vpop.permute.xlu0 %10605 }
0x3142   :  { %v10645_v4 = vcombine.low %v10623_v47, %v10630_v24 }
0x3144   :  { %v10653_v10 = vrot.slane %v10645_v4, %v12518_v9 }
0x3145   :  { %v10608_v17 = vpop.permute.xlu1 %10607 }
0x3146   :  { %v10615_v45 = vcombine.low %v10606_v13, %v10608_v17 }
0x3148   :  { %v10637_v62 = vrot.slane %v10615_v45, %v12518_v9 }
0x3149   :  { %v10610_v55 = vpop.permute.xlu0 %10609 }
0x314d   :  { %v10612_v61 = vpop.permute.xlu1 %10611 }
0x314e   :  { %v10616_v18 = vcombine.low %v10610_v55, %v10612_v61 }
0x3150   :  { %v10644_v60 = vrot.slane %v10616_v18, %v12518_v9 }
0x3151   :  { %v10774_v63 = vpop.permute.xlu1 %10773 }
0x3152   :  { %v10646_v43 = vcombine.low %v10637_v62, %v10644_v60  ;;  %v10776_v3 = vmax.f32 %v10771_v58, %v10774_v63  ;;  %v10950_v58 = vld [vmem:[%s17189_s0 + $0xe] sm:$0x1] }
0x3154   :  { %10778 = vrot.lane.b32.xlu1 %v10776_v3, %s12320_s18  ;;  %v10660_v49 = vrot.slane %v10646_v43, %v12518_v9 }
0x3156   :  { %v10661_v19 = vcombine.low %v10653_v10, %v10660_v49 }
0x3158   :  { %10780 = vrot.lane.b32.xlu1 %v10776_v3, %s12319_s17  ;;  %v10663_v57 = vsel %vm79_vm0, %v10661_v19, -inf }
0x3159   :  { %10664 = vmax.xlane.f32.xlu0 %v10663_v57 }
0x315c   :  { %10782 = vrot.lane.b32.xlu1 %v10776_v3, %s12321_s19 }
0x3160   :  { %10784 = vrot.lane.b32.xlu1 %v10776_v3, %s12322_s20 }
0x3164   :  { %10786 = vrot.lane.b32.xlu1 %v10776_v3, %s12323_s21 }
0x3168   :  { %10788 = vrot.lane.b32.xlu1 %v10776_v3, %s12324_s22 }
0x316f   :  { %10790 = vrot.lane.b32.xlu0 %v10776_v3, %s12325_s23 }
0x3173   :  { %10952 = vrot.lane.b32.xlu0 %v10950_v58, %s12318_s10 }
0x31c6   :  { %v10779_v12 = vpop.permute.xlu1 %10778 }
0x31c7   :  { %v10792_v61 = vcombine.low %v10776_v3, %v10779_v12 }
0x31c9   :  { %v10802_v60 = vrot.slane %v10792_v61, %v12518_v9 }
0x31ca   :  { %v10781_v13 = vpop.permute.xlu1 %10780 }
0x31ce   :  { %v10783_v17 = vpop.permute.xlu1 %10782 }
0x31cf   :  { %v10793_v45 = vcombine.low %v10781_v13, %v10783_v17 }
0x31d1   :  { %v10809_v47 = vrot.slane %v10793_v45, %v12518_v9 }
0x31d2   :  { %v10785_v22 = vpop.permute.xlu1 %10784 }
0x31d3   :  { %v10824_v43 = vcombine.low %v10802_v60, %v10809_v47 }
0x31d5   :  { %v10832_v3 = vrot.slane %v10824_v43, %v12518_v9 }
0x31d6   :  { %v10787_v24 = vpop.permute.xlu1 %10786 }
0x31d7   :  { %v10794_v18 = vcombine.low %v10785_v22, %v10787_v24 }
0x31d9   :  { %v10816_v10 = vrot.slane %v10794_v18, %v12518_v9 }
0x31da   :  { %v10789_v4 = vpop.permute.xlu1 %10788 }
0x31e2   :  { %v13965_v55 = vpop.xlane.xlu0 %10664 }
0x31e3   :  { %17341 = vst [vmem:[#allocation43_spill] sm:$0xff] %v13965_v55 }
0x31e6   :  { %v10791_v62 = vpop.permute.xlu0 %10790 }
0x31e7   :  { %v10795_v63 = vcombine.low %v10789_v4, %v10791_v62 }
0x31e9   :  { %v10823_v49 = vrot.slane %v10795_v63, %v12518_v9 }
0x31ea   :  { %v10953_v19 = vpop.permute.xlu0 %10952 }
0x31eb   :  { %v10825_v57 = vcombine.low %v10816_v10, %v10823_v49  ;;  %v10955_v30 = vmax.f32 %v10950_v58, %v10953_v19 }
0x31ed   :  { %10957 = vrot.lane.b32.xlu0 %v10955_v30, %s12320_s18  ;;  %v10839_v12 = vrot.slane %v10825_v57, %v12518_v9 }
0x31ef   :  { %v10840_v13 = vcombine.low %v10832_v3, %v10839_v12 }
0x31f1   :  { %10959 = vrot.lane.b32.xlu0 %v10955_v30, %s12319_s17  ;;  %v10842_v17 = vsel %vm79_vm0, %v10840_v13, -inf }
0x31f2   :  { %10843 = vmax.xlane.f32.xlu1 %v10842_v17 }
0x31f5   :  { %10961 = vrot.lane.b32.xlu0 %v10955_v30, %s12321_s19 }
0x31f9   :  { %10965 = vrot.lane.b32.xlu0 %v10955_v30, %s12323_s21 }
0x31fd   :  { %10967 = vrot.lane.b32.xlu0 %v10955_v30, %s12324_s22 }
0x3201   :  { %10969 = vrot.lane.b32.xlu0 %v10955_v30, %s12325_s23 }
0x3203   :  { %10963 = vrot.lane.b32.xlu1 %v10955_v30, %s12322_s20 }
0x3205   :  { %10971 = vrot.lane.b32.xlu0 %v10955_v30, %s12326_s24  ;;  %v11145_v30 = vld [vmem:[%s17189_s0 + $0xe] sm:$0x1] }
0x325f   :  { %v10958_v58 = vpop.permute.xlu0 %10957 }
0x3260   :  { %10973 = vrot.lane.b32.xlu1 %v10958_v58, %s12326_s24 }
0x3263   :  { %v10960_v22 = vpop.permute.xlu0 %10959 }
0x3264   :  { %10975 = vrot.lane.b32.xlu0 %v10960_v22, %s12326_s24 }
0x3267   :  { %v10962_v24 = vpop.permute.xlu0 %10961 }
0x3268   :  { %10977 = vrot.lane.b32.xlu1 %v10962_v24, %s12326_s24 }
0x326b   :  { %v10966_v45 = vpop.permute.xlu0 %10965 }
0x326c   :  { %10981 = vrot.lane.b32.xlu1 %v10966_v45, %s12326_s24 }
0x326f   :  { %v10968_v61 = vpop.permute.xlu0 %10967 }
0x3273   :  { %v10970_v47 = vpop.permute.xlu0 %10969 }
0x3274   :  { %10985 = vrot.lane.b32.xlu1 %v10970_v47, %s12326_s24 }
0x3277   :  { %v10972_v10 = vpop.permute.xlu0 %10971 }
0x3278   :  { %11147 = vrot.lane.b32.xlu1 %v11145_v30, %s12318_s10 }
0x327b   :  { %v13991_v18 = vpop.xlane.xlu1 %10843 }
0x327c   :  { %17342 = vst [vmem:[#allocation44_spill] sm:$0xff] %v13991_v18 }
0x327f   :  { %v10964_v4 = vpop.permute.xlu1 %10963 }
0x3280   :  { %10979 = vrot.lane.b32.xlu0 %v10964_v4, %s12326_s24 }
0x3284   :  { %10983 = vrot.lane.b32.xlu0 %v10968_v61, %s12326_s24 }
0x32d2   :  { %v10974_v62 = vpop.permute.xlu1 %10973 }
0x32d3   :  { %v10987_v13 = vcombine.low %v10972_v10, %v10974_v62 }
0x32d5   :  { %v10997_v24 = vrot.slane %v10987_v13, %v12518_v9 }
0x32d6   :  { %v10976_v57 = vpop.permute.xlu0 %10975 }
0x32da   :  { %v10978_v60 = vpop.permute.xlu1 %10977 }
0x32db   :  { %v10988_v3 = vcombine.low %v10976_v57, %v10978_v60 }
0x32dd   :  { %v11004_v17 = vrot.slane %v10988_v3, %v12518_v9 }
0x32de   :  { %v10982_v63 = vpop.permute.xlu1 %10981 }
0x32df   :  { %v11019_v61 = vcombine.low %v10997_v24, %v11004_v17  ;;  %v14030_v24 = vld [vmem:[%s17189_s0 + $0xf] sm:$0x1] }
0x32e1   :  { %v11027_v62 = vrot.slane %v11019_v61, %v12518_v9 }
0x32e6   :  { %v10986_v43 = vpop.permute.xlu1 %10985 }
0x32ea   :  { %v11148_v49 = vpop.permute.xlu1 %11147 }
0x32eb   :  { %v11150_v19 = vmax.f32 %v11145_v30, %v11148_v49 }
0x32ed   :  { %11152 = vrot.lane.b32.xlu1 %v11150_v19, %s12320_s18 }
0x32f1   :  { %11154 = vrot.lane.b32.xlu1 %v11150_v19, %s12319_s17 }
0x32f2   :  { %v10980_v12 = vpop.permute.xlu0 %10979 }
0x32f3   :  { %v10989_v58 = vcombine.low %v10980_v12, %v10982_v63 }
0x32f5   :  { %11156 = vrot.lane.b32.xlu1 %v11150_v19, %s12321_s19  ;;  %v11011_v47 = vrot.slane %v10989_v58, %v12518_v9  ;;  %v11340_v58 = vld [vmem:[%s17189_s0 + $0xe] sm:$0x1] }
0x32f6   :  { %v10984_v22 = vpop.permute.xlu0 %10983 }
0x32f7   :  { %v10990_v45 = vcombine.low %v10984_v22, %v10986_v43  ;;  %v11714_v22 = vld [vmem:[%s17189_s0 + $0xf] sm:$0x1] }
0x32f9   :  { %v11018_v30 = vrot.slane %v10990_v45, %v12518_v9  ;;  %11158 = vrot.lane.b32.xlu1 %v11150_v19, %s12322_s20  ;;  %v14037_v45 = vld [vmem:[%s17189_s0 + $0xf] sm:$0x1] }
0x32fb   :  { %v11020_v4 = vcombine.low %v11011_v47, %v11018_v30 }
0x32fd   :  { %11160 = vrot.lane.b32.xlu1 %v11150_v19, %s12323_s21  ;;  %v11034_v60 = vrot.slane %v11020_v4, %v12518_v9 }
0x32ff   :  { %v11035_v63 = vcombine.low %v11027_v62, %v11034_v60 }
0x3301   :  { %v11037_v10 = vsel %vm79_vm0, %v11035_v63, -inf  ;;  %11162 = vrot.lane.b32.xlu1 %v11150_v19, %s12324_s22 }
0x3302   :  { %11038 = vmax.xlane.f32.xlu0 %v11037_v10 }
0x3305   :  { %11166 = vrot.lane.b32.xlu1 %v11150_v19, %s12328_s26 }
0x3318   :  { %11164 = vrot.lane.b32.xlu0 %v11150_v19, %s12325_s23 }
0x335f   :  { %v11153_v43 = vpop.permute.xlu1 %11152 }
0x3360   :  { %11168 = vrot.lane.b32.xlu1 %v11153_v43, %s12328_s26 }
0x3363   :  { %v11155_v49 = vpop.permute.xlu1 %11154 }
0x3364   :  { %11170 = vrot.lane.b32.xlu1 %v11155_v49, %s12328_s26 }
0x3367   :  { %v11157_v57 = vpop.permute.xlu1 %11156 }
0x3368   :  { %11172 = vrot.lane.b32.xlu1 %v11157_v57, %s12328_s26 }
0x336b   :  { %v11159_v3 = vpop.permute.xlu1 %11158 }
0x336c   :  { %11174 = vrot.lane.b32.xlu1 %v11159_v3, %s12328_s26 }
0x336f   :  { %v11161_v12 = vpop.permute.xlu1 %11160 }
0x3370   :  { %11176 = vrot.lane.b32.xlu0 %v11161_v12, %s12328_s26 }
0x3373   :  { %v11163_v13 = vpop.permute.xlu1 %11162 }
0x3374   :  { %11178 = vrot.lane.b32.xlu1 %v11163_v13, %s12328_s26 }
0x3377   :  { %v11167_v61 = vpop.permute.xlu1 %11166 }
0x338b   :  { %v14016_v17 = vpop.xlane.xlu0 %11038 }
0x338c   :  { %17343 = vst [vmem:[#allocation45_spill] sm:$0xff] %v14016_v17 }
0x338f   :  { %v11165_v19 = vpop.permute.xlu0 %11164 }
0x3390   :  { %11180 = vrot.lane.b32.xlu0 %v11165_v19, %s12328_s26 }
0x3394   :  { %11342 = vrot.lane.b32.xlu0 %v11340_v58, %s12318_s10 }
0x3398   :  { %11716 = vrot.lane.b32.xlu0 %v11714_v22, %s12318_s10 }
0x339c   :  { %11911 = vrot.lane.b32.xlu0 %v14030_v24, %s12318_s10 }
0x33a0   :  { %12106 = vrot.lane.b32.xlu0 %v14037_v45, %s12318_s10 }
0x33d2   :  { %v11169_v47 = vpop.permute.xlu1 %11168 }
0x33d3   :  { %v11182_v10 = vcombine.low %v11167_v61, %v11169_v47 }
0x33d5   :  { %v11192_v12 = vrot.slane %v11182_v10, %v12518_v9 }
0x33d6   :  { %v11171_v30 = vpop.permute.xlu1 %11170 }
0x33da   :  { %v11173_v4 = vpop.permute.xlu1 %11172 }
0x33db   :  { %v11183_v60 = vcombine.low %v11171_v30, %v11173_v4 }
0x33dd   :  { %v11199_v43 = vrot.slane %v11183_v60, %v12518_v9 }
0x33de   :  { %v11175_v62 = vpop.permute.xlu1 %11174 }
0x33df   :  { %v11214_v19 = vcombine.low %v11192_v12, %v11199_v43 }
0x33e1   :  { %v11222_v61 = vrot.slane %v11214_v19, %v12518_v9 }
0x33e2   :  { %v11177_v63 = vpop.permute.xlu0 %11176 }
0x33e3   :  { %v11184_v49 = vcombine.low %v11175_v62, %v11177_v63 }
0x33e5   :  { %v11206_v17 = vrot.slane %v11184_v49, %v12518_v9  ;;  %v11535_v49 = vld [vmem:[%s17189_s0 + $0xf] sm:$0x1] }
0x33e6   :  { %v11179_v57 = vpop.permute.xlu1 %11178 }
0x3402   :  { %v11181_v3 = vpop.permute.xlu0 %11180 }
0x3403   :  { %v11185_v13 = vcombine.low %v11179_v57, %v11181_v3 }
0x3405   :  { %v11213_v18 = vrot.slane %v11185_v13, %v12518_v9 }
0x3406   :  { %v11343_v55 = vpop.permute.xlu0 %11342 }
0x3407   :  { %v11215_v0 = vcombine.low %v11206_v17, %v11213_v18  ;;  %v11345_v28 = vmax.f32 %v11340_v58, %v11343_v55 }
0x3409   :  { %11347 = vrot.lane.b32.xlu0 %v11345_v28, %s12320_s18  ;;  %v11229_v47 = vrot.slane %v11215_v0, %v12518_v9 }
0x340a   :  { %v11717_v55 = vpop.permute.xlu0 %11716 }
0x340b   :  { %v11230_v30 = vcombine.low %v11222_v61, %v11229_v47  ;;  %v14069_v57 = vmax.f32 %v11714_v22, %v11717_v55 }
0x340d   :  { %11349 = vrot.lane.b32.xlu0 %v11345_v28, %s12319_s17  ;;  %v11232_v4 = vsel %vm79_vm0, %v11230_v30, -inf }
0x340e   :  { %11233 = vmax.xlane.f32.xlu1 %v11232_v4  ;;  %v11912_v0 = vpop.permute.xlu0 %11911 }
0x340f   :  { %v14086_v22 = vmax.f32 %v14030_v24, %v11912_v0 }
0x3411   :  { %11351 = vrot.lane.b32.xlu0 %v11345_v28, %s12321_s19 }
0x3412   :  { %v12107_v18 = vpop.permute.xlu0 %12106 }
0x3413   :  { %v14099_v3 = vmax.f32 %v14037_v45, %v12107_v18 }
0x3415   :  { %11353 = vrot.lane.b32.xlu0 %v11345_v28, %s12322_s20  ;;  %17345 = vst [vmem:[#allocation47_spill] sm:$0xff] %v14099_v3 }
0x3419   :  { %11357 = vrot.lane.b32.xlu0 %v11345_v28, %s12324_s22 }
0x341d   :  { %11359 = vrot.lane.b32.xlu0 %v11345_v28, %s12325_s23 }
0x341f   :  { %11355 = vrot.lane.b32.xlu1 %v11345_v28, %s12323_s21 }
0x3421   :  { %11361 = vrot.lane.b32.xlu0 %v11345_v28, %s12327_s25 }
0x347b   :  { %v11348_v17 = vpop.permute.xlu0 %11347 }
0x347c   :  { %11363 = vrot.lane.b32.xlu0 %v11348_v17, %s12327_s25 }
0x347f   :  { %v11350_v58 = vpop.permute.xlu0 %11349 }
0x3480   :  { %11365 = vrot.lane.b32.xlu1 %v11350_v58, %s12327_s25 }
0x3483   :  { %v11352_v62 = vpop.permute.xlu0 %11351 }
0x3484   :  { %11367 = vrot.lane.b32.xlu0 %v11352_v62, %s12327_s25 }
0x3487   :  { %v11354_v60 = vpop.permute.xlu0 %11353 }
0x3488   :  { %11369 = vrot.lane.b32.xlu1 %v11354_v60, %s12327_s25 }
0x348b   :  { %v11358_v63 = vpop.permute.xlu0 %11357 }
0x348c   :  { %11373 = vrot.lane.b32.xlu1 %v11358_v63, %s12327_s25 }
0x348f   :  { %v11360_v43 = vpop.permute.xlu0 %11359 }
0x3493   :  { %v11362_v24 = vpop.permute.xlu0 %11361 }
0x3497   :  { %v14061_v10 = vpop.xlane.xlu1 %11233 }
0x3498   :  { %17344 = vst [vmem:[#allocation46_spill] sm:$0xff] %v14061_v10 }
0x349b   :  { %v11356_v28 = vpop.permute.xlu1 %11355 }
0x349c   :  { %11371 = vrot.lane.b32.xlu0 %v11356_v28, %s12327_s25 }
0x34a0   :  { %11375 = vrot.lane.b32.xlu0 %v11360_v43, %s12327_s25 }
0x34a4   :  { %11537 = vrot.lane.b32.xlu0 %v11535_v49, %s12318_s10 }
0x34a8   :  { %11721 = vrot.lane.b32.xlu0 %v14069_v57, %s12320_s18 }
0x34ac   :  { %11723 = vrot.lane.b32.xlu0 %v14069_v57, %s12319_s17 }
0x34b0   :  { %11725 = vrot.lane.b32.xlu0 %v14069_v57, %s12321_s19 }
0x34b4   :  { %11727 = vrot.lane.b32.xlu0 %v14069_v57, %s12322_s20 }
0x34b8   :  { %11729 = vrot.lane.b32.xlu0 %v14069_v57, %s12323_s21 }
0x34bc   :  { %11731 = vrot.lane.b32.xlu0 %v14069_v57, %s12324_s22 }
0x34c0   :  { %11733 = vrot.lane.b32.xlu0 %v14069_v57, %s12325_s23 }
0x34c4   :  { %11916 = vrot.lane.b32.xlu0 %v14086_v22, %s12320_s18 }
0x34c8   :  { %11920 = vrot.lane.b32.xlu0 %v14086_v22, %s12321_s19 }
0x34cc   :  { %11922 = vrot.lane.b32.xlu0 %v14086_v22, %s12322_s20 }
0x34d0   :  { %11924 = vrot.lane.b32.xlu0 %v14086_v22, %s12323_s21 }
0x34d4   :  { %11926 = vrot.lane.b32.xlu0 %v14086_v22, %s12324_s22 }
0x34d8   :  { %12111 = vrot.lane.b32.xlu0 %v14099_v3, %s12320_s18 }
0x34dc   :  { %12115 = vrot.lane.b32.xlu0 %v14099_v3, %s12321_s19 }
0x34e0   :  { %12119 = vrot.lane.b32.xlu0 %v14099_v3, %s12323_s21 }
0x34e4   :  { %12123 = vrot.lane.b32.xlu0 %v14099_v3, %s12325_s23 }
0x34ee   :  { %v11364_v12 = vpop.permute.xlu0 %11363 }
0x34ef   :  { %v11377_v30 = vcombine.low %v11362_v24, %v11364_v12 }
0x34f1   :  { %v11387_v17 = vrot.slane %v11377_v30, %v12518_v9 }
0x34f2   :  { %v11366_v13 = vpop.permute.xlu1 %11365 }
0x34f6   :  { %v11368_v19 = vpop.permute.xlu0 %11367 }
0x34f7   :  { %v11378_v47 = vcombine.low %v11366_v13, %v11368_v19 }
0x34f9   :  { %v11394_v4 = vrot.slane %v11378_v47, %v12518_v9 }
0x34fa   :  { %v11370_v61 = vpop.permute.xlu1 %11369 }
0x34fb   :  { %v11409_v62 = vcombine.low %v11387_v17, %v11394_v4 }
0x34fd   :  { %v11417_v24 = vrot.slane %v11409_v62, %v12518_v9  ;;  %v14159_v62 = vsub.s32 0, %v12513_v7 }
0x34fe   :  { %v11374_v0 = vpop.permute.xlu1 %11373 }
0x34ff   :  { %17348 = vst [vmem:[#allocation50_spill] sm:$0xff] %v14159_v62  ;;  %v1267_v35 = vrot.slane %v12689_v27, %v14159_v62 }
0x350e   :  { %v11372_v45 = vpop.permute.xlu0 %11371 }
0x350f   :  { %v11379_v55 = vcombine.low %v11370_v61, %v11372_v45 }
0x3511   :  { %v11401_v60 = vrot.slane %v11379_v55, %v12518_v9 }
0x3512   :  { %v11376_v18 = vpop.permute.xlu0 %11375 }
0x3513   :  { %v11380_v58 = vcombine.low %v11374_v0, %v11376_v18 }
0x3515   :  { %v11408_v63 = vrot.slane %v11380_v58, %v12518_v9 }
0x3516   :  { %v11538_v28 = vpop.permute.xlu0 %11537 }
0x3517   :  { %v11410_v43 = vcombine.low %v11401_v60, %v11408_v63  ;;  %v14113_v10 = vmax.f32 %v11535_v49, %v11538_v28  ;;  %v14162_v60 = vsub.s32 1, %v12513_v7  ;;  %v14165_v63 = vsub.s32 2, %v12513_v7 }
0x3518   :  { %v14171_v28 = vsub.s32 4, %v12513_v7 }
0x3519   :  { %17346 = vst [vmem:[#allocation48_spill] sm:$0xff] %v14113_v10  ;;  %11542 = vrot.lane.b32.xlu0 %v14113_v10, %s12320_s18  ;;  %v11424_v12 = vrot.slane %v11410_v43, %v12518_v9  ;;  %17349 = vst [vmem:[#allocation51_spill] sm:$0xff] %v14162_v60  ;;  %v14174_v43 = vsub.s32 5, %v12513_v7  ;;  %v1271_v37 = vrot.slane %v12689_v27, %v14162_v60 }
0x351a   :  { %v11722_v13 = vpop.permute.xlu0 %11721  ;;  %17350 = vst [vmem:[#allocation52_spill] sm:$0xff] %v14165_v63  ;;  %17352 = vst [vmem:[#allocation54_spill] sm:$0xff] %v14171_v28  ;;  %v1275_v44 = vrot.slane %v12689_v27, %v14165_v63 }
0x351b   :  { %v11425_v19 = vcombine.low %v11417_v24, %v11424_v12  ;;  %17353 = vst [vmem:[#allocation55_spill] sm:$0xff] %v14174_v43  ;;  %v14180_v24 = vsub.s32 7, %v12513_v7  ;;  %v87_v12 = vrot.slane %v12562_v41, %v14159_v62 }
0x351d   :  { %11546 = vrot.lane.b32.xlu0 %v14113_v10, %s12321_s19  ;;  %v11427_v61 = vsel %vm79_vm0, %v11425_v19, -inf  ;;  %v95_v19 = vrot.slane %v12562_v41, %v14165_v63  ;;  %v316_v15 = vrot.slane %v12687_v25, %v14180_v24 }
0x351e   :  { %11428 = vmax.xlane.f32.xlu1 %v11427_v61  ;;  %v11724_v47 = vpop.permute.xlu0 %11723 }
0x3521   :  { %11550 = vrot.lane.b32.xlu0 %v14113_v10, %s12323_s21 }
0x3522   :  { %v11726_v49 = vpop.permute.xlu0 %11725 }
0x3525   :  { %11554 = vrot.lane.b32.xlu0 %v14113_v10, %s12325_s23 }
0x3526   :  { %v11728_v45 = vpop.permute.xlu0 %11727 }
0x3529   :  { %11737 = vrot.lane.b32.xlu0 %v11722_v13, %s12326_s24  ;;  %v91_v13 = vrot.slane %v12562_v41, %v14162_v60 }
0x352a   :  { %v11730_v30 = vpop.permute.xlu0 %11729 }
0x352b   :  { %v116_v59 = vcombine.low %v87_v12, %v91_v13  ;;  %v1283_v12 = vrot.slane %v12689_v27, %v14171_v28  ;;  %v1287_v13 = vrot.slane %v12689_v27, %v14174_v43 }
0x352d   :  { %11741 = vrot.lane.b32.xlu0 %v11726_v49, %s12326_s24  ;;  %v107_v49 = vrot.slane %v12562_v41, %v14174_v43 }
0x352e   :  { %v11732_v4 = vpop.permute.xlu0 %11731 }
0x352f   :  { %11918 = vrot.lane.b32.xlu1 %v14086_v22, %s12319_s17 }
0x3531   :  { %11745 = vrot.lane.b32.xlu0 %v11730_v30, %s12326_s24  ;;  %v115_v30 = vrot.slane %v12562_v41, %v14180_v24 }
0x3532   :  { %v11734_v55 = vpop.permute.xlu0 %11733 }
0x3533   :  { %11928 = vrot.lane.b32.xlu1 %v14086_v22, %s12325_s23 }
0x3535   :  { %11749 = vrot.lane.b32.xlu0 %v11734_v55, %s12326_s24  ;;  %v292_v55 = vrot.slane %v12687_v25, %v14162_v60 }
0x3536   :  { %v11917_v0 = vpop.permute.xlu0 %11916 }
0x3537   :  { %12113 = vrot.lane.b32.xlu1 %v14099_v3, %s12319_s17 }
0x3539   :  { %11932 = vrot.lane.b32.xlu0 %v11917_v0, %s12328_s26  ;;  %v296_v0 = vrot.slane %v12687_v25, %v14165_v63 }
0x353a   :  { %v11921_v18 = vpop.permute.xlu0 %11920 }
0x353b   :  { %12117 = vrot.lane.b32.xlu1 %v14099_v3, %s12322_s20 }
0x353d   :  { %11936 = vrot.lane.b32.xlu0 %v11921_v18, %s12328_s26 }
0x353e   :  { %v14140_v17 = vpop.permute.xlu0 %11922 }
0x353f   :  { %17347 = vst [vmem:[#allocation49_spill] sm:$0xff] %v14140_v17  ;;  %12121 = vrot.lane.b32.xlu1 %v14099_v3, %s12324_s22 }
0x3542   :  { %v11925_v58 = vpop.permute.xlu0 %11924 }
0x3543   :  { %11544 = vrot.lane.b32.xlu1 %v14113_v10, %s12319_s17  ;;  %11940 = vrot.lane.b32.xlu0 %v11925_v58, %s12328_s26  ;;  %v304_v58 = vrot.slane %v12687_v25, %v14171_v28 }
0x3547   :  { %11548 = vrot.lane.b32.xlu1 %v14113_v10, %s12322_s20 }
0x354b   :  { %11552 = vrot.lane.b32.xlu1 %v14113_v10, %s12324_s22 }
0x354f   :  { %11735 = vrot.lane.b32.xlu1 %v14069_v57, %s12326_s24  ;;  %v14168_v57 = vsub.s32 3, %v12513_v7 }
0x3551   :  { %17351 = vst [vmem:[#allocation53_spill] sm:$0xff] %v14168_v57  ;;  %v99_v61 = vrot.slane %v12562_v41, %v14168_v57  ;;  %v300_v18 = vrot.slane %v12687_v25, %v14168_v57 }
0x3553   :  { %11739 = vrot.lane.b32.xlu1 %v11724_v47, %s12326_s24  ;;  %v103_v47 = vrot.slane %v12562_v41, %v14171_v28  ;;  %v117_v26 = vcombine.low %v95_v19, %v99_v61  ;;  %v318_v5 = vcombine.low %v296_v0, %v300_v18  ;;  %v126_v19 = vrot.slane %v116_v59, %v12518_v9 }
0x3554   :  { %v1296_v0 = vcombine.low %v1267_v35, %v1271_v37  ;;  %v869_v59 = vrot.slane %v12697_v54, %v14159_v62  ;;  %v897_v35 = vrot.slane %v12697_v54, %v14180_v24 }
0x3555   :  { %v118_v48 = vcombine.low %v103_v47, %v107_v49  ;;  %v133_v61 = vrot.slane %v117_v26, %v12518_v9 }
0x3557   :  { %11743 = vrot.lane.b32.xlu1 %v11728_v45, %s12326_s24  ;;  %v140_v47 = vrot.slane %v118_v48, %v12518_v9  ;;  %v873_v48 = vrot.slane %v12697_v54, %v14162_v60 }
0x355b   :  { %11747 = vrot.lane.b32.xlu1 %v11732_v4, %s12326_s24  ;;  %v288_v4 = vrot.slane %v12687_v25, %v14159_v62 }
0x355d   :  { %v317_v32 = vcombine.low %v288_v4, %v292_v55 }
0x355f   :  { %11930 = vrot.lane.b32.xlu1 %v14086_v22, %s12328_s26  ;;  %v14177_v22 = vsub.s32 6, %v12513_v7  ;;  %v308_v7 = vrot.slane %v12687_v25, %v14174_v43 }
0x3561   :  { %17354 = vst [vmem:[#allocation56_spill] sm:$0xff] %v14177_v22  ;;  %v111_v45 = vrot.slane %v12562_v41, %v14177_v22  ;;  %v312_v41 = vrot.slane %v12687_v25, %v14177_v22  ;;  %v319_v8 = vcombine.low %v304_v58, %v308_v7  ;;  %v1279_v25 = vrot.slane %v12689_v27, %v14168_v57 }
0x3562   :  { %v1291_v7 = vrot.slane %v12689_v27, %v14177_v22  ;;  %v1298_v58 = vcombine.low %v1283_v12, %v1287_v13  ;;  %v893_v37 = vrot.slane %v12697_v54, %v14177_v22 }
0x3563   :  { %v119_v38 = vcombine.low %v111_v45, %v115_v30  ;;  %v320_v34 = vcombine.low %v312_v41, %v316_v15  ;;  %v1295_v15 = vrot.slane %v12689_v27, %v14180_v24  ;;  %v327_v45 = vrot.slane %v317_v32, %v12518_v9 }
0x3564   :  { %v334_v30 = vrot.slane %v318_v5, %v12518_v9  ;;  %v341_v4 = vrot.slane %v319_v8, %v12518_v9  ;;  %v1297_v18 = vcombine.low %v1275_v44, %v1279_v25  ;;  %v881_v5 = vrot.slane %v12697_v54, %v14168_v57 }
0x3565   :  { %v147_v49 = vrot.slane %v119_v38, %v12518_v9  ;;  %v348_v55 = vrot.slane %v320_v34, %v12518_v9  ;;  %v1299_v27 = vcombine.low %v1291_v7, %v1295_v15  ;;  %v877_v38 = vrot.slane %v12697_v54, %v14165_v63 }
0x3566   :  { %v885_v8 = vrot.slane %v12697_v54, %v14171_v28  ;;  %v889_v44 = vrot.slane %v12697_v54, %v14174_v43  ;;  %v14254_v34 = vcombine.low %v126_v19, %v133_v61  ;;  %v14258_v26 = vcombine.low %v327_v45, %v334_v30 }
0x3567   :  { %v14256_v32 = vcombine.low %v140_v47, %v147_v49  ;;  %v14260_v41 = vcombine.low %v341_v4, %v348_v55  ;;  %v1306_v25 = vrot.slane %v1296_v0, %v12518_v9  ;;  %v1313_v12 = vrot.slane %v1297_v18, %v12518_v9 }
0x3568   :  { %v1320_v13 = vrot.slane %v1298_v58, %v12518_v9  ;;  %v1327_v7 = vrot.slane %v1299_v27, %v12518_v9  ;;  %v898_v15 = vcombine.low %v869_v59, %v873_v48  ;;  %v899_v42 = vcombine.low %v877_v38, %v881_v5 }
0x3569   :  { %v900_v56 = vcombine.low %v885_v8, %v889_v44  ;;  %v901_v54 = vcombine.low %v893_v37, %v897_v35  ;;  %v487_v19 = vrot.slane %v12700_v52, %v14159_v62  ;;  %v491_v61 = vrot.slane %v12700_v52, %v14162_v60 }
0x356a   :  { %v495_v47 = vrot.slane %v12700_v52, %v14165_v63  ;;  %v499_v49 = vrot.slane %v12700_v52, %v14168_v57  ;;  %v503_v45 = vrot.slane %v12700_v52, %v14171_v28  ;;  %v507_v30 = vrot.slane %v12700_v52, %v14174_v43 }
0x356b   :  { %v511_v4 = vrot.slane %v12700_v52, %v14177_v22  ;;  %v515_v55 = vrot.slane %v12700_v52, %v14180_v24  ;;  %v686_v0 = vrot.slane %v12702_v14, %v14159_v62  ;;  %v690_v18 = vrot.slane %v12702_v14, %v14162_v60 }
0x356c   :  { %v694_v58 = vrot.slane %v12702_v14, %v14165_v63  ;;  %v698_v27 = vrot.slane %v12702_v14, %v14168_v57  ;;  %v702_v59 = vrot.slane %v12702_v14, %v14171_v28  ;;  %v706_v48 = vrot.slane %v12702_v14, %v14174_v43 }
0x356d   :  { %v908_v52 = vrot.slane %v898_v15, %v12518_v9  ;;  %v915_v38 = vrot.slane %v899_v42, %v12518_v9  ;;  %v710_v5 = vrot.slane %v12702_v14, %v14177_v22  ;;  %v714_v8 = vrot.slane %v12702_v14, %v14180_v24 }
0x356e   :  { %v922_v44 = vrot.slane %v900_v56, %v12518_v9  ;;  %v929_v37 = vrot.slane %v901_v54, %v12518_v9  ;;  %v516_v35 = vcombine.low %v487_v19, %v491_v61  ;;  %v517_v33 = vcombine.low %v495_v47, %v499_v49 }
0x356f   :  { %v518_v10 = vcombine.low %v503_v45, %v507_v30  ;;  %v519_v40 = vcombine.low %v511_v4, %v515_v55  ;;  %v715_v11 = vcombine.low %v686_v0, %v690_v18  ;;  %v716_v21 = vcombine.low %v694_v58, %v698_v27 }
0x3570   :  { %v156_v15 = vrot.slane %v14254_v34, %v12518_v9  ;;  %v163_v42 = vrot.slane %v14256_v32, %v12518_v9  ;;  %v717_v1 = vcombine.low %v702_v59, %v706_v48  ;;  %v357_v14 = vrot.slane %v14258_v26, %v12518_v9 }
0x3571   :  { %v364_v56 = vrot.slane %v14260_v41, %v12518_v9  ;;  %v1328_v54 = vcombine.low %v1306_v25, %v1313_v12  ;;  %v718_v19 = vcombine.low %v710_v5, %v714_v8  ;;  %v930_v61 = vcombine.low %v908_v52, %v915_v38 }
0x3572   :  { %v931_v47 = vcombine.low %v922_v44, %v929_v37  ;;  %v1329_v49 = vcombine.low %v1320_v13, %v1327_v7  ;;  %v526_v45 = vrot.slane %v516_v35, %v12518_v9  ;;  %v533_v30 = vrot.slane %v517_v33, %v12518_v9 }
0x3573   :  { %v540_v34 = vrot.slane %v518_v10, %v12518_v9  ;;  %v547_v32 = vrot.slane %v519_v40, %v12518_v9  ;;  %v725_v4 = vrot.slane %v715_v11, %v12518_v9  ;;  %v732_v26 = vrot.slane %v716_v21, %v12518_v9 }
0x3574   :  { %v1068_v41 = vrot.slane %v12704_v50, %v14159_v62  ;;  %v1072_v25 = vrot.slane %v12704_v50, %v14162_v60  ;;  %v739_v12 = vrot.slane %v717_v1, %v12518_v9  ;;  %v1076_v13 = vrot.slane %v12704_v50, %v14165_v63 }
0x3575   :  { %v1080_v33 = vrot.slane %v12704_v50, %v14168_v57  ;;  %v1084_v40 = vrot.slane %v12704_v50, %v14171_v28  ;;  %v746_v11 = vrot.slane %v718_v19, %v12518_v9  ;;  %v1088_v21 = vrot.slane %v12704_v50, %v14174_v43 }
0x3576   :  { %v1092_v10 = vrot.slane %v12704_v50, %v14177_v22  ;;  %v1096_v1 = vrot.slane %v12704_v50, %v14180_v24  ;;  %v1466_v7 = vrot.slane %v12724_v46, %v14159_v62  ;;  %v1470_v55 = vrot.slane %v12724_v46, %v14162_v60 }
0x3577   :  { %v1474_v0 = vrot.slane %v12724_v46, %v14165_v63  ;;  %v1478_v18 = vrot.slane %v12724_v46, %v14168_v57  ;;  %v1482_v58 = vrot.slane %v12724_v46, %v14171_v28  ;;  %v1486_v27 = vrot.slane %v12724_v46, %v14174_v43 }
0x3578   :  { %v1490_v50 = vrot.slane %v12724_v46, %v14177_v22  ;;  %v1494_v59 = vrot.slane %v12724_v46, %v14180_v24  ;;  %v938_v48 = vrot.slane %v930_v61, %v12518_v9  ;;  %v945_v52 = vrot.slane %v931_v47, %v12518_v9 }
0x3579   :  { %v1336_v38 = vrot.slane %v1328_v54, %v12518_v9  ;;  %v1343_v5 = vrot.slane %v1329_v49, %v12518_v9  ;;  %v14354_v8 = vcombine.low %v526_v45, %v533_v30  ;;  %v14356_v44 = vcombine.low %v540_v34, %v547_v32 }
0x357a   :  { %v14358_v37 = vcombine.low %v725_v4, %v732_v26  ;;  %v1097_v35 = vcombine.low %v1068_v41, %v1072_v25  ;;  %v14360_v19 = vcombine.low %v739_v12, %v746_v11  ;;  %v1098_v31 = vcombine.low %v1076_v13, %v1080_v33 }
0x357b   :  { %v1099_v39 = vcombine.low %v1084_v40, %v1088_v21  ;;  %v1100_v46 = vcombine.low %v1092_v10, %v1096_v1  ;;  %v1495_v3 = vcombine.low %v1466_v7, %v1470_v55  ;;  %v1496_v61 = vcombine.low %v1474_v0, %v1478_v18  ;;  %v14410_v55 = vpop.permute.xlu0 %11926 }
0x357c   :  { %v1497_v53 = vcombine.low %v1482_v58, %v1486_v27  ;;  %v1498_v47 = vcombine.low %v1490_v50, %v1494_v59  ;;  %v14362_v17 = vcombine.low %v938_v48, %v945_v52  ;;  %v14364_v54 = vcombine.low %v156_v15, %v163_v42  ;;  %17359 = vst [vmem:[#allocation61_spill] sm:$0xff] %v14410_v55 }
0x357d   :  { %v14366_v49 = vcombine.low %v357_v14, %v364_v56  ;;  %v14368_v45 = vcombine.low %v1336_v38, %v1343_v5  ;;  %v1107_v4 = vrot.slane %v1097_v35, %v12518_v9  ;;  %v1114_v15 = vrot.slane %v1098_v31, %v12518_v9 }
0x357e   :  { %17355 = vst [vmem:[#allocation57_spill] sm:$0xff] %v14362_v17  ;;  %17356 = vst [vmem:[#allocation58_spill] sm:$0xff] %v14364_v54  ;;  %v1121_v42 = vrot.slane %v1099_v39, %v12518_v9  ;;  %v1128_v14 = vrot.slane %v1100_v46, %v12518_v9  ;;  %v1505_v56 = vrot.slane %v1495_v3, %v12518_v9 }
0x357f   :  { %17357 = vst [vmem:[#allocation59_spill] sm:$0xff] %v14366_v49  ;;  %17358 = vst [vmem:[#allocation60_spill] sm:$0xff] %v14368_v45  ;;  %v1512_v41 = vrot.slane %v1496_v61, %v12518_v9  ;;  %v1519_v25 = vrot.slane %v1497_v53, %v12518_v9  ;;  %v1526_v12 = vrot.slane %v1498_v47, %v12518_v9  ;;  %v14444_v55 = vpop.permute.xlu0 %12111 }
0x3580   :  { %v1649_v13 = vrot.slane %v12726_v23, %v14159_v62  ;;  %v1653_v33 = vrot.slane %v12726_v23, %v14162_v60  ;;  %v1657_v31 = vrot.slane %v12726_v23, %v14165_v63  ;;  %v1661_v39 = vrot.slane %v12726_v23, %v14168_v57 }
0x3581   :  { %v1665_v3 = vrot.slane %v12726_v23, %v14171_v28  ;;  %v1669_v53 = vrot.slane %v12726_v23, %v14174_v43  ;;  %v1673_v40 = vrot.slane %v12726_v23, %v14177_v22  ;;  %v1677_v11 = vrot.slane %v12726_v23, %v14180_v24 }
0x3582   :  { %v1848_v21 = vrot.slane %v12768_v2, %v14159_v62  ;;  %v1852_v10 = vrot.slane %v12768_v2, %v14162_v60  ;;  %v1856_v1 = vrot.slane %v12768_v2, %v14165_v63  ;;  %v1860_v7 = vrot.slane %v12768_v2, %v14168_v57 }
0x3583   :  { %v1864_v0 = vrot.slane %v12768_v2, %v14171_v28  ;;  %v1868_v23 = vrot.slane %v12768_v2, %v14174_v43  ;;  %v1872_v18 = vrot.slane %v12768_v2, %v14177_v22  ;;  %v1876_v58 = vrot.slane %v12768_v2, %v14180_v24 }
0x3584   :  { %v2047_v27 = vrot.slane %v12801_v29, %v14159_v62  ;;  %v2051_v50 = vrot.slane %v12801_v29, %v14162_v60  ;;  %v2055_v59 = vrot.slane %v12801_v29, %v14165_v63  ;;  %v2059_v48 = vrot.slane %v12801_v29, %v14168_v57 }
0x3585   :  { %v2063_v52 = vrot.slane %v12801_v29, %v14171_v28  ;;  %v2067_v38 = vrot.slane %v12801_v29, %v14174_v43  ;;  %v2071_v2 = vrot.slane %v12801_v29, %v14177_v22  ;;  %v2075_v5 = vrot.slane %v12801_v29, %v14180_v24 }
0x3586   :  { %v14436_v35 = vcombine.low %v1107_v4, %v1114_v15  ;;  %v14438_v46 = vcombine.low %v1121_v42, %v1128_v14  ;;  %v14440_v61 = vcombine.low %v1505_v56, %v1512_v41  ;;  %v14442_v47 = vcombine.low %v1519_v25, %v1526_v12 }
0x3587   :  { %v1678_v32 = vcombine.low %v1649_v13, %v1653_v33  ;;  %v1679_v26 = vcombine.low %v1657_v31, %v1661_v39  ;;  %v1680_v30 = vcombine.low %v1665_v3, %v1669_v53  ;;  %v1681_v34 = vcombine.low %v1673_v40, %v1677_v11 }
0x3588   :  { %v1877_v45 = vcombine.low %v1848_v21, %v1852_v10  ;;  %v1878_v49 = vcombine.low %v1856_v1, %v1860_v7  ;;  %v1879_v54 = vcombine.low %v1864_v0, %v1868_v23  ;;  %v1880_v17 = vcombine.low %v1872_v18, %v1876_v58  ;;  %v14474_v7 = vpop.permute.xlu0 %12115 }
0x3589   :  { %v2076_v20 = vcombine.low %v2047_v27, %v2051_v50  ;;  %v2077_v29 = vcombine.low %v2055_v59, %v2059_v48  ;;  %v2078_v4 = vcombine.low %v2063_v52, %v2067_v38  ;;  %v2079_v15 = vcombine.low %v2071_v2, %v2075_v5 }
0x358a   :  { %v2246_v42 = vrot.slane %v12821_v6, %v14159_v62  ;;  %v2250_v14 = vrot.slane %v12821_v6, %v14162_v60  ;;  %v2254_v56 = vrot.slane %v12821_v6, %v14165_v63  ;;  %v2258_v41 = vrot.slane %v12821_v6, %v14168_v57 }
0x358b   :  { %v2262_v25 = vrot.slane %v12821_v6, %v14171_v28  ;;  %v2266_v12 = vrot.slane %v12821_v6, %v14174_v43  ;;  %v2270_v13 = vrot.slane %v12821_v6, %v14177_v22  ;;  %v2274_v33 = vrot.slane %v12821_v6, %v14180_v24 }
0x358c   :  { %v1688_v31 = vrot.slane %v1678_v32, %v12518_v9  ;;  %v1695_v39 = vrot.slane %v1679_v26, %v12518_v9  ;;  %v1702_v3 = vrot.slane %v1680_v30, %v12518_v9  ;;  %v1709_v53 = vrot.slane %v1681_v34, %v12518_v9 }
0x358d   :  { %v1887_v40 = vrot.slane %v1877_v45, %v12518_v9  ;;  %v1894_v11 = vrot.slane %v1878_v49, %v12518_v9  ;;  %v1901_v21 = vrot.slane %v1879_v54, %v12518_v9  ;;  %v1908_v10 = vrot.slane %v1880_v17, %v12518_v9 }
0x358e   :  { %v2086_v1 = vrot.slane %v2076_v20, %v12518_v9  ;;  %v2093_v6 = vrot.slane %v2077_v29, %v12518_v9  ;;  %v2100_v32 = vrot.slane %v2078_v4, %v12518_v9  ;;  %v2107_v26 = vrot.slane %v2079_v15, %v12518_v9 }
0x358f   :  { %v2275_v30 = vcombine.low %v2246_v42, %v2250_v14  ;;  %v2276_v34 = vcombine.low %v2254_v56, %v2258_v41  ;;  %v2277_v0 = vcombine.low %v2262_v25, %v2266_v12  ;;  %v2278_v45 = vcombine.low %v2270_v13, %v2274_v33  ;;  %v14496_v56 = vpop.permute.xlu0 %12119 }
0x3590   :  { %v2429_v49 = vrot.slane %v12847_v36, %v14159_v62  ;;  %v2433_v17 = vrot.slane %v12847_v36, %v14162_v60  ;;  %v2437_v20 = vrot.slane %v12847_v36, %v14165_v63  ;;  %v2441_v54 = vrot.slane %v12847_v36, %v14168_v57 }
0x3591   :  { %v2445_v23 = vrot.slane %v12847_v36, %v14171_v28  ;;  %v2449_v18 = vrot.slane %v12847_v36, %v14174_v43  ;;  %v2453_v58 = vrot.slane %v12847_v36, %v14177_v22  ;;  %v2457_v27 = vrot.slane %v12847_v36, %v14180_v24 }
0x3592   :  { %v1710_v50 = vcombine.low %v1688_v31, %v1695_v39  ;;  %v1711_v59 = vcombine.low %v1702_v3, %v1709_v53  ;;  %v1909_v48 = vcombine.low %v1887_v40, %v1894_v11  ;;  %v1910_v52 = vcombine.low %v1901_v21, %v1908_v10 }
0x3593   :  { %v2108_v38 = vcombine.low %v2086_v1, %v2093_v6  ;;  %v2109_v2 = vcombine.low %v2100_v32, %v2107_v26  ;;  %v2285_v5 = vrot.slane %v2275_v30, %v12518_v9  ;;  %v2292_v29 = vrot.slane %v2276_v34, %v12518_v9 }
0x3594   :  { %v2299_v4 = vrot.slane %v2277_v0, %v12518_v9  ;;  %v2306_v15 = vrot.slane %v2278_v45, %v12518_v9  ;;  %v2458_v42 = vcombine.low %v2429_v49, %v2433_v17  ;;  %v2459_v14 = vcombine.low %v2437_v20, %v2441_v54  ;;  %v14546_v49 = vpop.permute.xlu0 %12123 }
0x3595   :  { %v1137_v36 = vrot.slane %v14436_v35, %v12518_v9  ;;  %v1144_v41 = vrot.slane %v14438_v46, %v12518_v9  ;;  %v2460_v25 = vcombine.low %v2445_v23, %v2449_v18  ;;  %v2461_v12 = vcombine.low %v2453_v58, %v2457_v27  ;;  %v17375_v58 = vld [vmem:[#allocation61_spill] sm:$0xff] }
0x3596   :  { %v1535_v13 = vrot.slane %v14440_v61, %v12518_v9  ;;  %v1542_v33 = vrot.slane %v14442_v47, %v12518_v9  ;;  %v1718_v31 = vrot.slane %v1710_v50, %v12518_v9  ;;  %v1725_v39 = vrot.slane %v1711_v59, %v12518_v9 }
0x3597   :  { %v1917_v3 = vrot.slane %v1909_v48, %v12518_v9  ;;  %v1924_v53 = vrot.slane %v1910_v52, %v12518_v9  ;;  %v2116_v35 = vrot.slane %v2108_v38, %v12518_v9  ;;  %v2123_v46 = vrot.slane %v2109_v2, %v12518_v9 }
0x3598   :  { %v14512_v40 = vcombine.low %v2285_v5, %v2292_v29  ;;  %v14514_v11 = vcombine.low %v2299_v4, %v2306_v15  ;;  %v2468_v61 = vrot.slane %v2458_v42, %v12518_v9  ;;  %v2475_v47 = vrot.slane %v2459_v14, %v12518_v9  ;;  %v14581_v15 = vpop.permute.xlu0 %11542 }
0x3599   :  { %v17361_v10 = vrot.slane %v14356_v44, %v12518_v9  ;;  %v17362_v1 = vrot.slane %v14354_v8, %v12518_v9  ;;  %v17364_v32 = vrot.slane %v14360_v19, %v12518_v9  ;;  %v17365_v26 = vrot.slane %v14358_v37, %v12518_v9 }
0x359a   :  { %v2482_v34 = vrot.slane %v2460_v25, %v12518_v9  ;;  %v2489_v0 = vrot.slane %v2461_v12, %v12518_v9  ;;  %v2628_v44 = vrot.slane %v12872_v51, %v14159_v62  ;;  %v2632_v8 = vrot.slane %v12872_v51, %v14162_v60 }
0x359b   :  { %v14526_v6 = vcombine.low %v17362_v1, %v17361_v10  ;;  %v14534_v30 = vcombine.low %v17365_v26, %v17364_v32  ;;  %v2636_v45 = vrot.slane %v12872_v51, %v14165_v63  ;;  %v2640_v19 = vrot.slane %v12872_v51, %v14168_v57  ;;  %v17374_v10 = vld [vmem:[#allocation4_spill] sm:$0xff] }
0x359c   :  { %v14548_v37 = vcombine.low %v1137_v36, %v1144_v41  ;;  %v14550_v17 = vcombine.low %v1535_v13, %v1542_v33  ;;  %v14552_v20 = vcombine.low %v1718_v31, %v1725_v39  ;;  %v14554_v54 = vcombine.low %v1917_v3, %v1924_v53  ;;  %v17372_v13 = vld [vmem:[#allocation3_spill] sm:$0xff] }
0x359d   :  { %17363 = vst [vmem:[#allocation63_spill] sm:$0xff] %v14526_v6  ;;  %17366 = vst [vmem:[#allocation64_spill] sm:$0xff] %v14534_v30  ;;  %v14556_v23 = vcombine.low %v2116_v35, %v2123_v46  ;;  %v14562_v27 = vcombine.low %v2468_v61, %v2475_v47  ;;  %v14564_v59 = vcombine.low %v2482_v34, %v2489_v0  ;;  %v17373_v46 = vld [vmem:[#allocation49_spill] sm:$0xff] }
0x359e   :  { %17367 = vst [vmem:[#allocation65_spill] sm:$0xff] %v14548_v37  ;;  %17368 = vst [vmem:[#allocation66_spill] sm:$0xff] %v14550_v17  ;;  %v2644_v48 = vrot.slane %v12872_v51, %v14171_v28  ;;  %v2648_v52 = vrot.slane %v12872_v51, %v14174_v43  ;;  %v2652_v38 = vrot.slane %v12872_v51, %v14177_v22 }
0x359f   :  { %17369 = vst [vmem:[#allocation67_spill] sm:$0xff] %v14552_v20  ;;  %17370 = vst [vmem:[#allocation68_spill] sm:$0xff] %v14554_v54  ;;  %v2656_v2 = vrot.slane %v12872_v51, %v14180_v24  ;;  %v14575_v5 = vcombine.low %v2628_v44, %v2632_v8  ;;  %v14577_v29 = vcombine.low %v2636_v45, %v2640_v19  ;;  %v14632_v19 = vpop.permute.xlu0 %11546 }
0x35a0   :  { %17371 = vst [vmem:[#allocation69_spill] sm:$0xff] %v14556_v23  ;;  %v2827_v4 = vrot.slane %v12905_v16, %v14159_v62  ;;  %v2831_v42 = vrot.slane %v12905_v16, %v14162_v60  ;;  %v2835_v14 = vrot.slane %v12905_v16, %v14165_v63  ;;  %v2839_v36 = vrot.slane %v12905_v16, %v14168_v57 }
0x35a1   :  { %v2843_v51 = vrot.slane %v12905_v16, %v14171_v28  ;;  %v2847_v41 = vrot.slane %v12905_v16, %v14174_v43  ;;  %v2851_v25 = vrot.slane %v12905_v16, %v14177_v22  ;;  %v2855_v12 = vrot.slane %v12905_v16, %v14180_v24 }
0x35a2   :  { %v3026_v33 = vrot.slane %v17372_v13, %v14159_v62  ;;  %v3030_v39 = vrot.slane %v17372_v13, %v14162_v60  ;;  %v3034_v3 = vrot.slane %v17372_v13, %v14165_v63  ;;  %v3038_v53 = vrot.slane %v17372_v13, %v14168_v57 }
0x35a3   :  { %v3042_v35 = vrot.slane %v17372_v13, %v14171_v28  ;;  %v3046_v16 = vrot.slane %v17372_v13, %v14174_v43  ;;  %v3050_v61 = vrot.slane %v17372_v13, %v14177_v22  ;;  %v3054_v47 = vrot.slane %v17372_v13, %v14180_v24 }
0x35a4   :  { %v3209_v1 = vrot.slane %v17374_v10, %v14159_v62  ;;  %v3213_v32 = vrot.slane %v17374_v10, %v14162_v60  ;;  %v3217_v26 = vrot.slane %v17374_v10, %v14165_v63  ;;  %v3221_v34 = vrot.slane %v17374_v10, %v14168_v57 }
0x35a5   :  { %v3225_v0 = vrot.slane %v17374_v10, %v14171_v28  ;;  %v3229_v44 = vrot.slane %v17374_v10, %v14174_v43  ;;  %v3233_v8 = vrot.slane %v17374_v10, %v14177_v22  ;;  %v3237_v45 = vrot.slane %v17374_v10, %v14180_v24 }
0x35a6   :  { %v2659_v13 = vcombine.low %v2644_v48, %v2648_v52  ;;  %v2856_v18 = vcombine.low %v2827_v4, %v2831_v42  ;;  %v2858_v23 = vcombine.low %v2843_v51, %v2847_v41  ;;  %v2859_v54 = vcombine.low %v2851_v25, %v2855_v12  ;;  %v17376_v42 = vld [vmem:[#allocation47_spill] sm:$0xff]  ;;  %v14652_v41 = vpop.permute.xlu0 %11550 }
0x35a7   :  { %v14518_v21 = vpop.xlane.xlu1 %11428  ;;  %v3055_v20 = vcombine.low %v3026_v33, %v3030_v39  ;;  %v3056_v10 = vcombine.low %v3034_v3, %v3038_v53  ;;  %v3057_v17 = vcombine.low %v3042_v35, %v3046_v16  ;;  %v3058_v37 = vcombine.low %v3050_v61, %v3054_v47 }
0x35a8   :  { %17360 = vst [vmem:[#allocation62_spill] sm:$0xff] %v14518_v21  ;;  %v2857_v21 = vcombine.low %v2835_v14, %v2839_v36  ;;  %v3238_v30 = vcombine.low %v3209_v1, %v3213_v32  ;;  %v3239_v48 = vcombine.low %v3217_v26, %v3221_v34  ;;  %v3240_v52 = vcombine.low %v3225_v0, %v3229_v44 }
0x35a9   :  { %v2880_v36 = vrot.slane %v2858_v23, %v12518_v9  ;;  %v2887_v51 = vrot.slane %v2859_v54, %v12518_v9  ;;  %v3072_v25 = vrot.slane %v3056_v10, %v12518_v9  ;;  %v3086_v12 = vrot.slane %v3058_v37, %v12518_v9 }
0x35aa   :  { %v2873_v14 = vrot.slane %v2857_v21, %v12518_v9  ;;  %v3248_v33 = vrot.slane %v3238_v30, %v12518_v9  ;;  %v3262_v21 = vrot.slane %v3240_v52, %v12518_v9  ;;  %v17377_v54 = vrot.slane %v14514_v11, %v12518_v9  ;;  %v14701_v26 = vpop.permute.xlu0 %11554 }
0x35ab   :  { %v11919_v50 = vpop.permute.xlu1 %11918  ;;  %v2498_v37 = vrot.slane %v14562_v27, %v12518_v9  ;;  %v2505_v30 = vrot.slane %v14564_v59, %v12518_v9  ;;  %v14691_v61 = vcombine.low %v2880_v36, %v2887_v51  ;;  %v17387_v51 = vld [vmem:[#allocation6_spill] sm:$0xff] }
0x35ac   :  { %11934 = vrot.lane.b32.xlu1 %v11919_v50, %s12328_s26 }
0x35af   :  { %v11929_v31 = vpop.permute.xlu1 %11928 }
0x35b0   :  { %11938 = vrot.lane.b32.xlu1 %v17373_v46, %s12328_s26  ;;  %11944 = vrot.lane.b32.xlu0 %v11929_v31, %s12328_s26  ;;  %v2660_v31 = vcombine.low %v2652_v38, %v2656_v2  ;;  %v2667_v46 = vrot.slane %v14575_v5, %v12518_v9  ;;  %v3241_v38 = vcombine.low %v3233_v8, %v3237_v45 }
0x35b1   :  { %v2674_v5 = vrot.slane %v14577_v29, %v12518_v9  ;;  %v3065_v29 = vrot.slane %v3055_v20, %v12518_v9  ;;  %v17378_v20 = vrot.slane %v14512_v40, %v12518_v9 }
0x35b2   :  { %v2688_v4 = vrot.slane %v2660_v31, %v12518_v9  ;;  %v3269_v23 = vrot.slane %v3241_v38, %v12518_v9 }
0x35b3   :  { %v12114_v50 = vpop.permute.xlu1 %12113  ;;  %v14668_v3 = vcombine.low %v17378_v20, %v17377_v54  ;;  %v14685_v35 = vcombine.low %v2667_v46, %v2674_v5  ;;  %v14693_v47 = vcombine.low %v3065_v29, %v3072_v25  ;;  %v3599_v29 = vrot.slane %v17387_v51, %v14159_v62  ;;  %v17388_v54 = vld [vmem:[#allocation7_spill] sm:$0xff] }
0x35b4   :  { %11942 = vrot.lane.b32.xlu1 %v17375_v58, %s12328_s26  ;;  %12127 = vrot.lane.b32.xlu0 %v14444_v55, %s12327_s25  ;;  %v2681_v58 = vrot.slane %v2659_v13, %v12518_v9  ;;  %v2866_v55 = vrot.slane %v2856_v18, %v12518_v9  ;;  %v3079_v18 = vrot.slane %v3057_v17, %v12518_v9  ;;  %v17380_v17 = vld [vmem:[#allocation5_spill] sm:$0xff] }
0x35b5   :  { %17379 = vst [vmem:[#allocation3_spill] sm:$0xff] %v14668_v3  ;;  %v3404_v53 = vrot.slane %v17380_v17, %v14159_v62  ;;  %v3408_v11 = vrot.slane %v17380_v17, %v14162_v60  ;;  %v3412_v40 = vrot.slane %v17380_v17, %v14165_v63  ;;  %v3416_v27 = vrot.slane %v17380_v17, %v14168_v57 }
0x35b6   :  { %v14687_v59 = vcombine.low %v2681_v58, %v2688_v4  ;;  %v14689_v16 = vcombine.low %v2866_v55, %v2873_v14  ;;  %17382 = vst [vmem:[#allocation4_spill] sm:$0xff] %v14693_v47  ;;  %v14699_v32 = vcombine.low %v3262_v21, %v3269_v23  ;;  %v3420_v0 = vrot.slane %v17380_v17, %v14171_v28 }
0x35b7   :  { %v12118_v2 = vpop.permute.xlu1 %12117  ;;  %v3424_v44 = vrot.slane %v17380_v17, %v14174_v43  ;;  %v3428_v8 = vrot.slane %v17380_v17, %v14177_v22  ;;  %v3432_v45 = vrot.slane %v17380_v17, %v14180_v24  ;;  %v3433_v13 = vcombine.low %v3404_v53, %v3408_v11 }
0x35b8   :  { %12125 = vrot.lane.b32.xlu1 %v17376_v42, %s12327_s25  ;;  %12131 = vrot.lane.b32.xlu0 %v14474_v7, %s12327_s25  ;;  %v3255_v7 = vrot.slane %v3239_v48, %v12518_v9  ;;  %17381 = vst [vmem:[#allocation49_spill] sm:$0xff] %v14689_v16  ;;  %17385 = vst [vmem:[#allocation5_spill] sm:$0xff] %v14699_v32  ;;  %v3434_v31 = vcombine.low %v3412_v40, %v3416_v27  ;;  %v12330_v58 = vmov 0  }
0x35b9   :  { %12316 = vset.pattern.permute.xlu0 %v12330_v58  ;;  %12317 = vset.pattern.permute.xlu1 %v12330_v58  ;;  %v3435_v55 = vcombine.low %v3420_v0, %v3424_v44  ;;  %v3436_v42 = vcombine.low %v3428_v8, %v3432_v45  ;;  %v3443_v14 = vrot.slane %v3433_v13, %v12518_v9  ;;  %v17389_v45 = vld [vmem:[#allocation8_spill] sm:$0xff] }
0x35ba   :  { %v14697_v1 = vcombine.low %v3248_v33, %v3255_v7  ;;  %v3450_v36 = vrot.slane %v3434_v31, %v12518_v9  ;;  %v3603_v25 = vrot.slane %v17387_v51, %v14162_v60  ;;  %v3611_v33 = vrot.slane %v17387_v51, %v14168_v57 }
0x35bb   :  { %v12122_v39 = vpop.permute.xlu1 %12121  ;;  %v3615_v7 = vrot.slane %v17387_v51, %v14171_v28  ;;  %v3619_v21 = vrot.slane %v17387_v51, %v14174_v43  ;;  %v3623_v23 = vrot.slane %v17387_v51, %v14177_v22  ;;  %v3794_v20 = vrot.slane %v17388_v54, %v14159_v62 }
0x35bc   :  { %12129 = vrot.lane.b32.xlu1 %v12114_v50, %s12327_s25  ;;  %12135 = vrot.lane.b32.xlu0 %v14496_v56, %s12327_s25  ;;  %v14695_v56 = vcombine.low %v3079_v18, %v3086_v12  ;;  %17384 = vst [vmem:[#allocation47_spill] sm:$0xff] %v14697_v1  ;;  %v14716_v50 = vcombine.low %v2498_v37, %v2505_v30  ;;  %v14743_v18 = vpop.permute.xlu0 %11737 }
0x35bd   :  { %v3607_v12 = vrot.slane %v17387_v51, %v14165_v63  ;;  %v3798_v37 = vrot.slane %v17388_v54, %v14162_v60  ;;  %v3802_v17 = vrot.slane %v17388_v54, %v14165_v63  ;;  %v3806_v53 = vrot.slane %v17388_v54, %v14168_v57 }
0x35be   :  { %17383 = vst [vmem:[#allocation61_spill] sm:$0xff] %v14695_v56  ;;  %17386 = vst [vmem:[#allocation70_spill] sm:$0xff] %v14716_v50  ;;  %v3810_v11 = vrot.slane %v17388_v54, %v14171_v28  ;;  %v3814_v40 = vrot.slane %v17388_v54, %v14174_v43  ;;  %v3457_v27 = vrot.slane %v3435_v55, %v12518_v9 }
0x35bf   :  { %v14703_v34 = vpop.permute.xlu1 %11544  ;;  %v3464_v0 = vrot.slane %v3436_v42, %v12518_v9  ;;  %v3818_v44 = vrot.slane %v17388_v54, %v14177_v22  ;;  %v3822_v8 = vrot.slane %v17388_v54, %v14180_v24  ;;  %v3973_v13 = vrot.slane %v17389_v45, %v14159_v62 }
0x35c0   :  { %12133 = vrot.lane.b32.xlu1 %v12118_v2, %s12327_s25  ;;  %12139 = vrot.lane.b32.xlu0 %v14546_v49, %s12327_s25  ;;  %v3977_v31 = vrot.slane %v17389_v45, %v14162_v60  ;;  %v3981_v58 = vrot.slane %v17389_v45, %v14165_v63  ;;  %v3985_v55 = vrot.slane %v17389_v45, %v14168_v57  ;;  %v11742_v54 = vpop.permute.xlu0 %11741 }
0x35c1   :  { %v14787_v42 = vcombine.low %v3599_v29, %v3603_v25  ;;  %v14789_v2 = vcombine.low %v3607_v12, %v3611_v33  ;;  %v14791_v4 = vcombine.low %v3615_v7, %v3619_v21  ;;  %v14795_v48 = vcombine.low %v3794_v20, %v3798_v37 }
0x35c2   :  { %v14797_v52 = vcombine.low %v3802_v17, %v3806_v53  ;;  %v14799_v46 = vcombine.low %v3810_v11, %v3814_v40  ;;  %v14801_v10 = vcombine.low %v3457_v27, %v3464_v0  ;;  %v3993_v29 = vrot.slane %v17389_v45, %v14174_v43  ;;  %v17392_v11 = vld [vmem:[#allocation10_spill] sm:$0xff] }
0x35c3   :  { %v14732_v5 = vpop.permute.xlu1 %11548  ;;  %v3997_v25 = vrot.slane %v17389_v45, %v14177_v22  ;;  %v4001_v12 = vrot.slane %v17389_v45, %v14180_v24  ;;  %v14813_v33 = vcombine.low %v3973_v13, %v3977_v31  ;;  %v14815_v7 = vcombine.low %v3981_v58, %v3985_v55 }
0x35c4   :  { %12137 = vrot.lane.b32.xlu1 %v12122_v39, %s12327_s25  ;;  %v3627_v39 = vrot.slane %v17387_v51, %v14180_v24  ;;  %v14785_v51 = vcombine.low %v3443_v14, %v3450_v36  ;;  %v14803_v14 = vcombine.low %v3818_v44, %v3822_v8  ;;  %v3989_v36 = vrot.slane %v17389_v45, %v14171_v28  ;;  %v17391_v44 = vld [vmem:[#allocation9_spill] sm:$0xff]  ;;  %v11746_v13 = vpop.permute.xlu0 %11745 }
0x35c5   :  { %v4168_v8 = vrot.slane %v17391_v44, %v14159_v62  ;;  %v4172_v45 = vrot.slane %v17391_v44, %v14162_v60  ;;  %v14841_v31 = vcombine.low %v3997_v25, %v4001_v12  ;;  %v4176_v21 = vrot.slane %v17391_v44, %v14165_v63 }
0x35c6   :  { %17390 = vst [vmem:[#allocation6_spill] sm:$0xff] %v14785_v51  ;;  %v14793_v49 = vcombine.low %v3623_v23, %v3627_v39  ;;  %v14835_v0 = vcombine.low %v3989_v36, %v3993_v29  ;;  %v4180_v29 = vrot.slane %v17391_v44, %v14168_v57  ;;  %v4184_v40 = vrot.slane %v17391_v44, %v14171_v28 }
0x35c7   :  { %v14761_v30 = vpop.permute.xlu1 %11552  ;;  %v4188_v25 = vrot.slane %v17391_v44, %v14174_v43  ;;  %v11558_v12 = vcombine.low %v14732_v5, %v14652_v41  ;;  %v4192_v27 = vrot.slane %v17391_v44, %v14177_v22  ;;  %v14864_v53 = vcombine.low %v4168_v8, %v4172_v45 }
0x35c8   :  { %v11559_v58 = vcombine.low %v14761_v30, %v14701_v26  ;;  %v4363_v20 = vrot.slane %v17392_v11, %v14159_v62  ;;  %v4367_v41 = vrot.slane %v17392_v11, %v14162_v60  ;;  %v11557_v26 = vcombine.low %v14703_v34, %v14632_v19  ;;  %v17393_v19 = vld [vmem:[#allocation48_spill] sm:$0xff]  ;;  %v11750_v17 = vpop.permute.xlu0 %11749 }
0x35c9   :  { %v4371_v5 = vrot.slane %v17392_v11, %v14165_v63  ;;  %v4375_v30 = vrot.slane %v17392_v11, %v14168_v57  ;;  %v4383_v8 = vrot.slane %v17392_v11, %v14174_v43  ;;  %v4387_v45 = vrot.slane %v17392_v11, %v14177_v22 }
0x35ca   :  { %v11556_v34 = vcombine.low %v17393_v19, %v14581_v15  ;;  %v11580_v23 = vrot.slane %v11558_v12, %v12518_v9  ;;  %v11587_v39 = vrot.slane %v11559_v58, %v12518_v9  ;;  %v4391_v3 = vrot.slane %v17392_v11, %v14180_v24 }
0x35cb   :  { %v11736_v38 = vpop.permute.xlu1 %11735  ;;  %v4199_v6 = vcombine.low %v4184_v40, %v4188_v25  ;;  %v11573_v51 = vrot.slane %v11557_v26, %v12518_v9  ;;  %v4392_v32 = vcombine.low %v4363_v20, %v4367_v41  ;;  %v4393_v47 = vcombine.low %v4371_v5, %v4375_v30 }
0x35cc   :  { %v11566_v56 = vrot.slane %v11556_v34, %v12518_v9  ;;  %v11589_v16 = vcombine.low %v11580_v23, %v11587_v39  ;;  %v4207_v20 = vrot.slane %v14864_v53, %v12518_v9 }
0x35cd   :  { %v4402_v23 = vrot.slane %v4392_v32, %v12518_v9 }
0x35cf   :  { %v11740_v37 = vpop.permute.xlu1 %11739 }
0x35d0   :  { %v11752_v36 = vcombine.low %v11740_v37, %v11742_v54  ;;  %v4196_v54 = vrot.slane %v17391_v44, %v14180_v24  ;;  %v11751_v37 = vcombine.low %v11736_v38, %v14743_v18  ;;  %v4379_v38 = vrot.slane %v17392_v11, %v14171_v28 }
0x35d1   :  { %v4026_v11 = vrot.slane %v14835_v0, %v12518_v9  ;;  %v4409_v0 = vrot.slane %v4393_v47, %v12518_v9 }
0x35d2   :  { %v11768_v18 = vrot.slane %v11752_v36, %v12518_v9  ;;  %v4198_v36 = vcombine.low %v4176_v21, %v4180_v29  ;;  %v4200_v1 = vcombine.low %v4192_v27, %v4196_v54  ;;  %v4394_v58 = vcombine.low %v4379_v38, %v4383_v8 }
0x35d3   :  { %v11744_v55 = vpop.permute.xlu1 %11743  ;;  %v11588_v27 = vcombine.low %v11566_v56, %v11573_v51  ;;  %v4221_v29 = vrot.slane %v4199_v6, %v12518_v9  ;;  %v11603_v54 = vrot.slane %v11589_v16, %v12518_v9  ;;  %v17394_v56 = vld [vmem:[#allocation11_spill] sm:$0xff]  ;;  %v17395_v38 = vrot.slane %v14789_v2, %v12518_v9 }
0x35d4   :  { %v11753_v44 = vcombine.low %v11744_v55, %v11746_v13  ;;  %v11761_v13 = vrot.slane %v11751_v37, %v12518_v9  ;;  %v4214_v40 = vrot.slane %v4198_v36, %v12518_v9  ;;  %v4228_v25 = vrot.slane %v4200_v1, %v12518_v9 }
0x35d5   :  { %v4558_v51 = vrot.slane %v17394_v56, %v14159_v62  ;;  %v4562_v6 = vrot.slane %v17394_v56, %v14162_v60  ;;  %v4566_v32 = vrot.slane %v17394_v56, %v14165_v63  ;;  %v4570_v37 = vrot.slane %v17394_v56, %v14168_v57 }
0x35d6   :  { %v11783_v15 = vcombine.low %v11761_v13, %v11768_v18  ;;  %v11775_v19 = vrot.slane %v11753_v44, %v12518_v9  ;;  %v4574_v47 = vrot.slane %v17394_v56, %v14171_v28  ;;  %v11596_v16 = vrot.slane %v11588_v27, %v12518_v9 }
0x35d7   :  { %v11748_v50 = vpop.permute.xlu1 %11747  ;;  %v4578_v41 = vrot.slane %v17394_v56, %v14174_v43  ;;  %v4582_v26 = vrot.slane %v17394_v56, %v14177_v22  ;;  %v4586_v5 = vrot.slane %v17394_v56, %v14180_v24  ;;  %v17396_v18 = vrot.slane %v14787_v42, %v12518_v9 }
0x35d8   :  { %v11754_v55 = vcombine.low %v11748_v50, %v11750_v17  ;;  %v4395_v50 = vcombine.low %v4387_v45, %v4391_v3  ;;  %v4033_v17 = vrot.slane %v14841_v31, %v12518_v9  ;;  %v11791_v39 = vrot.slane %v11783_v15, %v12518_v9 }
0x35d9   :  { %v4416_v31 = vrot.slane %v4394_v58, %v12518_v9  ;;  %v3660_v44 = vcombine.low %v17396_v18, %v17395_v38  ;;  %v17397_v8 = vrot.slane %v14793_v49, %v12518_v9  ;;  %v17398_v45 = vrot.slane %v14791_v4, %v12518_v9 }
0x35da   :  { %v11782_v12 = vrot.slane %v11754_v55, %v12518_v9  ;;  %v4423_v53 = vrot.slane %v4395_v50, %v12518_v9  ;;  %v17399_v13 = vrot.slane %v14797_v52, %v12518_v9  ;;  %v17400_v55 = vrot.slane %v14795_v48, %v12518_v9 }
0x35db   :  { %v3661_v34 = vcombine.low %v17398_v45, %v17397_v8  ;;  %v11604_v2 = vcombine.low %v11596_v16, %v11603_v54  ;;  %v17401_v42 = vrot.slane %v14803_v14, %v12518_v9  ;;  %v17402_v15 = vrot.slane %v14799_v46, %v12518_v9 }
0x35dc   :  { %v11784_v21 = vcombine.low %v11775_v19, %v11782_v12  ;;  %v3855_v36 = vcombine.low %v17400_v55, %v17399_v13  ;;  %v17403_v4 = vrot.slane %v14815_v7, %v12518_v9  ;;  %v17404_v19 = vrot.slane %v14813_v33, %v12518_v9  ;;  %v17415_v55 = vld [vmem:[#allocation4_spill] sm:$0xff] }
0x35dd   :  { %v3856_v49 = vcombine.low %v17402_v15, %v17401_v42  ;;  %v4035_v12 = vcombine.low %v4026_v11, %v4033_v17  ;;  %v4229_v58 = vcombine.low %v4207_v20, %v4214_v40  ;;  %v4230_v48 = vcombine.low %v4221_v29, %v4228_v25  ;;  %v17420_v42 = vld [vmem:[#allocation47_spill] sm:$0xff] }
0x35de   :  { %v11798_v3 = vrot.slane %v11784_v21, %v12518_v9  ;;  %v4034_v52 = vcombine.low %v17404_v19, %v17403_v4  ;;  %v4424_v50 = vcombine.low %v4402_v23, %v4409_v0  ;;  %v4425_v21 = vcombine.low %v4416_v31, %v4423_v53 }
0x35df   :  { %v4587_v27 = vcombine.low %v4558_v51, %v4562_v6  ;;  %v4590_v14 = vcombine.low %v4582_v26, %v4586_v5  ;;  %v3480_v46 = vrot.slane %v14801_v10, %v12518_v9  ;;  %v3668_v54 = vrot.slane %v3660_v44, %v12518_v9  ;;  %v17405_v51 = vld [vmem:[#allocation12_spill] sm:$0xff]  ;;  %v17410_v44 = vld [vmem:[#allocation49_spill] sm:$0xff] }
0x35e0   :  { %v11799_v1 = vcombine.low %v11791_v39, %v11798_v3  ;;  %v4588_v39 = vcombine.low %v4566_v32, %v4570_v37  ;;  %v4589_v3 = vcombine.low %v4574_v47, %v4578_v41  ;;  %v3675_v7 = vrot.slane %v3661_v34, %v12518_v9  ;;  %v17413_v34 = vld [vmem:[#allocation61_spill] sm:$0xff] }
0x35e1   :  { %v3863_v56 = vrot.slane %v3855_v36, %v12518_v9  ;;  %v11606_v33 = vsel %vm79_vm0, %v11604_v2, -inf  ;;  %v3870_v11 = vrot.slane %v3856_v49, %v12518_v9  ;;  %v4042_v17 = vrot.slane %v4034_v52, %v12518_v9  ;;  %v17418_v2 = vld [vmem:[#allocation5_spill] sm:$0xff]  ;;  %v17423_v49 = vld [vmem:[#allocation6_spill] sm:$0xff] }
0x35e2   :  { %v11801_v30 = vsel %vm79_vm0, %v11799_v1, -inf  ;;  %v4049_v20 = vrot.slane %v4035_v12, %v12518_v9  ;;  %v4237_v40 = vrot.slane %v4229_v58, %v12518_v9  ;;  %v4244_v29 = vrot.slane %v4230_v48, %v12518_v9 }
0x35e3   :  { %11802 = vmax.xlane.f32.xlu0 %v11801_v30  ;;  %v4432_v10 = vrot.slane %v4424_v50, %v12518_v9  ;;  %v4439_v25 = vrot.slane %v4425_v21, %v12518_v9  ;;  %v4597_v23 = vrot.slane %v4587_v27, %v12518_v9  ;;  %v4604_v0 = vrot.slane %v4588_v39, %v12518_v9 }
0x35e4   :  { %v4611_v31 = vrot.slane %v4589_v3, %v12518_v9  ;;  %v4618_v53 = vrot.slane %v4590_v14, %v12518_v9  ;;  %v4737_v6 = vrot.slane %v17405_v51, %v14159_v62  ;;  %v4741_v1 = vrot.slane %v17405_v51, %v14162_v60 }
0x35e5   :  { %v4745_v32 = vrot.slane %v17405_v51, %v14165_v63  ;;  %v4749_v37 = vrot.slane %v17405_v51, %v14168_v57  ;;  %v4753_v47 = vrot.slane %v17405_v51, %v14171_v28  ;;  %v4757_v16 = vrot.slane %v17405_v51, %v14174_v43 }
0x35e6   :  { %v4761_v41 = vrot.slane %v17405_v51, %v14177_v22  ;;  %v4765_v26 = vrot.slane %v17405_v51, %v14180_v24  ;;  %v17406_v5 = vrot.slane %v14687_v59, %v12518_v9  ;;  %v17407_v30 = vrot.slane %v14685_v35, %v12518_v9 }
0x35e7   :  { %v17409_v18 = vrot.slane %v14691_v61, %v12518_v9  ;;  %v17411_v8 = vrot.slane %v17410_v44, %v12518_v9  ;;  %v17414_v13 = vrot.slane %v17413_v34, %v12518_v9  ;;  %v17416_v36 = vrot.slane %v17415_v55, %v12518_v9 }
0x35e8   :  { %11607 = vmax.xlane.f32.xlu1 %v11606_v33  ;;  %v14997_v38 = vcombine.low %v17407_v30, %v17406_v5  ;;  %v17419_v35 = vrot.slane %v17418_v2, %v12518_v9  ;;  %v17421_v15 = vrot.slane %v17420_v42, %v12518_v9  ;;  %v17424_v4 = vrot.slane %v17423_v49, %v12518_v9 }
0x35e9   :  { %v15005_v45 = vcombine.low %v17411_v8, %v17409_v18  ;;  %v15013_v59 = vcombine.low %v17416_v36, %v17414_v13  ;;  %v15028_v52 = vcombine.low %v3668_v54, %v3675_v7  ;;  %v15030_v12 = vcombine.low %v3863_v56, %v3870_v11 }
0x35ea   :  { %17408 = vst [vmem:[#allocation7_spill] sm:$0xff] %v14997_v38  ;;  %v15021_v61 = vcombine.low %v17421_v15, %v17419_v35  ;;  %v15026_v19 = vcombine.low %v17424_v4, %v3480_v46  ;;  %v15032_v58 = vcombine.low %v4042_v17, %v4049_v20  ;;  %v15034_v48 = vcombine.low %v4237_v40, %v4244_v29  ;;  %v17431_v46 = vld [vmem:[#allocation13_spill] sm:$0xff] }
0x35eb   :  { %17412 = vst [vmem:[#allocation8_spill] sm:$0xff] %v15005_v45  ;;  %17417 = vst [vmem:[#allocation9_spill] sm:$0xff] %v15013_v59  ;;  %v15036_v50 = vcombine.low %v4432_v10, %v4439_v25  ;;  %v15038_v21 = vcombine.low %v4597_v23, %v4604_v0  ;;  %v15040_v27 = vcombine.low %v4611_v31, %v4618_v53  ;;  %v17432_v10 = vld [vmem:[#allocation14_spill] sm:$0xff] }
0x35ec   :  { %17422 = vst [vmem:[#allocation10_spill] sm:$0xff] %v15021_v61  ;;  %17425 = vst [vmem:[#allocation48_spill] sm:$0xff] %v15026_v19  ;;  %v4766_v39 = vcombine.low %v4737_v6, %v4741_v1  ;;  %v4767_v3 = vcombine.low %v4745_v32, %v4749_v37  ;;  %v4768_v14 = vcombine.low %v4753_v47, %v4757_v16  ;;  %v17433_v32 = vld [vmem:[#allocation15_spill] sm:$0xff] }
0x35ed   :  { %17426 = vst [vmem:[#allocation11_spill] sm:$0xff] %v15028_v52  ;;  %17427 = vst [vmem:[#allocation12_spill] sm:$0xff] %v15030_v12  ;;  %v4769_v33 = vcombine.low %v4761_v41, %v4765_v26  ;;  %v4932_v54 = vrot.slane %v17431_v46, %v14159_v62  ;;  %v4936_v7 = vrot.slane %v17431_v46, %v14162_v60 }
0x35ee   :  { %17428 = vst [vmem:[#allocation49_spill] sm:$0xff] %v15032_v58  ;;  %17429 = vst [vmem:[#allocation61_spill] sm:$0xff] %v15034_v48  ;;  %v4940_v56 = vrot.slane %v17431_v46, %v14165_v63  ;;  %v4944_v11 = vrot.slane %v17431_v46, %v14168_v57  ;;  %v4948_v17 = vrot.slane %v17431_v46, %v14171_v28 }
0x35ef   :  { %17430 = vst [vmem:[#allocation4_spill] sm:$0xff] %v15036_v50  ;;  %v4952_v20 = vrot.slane %v17431_v46, %v14174_v43  ;;  %v4956_v40 = vrot.slane %v17431_v46, %v14177_v22  ;;  %v4960_v29 = vrot.slane %v17431_v46, %v14180_v24  ;;  %v5127_v25 = vrot.slane %v17432_v10, %v14159_v62 }
0x35f0   :  { %v5131_v23 = vrot.slane %v17432_v10, %v14162_v60  ;;  %v5135_v0 = vrot.slane %v17432_v10, %v14165_v63  ;;  %v5139_v31 = vrot.slane %v17432_v10, %v14168_v57  ;;  %v5143_v53 = vrot.slane %v17432_v10, %v14171_v28 }
0x35f1   :  { %v5147_v51 = vrot.slane %v17432_v10, %v14174_v43  ;;  %v5151_v6 = vrot.slane %v17432_v10, %v14177_v22  ;;  %v5155_v1 = vrot.slane %v17432_v10, %v14180_v24  ;;  %v5322_v37 = vrot.slane %v17433_v32, %v14159_v62 }
0x35f2   :  { %v5326_v47 = vrot.slane %v17433_v32, %v14162_v60  ;;  %v5330_v16 = vrot.slane %v17433_v32, %v14165_v63  ;;  %v5334_v41 = vrot.slane %v17433_v32, %v14168_v57  ;;  %v5338_v26 = vrot.slane %v17433_v32, %v14171_v28 }
0x35f3   :  { %v5342_v5 = vrot.slane %v17433_v32, %v14174_v43  ;;  %v5346_v30 = vrot.slane %v17433_v32, %v14177_v22  ;;  %v5350_v18 = vrot.slane %v17433_v32, %v14180_v24  ;;  %v4776_v44 = vrot.slane %v4766_v39, %v12518_v9 }
0x35f4   :  { %v4783_v8 = vrot.slane %v4767_v3, %v12518_v9  ;;  %v4790_v34 = vrot.slane %v4768_v14, %v12518_v9  ;;  %v4797_v13 = vrot.slane %v4769_v33, %v12518_v9  ;;  %v4961_v55 = vcombine.low %v4932_v54, %v4936_v7 }
0x35f5   :  { %v4962_v36 = vcombine.low %v4940_v56, %v4944_v11  ;;  %v4963_v2 = vcombine.low %v4948_v17, %v4952_v20  ;;  %v4964_v35 = vcombine.low %v4956_v40, %v4960_v29  ;;  %v5156_v42 = vcombine.low %v5127_v25, %v5131_v23 }
0x35f6   :  { %v5157_v15 = vcombine.low %v5135_v0, %v5139_v31  ;;  %v5158_v49 = vcombine.low %v5143_v53, %v5147_v51  ;;  %v5159_v4 = vcombine.low %v5151_v6, %v5155_v1  ;;  %v5351_v46 = vcombine.low %v5322_v37, %v5326_v47  ;;  %v17434_v0 = vld [vmem:[#allocation16_spill] sm:$0xff] }
0x35f7   :  { %v5352_v10 = vcombine.low %v5330_v16, %v5334_v41  ;;  %v5353_v50 = vcombine.low %v5338_v26, %v5342_v5  ;;  %v5354_v32 = vcombine.low %v5346_v30, %v5350_v18  ;;  %v4627_v39 = vrot.slane %v15038_v21, %v12518_v9  ;;  %v17435_v16 = vld [vmem:[#allocation17_spill] sm:$0xff] }
0x35f8   :  { %v4634_v3 = vrot.slane %v15040_v27, %v12518_v9  ;;  %v4798_v14 = vcombine.low %v4776_v44, %v4783_v8  ;;  %v4799_v33 = vcombine.low %v4790_v34, %v4797_v13  ;;  %v4971_v54 = vrot.slane %v4961_v55, %v12518_v9 }
0x35f9   :  { %v4978_v7 = vrot.slane %v4962_v36, %v12518_v9  ;;  %v4985_v56 = vrot.slane %v4963_v2, %v12518_v9  ;;  %v4992_v11 = vrot.slane %v4964_v35, %v12518_v9  ;;  %v5166_v17 = vrot.slane %v5156_v42, %v12518_v9 }
0x35fa   :  { %v5173_v20 = vrot.slane %v5157_v15, %v12518_v9  ;;  %v5180_v40 = vrot.slane %v5158_v49, %v12518_v9  ;;  %v5187_v21 = vrot.slane %v5159_v4, %v12518_v9  ;;  %v5361_v27 = vrot.slane %v5351_v46, %v12518_v9 }
0x35fb   :  { %v5368_v29 = vrot.slane %v5352_v10, %v12518_v9  ;;  %v5375_v25 = vrot.slane %v5353_v50, %v12518_v9  ;;  %v5382_v23 = vrot.slane %v5354_v32, %v12518_v9  ;;  %v5501_v31 = vrot.slane %v17434_v0, %v14159_v62 }
0x35fc   :  { %v5505_v53 = vrot.slane %v17434_v0, %v14162_v60  ;;  %v5509_v51 = vrot.slane %v17434_v0, %v14165_v63  ;;  %v5513_v6 = vrot.slane %v17434_v0, %v14168_v57  ;;  %v5517_v1 = vrot.slane %v17434_v0, %v14171_v28 }
0x35fd   :  { %v5521_v50 = vrot.slane %v17434_v0, %v14174_v43  ;;  %v5525_v37 = vrot.slane %v17434_v0, %v14177_v22  ;;  %v5529_v47 = vrot.slane %v17434_v0, %v14180_v24  ;;  %v5696_v41 = vrot.slane %v17435_v16, %v14159_v62 }
0x35fe   :  { %v5700_v26 = vrot.slane %v17435_v16, %v14162_v60  ;;  %v5704_v5 = vrot.slane %v17435_v16, %v14165_v63  ;;  %v5708_v30 = vrot.slane %v17435_v16, %v14168_v57  ;;  %v5712_v18 = vrot.slane %v17435_v16, %v14171_v28 }
0x35ff   :  { %v5716_v44 = vrot.slane %v17435_v16, %v14174_v43  ;;  %v5720_v8 = vrot.slane %v17435_v16, %v14177_v22  ;;  %v5724_v34 = vrot.slane %v17435_v16, %v14180_v24  ;;  %v4806_v13 = vrot.slane %v4798_v14, %v12518_v9 }
0x3600   :  { %v4813_v55 = vrot.slane %v4799_v33, %v12518_v9  ;;  %v15144_v36 = vcombine.low %v4971_v54, %v4978_v7  ;;  %v15146_v2 = vcombine.low %v4985_v56, %v4992_v11  ;;  %v15148_v35 = vcombine.low %v5166_v17, %v5173_v20 }
0x3601   :  { %v15150_v42 = vcombine.low %v5180_v40, %v5187_v21  ;;  %v15152_v15 = vcombine.low %v5361_v27, %v5368_v29  ;;  %v15154_v49 = vcombine.low %v5375_v25, %v5382_v23  ;;  %v5530_v4 = vcombine.low %v5501_v31, %v5505_v53 }
0x3602   :  { %17436 = vst [vmem:[#allocation5_spill] sm:$0xff] %v15144_v36  ;;  %17437 = vst [vmem:[#allocation47_spill] sm:$0xff] %v15146_v2  ;;  %v5531_v46 = vcombine.low %v5509_v51, %v5513_v6  ;;  %v5532_v10 = vcombine.low %v5517_v1, %v5521_v50  ;;  %v5533_v32 = vcombine.low %v5525_v37, %v5529_v47  ;;  %v17444_v51 = vld [vmem:[#allocation18_spill] sm:$0xff] }
0x3603   :  { %17438 = vst [vmem:[#allocation6_spill] sm:$0xff] %v15148_v35  ;;  %17439 = vst [vmem:[#allocation13_spill] sm:$0xff] %v15150_v42  ;;  %v5725_v0 = vcombine.low %v5696_v41, %v5700_v26  ;;  %v5726_v14 = vcombine.low %v5704_v5, %v5708_v30  ;;  %v5727_v16 = vcombine.low %v5712_v18, %v5716_v44  ;;  %v17445_v30 = vld [vmem:[#allocation19_spill] sm:$0xff] }
0x3604   :  { %17440 = vst [vmem:[#allocation14_spill] sm:$0xff] %v15152_v15  ;;  %17441 = vst [vmem:[#allocation15_spill] sm:$0xff] %v15154_v49  ;;  %v5728_v33 = vcombine.low %v5720_v8, %v5724_v34  ;;  %v15156_v54 = vcombine.low %v4627_v39, %v4634_v3  ;;  %v15158_v7 = vcombine.low %v4806_v13, %v4813_v55 }
0x3605   :  { %v5540_v3 = vrot.slane %v5530_v4, %v12518_v9  ;;  %v5547_v21 = vrot.slane %v5531_v46, %v12518_v9  ;;  %v5554_v27 = vrot.slane %v5532_v10, %v12518_v9  ;;  %v5561_v29 = vrot.slane %v5533_v32, %v12518_v9  ;;  %v17446_v10 = vld [vmem:[#allocation20_spill] sm:$0xff] }
0x3606   :  { %17442 = vst [vmem:[#allocation16_spill] sm:$0xff] %v15156_v54  ;;  %17443 = vst [vmem:[#allocation17_spill] sm:$0xff] %v15158_v7  ;;  %v5735_v25 = vrot.slane %v5725_v0, %v12518_v9  ;;  %v5742_v23 = vrot.slane %v5726_v14, %v12518_v9  ;;  %v5749_v31 = vrot.slane %v5727_v16, %v12518_v9 }
0x3607   :  { %v5756_v53 = vrot.slane %v5728_v33, %v12518_v9  ;;  %v5891_v6 = vrot.slane %v17444_v51, %v14159_v62  ;;  %v5895_v1 = vrot.slane %v17444_v51, %v14162_v60  ;;  %v5899_v50 = vrot.slane %v17444_v51, %v14165_v63 }
0x3608   :  { %v5903_v37 = vrot.slane %v17444_v51, %v14168_v57  ;;  %v5907_v47 = vrot.slane %v17444_v51, %v14171_v28  ;;  %v5911_v41 = vrot.slane %v17444_v51, %v14174_v43  ;;  %v5915_v26 = vrot.slane %v17444_v51, %v14177_v22 }
0x3609   :  { %v5919_v5 = vrot.slane %v17444_v51, %v14180_v24  ;;  %v6086_v18 = vrot.slane %v17445_v30, %v14159_v62  ;;  %v6090_v44 = vrot.slane %v17445_v30, %v14162_v60  ;;  %v6094_v8 = vrot.slane %v17445_v30, %v14165_v63 }
0x360a   :  { %v6098_v34 = vrot.slane %v17445_v30, %v14168_v57  ;;  %v6102_v13 = vrot.slane %v17445_v30, %v14171_v28  ;;  %v6106_v55 = vrot.slane %v17445_v30, %v14174_v43  ;;  %v6110_v4 = vrot.slane %v17445_v30, %v14177_v22 }
0x360b   :  { %v6114_v46 = vrot.slane %v17445_v30, %v14180_v24  ;;  %v6265_v32 = vrot.slane %v17446_v10, %v14159_v62  ;;  %v6269_v0 = vrot.slane %v17446_v10, %v14162_v60  ;;  %v6273_v14 = vrot.slane %v17446_v10, %v14165_v63 }
0x360c   :  { %v6277_v16 = vrot.slane %v17446_v10, %v14168_v57  ;;  %v6281_v33 = vrot.slane %v17446_v10, %v14171_v28  ;;  %v6285_v51 = vrot.slane %v17446_v10, %v14174_v43  ;;  %v6289_v30 = vrot.slane %v17446_v10, %v14177_v22 }
0x360d   :  { %v6293_v40 = vrot.slane %v17446_v10, %v14180_v24  ;;  %v15228_v39 = vcombine.low %v5540_v3, %v5547_v21  ;;  %v15230_v17 = vcombine.low %v5554_v27, %v5561_v29  ;;  %v15232_v20 = vcombine.low %v5735_v25, %v5742_v23  ;;  %v15236_v3 = vpop.permute.xlu0 %11932 }
0x360e   :  { %v15234_v56 = vcombine.low %v5749_v31, %v5756_v53  ;;  %v5920_v11 = vcombine.low %v5891_v6, %v5895_v1  ;;  %v5921_v7 = vcombine.low %v5899_v50, %v5903_v37  ;;  %v5922_v54 = vcombine.low %v5907_v47, %v5911_v41 }
0x360f   :  { %17447 = vst [vmem:[#allocation18_spill] sm:$0xff] %v15228_v39  ;;  %17448 = vst [vmem:[#allocation19_spill] sm:$0xff] %v15230_v17  ;;  %v5923_v48 = vcombine.low %v5915_v26, %v5919_v5  ;;  %v6115_v58 = vcombine.low %v6086_v18, %v6090_v44  ;;  %v6116_v12 = vcombine.low %v6094_v8, %v6098_v34  ;;  %v11931_v5 = vpop.permute.xlu1 %11930  ;;  %v17452_v18 = vld [vmem:[#allocation22_spill] sm:$0xff] }
0x3610   :  { %17449 = vst [vmem:[#allocation20_spill] sm:$0xff] %v15232_v20  ;;  %17450 = vst [vmem:[#allocation71_spill] sm:$0xff] %v15234_v56  ;;  %v6117_v52 = vcombine.low %v6102_v13, %v6106_v55  ;;  %v6118_v19 = vcombine.low %v6110_v4, %v6114_v46  ;;  %v6294_v61 = vcombine.low %v6265_v32, %v6269_v0 }
0x3611   :  { %v6295_v59 = vcombine.low %v6273_v14, %v6277_v16  ;;  %v6296_v45 = vcombine.low %v6281_v33, %v6285_v51  ;;  %v6297_v10 = vcombine.low %v6289_v30, %v6293_v40  ;;  %v5930_v23 = vrot.slane %v5920_v11, %v12518_v9 }
0x3612   :  { %v5937_v31 = vrot.slane %v5921_v7, %v12518_v9  ;;  %v5944_v40 = vrot.slane %v5922_v54, %v12518_v9  ;;  %v5951_v53 = vrot.slane %v5923_v48, %v12518_v9  ;;  %v6125_v6 = vrot.slane %v6115_v58, %v12518_v9  ;;  %v17451_v54 = vld [vmem:[#allocation21_spill] sm:$0xff]  ;;  %v11937_v48 = vpop.permute.xlu0 %11936 }
0x3613   :  { %v6132_v1 = vrot.slane %v6116_v12, %v12518_v9  ;;  %v6139_v50 = vrot.slane %v6117_v52, %v12518_v9  ;;  %v6146_v37 = vrot.slane %v6118_v19, %v12518_v9  ;;  %v6304_v47 = vrot.slane %v6294_v61, %v12518_v9 }
0x3614   :  { %v6311_v41 = vrot.slane %v6295_v59, %v12518_v9  ;;  %v6318_v11 = vrot.slane %v6296_v45, %v12518_v9  ;;  %v6325_v7 = vrot.slane %v6297_v10, %v12518_v9  ;;  %v6460_v26 = vrot.slane %v17451_v54, %v14159_v62 }
0x3615   :  { %v6464_v58 = vrot.slane %v17451_v54, %v14162_v60  ;;  %v6468_v12 = vrot.slane %v17451_v54, %v14165_v63  ;;  %v6472_v19 = vrot.slane %v17451_v54, %v14168_v57  ;;  %v6476_v61 = vrot.slane %v17451_v54, %v14171_v28 }
0x3616   :  { %v6480_v45 = vrot.slane %v17451_v54, %v14174_v43  ;;  %v6484_v59 = vrot.slane %v17451_v54, %v14177_v22  ;;  %v6488_v52 = vrot.slane %v17451_v54, %v14180_v24  ;;  %v6655_v44 = vrot.slane %v17452_v18, %v14159_v62 }
0x3617   :  { %v6659_v8 = vrot.slane %v17452_v18, %v14162_v60  ;;  %v6663_v34 = vrot.slane %v17452_v18, %v14165_v63  ;;  %v6667_v13 = vrot.slane %v17452_v18, %v14168_v57  ;;  %v15282_v55 = vcombine.low %v5930_v23, %v5937_v31  ;;  %v11941_v31 = vpop.permute.xlu0 %11940 }
0x3618   :  { %v15284_v4 = vcombine.low %v5944_v40, %v5951_v53  ;;  %v15286_v46 = vcombine.low %v6125_v6, %v6132_v1  ;;  %v15288_v32 = vcombine.low %v6139_v50, %v6146_v37  ;;  %v15290_v0 = vcombine.low %v6304_v47, %v6311_v41  ;;  %v17460_v41 = vld [vmem:[#allocation24_spill] sm:$0xff] }
0x3619   :  { %17453 = vst [vmem:[#allocation21_spill] sm:$0xff] %v15282_v55  ;;  %v15292_v14 = vcombine.low %v6318_v11, %v6325_v7  ;;  %v15294_v16 = vcombine.low %v6460_v26, %v6464_v58  ;;  %v15296_v33 = vcombine.low %v6468_v12, %v6472_v19  ;;  %v15298_v51 = vcombine.low %v6476_v61, %v6480_v45  ;;  %v17461_v26 = vld [vmem:[#allocation25_spill] sm:$0xff] }
0x361a   :  { %17454 = vst [vmem:[#allocation22_spill] sm:$0xff] %v15284_v4  ;;  %17455 = vst [vmem:[#allocation72_spill] sm:$0xff] %v15286_v46  ;;  %v15300_v30 = vcombine.low %v6484_v59, %v6488_v52  ;;  %v6671_v10 = vrot.slane %v17452_v18, %v14171_v28  ;;  %v6675_v23 = vrot.slane %v17452_v18, %v14174_v43 }
0x361b   :  { %17456 = vst [vmem:[#allocation73_spill] sm:$0xff] %v15288_v32  ;;  %17457 = vst [vmem:[#allocation74_spill] sm:$0xff] %v15290_v0  ;;  %v6679_v53 = vrot.slane %v17452_v18, %v14177_v22  ;;  %v6683_v6 = vrot.slane %v17452_v18, %v14180_v24  ;;  %v15310_v1 = vcombine.low %v6655_v44, %v6659_v8 }
0x361c   :  { %17458 = vst [vmem:[#allocation75_spill] sm:$0xff] %v15292_v14  ;;  %v15312_v50 = vcombine.low %v6663_v34, %v6667_v13  ;;  %v15334_v45 = vcombine.low %v6671_v10, %v6675_v23  ;;  %v11946_v13 = vcombine.low %v11931_v5, %v15236_v3  ;;  %v7029_v11 = vrot.slane %v17460_v41, %v14159_v62 }
0x361d   :  { %v15336_v18 = vcombine.low %v6679_v53, %v6683_v6  ;;  %v7033_v37 = vrot.slane %v17460_v41, %v14162_v60  ;;  %v7037_v25 = vrot.slane %v17460_v41, %v14165_v63  ;;  %v7041_v21 = vrot.slane %v17460_v41, %v14168_v57 }
0x361e   :  { %v11935_v40 = vpop.permute.xlu1 %11934  ;;  %v7053_v27 = vrot.slane %v17460_v41, %v14177_v22  ;;  %v7057_v44 = vrot.slane %v17460_v41, %v14180_v24  ;;  %v7224_v58 = vrot.slane %v17461_v26, %v14159_v62 }
0x361f   :  { %v11947_v12 = vcombine.low %v11935_v40, %v11937_v48  ;;  %v17459_v48 = vld [vmem:[#allocation23_spill] sm:$0xff] }
0x3620   :  { %v6850_v34 = vrot.slane %v17459_v48, %v14159_v62  ;;  %v6854_v40 = vrot.slane %v17459_v48, %v14162_v60  ;;  %v6858_v10 = vrot.slane %v17459_v48, %v14165_v63  ;;  %v6862_v23 = vrot.slane %v17459_v48, %v14168_v57 }
0x3621   :  { %v6866_v53 = vrot.slane %v17459_v48, %v14171_v28  ;;  %v6870_v6 = vrot.slane %v17459_v48, %v14174_v43  ;;  %v6874_v7 = vrot.slane %v17459_v48, %v14177_v22  ;;  %v6878_v3 = vrot.slane %v17459_v48, %v14180_v24 }
0x3622   :  { %v11939_v59 = vpop.permute.xlu1 %11938  ;;  %v11945_v52 = vpop.permute.xlu0 %11944  ;;  %v11963_v5 = vrot.slane %v11947_v12, %v12518_v9  ;;  %v7045_v48 = vrot.slane %v17460_v41, %v14171_v28  ;;  %v11956_v12 = vrot.slane %v11946_v13, %v12518_v9  ;;  %v15381_v19 = vcombine.low %v6850_v34, %v6854_v40 }
0x3623   :  { %v11948_v54 = vcombine.low %v11939_v59, %v11941_v31  ;;  %v7049_v31 = vrot.slane %v17460_v41, %v14174_v43  ;;  %v15383_v61 = vcombine.low %v6858_v10, %v6862_v23  ;;  %v15391_v14 = vcombine.low %v6866_v53, %v6870_v6 }
0x3624   :  { %v11978_v38 = vcombine.low %v11956_v12, %v11963_v5  ;;  %v15393_v8 = vcombine.low %v6874_v7, %v6878_v3  ;;  %v15395_v34 = vcombine.low %v7029_v11, %v7033_v37  ;;  %v15397_v40 = vcombine.low %v7037_v25, %v7041_v21  ;;  %v17463_v3 = vld [vmem:[#allocation26_spill] sm:$0xff] }
0x3625   :  { %v11970_v13 = vrot.slane %v11948_v54, %v12518_v9  ;;  %v15399_v23 = vcombine.low %v7045_v48, %v7049_v31  ;;  %v15401_v5 = vcombine.low %v7053_v27, %v7057_v44  ;;  %v7232_v54 = vrot.slane %v17461_v26, %v14165_v63 }
0x3626   :  { %v11943_v47 = vpop.permute.xlu1 %11942  ;;  %v15364_v29 = vpop.permute.xlu0 %12127  ;;  %v7236_v12 = vrot.slane %v17461_v26, %v14168_v57  ;;  %v7240_v53 = vrot.slane %v17461_v26, %v14171_v28  ;;  %v7244_v37 = vrot.slane %v17461_v26, %v14174_v43  ;;  %v7248_v21 = vrot.slane %v17461_v26, %v14177_v22 }
0x3627   :  { %v11949_v59 = vcombine.low %v11943_v47, %v11945_v52  ;;  %v7228_v52 = vrot.slane %v17461_v26, %v14162_v60  ;;  %v11986_v25 = vrot.slane %v11978_v38, %v12518_v9  ;;  %v7252_v11 = vrot.slane %v17461_v26, %v14180_v24 }
0x3628   :  { %v15439_v38 = vcombine.low %v7240_v53, %v7244_v37  ;;  %v7435_v53 = vrot.slane %v17463_v3, %v14171_v28  ;;  %v7439_v37 = vrot.slane %v17463_v3, %v14174_v43 }
0x3629   :  { %v11977_v47 = vrot.slane %v11949_v59, %v12518_v9  ;;  %v15417_v7 = vcombine.low %v7224_v58, %v7228_v52  ;;  %v15442_v59 = vcombine.low %v7248_v21, %v7252_v11  ;;  %v7423_v52 = vrot.slane %v17463_v3, %v14162_v60 }
0x362a   :  { %v12126_v0 = vpop.permute.xlu1 %12125  ;;  %v12132_v41 = vpop.permute.xlu0 %12131  ;;  %v7443_v21 = vrot.slane %v17463_v3, %v14177_v22  ;;  %v7447_v11 = vrot.slane %v17463_v3, %v14180_v24 }
0x362b   :  { %v11979_v10 = vcombine.low %v11970_v13, %v11977_v47  ;;  %17462 = vst [vmem:[#allocation23_spill] sm:$0xff] %v15417_v7  ;;  %v7419_v47 = vrot.slane %v17463_v3, %v14159_v62 }
0x362c   :  { %v7451_v42 = vcombine.low %v7443_v21, %v7447_v11 }
0x362d   :  { %v11993_v27 = vrot.slane %v11979_v10, %v12518_v9  ;;  %v15437_v10 = vcombine.low %v7232_v54, %v7236_v12  ;;  %v7427_v54 = vrot.slane %v17463_v3, %v14165_v63  ;;  %v12141_v12 = vcombine.low %v12126_v0, %v15364_v29 }
0x362e   :  { %v12130_v44 = vpop.permute.xlu1 %12129  ;;  %v12136_v13 = vpop.permute.xlu0 %12135 }
0x362f   :  { %v11994_v31 = vcombine.low %v11986_v25, %v11993_v27  ;;  %v12142_v25 = vcombine.low %v12130_v44, %v12132_v41  ;;  %v7431_v41 = vrot.slane %v17463_v3, %v14168_v57  ;;  %v17464_v44 = vld [vmem:[#allocation27_spill] sm:$0xff] }
0x3630   :  { %v7622_v29 = vrot.slane %v17464_v44, %v14165_v63  ;;  %v7626_v48 = vrot.slane %v17464_v44, %v14168_v57  ;;  %v7630_v6 = vrot.slane %v17464_v44, %v14171_v28  ;;  %v7634_v32 = vrot.slane %v17464_v44, %v14174_v43 }
0x3631   :  { %v11996_v27 = vsel %vm79_vm0, %v11994_v31, -inf  ;;  %v7614_v31 = vrot.slane %v17464_v44, %v14159_v62  ;;  %v12158_v0 = vrot.slane %v12142_v25, %v12518_v9  ;;  %v7638_v55 = vrot.slane %v17464_v44, %v14177_v22  ;;  %v17465_v25 = vld [vmem:[#allocation28_spill] sm:$0xff] }
0x3632   :  { %v12134_v58 = vpop.permute.xlu1 %12133  ;;  %11997 = vmax.xlane.f32.xlu0 %v11996_v27  ;;  %v7618_v27 = vrot.slane %v17464_v44, %v14162_v60  ;;  %v12140_v46 = vpop.permute.xlu0 %12139  ;;  %v7642_v4 = vrot.slane %v17464_v44, %v14180_v24  ;;  %v7797_v56 = vrot.slane %v17465_v25, %v14162_v60  ;;  %v7801_v39 = vrot.slane %v17465_v25, %v14165_v63  ;;  %v17482_v21 = vld [vmem:[#allocation23_spill] sm:$0xff] }
0x3633   :  { %v12143_v26 = vcombine.low %v12134_v58, %v12136_v13  ;;  %v7793_v58 = vrot.slane %v17465_v25, %v14159_v62  ;;  %v12151_v13 = vrot.slane %v12141_v12, %v12518_v9  ;;  %v7805_v17 = vrot.slane %v17465_v25, %v14168_v57 }
0x3634   :  { %v7809_v15 = vrot.slane %v17465_v25, %v14171_v28  ;;  %v7813_v44 = vrot.slane %v17465_v25, %v14174_v43  ;;  %v7817_v62 = vrot.slane %v17465_v25, %v14177_v22  ;;  %v7821_v63 = vrot.slane %v17465_v25, %v14180_v24 }
0x3635   :  { %v12173_v12 = vcombine.low %v12151_v13, %v12158_v0  ;;  %v7270_v57 = vrot.slane %v15437_v10, %v12518_v9  ;;  %v7448_v60 = vcombine.low %v7419_v47, %v7423_v52  ;;  %v7449_v49 = vcombine.low %v7427_v54, %v7431_v41 }
0x3636   :  { %v12138_v3 = vpop.permute.xlu1 %12137  ;;  %v7450_v28 = vcombine.low %v7435_v53, %v7439_v37  ;;  %v7643_v43 = vcombine.low %v7614_v31, %v7618_v27  ;;  %v7644_v36 = vcombine.low %v7622_v29, %v7626_v48  ;;  %v7645_v2 = vcombine.low %v7630_v6, %v7634_v32 }
0x3637   :  { %v12144_v20 = vcombine.low %v12138_v3, %v12140_v46  ;;  %v12165_v46 = vrot.slane %v12143_v26, %v12518_v9  ;;  %v7646_v22 = vcombine.low %v7638_v55, %v7642_v4  ;;  %v7822_v0 = vcombine.low %v7793_v58, %v7797_v56 }
0x3638   :  { %v7823_v13 = vcombine.low %v7801_v39, %v7805_v17  ;;  %v12181_v26 = vrot.slane %v12173_v12, %v12518_v9  ;;  %v7824_v7 = vcombine.low %v7809_v15, %v7813_v44  ;;  %v7825_v25 = vcombine.low %v7817_v62, %v7821_v63 }
0x3639   :  { %v12172_v3 = vrot.slane %v12144_v20, %v12518_v9  ;;  %v7277_v10 = vrot.slane %v15439_v38, %v12518_v9  ;;  %v7284_v47 = vrot.slane %v15442_v59, %v12518_v9  ;;  %v7458_v52 = vrot.slane %v7448_v60, %v12518_v9 }
0x363a   :  { %v7465_v48 = vrot.slane %v7449_v49, %v12518_v9  ;;  %v7472_v56 = vrot.slane %v7450_v28, %v12518_v9  ;;  %v7479_v17 = vrot.slane %v7451_v42, %v12518_v9  ;;  %v7653_v39 = vrot.slane %v7643_v43, %v12518_v9 }
0x363b   :  { %v12174_v35 = vcombine.low %v12165_v46, %v12172_v3  ;;  %v7667_v62 = vrot.slane %v7645_v2, %v12518_v9  ;;  %v7674_v63 = vrot.slane %v7646_v22, %v12518_v9  ;;  %v7832_v15 = vrot.slane %v7822_v0, %v12518_v9 }
0x363c   :  { %v7839_v60 = vrot.slane %v7823_v13, %v12518_v9  ;;  %v7846_v49 = vrot.slane %v7824_v7, %v12518_v9  ;;  %v7853_v28 = vrot.slane %v7825_v25, %v12518_v9  ;;  %v17466_v43 = vrot.slane %v15296_v33, %v12518_v9  ;;  %v17484_v13 = vld [vmem:[#allocation63_spill] sm:$0xff] }
0x363d   :  { %v12188_v20 = vrot.slane %v12174_v35, %v12518_v9  ;;  %v7660_v35 = vrot.slane %v7644_v36, %v12518_v9  ;;  %v17467_v36 = vrot.slane %v15294_v16, %v12518_v9  ;;  %v17468_v22 = vrot.slane %v15300_v30, %v12518_v9 }
0x363e   :  { %v17469_v42 = vrot.slane %v15298_v51, %v12518_v9  ;;  %v17470_v7 = vrot.slane %v15312_v50, %v12518_v9  ;;  %v17471_v6 = vrot.slane %v15310_v1, %v12518_v9  ;;  %v17472_v33 = vrot.slane %v15336_v18, %v12518_v9 }
0x363f   :  { %v12189_v32 = vcombine.low %v12181_v26, %v12188_v20  ;;  %v6521_v2 = vcombine.low %v17467_v36, %v17466_v43  ;;  %v17473_v16 = vrot.slane %v15334_v45, %v12518_v9  ;;  %v17474_v30 = vrot.slane %v15383_v61, %v12518_v9  ;;  %v17497_v36 = vld [vmem:[#allocation14_spill] sm:$0xff] }
0x3640   :  { %v6522_v4 = vcombine.low %v17469_v42, %v17468_v22  ;;  %v6716_v38 = vcombine.low %v17471_v6, %v17470_v7  ;;  %v17475_v51 = vrot.slane %v15381_v19, %v12518_v9  ;;  %v17476_v50 = vrot.slane %v15393_v8, %v12518_v9  ;;  %v17500_v42 = vld [vmem:[#allocation19_spill] sm:$0xff]  ;;  %v17502_v7 = vld [vmem:[#allocation18_spill] sm:$0xff] }
0x3641   :  { %v12191_v55 = vsel %vm79_vm0, %v12189_v32, -inf  ;;  %v6717_v59 = vcombine.low %v17473_v16, %v17472_v33  ;;  %v17477_v1 = vrot.slane %v15391_v14, %v12518_v9  ;;  %v17478_v18 = vrot.slane %v15397_v40, %v12518_v9  ;;  %v17505_v33 = vld [vmem:[#allocation71_spill] sm:$0xff] }
0x3642   :  { %12192 = vmax.xlane.f32.xlu1 %v12191_v55  ;;  %v6911_v54 = vcombine.low %v17475_v51, %v17474_v30  ;;  %v17479_v45 = vrot.slane %v15395_v34, %v12518_v9  ;;  %v17480_v61 = vrot.slane %v15401_v5, %v12518_v9  ;;  %v17481_v19 = vrot.slane %v15399_v23, %v12518_v9  ;;  %v17492_v55 = vld [vmem:[#allocation6_spill] sm:$0xff] }
0x3643   :  { %v6912_v41 = vcombine.low %v17477_v1, %v17476_v50  ;;  %v17483_v8 = vrot.slane %v17482_v21, %v12518_v9  ;;  %v7286_v14 = vcombine.low %v7277_v10, %v7284_v47  ;;  %v7480_v31 = vcombine.low %v7458_v52, %v7465_v48  ;;  %v17512_v1 = vld [vmem:[#allocation21_spill] sm:$0xff]  ;;  %v17520_v21 = vld [vmem:[#allocation75_spill] sm:$0xff] }
0x3644   :  { %v7090_v53 = vcombine.low %v17479_v45, %v17478_v18  ;;  %v7091_v37 = vcombine.low %v17481_v19, %v17480_v61  ;;  %v7481_v27 = vcombine.low %v7472_v56, %v7479_v17  ;;  %v7675_v29 = vcombine.low %v7653_v39, %v7660_v35  ;;  %v17485_v56 = vld [vmem:[#allocation47_spill] sm:$0xff]  ;;  %v17487_v39 = vld [vmem:[#allocation5_spill] sm:$0xff]  ;;  %v17517_v61 = vld [vmem:[#allocation72_spill] sm:$0xff] }
0x3645   :  { %v7285_v11 = vcombine.low %v17483_v8, %v7270_v57  ;;  %v7676_v40 = vcombine.low %v7667_v62, %v7674_v63  ;;  %v7854_v58 = vcombine.low %v7832_v15, %v7839_v60  ;;  %v7855_v44 = vcombine.low %v7846_v49, %v7853_v28  ;;  %v17490_v63 = vld [vmem:[#allocation13_spill] sm:$0xff]  ;;  %v17495_v28 = vld [vmem:[#allocation15_spill] sm:$0xff] }
0x3646   :  { %v6529_v34 = vrot.slane %v6521_v2, %v12518_v9  ;;  %v6536_v12 = vrot.slane %v6522_v4, %v12518_v9  ;;  %v6724_v5 = vrot.slane %v6716_v38, %v12518_v9  ;;  %v6731_v23 = vrot.slane %v6717_v59, %v12518_v9  ;;  %v17507_v59 = vld [vmem:[#allocation20_spill] sm:$0xff]  ;;  %v17515_v45 = vld [vmem:[#allocation73_spill] sm:$0xff] }
0x3647   :  { %v6919_v46 = vrot.slane %v6911_v54, %v12518_v9  ;;  %v6926_v3 = vrot.slane %v6912_v41, %v12518_v9  ;;  %v7098_v57 = vrot.slane %v7090_v53, %v12518_v9  ;;  %v7105_v0 = vrot.slane %v7091_v37, %v12518_v9  ;;  %v17510_v54 = vld [vmem:[#allocation22_spill] sm:$0xff] }
0x3648   :  { %566 = vperm.xlu0 %12316, %v17484_v13   ;;  %v7293_v26 = vrot.slane %v7285_v11, %v12518_v9  ;;  %v7300_v20 = vrot.slane %v7286_v14, %v12518_v9  ;;  %v7488_v25 = vrot.slane %v7480_v31, %v12518_v9  ;;  %v7495_v10 = vrot.slane %v7481_v27, %v12518_v9  ;;  %v17522_v11 = vld [vmem:[#allocation74_spill] sm:$0xff]  ;;  %v17525_v27 = vld [vmem:[#allocation64_spill] sm:$0xff] }
0x3649   :  { %v7683_v47 = vrot.slane %v7675_v29, %v12518_v9  ;;  %v7690_v52 = vrot.slane %v7676_v40, %v12518_v9  ;;  %v7862_v48 = vrot.slane %v7854_v58, %v12518_v9  ;;  %v7869_v32 = vrot.slane %v7855_v44, %v12518_v9 }
0x364a   :  { %v17486_v17 = vrot.slane %v17485_v56, %v12518_v9  ;;  %v17488_v35 = vrot.slane %v17487_v39, %v12518_v9  ;;  %v17491_v15 = vrot.slane %v17490_v63, %v12518_v9  ;;  %v17493_v60 = vrot.slane %v17492_v55, %v12518_v9  ;;  %v17535_v63 = vld [vmem:[#allocation29_spill] sm:$0xff]  ;;  %v17536_v55 = vld [vmem:[#allocation51_spill] sm:$0xff] }
0x364b   :  { %v17496_v43 = vrot.slane %v17495_v28, %v12518_v9  ;;  %v17498_v2 = vrot.slane %v17497_v36, %v12518_v9  ;;  %v17501_v4 = vrot.slane %v17500_v42, %v12518_v9  ;;  %v17503_v6 = vrot.slane %v17502_v7, %v12518_v9 }
0x364c   :  { %v15594_v62 = vcombine.low %v17488_v35, %v17486_v17  ;;  %v15602_v49 = vcombine.low %v17493_v60, %v17491_v15  ;;  %v17506_v16 = vrot.slane %v17505_v33, %v12518_v9  ;;  %v17508_v30 = vrot.slane %v17507_v59, %v12518_v9  ;;  %765 = vperm.xlu0 %12316, %v17525_v27   ;;  %v17534_v35 = vld [vmem:[#allocation50_spill] sm:$0xff] }
0x364d   :  { %v15610_v22 = vcombine.low %v17498_v2, %v17496_v43  ;;  %v15618_v38 = vcombine.low %v17503_v6, %v17501_v4  ;;  %v17511_v50 = vrot.slane %v17510_v54, %v12518_v9  ;;  %v17513_v41 = vrot.slane %v17512_v1, %v12518_v9  ;;  %v17544_v4 = vld [vmem:[#allocation31_spill] sm:$0xff]  ;;  %v17545_v59 = vld [vmem:[#allocation58_spill] sm:$0xff] }
0x364e   :  { %17489 = vst [vmem:[#allocation24_spill] sm:$0xff] %v15594_v62  ;;  %17494 = vst [vmem:[#allocation25_spill] sm:$0xff] %v15602_v49  ;;  %v15626_v51 = vcombine.low %v17508_v30, %v17506_v16  ;;  %v17516_v53 = vrot.slane %v17515_v45, %v12518_v9  ;;  %v17518_v19 = vrot.slane %v17517_v61, %v12518_v9  ;;  %v17547_v45 = vld [vmem:[#allocation32_spill] sm:$0xff]  ;;  %v17564_v49 = vld [vmem:[#allocation7_spill] sm:$0xff] }
0x364f   :  { %17499 = vst [vmem:[#allocation26_spill] sm:$0xff] %v15610_v22  ;;  %17504 = vst [vmem:[#allocation27_spill] sm:$0xff] %v15618_v38  ;;  %v15634_v18 = vcombine.low %v17513_v41, %v17511_v50  ;;  %v17521_v8 = vrot.slane %v17520_v21, %v12518_v9  ;;  %v17523_v14 = vrot.slane %v17522_v11, %v12518_v9  ;;  %v17546_v41 = vld [vmem:[#allocation65_spill] sm:$0xff] }
0x3650   :  { %17509 = vst [vmem:[#allocation28_spill] sm:$0xff] %v15626_v51  ;;  %v15642_v37 = vcombine.low %v17518_v19, %v17516_v53  ;;  %v15653_v29 = vcombine.low %v6529_v34, %v6536_v12  ;;  %v15655_v40 = vcombine.low %v6724_v5, %v6731_v23  ;;  %v15657_v58 = vcombine.low %v6919_v46, %v6926_v3  ;;  %v17537_v12 = vld [vmem:[#allocation52_spill] sm:$0xff]  ;;  %v17538_v23 = vld [vmem:[#allocation53_spill] sm:$0xff]  ;;  %v17539_v3 = vld [vmem:[#allocation54_spill] sm:$0xff] }
0x3651   :  { %17514 = vst [vmem:[#allocation23_spill] sm:$0xff] %v15634_v18  ;;  %v15650_v31 = vcombine.low %v17523_v14, %v17521_v8  ;;  %v15659_v44 = vcombine.low %v7098_v57, %v7105_v0  ;;  %v15661_v13 = vcombine.low %v7293_v26, %v7300_v20  ;;  %v15663_v56 = vcombine.low %v7488_v25, %v7495_v10  ;;  %v17540_v0 = vld [vmem:[#allocation55_spill] sm:$0xff]  ;;  %v17541_v20 = vld [vmem:[#allocation56_spill] sm:$0xff] }
0x3652   :  { %17519 = vst [vmem:[#allocation63_spill] sm:$0xff] %v15642_v37  ;;  %17526 = vst [vmem:[#allocation5_spill] sm:$0xff] %v15653_v29  ;;  %v15665_v17 = vcombine.low %v7683_v47, %v7690_v52  ;;  %v15667_v39 = vcombine.low %v7862_v48, %v7869_v32  ;;  %v7988_v15 = vrot.slane %v17535_v63, %v17534_v35  ;;  %v17542_v47 = vld [vmem:[#allocation57_spill] sm:$0xff]  ;;  %v17543_v52 = vld [vmem:[#allocation30_spill] sm:$0xff] }
0x3653   :  { %17524 = vst [vmem:[#allocation47_spill] sm:$0xff] %v15650_v31  ;;  %17527 = vst [vmem:[#allocation13_spill] sm:$0xff] %v15655_v40  ;;  %v7992_v34 = vrot.slane %v17535_v63, %v17536_v55  ;;  %v7996_v5 = vrot.slane %v17535_v63, %v17537_v12  ;;  %v8000_v46 = vrot.slane %v17535_v63, %v17538_v23  ;;  %948 = vperm.xlu0 %12316, %v17542_v47  }
0x3654   :  { %17528 = vst [vmem:[#allocation6_spill] sm:$0xff] %v15657_v58  ;;  %17529 = vst [vmem:[#allocation15_spill] sm:$0xff] %v15659_v44  ;;  %v8004_v57 = vrot.slane %v17535_v63, %v17539_v3  ;;  %v8008_v26 = vrot.slane %v17535_v63, %v17540_v0  ;;  %v8012_v25 = vrot.slane %v17535_v63, %v17541_v20  ;;  %166 = vperm.xlu1 %12317, %v17545_v59   ;;  %v17548_v59 = vld [vmem:[#allocation59_spill] sm:$0xff]  ;;  %v17563_v44 = vld [vmem:[#allocation36_spill] sm:$0xff] }
0x3655   :  { %17530 = vst [vmem:[#allocation14_spill] sm:$0xff] %v15661_v13  ;;  %17531 = vst [vmem:[#allocation19_spill] sm:$0xff] %v15663_v56  ;;  %v8016_v10 = vrot.slane %v17535_v63, %v14180_v24  ;;  %v8183_v48 = vrot.slane %v17543_v52, %v17534_v35  ;;  %v8187_v32 = vrot.slane %v17543_v52, %v17536_v55  ;;  %v17549_v13 = vld [vmem:[#allocation66_spill] sm:$0xff] }
0x3656   :  { %17532 = vst [vmem:[#allocation18_spill] sm:$0xff] %v15665_v17  ;;  %17533 = vst [vmem:[#allocation71_spill] sm:$0xff] %v15667_v39  ;;  %v8191_v60 = vrot.slane %v17543_v52, %v17537_v12  ;;  %v8195_v28 = vrot.slane %v17543_v52, %v17538_v23  ;;  %v8199_v43 = vrot.slane %v17543_v52, %v17539_v3 }
0x3657   :  { %v8203_v36 = vrot.slane %v17543_v52, %v17540_v0  ;;  %v8207_v2 = vrot.slane %v17543_v52, %v17541_v20  ;;  %v8211_v42 = vrot.slane %v17543_v52, %v14180_v24  ;;  %v8378_v7 = vrot.slane %v17544_v4, %v17534_v35  ;;  %1147 = vperm.xlu0 %12316, %v17546_v41  }
0x3658   :  { %v8382_v6 = vrot.slane %v17544_v4, %v17536_v55  ;;  %v8386_v33 = vrot.slane %v17544_v4, %v17537_v12  ;;  %v8390_v16 = vrot.slane %v17544_v4, %v17538_v23  ;;  %v8394_v30 = vrot.slane %v17544_v4, %v17539_v3  ;;  %367 = vperm.xlu1 %12317, %v17548_v59  }
0x3659   :  { %v8398_v54 = vrot.slane %v17544_v4, %v17540_v0  ;;  %v8402_v50 = vrot.slane %v17544_v4, %v17541_v20  ;;  %v8406_v1 = vrot.slane %v17544_v4, %v14180_v24  ;;  %v8557_v53 = vrot.slane %v17547_v45, %v17534_v35 }
0x365a   :  { %v8561_v61 = vrot.slane %v17547_v45, %v17536_v55  ;;  %v8565_v19 = vrot.slane %v17547_v45, %v17537_v12  ;;  %v8569_v21 = vrot.slane %v17547_v45, %v17538_v23  ;;  %v8573_v8 = vrot.slane %v17547_v45, %v17539_v3 }
0x365b   :  { %v8577_v11 = vrot.slane %v17547_v45, %v17540_v0  ;;  %v8581_v14 = vrot.slane %v17547_v45, %v17541_v20  ;;  %v8585_v27 = vrot.slane %v17547_v45, %v14180_v24  ;;  %v15736_v63 = vcombine.low %v7988_v15, %v7992_v34  ;;  %1545 = vperm.xlu0 %12316, %v17549_v13   ;;  %v17562_v13 = vld [vmem:[#allocation70_spill] sm:$0xff] }
0x365c   :  { %v15738_v47 = vcombine.low %v7996_v5, %v8000_v46  ;;  %v15740_v52 = vcombine.low %v8004_v57, %v8008_v26  ;;  %v15742_v4 = vcombine.low %v8012_v25, %v8016_v10  ;;  %v15745_v41 = vcombine.low %v8183_v48, %v8187_v32 }
0x365d   :  { %v15747_v39 = vcombine.low %v8191_v60, %v8195_v28  ;;  %v15749_v17 = vcombine.low %v8199_v43, %v8203_v36  ;;  %v15751_v56 = vcombine.low %v8207_v2, %v8211_v42  ;;  %v15754_v15 = vcombine.low %v8378_v7, %v8382_v6  ;;  %v17554_v28 = vld [vmem:[#allocation60_spill] sm:$0xff]  ;;  %v17555_v7 = vld [vmem:[#allocation67_spill] sm:$0xff] }
0x365e   :  { %v15756_v34 = vcombine.low %v8386_v33, %v8390_v16  ;;  %v15758_v5 = vcombine.low %v8394_v30, %v8398_v54  ;;  %v15760_v46 = vcombine.low %v8402_v50, %v8406_v1  ;;  %v15762_v57 = vcombine.low %v8557_v53, %v8561_v61  ;;  %1346 = vperm.xlu1 %12317, %v17554_v28   ;;  %v17556_v53 = vld [vmem:[#allocation33_spill] sm:$0xff]  ;;  %v17559_v1 = vld [vmem:[#allocation34_spill] sm:$0xff]  ;;  %v17560_v6 = vld [vmem:[#allocation35_spill] sm:$0xff] }
0x365f   :  { %v15764_v26 = vcombine.low %v8565_v19, %v8569_v21  ;;  %v15766_v25 = vcombine.low %v8573_v8, %v8577_v11  ;;  %v15768_v10 = vcombine.low %v8581_v14, %v8585_v27  ;;  %1728 = vperm.xlu0 %12316, %v17555_v7   ;;  %v8752_v61 = vrot.slane %v17556_v53, %v17534_v35  ;;  %v17557_v11 = vld [vmem:[#allocation68_spill] sm:$0xff]  ;;  %v17558_v7 = vld [vmem:[#allocation69_spill] sm:$0xff]  ;;  %v17561_v36 = vld [vmem:[#allocation3_spill] sm:$0xff] }
0x3660   :  { %17550 = vst [vmem:[#allocation20_spill] sm:$0xff] %v15762_v57  ;;  %v8756_v19 = vrot.slane %v17556_v53, %v17536_v55  ;;  %v8760_v21 = vrot.slane %v17556_v53, %v17537_v12  ;;  %v8764_v8 = vrot.slane %v17556_v53, %v17538_v23  ;;  %v8768_v14 = vrot.slane %v17556_v53, %v17539_v3 }
0x3661   :  { %17551 = vst [vmem:[#allocation22_spill] sm:$0xff] %v15764_v26  ;;  %17552 = vst [vmem:[#allocation21_spill] sm:$0xff] %v15766_v25  ;;  %v8772_v27 = vrot.slane %v17556_v53, %v17540_v0  ;;  %v8776_v59 = vrot.slane %v17556_v53, %v17541_v20  ;;  %v8780_v28 = vrot.slane %v17556_v53, %v14180_v24 }
0x3662   :  { %17553 = vst [vmem:[#allocation73_spill] sm:$0xff] %v15768_v10  ;;  %1927 = vperm.xlu1 %12317, %v17557_v11   ;;  %v8947_v45 = vrot.slane %v17559_v1, %v17534_v35  ;;  %v8951_v11 = vrot.slane %v17559_v1, %v17536_v55  ;;  %v8955_v54 = vrot.slane %v17559_v1, %v17537_v12 }
0x3663   :  { %2126 = vperm.xlu0 %12316, %v17558_v7   ;;  %v8959_v50 = vrot.slane %v17559_v1, %v17538_v23  ;;  %v8963_v16 = vrot.slane %v17559_v1, %v17539_v3  ;;  %v8967_v53 = vrot.slane %v17559_v1, %v17540_v0  ;;  %v8971_v7 = vrot.slane %v17559_v1, %v17541_v20 }
0x3664   :  { %v8975_v30 = vrot.slane %v17559_v1, %v14180_v24  ;;  %v9142_v33 = vrot.slane %v17560_v6, %v17534_v35  ;;  %v9146_v2 = vrot.slane %v17560_v6, %v17536_v55  ;;  %v9150_v42 = vrot.slane %v17560_v6, %v17537_v12 }
0x3665   :  { %v9154_v43 = vrot.slane %v17560_v6, %v17538_v23  ;;  %v9158_v32 = vrot.slane %v17560_v6, %v17539_v3  ;;  %v9162_v1 = vrot.slane %v17560_v6, %v17540_v0  ;;  %v9166_v60 = vrot.slane %v17560_v6, %v17541_v20 }
0x3666   :  { %2325 = vperm.xlu1 %12317, %v17561_v36   ;;  %v9170_v48 = vrot.slane %v17560_v6, %v14180_v24  ;;  %v9321_v58 = vrot.slane %v17563_v44, %v17534_v35  ;;  %v9325_v36 = vrot.slane %v17563_v44, %v17536_v55  ;;  %v9329_v40 = vrot.slane %v17563_v44, %v17537_v12 }
0x3667   :  { %2508 = vperm.xlu0 %12316, %v17562_v13   ;;  %v9333_v29 = vrot.slane %v17563_v44, %v17538_v23  ;;  %v9337_v31 = vrot.slane %v17563_v44, %v17539_v3  ;;  %v9341_v6 = vrot.slane %v17563_v44, %v17540_v0  ;;  %v9345_v13 = vrot.slane %v17563_v44, %v17541_v20  ;;  %v17565_v3 = vld [vmem:[#allocation8_spill] sm:$0xff] }
0x3668   :  { %v9349_v37 = vrot.slane %v17563_v44, %v14180_v24  ;;  %v8781_v18 = vcombine.low %v8752_v61, %v8756_v19  ;;  %v8782_v51 = vcombine.low %v8760_v21, %v8764_v8  ;;  %v8783_v38 = vcombine.low %v8768_v14, %v8772_v27  ;;  %v17589_v8 = vld [vmem:[#allocation11_spill] sm:$0xff] }
0x3669   :  { %v8784_v22 = vcombine.low %v8776_v59, %v8780_v28  ;;  %v8976_v62 = vcombine.low %v8947_v45, %v8951_v11  ;;  %v8977_v23 = vcombine.low %v8955_v54, %v8959_v50  ;;  %v8978_v12 = vcombine.low %v8963_v16, %v8967_v53  ;;  %v17566_v16 = vld [vmem:[#allocation9_spill] sm:$0xff] }
0x366a   :  { %2707 = vperm.xlu1 %12317, %v17564_v49   ;;  %v8979_v55 = vcombine.low %v8971_v7, %v8975_v30  ;;  %v9171_v35 = vcombine.low %v9142_v33, %v9146_v2  ;;  %v9172_v0 = vcombine.low %v9150_v42, %v9154_v43  ;;  %v9173_v25 = vcombine.low %v9158_v32, %v9162_v1  ;;  %v17576_v32 = vld [vmem:[#allocation48_spill] sm:$0xff]  ;;  %v17581_v2 = vld [vmem:[#allocation22_spill] sm:$0xff]  ;;  %v17585_v50 = vld [vmem:[#allocation73_spill] sm:$0xff] }
0x366b   :  { %2906 = vperm.xlu0 %12316, %v17565_v3   ;;  %v9174_v10 = vcombine.low %v9166_v60, %v9170_v48  ;;  %v9350_v20 = vcombine.low %v9321_v58, %v9325_v36  ;;  %v9351_v57 = vcombine.low %v9329_v40, %v9333_v29  ;;  %v9352_v26 = vcombine.low %v9337_v31, %v9341_v6  ;;  %v17567_v31 = vld [vmem:[#allocation10_spill] sm:$0xff]  ;;  %v17583_v42 = vld [vmem:[#allocation20_spill] sm:$0xff]  ;;  %v17587_v45 = vld [vmem:[#allocation21_spill] sm:$0xff] }
0x366c   :  { %v9353_v44 = vcombine.low %v9345_v13, %v9349_v37  ;;  %v8791_v61 = vrot.slane %v8781_v18, %v12518_v9  ;;  %v8798_v19 = vrot.slane %v8782_v51, %v12518_v9  ;;  %v8805_v49 = vrot.slane %v8783_v38, %v12518_v9  ;;  %v17590_v13 = vld [vmem:[#allocation12_spill] sm:$0xff] }
0x366d   :  { %v8812_v54 = vrot.slane %v8784_v22, %v12518_v9  ;;  %v8986_v3 = vrot.slane %v8976_v62, %v12518_v9  ;;  %v8993_v43 = vrot.slane %v8977_v23, %v12518_v9  ;;  %v9000_v48 = vrot.slane %v8978_v12, %v12518_v9 }
0x366e   :  { %3105 = vperm.xlu1 %12317, %v17566_v16   ;;  %v9007_v29 = vrot.slane %v8979_v55, %v12518_v9  ;;  %v9181_v18 = vrot.slane %v9171_v35, %v12518_v9  ;;  %v9188_v51 = vrot.slane %v9172_v0, %v12518_v9  ;;  %v9195_v38 = vrot.slane %v9173_v25, %v12518_v9 }
0x366f   :  { %3288 = vperm.xlu0 %12316, %v17567_v31   ;;  %v9202_v22 = vrot.slane %v9174_v10, %v12518_v9  ;;  %v9360_v37 = vrot.slane %v9350_v20, %v12518_v9  ;;  %v9367_v62 = vrot.slane %v9351_v57, %v12518_v9  ;;  %v9374_v40 = vrot.slane %v9352_v26, %v12518_v9 }
0x3670   :  { %v9381_v58 = vrot.slane %v9353_v44, %v12518_v9  ;;  %v17568_v55 = vrot.slane %v15738_v47, %v12518_v9  ;;  %v17569_v35 = vrot.slane %v15736_v63, %v12518_v9  ;;  %v17570_v23 = vrot.slane %v15742_v4, %v12518_v9 }
0x3671   :  { %v17571_v0 = vrot.slane %v15740_v52, %v12518_v9  ;;  %v17572_v57 = vrot.slane %v15747_v39, %v12518_v9  ;;  %v17573_v26 = vrot.slane %v15745_v41, %v12518_v9  ;;  %v17574_v47 = vrot.slane %v15751_v56, %v12518_v9 }
0x3672   :  { %v8049_v12 = vcombine.low %v17569_v35, %v17568_v55  ;;  %v17575_v63 = vrot.slane %v15749_v17, %v12518_v9  ;;  %3483 = vperm.xlu1 %12317, %v17576_v32   ;;  %v17577_v52 = vrot.slane %v15756_v34, %v12518_v9  ;;  %v17578_v4 = vrot.slane %v15754_v15, %v12518_v9  ;;  %v17596_v35 = vld [vmem:[#allocation53_spill] sm:$0xff]  ;;  %v17602_v32 = vld [vmem:[#allocation38_spill] sm:$0xff] }
0x3673   :  { %v8050_v20 = vcombine.low %v17571_v0, %v17570_v23  ;;  %v8244_v25 = vcombine.low %v17573_v26, %v17572_v57  ;;  %v17579_v41 = vrot.slane %v15760_v46, %v12518_v9  ;;  %v17580_v60 = vrot.slane %v15758_v5, %v12518_v9  ;;  %3678 = vperm.xlu0 %12316, %v17589_v8   ;;  %v17597_v23 = vld [vmem:[#allocation61_spill] sm:$0xff]  ;;  %v17598_v0 = vld [vmem:[#allocation54_spill] sm:$0xff]  ;;  %v17599_v57 = vld [vmem:[#allocation55_spill] sm:$0xff] }
0x3674   :  { %v8245_v10 = vcombine.low %v17575_v63, %v17574_v47  ;;  %v8439_v39 = vcombine.low %v17578_v4, %v17577_v52  ;;  %v17582_v17 = vrot.slane %v17581_v2, %v12518_v9  ;;  %v17584_v33 = vrot.slane %v17583_v42, %v12518_v9 }
0x3675   :  { %v8440_v56 = vcombine.low %v17580_v60, %v17579_v41  ;;  %v17586_v34 = vrot.slane %v17585_v50, %v12518_v9  ;;  %v17588_v15 = vrot.slane %v17587_v45, %v12518_v9  ;;  %v8813_v46 = vcombine.low %v8791_v61, %v8798_v19 }
0x3676   :  { %v8618_v30 = vcombine.low %v17584_v33, %v17582_v17  ;;  %v8814_v14 = vcombine.low %v8805_v49, %v8812_v54  ;;  %v9008_v5 = vcombine.low %v8986_v3, %v8993_v43  ;;  %v9009_v27 = vcombine.low %v9000_v48, %v9007_v29  ;;  %3873 = vperm.xlu1 %12317, %v17590_v13   ;;  %v17591_v54 = vld [vmem:[#allocation49_spill] sm:$0xff] }
0x3677   :  { %v8619_v21 = vcombine.low %v17588_v15, %v17586_v34  ;;  %v9203_v59 = vcombine.low %v9181_v18, %v9188_v51  ;;  %v9204_v28 = vcombine.low %v9195_v38, %v9202_v22  ;;  %v9382_v11 = vcombine.low %v9360_v37, %v9367_v62  ;;  %4052 = vperm.xlu0 %12316, %v17591_v54   ;;  %v17592_v38 = vld [vmem:[#allocation50_spill] sm:$0xff]  ;;  %v17593_v22 = vld [vmem:[#allocation37_spill] sm:$0xff]  ;;  %v17594_v62 = vld [vmem:[#allocation51_spill] sm:$0xff] }
0x3678   :  { %v9383_v53 = vcombine.low %v9374_v40, %v9381_v58  ;;  %v8057_v7 = vrot.slane %v8049_v12, %v12518_v9  ;;  %v8064_v1 = vrot.slane %v8050_v20, %v12518_v9  ;;  %v8252_v36 = vrot.slane %v8244_v25, %v12518_v9  ;;  %v17595_v58 = vld [vmem:[#allocation52_spill] sm:$0xff] }
0x3679   :  { %v8259_v6 = vrot.slane %v8245_v10, %v12518_v9  ;;  %v8447_v44 = vrot.slane %v8439_v39, %v12518_v9  ;;  %v8454_v61 = vrot.slane %v8440_v56, %v12518_v9  ;;  %v8626_v19 = vrot.slane %v8618_v30, %v12518_v9  ;;  %v17600_v25 = vld [vmem:[#allocation56_spill] sm:$0xff] }
0x367a   :  { %v8633_v49 = vrot.slane %v8619_v21, %v12518_v9  ;;  %v8821_v16 = vrot.slane %v8813_v46, %v12518_v9  ;;  %v8828_v3 = vrot.slane %v8814_v14, %v12518_v9  ;;  %v9016_v43 = vrot.slane %v9008_v5, %v12518_v9  ;;  %4247 = vperm.xlu1 %12317, %v17597_v23   ;;  %v17601_v10 = vld [vmem:[#allocation4_spill] sm:$0xff]  ;;  %v17608_v46 = vld [vmem:[#allocation17_spill] sm:$0xff] }
0x367b   :  { %v9023_v48 = vrot.slane %v9009_v27, %v12518_v9  ;;  %v9211_v29 = vrot.slane %v9203_v59, %v12518_v9  ;;  %v9218_v31 = vrot.slane %v9204_v28, %v12518_v9  ;;  %v9390_v18 = vrot.slane %v9382_v11, %v12518_v9  ;;  %4442 = vperm.xlu0 %12316, %v17601_v10   ;;  %v17603_v34 = vld [vmem:[#allocation16_spill] sm:$0xff] }
0x367c   :  { %v9397_v51 = vrot.slane %v9383_v53, %v12518_v9  ;;  %v9516_v37 = vrot.slane %v17593_v22, %v17592_v38  ;;  %v9520_v40 = vrot.slane %v17593_v22, %v17594_v62  ;;  %v9524_v55 = vrot.slane %v17593_v22, %v17595_v58 }
0x367d   :  { %v9528_v12 = vrot.slane %v17593_v22, %v17596_v35  ;;  %v9532_v20 = vrot.slane %v17593_v22, %v17598_v0  ;;  %v9536_v26 = vrot.slane %v17593_v22, %v17599_v57  ;;  %v9540_v47 = vrot.slane %v17593_v22, %v17600_v25 }
0x367e   :  { %v9544_v63 = vrot.slane %v17593_v22, %v14180_v24  ;;  %v9711_v52 = vrot.slane %v17602_v32, %v17592_v38  ;;  %v9715_v4 = vrot.slane %v17602_v32, %v17594_v62  ;;  %v9719_v39 = vrot.slane %v17602_v32, %v17595_v58  ;;  %4637 = vperm.xlu1 %12317, %v17603_v34  }
0x367f   :  { %v9723_v41 = vrot.slane %v17602_v32, %v17596_v35  ;;  %v9727_v60 = vrot.slane %v17602_v32, %v17598_v0  ;;  %v9731_v56 = vrot.slane %v17602_v32, %v17599_v57  ;;  %v9735_v2 = vrot.slane %v17602_v32, %v17600_v25  ;;  %4816 = vperm.xlu0 %12316, %v17608_v46   ;;  %v17615_v46 = vld [vmem:[#allocation41_spill] sm:$0xff] }
0x3680   :  { %v9739_v17 = vrot.slane %v17602_v32, %v14180_v24  ;;  %v15994_v42 = vcombine.low %v8057_v7, %v8064_v1  ;;  %v15996_v33 = vcombine.low %v8252_v36, %v8259_v6  ;;  %v15998_v30 = vcombine.low %v8447_v44, %v8454_v61  ;;  %v17609_v1 = vld [vmem:[#allocation39_spill] sm:$0xff]  ;;  %v17610_v61 = vld [vmem:[#allocation24_spill] sm:$0xff] }
0x3681   :  { %v16000_v50 = vcombine.low %v8626_v19, %v8633_v49  ;;  %v16003_v45 = vcombine.low %v8821_v16, %v8828_v3  ;;  %v16005_v15 = vcombine.low %v9016_v43, %v9023_v48  ;;  %v16007_v21 = vcombine.low %v9211_v29, %v9218_v31  ;;  %v17611_v3 = vld [vmem:[#allocation25_spill] sm:$0xff]  ;;  %v17612_v43 = vld [vmem:[#allocation40_spill] sm:$0xff] }
0x3682   :  { %v16009_v8 = vcombine.low %v9390_v18, %v9397_v51  ;;  %v16012_v14 = vcombine.low %v9516_v37, %v9520_v40  ;;  %v16014_v5 = vcombine.low %v9524_v55, %v9528_v12  ;;  %v16016_v27 = vcombine.low %v9532_v20, %v9536_v26  ;;  %5011 = vperm.xlu1 %12317, %v17610_v61   ;;  %v17613_v26 = vld [vmem:[#allocation26_spill] sm:$0xff] }
0x3683   :  { %17604 = vst [vmem:[#allocation72_spill] sm:$0xff] %v16003_v45  ;;  %17605 = vst [vmem:[#allocation75_spill] sm:$0xff] %v16005_v15  ;;  %v16018_v59 = vcombine.low %v9540_v47, %v9544_v63  ;;  %v16020_v28 = vcombine.low %v9711_v52, %v9715_v4  ;;  %v16022_v11 = vcombine.low %v9719_v39, %v9723_v41  ;;  %5206 = vperm.xlu0 %12316, %v17611_v3   ;;  %v17614_v52 = vld [vmem:[#allocation27_spill] sm:$0xff]  ;;  %v17622_v45 = vld [vmem:[#allocation13_spill] sm:$0xff] }
0x3684   :  { %17606 = vst [vmem:[#allocation74_spill] sm:$0xff] %v16007_v21  ;;  %17607 = vst [vmem:[#allocation64_spill] sm:$0xff] %v16009_v8  ;;  %v16024_v53 = vcombine.low %v9727_v60, %v9731_v56  ;;  %v16026_v7 = vcombine.low %v9735_v2, %v9739_v17  ;;  %v9906_v36 = vrot.slane %v17609_v1, %v17592_v38  ;;  %v17621_v21 = vld [vmem:[#allocation5_spill] sm:$0xff] }
0x3685   :  { %v9910_v6 = vrot.slane %v17609_v1, %v17594_v62  ;;  %v9914_v13 = vrot.slane %v17609_v1, %v17595_v58  ;;  %v9918_v44 = vrot.slane %v17609_v1, %v17596_v35  ;;  %v9922_v19 = vrot.slane %v17609_v1, %v17598_v0 }
0x3686   :  { %v9926_v49 = vrot.slane %v17609_v1, %v17599_v57  ;;  %v9930_v54 = vrot.slane %v17609_v1, %v17600_v25  ;;  %v9934_v16 = vrot.slane %v17609_v1, %v14180_v24  ;;  %v10085_v48 = vrot.slane %v17612_v43, %v17592_v38  ;;  %5401 = vperm.xlu1 %12317, %v17613_v26   ;;  %v17620_v26 = vld [vmem:[#allocation47_spill] sm:$0xff] }
0x3687   :  { %v10089_v29 = vrot.slane %v17612_v43, %v17594_v62  ;;  %v10093_v31 = vrot.slane %v17612_v43, %v17595_v58  ;;  %v10097_v18 = vrot.slane %v17612_v43, %v17596_v35  ;;  %v10101_v51 = vrot.slane %v17612_v43, %v17598_v0  ;;  %5580 = vperm.xlu0 %12316, %v17614_v52  }
0x3688   :  { %v10105_v22 = vrot.slane %v17612_v43, %v17599_v57  ;;  %v10109_v37 = vrot.slane %v17612_v43, %v17600_v25  ;;  %v10113_v40 = vrot.slane %v17612_v43, %v14180_v24  ;;  %v9555_v55 = vrot.slane %v16012_v14, %v12518_v9 }
0x3689   :  { %v9562_v12 = vrot.slane %v16014_v5, %v12518_v9  ;;  %v9569_v23 = vrot.slane %v16016_v27, %v12518_v9  ;;  %v9576_v20 = vrot.slane %v16018_v59, %v12518_v9  ;;  %v9750_v47 = vrot.slane %v16020_v28, %v12518_v9  ;;  %v17616_v28 = vld [vmem:[#allocation28_spill] sm:$0xff] }
0x368a   :  { %v9757_v63 = vrot.slane %v16022_v11, %v12518_v9  ;;  %v9764_v10 = vrot.slane %v16024_v53, %v12518_v9  ;;  %v9771_v32 = vrot.slane %v16026_v7, %v12518_v9  ;;  %v9935_v4 = vcombine.low %v9906_v36, %v9910_v6  ;;  %5775 = vperm.xlu1 %12317, %v17616_v28   ;;  %v17617_v36 = vld [vmem:[#allocation23_spill] sm:$0xff]  ;;  %v17618_v6 = vld [vmem:[#allocation42_spill] sm:$0xff] }
0x368b   :  { %v9936_v39 = vcombine.low %v9914_v13, %v9918_v44  ;;  %v9937_v41 = vcombine.low %v9922_v19, %v9926_v49  ;;  %v9938_v60 = vcombine.low %v9930_v54, %v9934_v16  ;;  %v10114_v56 = vcombine.low %v10085_v48, %v10089_v29  ;;  %5970 = vperm.xlu0 %12316, %v17617_v36  }
0x368c   :  { %v10115_v2 = vcombine.low %v10093_v31, %v10097_v18  ;;  %v10116_v17 = vcombine.low %v10101_v51, %v10105_v22  ;;  %v10117_v34 = vcombine.low %v10109_v37, %v10113_v40  ;;  %v10280_v14 = vrot.slane %v17615_v46, %v17592_v38  ;;  %v17619_v18 = vld [vmem:[#allocation63_spill] sm:$0xff] }
0x368d   :  { %v10284_v5 = vrot.slane %v17615_v46, %v17594_v62  ;;  %v10288_v27 = vrot.slane %v17615_v46, %v17595_v58  ;;  %v10292_v59 = vrot.slane %v17615_v46, %v17596_v35  ;;  %v10296_v11 = vrot.slane %v17615_v46, %v17598_v0 }
0x368e   :  { %v10300_v53 = vrot.slane %v17615_v46, %v17599_v57  ;;  %v10304_v7 = vrot.slane %v17615_v46, %v17600_v25  ;;  %v10308_v1 = vrot.slane %v17615_v46, %v14180_v24  ;;  %v10475_v13 = vrot.slane %v17618_v6, %v17592_v38  ;;  %6165 = vperm.xlu1 %12317, %v17619_v18  }
0x368f   :  { %v10479_v44 = vrot.slane %v17618_v6, %v17594_v62  ;;  %v10483_v61 = vrot.slane %v17618_v6, %v17595_v58  ;;  %v10487_v19 = vrot.slane %v17618_v6, %v17596_v35  ;;  %v10491_v49 = vrot.slane %v17618_v6, %v17598_v0  ;;  %6344 = vperm.xlu0 %12316, %v17620_v26  }
0x3690   :  { %v10495_v54 = vrot.slane %v17618_v6, %v17599_v57  ;;  %v10499_v16 = vrot.slane %v17618_v6, %v17600_v25  ;;  %v10503_v3 = vrot.slane %v17618_v6, %v14180_v24  ;;  %v9945_v43 = vrot.slane %v9935_v4, %v12518_v9 }
0x3691   :  { %v9952_v48 = vrot.slane %v9936_v39, %v12518_v9  ;;  %v9959_v29 = vrot.slane %v9937_v41, %v12518_v9  ;;  %v9966_v31 = vrot.slane %v9938_v60, %v12518_v9  ;;  %v10124_v51 = vrot.slane %v10114_v56, %v12518_v9 }
0x3692   :  { %v10131_v22 = vrot.slane %v10115_v2, %v12518_v9  ;;  %v10138_v37 = vrot.slane %v10116_v17, %v12518_v9  ;;  %v10145_v40 = vrot.slane %v10117_v34, %v12518_v9  ;;  %v10309_v52 = vcombine.low %v10280_v14, %v10284_v5  ;;  %6539 = vperm.xlu1 %12317, %v17621_v21  }
0x3693   :  { %v10310_v4 = vcombine.low %v10288_v27, %v10292_v59  ;;  %v10311_v46 = vcombine.low %v10296_v11, %v10300_v53  ;;  %v10312_v39 = vcombine.low %v10304_v7, %v10308_v1  ;;  %v10504_v28 = vcombine.low %v10475_v13, %v10479_v44  ;;  %6734 = vperm.xlu0 %12316, %v17622_v45   ;;  %v17625_v13 = vld [vmem:[#allocation15_spill] sm:$0xff] }
0x3694   :  { %v10505_v41 = vcombine.low %v10483_v61, %v10487_v19  ;;  %v10506_v36 = vcombine.low %v10491_v49, %v10495_v54  ;;  %v10507_v60 = vcombine.low %v10499_v16, %v10503_v3  ;;  %v9577_v6 = vcombine.low %v9555_v55, %v9562_v12 }
0x3695   :  { %v9578_v18 = vcombine.low %v9569_v23, %v9576_v20  ;;  %v9772_v8 = vcombine.low %v9750_v47, %v9757_v63  ;;  %v9773_v56 = vcombine.low %v9764_v10, %v9771_v32  ;;  %v9967_v2 = vcombine.low %v9945_v43, %v9952_v48  ;;  %v17623_v20 = vld [vmem:[#allocation43_spill] sm:$0xff]  ;;  %v17624_v32 = vld [vmem:[#allocation6_spill] sm:$0xff] }
0x3696   :  { %v9968_v17 = vcombine.low %v9959_v29, %v9966_v31  ;;  %v10146_v15 = vcombine.low %v10124_v51, %v10131_v22  ;;  %v10147_v34 = vcombine.low %v10138_v37, %v10145_v40  ;;  %v10319_v14 = vrot.slane %v10309_v52, %v12518_v9  ;;  %6929 = vperm.xlu1 %12317, %v17624_v32   ;;  %v17626_v22 = vld [vmem:[#allocation14_spill] sm:$0xff]  ;;  %v17627_v52 = vld [vmem:[#allocation19_spill] sm:$0xff]  ;;  %v17631_v32 = vld [vmem:[#allocation45_spill] sm:$0xff] }
0x3697   :  { %v10326_v5 = vrot.slane %v10310_v4, %v12518_v9  ;;  %v10333_v27 = vrot.slane %v10311_v46, %v12518_v9  ;;  %v10340_v59 = vrot.slane %v10312_v39, %v12518_v9  ;;  %v10514_v55 = vrot.slane %v10504_v28, %v12518_v9  ;;  %7108 = vperm.xlu0 %12316, %v17625_v13   ;;  %v17628_v4 = vld [vmem:[#allocation44_spill] sm:$0xff] }
0x3698   :  { %v10521_v12 = vrot.slane %v10505_v41, %v12518_v9  ;;  %v10528_v21 = vrot.slane %v10506_v36, %v12518_v9  ;;  %v10535_v23 = vrot.slane %v10507_v60, %v12518_v9  ;;  %v10670_v47 = vrot.slane %v17623_v20, %v17592_v38 }
0x3699   :  { %v10674_v45 = vrot.slane %v17623_v20, %v17594_v62  ;;  %v10678_v63 = vrot.slane %v17623_v20, %v17595_v58  ;;  %v10682_v10 = vrot.slane %v17623_v20, %v17596_v35  ;;  %v10686_v11 = vrot.slane %v17623_v20, %v17598_v0 }
0x369a   :  { %v10690_v53 = vrot.slane %v17623_v20, %v17599_v57  ;;  %v10694_v7 = vrot.slane %v17623_v20, %v17600_v25  ;;  %v10698_v1 = vrot.slane %v17623_v20, %v14180_v24  ;;  %v9585_v44 = vrot.slane %v9577_v6, %v12518_v9  ;;  %7303 = vperm.xlu1 %12317, %v17626_v22  }
0x369b   :  { %v9592_v61 = vrot.slane %v9578_v18, %v12518_v9  ;;  %v9780_v19 = vrot.slane %v9772_v8, %v12518_v9  ;;  %v9787_v49 = vrot.slane %v9773_v56, %v12518_v9  ;;  %v9975_v54 = vrot.slane %v9967_v2, %v12518_v9  ;;  %7498 = vperm.xlu0 %12316, %v17627_v52  }
0x369c   :  { %v9982_v16 = vrot.slane %v9968_v17, %v12518_v9  ;;  %v10154_v3 = vrot.slane %v10146_v15, %v12518_v9  ;;  %v10161_v43 = vrot.slane %v10147_v34, %v12518_v9  ;;  %v10341_v48 = vcombine.low %v10319_v14, %v10326_v5  ;;  %v17629_v34 = vld [vmem:[#allocation18_spill] sm:$0xff] }
0x369d   :  { %v10342_v29 = vcombine.low %v10333_v27, %v10340_v59  ;;  %v10536_v31 = vcombine.low %v10514_v55, %v10521_v12  ;;  %v10537_v51 = vcombine.low %v10528_v21, %v10535_v23  ;;  %v10699_v37 = vcombine.low %v10670_v47, %v10674_v45  ;;  %v17630_v55 = vld [vmem:[#allocation71_spill] sm:$0xff] }
0x369e   :  { %v10700_v40 = vcombine.low %v10678_v63, %v10682_v10  ;;  %v10701_v26 = vcombine.low %v10686_v11, %v10690_v53  ;;  %v10702_v8 = vcombine.low %v10694_v7, %v10698_v1  ;;  %v10849_v46 = vrot.slane %v17628_v4, %v17592_v38  ;;  %7693 = vperm.xlu1 %12317, %v17629_v34  }
0x369f   :  { %v10853_v15 = vrot.slane %v17628_v4, %v17594_v62  ;;  %v10857_v39 = vrot.slane %v17628_v4, %v17595_v58  ;;  %v10861_v28 = vrot.slane %v17628_v4, %v17596_v35  ;;  %v10865_v41 = vrot.slane %v17628_v4, %v17598_v0  ;;  %7872 = vperm.xlu0 %12316, %v17630_v55  }
0x36a0   :  { %v10869_v36 = vrot.slane %v17628_v4, %v17599_v57  ;;  %v10873_v60 = vrot.slane %v17628_v4, %v17600_v25  ;;  %v10877_v6 = vrot.slane %v17628_v4, %v14180_v24  ;;  %v16178_v18 = vcombine.low %v9585_v44, %v9592_v61 }
0x36a1   :  { %v16180_v56 = vcombine.low %v9780_v19, %v9787_v49  ;;  %v16182_v2 = vcombine.low %v9975_v54, %v9982_v16  ;;  %v16184_v17 = vcombine.low %v10154_v3, %v10161_v43  ;;  %v10349_v14 = vrot.slane %v10341_v48, %v12518_v9  ;;  %v17632_v49 = vld [vmem:[#allocation46_spill] sm:$0xff] }
0x36a2   :  { %v10356_v5 = vrot.slane %v10342_v29, %v12518_v9  ;;  %v10544_v27 = vrot.slane %v10536_v31, %v12518_v9  ;;  %v10551_v59 = vrot.slane %v10537_v51, %v12518_v9  ;;  %v10709_v12 = vrot.slane %v10699_v37, %v12518_v9  ;;  %8067 = vperm.xlu1 %12317, %v15994_v42  }
0x36a3   :  { %v10716_v21 = vrot.slane %v10700_v40, %v12518_v9  ;;  %v10723_v23 = vrot.slane %v10701_v26, %v12518_v9  ;;  %v10730_v20 = vrot.slane %v10702_v8, %v12518_v9  ;;  %v10878_v47 = vcombine.low %v10849_v46, %v10853_v15  ;;  %8262 = vperm.xlu0 %12316, %v15996_v33  }
0x36a4   :  { %v10879_v45 = vcombine.low %v10857_v39, %v10861_v28  ;;  %v10880_v63 = vcombine.low %v10865_v41, %v10869_v36  ;;  %v10881_v10 = vcombine.low %v10873_v60, %v10877_v6  ;;  %v11044_v11 = vrot.slane %v17631_v32, %v17592_v38 }
0x36a5   :  { %v11048_v53 = vrot.slane %v17631_v32, %v17594_v62  ;;  %v11052_v7 = vrot.slane %v17631_v32, %v17595_v58  ;;  %v11056_v1 = vrot.slane %v17631_v32, %v17596_v35  ;;  %v11060_v13 = vrot.slane %v17631_v32, %v17598_v0 }
0x36a6   :  { %v11064_v44 = vrot.slane %v17631_v32, %v17599_v57  ;;  %v11068_v61 = vrot.slane %v17631_v32, %v17600_v25  ;;  %v11072_v19 = vrot.slane %v17631_v32, %v14180_v24  ;;  %v11239_v54 = vrot.slane %v17632_v49, %v17592_v38  ;;  %8457 = vperm.xlu1 %12317, %v15998_v30   ;;  %v17633_v30 = vld [vmem:[#allocation62_spill] sm:$0xff] }
0x36a7   :  { %v11243_v42 = vrot.slane %v17632_v49, %v17594_v62  ;;  %v11247_v16 = vrot.slane %v17632_v49, %v17595_v58  ;;  %v11251_v3 = vrot.slane %v17632_v49, %v17596_v35  ;;  %v11255_v43 = vrot.slane %v17632_v49, %v17598_v0  ;;  %8636 = vperm.xlu0 %12316, %v16000_v50  }
0x36a8   :  { %v11259_v48 = vrot.slane %v17632_v49, %v17599_v57  ;;  %v11263_v33 = vrot.slane %v17632_v49, %v17600_v25  ;;  %v11267_v29 = vrot.slane %v17632_v49, %v14180_v24  ;;  %v16230_v31 = vcombine.low %v10349_v14, %v10356_v5  ;;  %v17634_v5 = vld [vmem:[#allocation72_spill] sm:$0xff] }
0x36a9   :  { %v16232_v51 = vcombine.low %v10544_v27, %v10551_v59  ;;  %v16234_v22 = vcombine.low %v10709_v12, %v10716_v21  ;;  %v16236_v37 = vcombine.low %v10723_v23, %v10730_v20  ;;  %v10888_v40 = vrot.slane %v10878_v47, %v12518_v9  ;;  %v17635_v21 = vld [vmem:[#allocation75_spill] sm:$0xff] }
0x36aa   :  { %v10895_v26 = vrot.slane %v10879_v45, %v12518_v9  ;;  %v10902_v8 = vrot.slane %v10880_v63, %v12518_v9  ;;  %v10909_v52 = vrot.slane %v10881_v10, %v12518_v9  ;;  %v11073_v4 = vcombine.low %v11044_v11, %v11048_v53  ;;  %8831 = vperm.xlu1 %12317, %v17634_v5   ;;  %v11803_v63 = vpop.xlane.xlu0 %11802 }
0x36ab   :  { %v11074_v46 = vcombine.low %v11052_v7, %v11056_v1  ;;  %v11075_v15 = vcombine.low %v11060_v13, %v11064_v44  ;;  %v11076_v39 = vcombine.low %v11068_v61, %v11072_v19  ;;  %v11268_v28 = vcombine.low %v11239_v54, %v11243_v42  ;;  %9026 = vperm.xlu0 %12316, %v17635_v21   ;;  %v11608_v7 = vpop.xlane.xlu1 %11607  ;;  %v17636_v19 = vld [vmem:[#allocation74_spill] sm:$0xff] }
0x36ac   :  { %v11269_v41 = vcombine.low %v11247_v16, %v11251_v3  ;;  %v11270_v36 = vcombine.low %v11255_v43, %v11259_v48  ;;  %v11271_v60 = vcombine.low %v11263_v33, %v11267_v29  ;;  %v11434_v6 = vrot.slane %v17633_v30, %v17592_v38  ;;  %v17637_v3 = vld [vmem:[#allocation64_spill] sm:$0xff] }
0x36ad   :  { %v11438_v34 = vrot.slane %v17633_v30, %v17594_v62  ;;  %v11442_v14 = vrot.slane %v17633_v30, %v17595_v58  ;;  %v11446_v50 = vrot.slane %v17633_v30, %v17596_v35  ;;  %v11450_v27 = vrot.slane %v17633_v30, %v17598_v0 }
0x36ae   :  { %v11454_v59 = vrot.slane %v17633_v30, %v17599_v57  ;;  %v11458_v55 = vrot.slane %v17633_v30, %v17600_v25  ;;  %v11462_v12 = vrot.slane %v17633_v30, %v14180_v24  ;;  %v10739_v23 = vrot.slane %v16234_v22, %v12518_v9  ;;  %9221 = vperm.xlu1 %12317, %v17636_v19  }
0x36af   :  { %v10746_v20 = vrot.slane %v16236_v37, %v12518_v9  ;;  %v16266_v47 = vcombine.low %v10888_v40, %v10895_v26  ;;  %v16268_v45 = vcombine.low %v10902_v8, %v10909_v52  ;;  %v11083_v10 = vrot.slane %v11073_v4, %v12518_v9  ;;  %9400 = vperm.xlu0 %12316, %v17637_v3  }
0x36b0   :  { %v11090_v32 = vrot.slane %v11074_v46, %v12518_v9  ;;  %v11097_v11 = vrot.slane %v11075_v15, %v12518_v9  ;;  %v11104_v53 = vrot.slane %v11076_v39, %v12518_v9  ;;  %v11278_v1 = vrot.slane %v11268_v28, %v12518_v9 }
0x36b1   :  { %v11285_v13 = vrot.slane %v11269_v41, %v12518_v9  ;;  %v11292_v44 = vrot.slane %v11270_v36, %v12518_v9  ;;  %v11299_v61 = vrot.slane %v11271_v60, %v12518_v9  ;;  %v11463_v49 = vcombine.low %v11434_v6, %v11438_v34 }
0x36b2   :  { %v11464_v54 = vcombine.low %v11442_v14, %v11446_v50  ;;  %v11465_v42 = vcombine.low %v11450_v27, %v11454_v59  ;;  %v11466_v16 = vcombine.low %v11458_v55, %v11462_v12  ;;  %v11808_v43 = vrot.slane %v11803_v63, %v17592_v38  ;;  %9595 = vperm.xlu1 %12317, %v16178_v18  }
0x36b3   :  { %v11812_v48 = vrot.slane %v11803_v63, %v17594_v62  ;;  %v11816_v33 = vrot.slane %v11803_v63, %v17595_v58  ;;  %v11820_v29 = vrot.slane %v11803_v63, %v17596_v35  ;;  %v11613_v40 = vrot.slane %v11608_v7, %v17592_v38  ;;  %9790 = vperm.xlu0 %12316, %v16180_v56  }
0x36b4   :  { %v11617_v26 = vrot.slane %v11608_v7, %v17594_v62  ;;  %v11621_v8 = vrot.slane %v11608_v7, %v17595_v58  ;;  %v11625_v52 = vrot.slane %v11608_v7, %v17596_v35  ;;  %v11629_v4 = vrot.slane %v11608_v7, %v17598_v0 }
0x36b5   :  { %v11633_v46 = vrot.slane %v11608_v7, %v17599_v57  ;;  %v11637_v15 = vrot.slane %v11608_v7, %v17600_v25  ;;  %v11641_v39 = vrot.slane %v11608_v7, %v14180_v24  ;;  %v11824_v28 = vrot.slane %v11803_v63, %v17598_v0 }
0x36b6   :  { %v11828_v41 = vrot.slane %v11803_v63, %v17599_v57  ;;  %v11832_v36 = vrot.slane %v11803_v63, %v17600_v25  ;;  %v11836_v60 = vrot.slane %v11803_v63, %v14180_v24  ;;  %v11105_v30 = vcombine.low %v11083_v10, %v11090_v32  ;;  %9985 = vperm.xlu1 %12317, %v16182_v2  }
0x36b7   :  { %v11106_v6 = vcombine.low %v11097_v11, %v11104_v53  ;;  %v11300_v34 = vcombine.low %v11278_v1, %v11285_v13  ;;  %v11301_v14 = vcombine.low %v11292_v44, %v11299_v61  ;;  %v11473_v50 = vrot.slane %v11463_v49, %v12518_v9  ;;  %10164 = vperm.xlu0 %12316, %v16184_v17  }
0x36b8   :  { %v11480_v5 = vrot.slane %v11464_v54, %v12518_v9  ;;  %v11487_v18 = vrot.slane %v11465_v42, %v12518_v9  ;;  %v11494_v27 = vrot.slane %v11466_v16, %v12518_v9  ;;  %v11642_v59 = vcombine.low %v11613_v40, %v11617_v26 }
0x36b9   :  { %v11643_v55 = vcombine.low %v11621_v8, %v11625_v52  ;;  %v11644_v12 = vcombine.low %v11629_v4, %v11633_v46  ;;  %v11645_v21 = vcombine.low %v11637_v15, %v11641_v39  ;;  %v11837_v63 = vcombine.low %v11808_v43, %v11812_v48 }
0x36ba   :  { %v11838_v56 = vcombine.low %v11816_v33, %v11820_v29  ;;  %v11839_v10 = vcombine.low %v11824_v28, %v11828_v41  ;;  %v11840_v32 = vcombine.low %v11832_v36, %v11836_v60  ;;  %v10918_v11 = vrot.slane %v16266_v47, %v12518_v9  ;;  %10359 = vperm.xlu1 %12317, %v16230_v31  }
0x36bb   :  { %v10925_v53 = vrot.slane %v16268_v45, %v12518_v9  ;;  %v11113_v7 = vrot.slane %v11105_v30, %v12518_v9  ;;  %v11120_v1 = vrot.slane %v11106_v6, %v12518_v9  ;;  %v11308_v13 = vrot.slane %v11300_v34, %v12518_v9  ;;  %10554 = vperm.xlu0 %12316, %v16232_v51   ;;  %v11998_v40 = vpop.xlane.xlu0 %11997 }
0x36bc   :  { %v11315_v2 = vrot.slane %v11301_v14, %v12518_v9  ;;  %v11495_v44 = vcombine.low %v11473_v50, %v11480_v5  ;;  %v11496_v61 = vcombine.low %v11487_v18, %v11494_v27  ;;  %v11652_v19 = vrot.slane %v11642_v59, %v12518_v9 }
0x36bd   :  { %v11659_v17 = vrot.slane %v11643_v55, %v12518_v9  ;;  %v11666_v49 = vrot.slane %v11644_v12, %v12518_v9  ;;  %v11673_v47 = vrot.slane %v11645_v21, %v12518_v9  ;;  %v11847_v45 = vrot.slane %v11837_v63, %v12518_v9 }
0x36be   :  { %v11854_v54 = vrot.slane %v11838_v56, %v12518_v9  ;;  %v11861_v42 = vrot.slane %v11839_v10, %v12518_v9  ;;  %v11868_v16 = vrot.slane %v11840_v32, %v12518_v9  ;;  %v10747_v3 = vcombine.low %v10739_v23, %v10746_v20 }
0x36bf   :  { %v10926_v43 = vcombine.low %v10918_v11, %v10925_v53  ;;  %v11121_v48 = vcombine.low %v11113_v7, %v11120_v1  ;;  %v11316_v31 = vcombine.low %v11308_v13, %v11315_v2  ;;  %v11674_v33 = vcombine.low %v11652_v19, %v11659_v17 }
0x36c0   :  { %v11675_v29 = vcombine.low %v11666_v49, %v11673_v47  ;;  %10749 = vperm.xlu1 %12317, %v10747_v3   ;;  %v11503_v26 = vrot.slane %v11495_v44, %v12518_v9  ;;  %v11510_v8 = vrot.slane %v11496_v61, %v12518_v9  ;;  %v11869_v52 = vcombine.low %v11847_v45, %v11854_v54  ;;  %v17639_v47 = vld [vmem:[#allocation2_spill] sm:$0xff] }
0x36c1   :  { %v11870_v51 = vcombine.low %v11861_v42, %v11868_v16  ;;  %10928 = vperm.xlu0 %12316, %v10926_v43   ;;  %v12003_v37 = vrot.slane %v11998_v40, %v17592_v38  ;;  %v12007_v4 = vrot.slane %v11998_v40, %v17594_v62  ;;  %v12011_v22 = vrot.slane %v11998_v40, %v17595_v58 }
0x36c2   :  { %v12015_v23 = vrot.slane %v11998_v40, %v17596_v35  ;;  %v12019_v20 = vrot.slane %v11998_v40, %v17598_v0  ;;  %v12023_v46 = vrot.slane %v11998_v40, %v17599_v57  ;;  %v12027_v15 = vrot.slane %v11998_v40, %v17600_v25 }
0x36c3   :  { %v12031_v39 = vrot.slane %v11998_v40, %v14180_v24  ;;  %v11682_v28 = vrot.slane %v11674_v33, %v12518_v9  ;;  %v11689_v41 = vrot.slane %v11675_v29, %v12518_v9  ;;  %v12032_v36 = vcombine.low %v12003_v37, %v12007_v4  ;;  %v16349_v56 = vpop.permute.xlu0 %566 }
0x36c4   :  { %v12033_v60 = vcombine.low %v12011_v22, %v12015_v23  ;;  %11123 = vperm.xlu1 %12317, %v11121_v48   ;;  %v12034_v30 = vcombine.low %v12019_v20, %v12023_v46  ;;  %v11511_v34 = vcombine.low %v11503_v26, %v11510_v8  ;;  %v11877_v5 = vrot.slane %v11869_v52, %v12518_v9 }
0x36c5   :  { %v12035_v6 = vcombine.low %v12027_v15, %v12031_v39  ;;  %11318 = vperm.xlu0 %12316, %v11316_v31   ;;  %v12042_v14 = vrot.slane %v12032_v36, %v12518_v9  ;;  %v11884_v18 = vrot.slane %v11870_v51, %v12518_v9  ;;  %v17638_v55 = vlaneseq }
0x36c6   :  { %v12049_v50 = vrot.slane %v12033_v60, %v12518_v9  ;;  %v12056_v27 = vrot.slane %v12034_v30, %v12518_v9  ;;  %v11690_v21 = vcombine.low %v11682_v28, %v11689_v41  ;;  %v17640_v31 = vmov 0 }
0x36c7   :  { %v12063_v59 = vrot.slane %v12035_v6, %v12518_v9  ;;  %v16347_v12 = vand.u32 127, %v17638_v55  ;;  %v11885_v32 = vcombine.low %v11877_v5, %v11884_v18  ;;  %v16356_v2 = vpop.permute.xlu0 %765  ;;  %vm16379_vm1 = vcmp.lt.s32.totalorder %v17638_v55, 8 }
0x36c8   :  { %v12064_v63 = vcombine.low %v12042_v14, %v12049_v50  ;;  %11513 = vperm.xlu1 %12317, %v11511_v34   ;;  %v17641_v31 = vsel %vm16379_vm1, 4294967295, %v17640_v31  ;;  %vm16390_vm2 = vcmp.ge.s32.totalorder %v17638_v55, 8  ;;  %vm16395_vm3 = vcmp.lt.s32.totalorder %v17638_v55, 16 }
0x36c9   :  { %v12065_v10 = vcombine.low %v12056_v27, %v12063_v59  ;;  %11692 = vperm.xlu0 %12316, %v11690_v21   ;;  %v568_v7 = vadd.s32 4294967280, %v16347_v12  ;;  %v767_v1 = vadd.s32 4294967272, %v16347_v12  ;;  %v950_v13 = vadd.s32 4294967264, %v16347_v12 }
0x36ca   :  { %v12072_v11 = vrot.slane %v12064_v63, %v12518_v9  ;;  %v1149_v44 = vadd.s32 4294967256, %v16347_v12  ;;  %v369_v61 = vadd.s32 4294967288, %v16347_v12  ;;  %v1547_v19 = vadd.s32 4294967240, %v16347_v12 }
0x36cb   :  { %v12079_v53 = vrot.slane %v12065_v10, %v12518_v9  ;;  %v1348_v17 = vadd.s32 4294967248, %v16347_v12  ;;  %v16363_v45 = vsub.s32 %v568_v7, %v17639_v47  ;;  %v16366_v54 = vsub.s32 %v767_v1, %v17639_v47  ;;  %v12193_v3 = vpop.xlane.xlu1 %12192 }
0x36cc   :  { %11887 = vperm.xlu1 %12317, %v11885_v32   ;;  %v16369_v42 = vsub.s32 %v950_v13, %v17639_v47  ;;  %v1730_v16 = vadd.s32 4294967232, %v16347_v12  ;;  %v16376_v48 = vsub.s32 %v16347_v12, %v17639_v47  ;;  %v16384_v33 = vsub.s32 %v1149_v44, %v17639_v47 }
0x36cd   :  { %v12080_v49 = vcombine.low %v12072_v11, %v12079_v53  ;;  %v16387_v29 = vsub.s32 %v369_v61, %v17639_v47  ;;  %v16400_v8 = vsub.s32 %v1547_v19, %v17639_v47  ;;  %v16403_v52 = vsub.s32 %v1348_v17, %v17639_v47 }
0x36ce   :  { %v16372_v43 = vpop.permute.xlu0 %948  ;;  %v12198_v51 = vrot.slane %v12193_v3, %v17592_v38  ;;  %v12202_v37 = vrot.slane %v12193_v3, %v17594_v62  ;;  %vm16408_vm4 = vcmp.ge.s32.totalorder %v17638_v55, 16  ;;  %vm16413_vm5 = vcmp.lt.s32.totalorder %v17638_v55, 24 }
0x36cf   :  { %v12206_v23 = vrot.slane %v12193_v3, %v17595_v58  ;;  %v12210_v20 = vrot.slane %v12193_v3, %v17596_v35  ;;  %v12214_v46 = vrot.slane %v12193_v3, %v17598_v0  ;;  %v12218_v38 = vrot.slane %v12193_v3, %v17599_v57  ;;  %v167_v28 = vpop.permute.xlu1 %166 }
0x36d0   :  { %12082 = vperm.xlu1 %12317, %v12080_v49   ;;  %vm16422_vm6 = vcmp.ge.s32.totalorder %v17638_v55, 24  ;;  %vm16427_vm7 = vcmp.lt.s32.totalorder %v17638_v55, 32  ;;  %v16432_v39 = vsub.s32 %v1730_v16, %v17639_v47  ;;  %v12222_v58 = vrot.slane %v12193_v3, %v17600_v25 }
0x36d1   :  { %v12226_v35 = vrot.slane %v12193_v3, %v14180_v24  ;;  %v12227_v0 = vcombine.low %v12198_v51, %v12202_v37  ;;  %vm16437_vm8 = vcmp.ge.s32.totalorder %v17638_v55, 32  ;;  %vm16442_vm9 = vcmp.lt.s32.totalorder %v17638_v55, 40 }
0x36d2   :  { %v1148_v57 = vpop.permute.xlu0 %1147  ;;  %v12228_v60 = vcombine.low %v12206_v23, %v12210_v20  ;;  %v12229_v30 = vcombine.low %v12214_v46, %v12218_v38  ;;  %v1929_v6 = vadd.s32 4294967224, %v16347_v12  ;;  %v2128_v25 = vadd.s32 4294967216, %v16347_v12 }
0x36d3   :  { %v173_v24 = vrot.slane %v167_v28, %v16376_v48  ;;  %vm16450_vm10 = vcmp.ge.s32.totalorder %v17638_v55, 40  ;;  %vm16455_vm11 = vcmp.lt.s32.totalorder %v17638_v55, 48  ;;  %v12230_v50 = vcombine.low %v12222_v58, %v12226_v35  ;;  %v368_v1 = vpop.permute.xlu1 %367 }
0x36d4   :  { %v572_v5 = vrot.slane %v16349_v56, %v16363_v45  ;;  %vm16462_vm12 = vcmp.ge.s32.totalorder %v17638_v55, 48  ;;  %vm16467_vm13 = vcmp.lt.s32.totalorder %v17638_v55, 56  ;;  %v12237_v59 = vrot.slane %v12227_v0, %v12518_v9 }
0x36d5   :  { %v12244_v21 = vrot.slane %v12228_v60, %v12518_v9  ;;  %v12251_v63 = vrot.slane %v12229_v30, %v12518_v9  ;;  %v771_v10 = vrot.slane %v16356_v2, %v16366_v54  ;;  %v180_v56 = vrot.slane %v173_v24, %v12518_v9 }
0x36d6   :  { %vm16478_vm14 = vcmp.ge.s32.totalorder %v17638_v55, 56  ;;  %v17666_v32 = vmov 0  ;;  %vm16483_vm15 = vcmp.lt.s32.totalorder %v17638_v55, 64  ;;  %v12258_v53 = vrot.slane %v12230_v50, %v12518_v9  ;;  %v1546_v13 = vpop.permute.xlu0 %1545 }
0x36d7   :  { %v17667_v32 = vsel %vm16478_vm14, 4294967295, %v17666_v32  ;;  %v954_v7 = vrot.slane %v16372_v43, %v16369_v42  ;;  %v12259_v2 = vcombine.low %v12237_v59, %v12244_v21  ;;  %v16491_v44 = vsub.s32 %v1929_v6, %v17639_v47 }
0x36d8   :  { %v16494_v61 = vsub.s32 %v2128_v25, %v17639_v47  ;;  %v187_v19 = vrot.slane %v180_v56, %v12518_v9  ;;  %v1153_v17 = vrot.slane %v1148_v57, %v16384_v33  ;;  %v373_v49 = vrot.slane %v368_v1, %v16387_v29 }
0x36d9   :  { %vm16500_vm0 = vcmp.ge.s32.totalorder %v17638_v55, 64  ;;  %v17670_v16 = vmov 0  ;;  %v579_v3 = vrot.slane %v572_v5, %v12518_v9  ;;  %v12260_v43 = vcombine.low %v12251_v63, %v12258_v53  ;;  %v1347_v0 = vpop.permute.xlu1 %1346 }
0x36da   :  { %v17671_v16 = vsel %vm16500_vm0, 4294967295, %v17670_v16  ;;  %v12267_v51 = vrot.slane %v12259_v2, %v12518_v9  ;;  %v2327_v37 = vadd.s32 4294967208, %v16347_v12  ;;  %v778_v23 = vrot.slane %v771_v10, %v12518_v9  ;;  %193 = vst.msk [vmem:[%s17190_s1] sm:$0x1] %vm16379_vm1, %v187_v19  ;;  %vm16521_vm0 = vmand %vm16390_vm2, %vm16395_vm3  ;;  %v1729_v57 = vpop.permute.xlu0 %1728 }
0x36db   :  { %v380_v20 = vrot.slane %v373_v49, %v12518_v9  ;;  %v1551_v46 = vrot.slane %v1546_v13, %v16400_v8  ;;  %v2510_v38 = vadd.s32 4294967200, %v16347_v12  ;;  %v961_v58 = vrot.slane %v954_v7, %v12518_v9  ;;  %vm16541_vm2 = vmand %vm16408_vm4, %vm16413_vm5 }
0x36dc   :  { %vm16526_vm14 = vcmp.lt.s32.totalorder %v17638_v55, 72  ;;  %v12274_v60 = vrot.slane %v12260_v43, %v12518_v9  ;;  %vm16532_vm1 = vcmp.ge.s32.totalorder %v17638_v55, 72  ;;  %v1160_v40 = vrot.slane %v1153_v17, %v12518_v9  ;;  %vm16553_vm3 = vmand %vm16422_vm6, %vm16427_vm7 }
0x36dd   :  { %v387_v6 = vrot.slane %v380_v20, %v12518_v9  ;;  %v1352_v25 = vrot.slane %v1347_v0, %v16403_v52  ;;  %v1734_v24 = vrot.slane %v1729_v57, %v16432_v39  ;;  %v586_v50 = vrot.slane %v579_v3, %v12518_v9  ;;  %vm16576_vm5 = vmand %vm16437_vm8, %vm16442_vm9  ;;  %v1928_v53 = vpop.permute.xlu1 %1927 }
0x36de   :  { %v12275_v4 = vcombine.low %v12267_v51, %v12274_v60  ;;  %vm16558_vm4 = vcmp.lt.s32.totalorder %v17638_v55, 80  ;;  %v16563_v59 = vsub.s32 %v2327_v37, %v17639_v47  ;;  %v785_v21 = vrot.slane %v778_v23, %v12518_v9  ;;  %vm16594_vm6 = vmand %vm16450_vm10, %vm16455_vm11  ;;  %v2127_v7 = vpop.permute.xlu0 %2126 }
0x36df   :  { %392 = vst.msk [vmem:[%s17190_s1] sm:$0x1] %vm16521_vm0, %v387_v6  ;;  %v1558_v62 = vrot.slane %v1551_v46, %v12518_v9  ;;  %v1359_v63 = vrot.slane %v1352_v25, %v12518_v9  ;;  %v16582_v10 = vsub.s32 %v2510_v38, %v17639_v47  ;;  %v968_v56 = vrot.slane %v961_v58, %v12518_v9  ;;  %vm16611_vm7 = vmand %vm16462_vm12, %vm16467_vm13 }
0x36e0   :  { %591 = vst.msk [vmem:[%s17190_s1] sm:$0x1] %vm16541_vm2, %v586_v50  ;;  %v1741_v36 = vrot.slane %v1734_v24, %v12518_v9  ;;  %12277 = vperm.xlu0 %12316, %v12275_v4   ;;  %v2709_v1 = vadd.s32 4294967192, %v16347_v12  ;;  %v2908_v13 = vadd.s32 4294967184, %v16347_v12  ;;  %v1167_v2 = vrot.slane %v1160_v40, %v12518_v9 }
0x36e1   :  { %790 = vst.msk [vmem:[%s17190_s1] sm:$0x1] %vm16553_vm3, %v785_v21  ;;  %v1366_v14 = vrot.slane %v1359_v63, %v12518_v9  ;;  %v1933_v19 = vrot.slane %v1928_v53, %v16491_v44  ;;  %v2132_v17 = vrot.slane %v2127_v7, %v16494_v61  ;;  %vm17690_vm8 = vnez %v17667_v32  ;;  %v2326_v20 = vpop.permute.xlu1 %2325 }
0x36e2   :  { %973 = vst.msk [vmem:[%s17190_s1] sm:$0x1] %vm16576_vm5, %v968_v56  ;;  %vm16627_vm9 = vmand %vm17690_vm8, %vm16483_vm15  ;;  %vm16632_vm10 = vcmp.ge.s32.totalorder %v17638_v55, 80  ;;  %vm16637_vm11 = vcmp.lt.s32.totalorder %v17638_v55, 88  ;;  %vm16642_vm12 = vcmp.ge.s32.totalorder %v17638_v55, 88  ;;  %v1565_v32 = vrot.slane %v1558_v62, %v12518_v9  ;;  %v2509_v46 = vpop.permute.xlu0 %2508 }
0x36e3   :  { %1172 = vst.msk [vmem:[%s17190_s1] sm:$0x1] %vm16594_vm6, %v1167_v2  ;;  %vm17699_vm13 = vnez %v17671_v16  ;;  %v17700_v11 = vmov 0  ;;  %v1940_v43 = vrot.slane %v1933_v19, %v12518_v9  ;;  %v2139_v51 = vrot.slane %v2132_v17, %v12518_v9 }
0x36e4   :  { %vm16656_vm15 = vmand %vm17699_vm13, %vm16526_vm14  ;;  %vm16663_vm8 = vcmp.lt.s32.totalorder %v17638_v55, 96  ;;  %1371 = vst.msk [vmem:[%s17190_s1] sm:$0x1] %vm16611_vm7, %v1366_v14  ;;  %v1748_v16 = vrot.slane %v1741_v36, %v12518_v9  ;;  %v17704_v23 = vmov 0  ;;  %v16682_v38 = vsub.s32 %v2709_v1, %v17639_v47 }
0x36e5   :  { %v17701_v11 = vsel %vm16656_vm15, 4294967295, %v17700_v11  ;;  %vm16677_vm14 = vmand %vm16532_vm1, %vm16558_vm4  ;;  %v16685_v58 = vsub.s32 %v2908_v13, %v17639_v47  ;;  %v3107_v0 = vadd.s32 4294967176, %v16347_v12  ;;  %1570 = vst.msk [vmem:[%s17190_s1] sm:$0x1] %vm16627_vm9, %v1565_v32  ;;  %v1947_v28 = vrot.slane %v1940_v43, %v12518_v9  ;;  %v2708_v4 = vpop.permute.xlu1 %2707 }
0x36e6   :  { %v17705_v23 = vsel %vm16677_vm14, 4294967295, %v17704_v23  ;;  %vm16698_vm1 = vmand %vm16632_vm10, %vm16637_vm11  ;;  %v17706_v57 = vmov 0  ;;  %v2146_v60 = vrot.slane %v2139_v51, %v12518_v9  ;;  %v2331_v12 = vrot.slane %v2326_v20, %v16563_v59  ;;  %1753 = vst.msk [vmem:[%s17190_s1] sm:$0x1] %vm16656_vm15, %v1748_v16  ;;  %v2907_v5 = vpop.permute.xlu0 %2906 }
0x36e7   :  { %v17707_v57 = vsel %vm16698_vm1, 4294967295, %v17706_v57  ;;  %v2514_v30 = vrot.slane %v2509_v46, %v16582_v10  ;;  %vm2530_vm4 = vcmp.ge.s32.totalorder %v17638_v55, 96  ;;  %vm2531_vm13 = vcmp.lt.s32.totalorder %v17638_v55, 104  ;;  %1952 = vst.msk [vmem:[%s17190_s1] sm:$0x1] %vm16677_vm14, %v1947_v28  ;;  %vm16728_vm10 = vmand %vm16642_vm12, %vm16663_vm8 }
0x36e8   :  { %v2338_v40 = vrot.slane %v2331_v12, %v12518_v9  ;;  %2151 = vst.msk [vmem:[%s17190_s1] sm:$0x1] %vm16698_vm1, %v2146_v60  ;;  %v17708_v25 = vmov 0  ;;  %vm16733_vm11 = vcmp.ge.s32.totalorder %v17638_v55, 104  ;;  %vm16738_vm14 = vcmp.lt.s32.totalorder %v17638_v55, 112  ;;  %vm16746_vm12 = vmand %vm2530_vm4, %vm2531_vm13 }
0x36e9   :  { %v2521_v6 = vrot.slane %v2514_v30, %v12518_v9  ;;  %v17709_v25 = vsel %vm16728_vm10, 4294967295, %v17708_v25  ;;  %v16743_v21 = vsub.s32 %v3107_v0, %v17639_v47  ;;  %v2713_v36 = vrot.slane %v2708_v4, %v16682_v38  ;;  %vm16771_vm4 = vmand %vm16733_vm11, %vm16738_vm14  ;;  %v3106_v13 = vpop.permute.xlu1 %3105 }
0x36ea   :  { %v2345_v62 = vrot.slane %v2338_v40, %v12518_v9  ;;  %v2912_v53 = vrot.slane %v2907_v5, %v16685_v58  ;;  %vm2928_vm8 = vcmp.ge.s32.totalorder %v17638_v55, 112  ;;  %vm2929_vm1 = vcmp.lt.s32.totalorder %v17638_v55, 120  ;;  %v3289_v2 = vpop.permute.xlu0 %3288 }
0x36eb   :  { %v2528_v56 = vrot.slane %v2521_v6, %v12518_v9  ;;  %v2720_v47 = vrot.slane %v2713_v36, %v12518_v9  ;;  %vm3127_vm13 = vcmp.ge.s32.totalorder %v17638_v55, 120  ;;  %vm16778_vm15 = vmand %vm2928_vm8, %vm2929_vm1  ;;  %v3111_v27 = vrot.slane %v3106_v13, %v16743_v21 }
0x36ec   :  { %2350 = vst.msk [vmem:[%s17190_s1] sm:$0x1] %vm16728_vm10, %v2345_v62  ;;  %v2919_v7 = vrot.slane %v2912_v53, %v12518_v9  ;;  %vm3128_vm10 = vcmp.lt.s32.totalorder %v17638_v55, 128  ;;  %v3293_v49 = vrot.slane %v3289_v2, %v16376_v48  ;;  %vm17722_vm1 = vnez %v17641_v31 }
0x36ed   :  { %2533 = vst.msk [vmem:[%s17190_s1] sm:$0x1] %vm16746_vm12, %v2528_v56  ;;  %v2727_v14 = vrot.slane %v2720_v47, %v12518_v9  ;;  %v3118_v55 = vrot.slane %v3111_v27, %v12518_v9  ;;  %vm16797_vm14 = vmand %vm3127_vm13, %vm3128_vm10  ;;  %v3484_v43 = vpop.permute.xlu1 %3483  ;;  %vm17723_vm10 = vnez %v17701_v11  ;;  %vm17724_vm11 = vnez %v17705_v23 }
0x36ee   :  { %v2926_v17 = vrot.slane %v2919_v7, %v12518_v9  ;;  %v3300_v3 = vrot.slane %v3293_v49, %v12518_v9  ;;  %v3679_v51 = vpop.permute.xlu0 %3678  ;;  %v3488_v20 = vrot.slane %v3484_v43, %v16387_v29  ;;  %vm17725_vm8 = vnez %v17707_v57 }
0x36ef   :  { %2732 = vst.msk [vmem:[%s17190_s1] sm:$0x1] %vm16771_vm4, %v2727_v14  ;;  %v3125_v37 = vrot.slane %v3118_v55, %v12518_v9  ;;  %v3683_v46 = vrot.slane %v3679_v51, %v16363_v45  ;;  %vm17726_vm13 = vnez %v17709_v25 }
0x36f0   :  { %2931 = vst.msk [vmem:[%s17190_s1] sm:$0x1] %vm16778_vm15, %v2926_v17  ;;  %v3307_v16 = vrot.slane %v3300_v3, %v12518_v9  ;;  %v3495_v0 = vrot.slane %v3488_v20, %v12518_v9 }
0x36f1   :  { %3130 = vst.msk [vmem:[%s17190_s1] sm:$0x1] %vm16797_vm14, %v3125_v37  ;;  %v3690_v28 = vrot.slane %v3683_v46, %v12518_v9  ;;  %v3874_v60 = vpop.permute.xlu1 %3873 }
0x36f2   :  { %3309 = vst.msk [vmem:[%s17190_s1 + $0x1] sm:$0x1] %vm17722_vm1, %v3307_v16  ;;  %v4053_v12 = vpop.permute.xlu0 %4052  ;;  %v3502_v30 = vrot.slane %v3495_v0, %v12518_v9  ;;  %v3878_v6 = vrot.slane %v3874_v60, %v16366_v54 }
0x36f3   :  { %v3697_v40 = vrot.slane %v3690_v28, %v12518_v9  ;;  %v4057_v24 = vrot.slane %v4053_v12, %v16369_v42 }
0x36f4   :  { %3504 = vst.msk [vmem:[%s17190_s1 + $0x1] sm:$0x1] %vm16521_vm0, %v3502_v30  ;;  %v3885_v50 = vrot.slane %v3878_v6, %v12518_v9 }
0x36f5   :  { %v4064_v4 = vrot.slane %v4057_v24, %v12518_v9  ;;  %3699 = vst.msk [vmem:[%s17190_s1 + $0x1] sm:$0x1] %vm16541_vm2, %v3697_v40  ;;  %v4248_v5 = vpop.permute.xlu1 %4247 }
0x36f6   :  { %v4443_v62 = vpop.permute.xlu0 %4442  ;;  %v3892_v56 = vrot.slane %v3885_v50, %v12518_v9  ;;  %v4252_v53 = vrot.slane %v4248_v5, %v16384_v33 }
0x36f7   :  { %v4071_v36 = vrot.slane %v4064_v4, %v12518_v9  ;;  %v4447_v47 = vrot.slane %v4443_v62, %v16403_v52 }
0x36f8   :  { %3894 = vst.msk [vmem:[%s17190_s1 + $0x1] sm:$0x1] %vm16553_vm3, %v3892_v56  ;;  %v4259_v7 = vrot.slane %v4252_v53, %v12518_v9 }
0x36f9   :  { %v4454_v13 = vrot.slane %v4447_v47, %v12518_v9  ;;  %4073 = vst.msk [vmem:[%s17190_s1 + $0x1] sm:$0x1] %vm16576_vm5, %v4071_v36  ;;  %v4638_v2 = vpop.permute.xlu1 %4637 }
0x36fa   :  { %v4817_v14 = vpop.permute.xlu0 %4816  ;;  %v4266_v17 = vrot.slane %v4259_v7, %v12518_v9  ;;  %v4642_v49 = vrot.slane %v4638_v2, %v16400_v8 }
0x36fb   :  { %v4461_v27 = vrot.slane %v4454_v13, %v12518_v9  ;;  %v4821_v55 = vrot.slane %v4817_v14, %v16432_v39 }
0x36fc   :  { %4268 = vst.msk [vmem:[%s17190_s1 + $0x1] sm:$0x1] %vm16594_vm6, %v4266_v17  ;;  %v4649_v3 = vrot.slane %v4642_v49, %v12518_v9 }
0x36fd   :  { %v4828_v43 = vrot.slane %v4821_v55, %v12518_v9  ;;  %4463 = vst.msk [vmem:[%s17190_s1 + $0x1] sm:$0x1] %vm16611_vm7, %v4461_v27  ;;  %v5012_v51 = vpop.permute.xlu1 %5011 }
0x36fe   :  { %v5207_v37 = vpop.permute.xlu0 %5206  ;;  %v4656_v16 = vrot.slane %v4649_v3, %v12518_v9  ;;  %v5016_v46 = vrot.slane %v5012_v51, %v16491_v44 }
0x36ff   :  { %v4835_v20 = vrot.slane %v4828_v43, %v12518_v9  ;;  %v5211_v0 = vrot.slane %v5207_v37, %v16494_v61 }
0x3700   :  { %4658 = vst.msk [vmem:[%s17190_s1 + $0x1] sm:$0x1] %vm16627_vm9, %v4656_v16  ;;  %v5023_v28 = vrot.slane %v5016_v46, %v12518_v9 }
0x3701   :  { %v5218_v60 = vrot.slane %v5211_v0, %v12518_v9  ;;  %4837 = vst.msk [vmem:[%s17190_s1 + $0x1] sm:$0x1] %vm17723_vm10, %v4835_v20  ;;  %v5402_v12 = vpop.permute.xlu1 %5401 }
0x3702   :  { %v5581_v30 = vpop.permute.xlu0 %5580  ;;  %v5030_v40 = vrot.slane %v5023_v28, %v12518_v9  ;;  %v5406_v24 = vrot.slane %v5402_v12, %v16563_v59 }
0x3703   :  { %v5225_v6 = vrot.slane %v5218_v60, %v12518_v9  ;;  %v5585_v50 = vrot.slane %v5581_v30, %v16582_v10 }
0x3704   :  { %5032 = vst.msk [vmem:[%s17190_s1 + $0x1] sm:$0x1] %vm17724_vm11, %v5030_v40  ;;  %v5413_v4 = vrot.slane %v5406_v24, %v12518_v9 }
0x3705   :  { %v5592_v5 = vrot.slane %v5585_v50, %v12518_v9  ;;  %5227 = vst.msk [vmem:[%s17190_s1 + $0x1] sm:$0x1] %vm17725_vm8, %v5225_v6  ;;  %v5776_v62 = vpop.permute.xlu1 %5775 }
0x3706   :  { %v5971_v56 = vpop.permute.xlu0 %5970  ;;  %v5420_v36 = vrot.slane %v5413_v4, %v12518_v9  ;;  %v5780_v47 = vrot.slane %v5776_v62, %v16682_v38 }
0x3707   :  { %v5599_v53 = vrot.slane %v5592_v5, %v12518_v9  ;;  %v5975_v7 = vrot.slane %v5971_v56, %v16685_v58 }
0x3708   :  { %5422 = vst.msk [vmem:[%s17190_s1 + $0x1] sm:$0x1] %vm17726_vm13, %v5420_v36  ;;  %v5787_v13 = vrot.slane %v5780_v47, %v12518_v9 }
0x3709   :  { %v5982_v2 = vrot.slane %v5975_v7, %v12518_v9  ;;  %5601 = vst.msk [vmem:[%s17190_s1 + $0x1] sm:$0x1] %vm16746_vm12, %v5599_v53  ;;  %v6166_v14 = vpop.permute.xlu1 %6165 }
0x370a   :  { %v6345_v17 = vpop.permute.xlu0 %6344  ;;  %v5794_v27 = vrot.slane %v5787_v13, %v12518_v9  ;;  %v6170_v55 = vrot.slane %v6166_v14, %v16743_v21 }
0x370b   :  { %v5989_v49 = vrot.slane %v5982_v2, %v12518_v9  ;;  %v6349_v3 = vrot.slane %v6345_v17, %v16376_v48 }
0x370c   :  { %5796 = vst.msk [vmem:[%s17190_s1 + $0x1] sm:$0x1] %vm16771_vm4, %v5794_v27  ;;  %v6177_v43 = vrot.slane %v6170_v55, %v12518_v9 }
0x370d   :  { %v6356_v51 = vrot.slane %v6349_v3, %v12518_v9  ;;  %5991 = vst.msk [vmem:[%s17190_s1 + $0x1] sm:$0x1] %vm16778_vm15, %v5989_v49  ;;  %v6540_v37 = vpop.permute.xlu1 %6539 }
0x370e   :  { %v6735_v16 = vpop.permute.xlu0 %6734  ;;  %v6184_v20 = vrot.slane %v6177_v43, %v12518_v9  ;;  %v6544_v0 = vrot.slane %v6540_v37, %v16387_v29 }
0x370f   :  { %v6363_v46 = vrot.slane %v6356_v51, %v12518_v9  ;;  %v6739_v28 = vrot.slane %v6735_v16, %v16363_v45 }
0x3710   :  { %6186 = vst.msk [vmem:[%s17190_s1 + $0x1] sm:$0x1] %vm16797_vm14, %v6184_v20  ;;  %v6551_v60 = vrot.slane %v6544_v0, %v12518_v9 }
0x3711   :  { %6365 = vst.msk [vmem:[%s17190_s1 + $0x2] sm:$0x1] %vm17722_vm1, %v6363_v46  ;;  %v6746_v12 = vrot.slane %v6739_v28, %v12518_v9  ;;  %v6930_v30 = vpop.permute.xlu1 %6929 }
0x3712   :  { %v7109_v40 = vpop.permute.xlu0 %7108  ;;  %v6558_v6 = vrot.slane %v6551_v60, %v12518_v9  ;;  %v6934_v50 = vrot.slane %v6930_v30, %v16366_v54 }
0x3713   :  { %v6753_v24 = vrot.slane %v6746_v12, %v12518_v9  ;;  %v7113_v4 = vrot.slane %v7109_v40, %v16369_v42 }
0x3714   :  { %6560 = vst.msk [vmem:[%s17190_s1 + $0x2] sm:$0x1] %vm16521_vm0, %v6558_v6  ;;  %v6941_v5 = vrot.slane %v6934_v50, %v12518_v9 }
0x3715   :  { %v7120_v62 = vrot.slane %v7113_v4, %v12518_v9  ;;  %6755 = vst.msk [vmem:[%s17190_s1 + $0x2] sm:$0x1] %vm16541_vm2, %v6753_v24  ;;  %v7304_v56 = vpop.permute.xlu1 %7303 }
0x3716   :  { %v7499_v36 = vpop.permute.xlu0 %7498  ;;  %v6948_v53 = vrot.slane %v6941_v5, %v12518_v9  ;;  %v7308_v7 = vrot.slane %v7304_v56, %v16384_v33 }
0x3717   :  { %v7127_v47 = vrot.slane %v7120_v62, %v12518_v9  ;;  %v7503_v13 = vrot.slane %v7499_v36, %v16403_v52 }
0x3718   :  { %6950 = vst.msk [vmem:[%s17190_s1 + $0x2] sm:$0x1] %vm16553_vm3, %v6948_v53  ;;  %v7315_v2 = vrot.slane %v7308_v7, %v12518_v9 }
0x3719   :  { %v7510_v14 = vrot.slane %v7503_v13, %v12518_v9  ;;  %7129 = vst.msk [vmem:[%s17190_s1 + $0x2] sm:$0x1] %vm16576_vm5, %v7127_v47  ;;  %v7694_v17 = vpop.permute.xlu1 %7693 }
0x371a   :  { %v7873_v27 = vpop.permute.xlu0 %7872  ;;  %v7322_v49 = vrot.slane %v7315_v2, %v12518_v9  ;;  %v7698_v3 = vrot.slane %v7694_v17, %v16400_v8 }
0x371b   :  { %v7517_v55 = vrot.slane %v7510_v14, %v12518_v9  ;;  %v7877_v43 = vrot.slane %v7873_v27, %v16432_v39 }
0x371c   :  { %7324 = vst.msk [vmem:[%s17190_s1 + $0x2] sm:$0x1] %vm16594_vm6, %v7322_v49  ;;  %v7705_v51 = vrot.slane %v7698_v3, %v12518_v9 }
0x371d   :  { %v7884_v37 = vrot.slane %v7877_v43, %v12518_v9  ;;  %7519 = vst.msk [vmem:[%s17190_s1 + $0x2] sm:$0x1] %vm16611_vm7, %v7517_v55  ;;  %v8068_v16 = vpop.permute.xlu1 %8067 }
0x371e   :  { %v8263_v20 = vpop.permute.xlu0 %8262  ;;  %v7712_v46 = vrot.slane %v7705_v51, %v12518_v9  ;;  %v8072_v28 = vrot.slane %v8068_v16, %v16491_v44 }
0x371f   :  { %v7891_v0 = vrot.slane %v7884_v37, %v12518_v9  ;;  %v8267_v60 = vrot.slane %v8263_v20, %v16494_v61 }
0x3720   :  { %7714 = vst.msk [vmem:[%s17190_s1 + $0x2] sm:$0x1] %vm16627_vm9, %v7712_v46  ;;  %v8079_v12 = vrot.slane %v8072_v28, %v12518_v9 }
0x3721   :  { %v8274_v30 = vrot.slane %v8267_v60, %v12518_v9  ;;  %7893 = vst.msk [vmem:[%s17190_s1 + $0x2] sm:$0x1] %vm17723_vm10, %v7891_v0  ;;  %v8458_v40 = vpop.permute.xlu1 %8457 }
0x3722   :  { %v8637_v6 = vpop.permute.xlu0 %8636  ;;  %v8086_v24 = vrot.slane %v8079_v12, %v12518_v9  ;;  %v8462_v4 = vrot.slane %v8458_v40, %v16563_v59 }
0x3723   :  { %v8281_v50 = vrot.slane %v8274_v30, %v12518_v9  ;;  %v8641_v5 = vrot.slane %v8637_v6, %v16582_v10 }
0x3724   :  { %8088 = vst.msk [vmem:[%s17190_s1 + $0x2] sm:$0x1] %vm17724_vm11, %v8086_v24  ;;  %v8469_v62 = vrot.slane %v8462_v4, %v12518_v9 }
0x3725   :  { %v8648_v56 = vrot.slane %v8641_v5, %v12518_v9  ;;  %8283 = vst.msk [vmem:[%s17190_s1 + $0x2] sm:$0x1] %vm17725_vm8, %v8281_v50  ;;  %v8832_v36 = vpop.permute.xlu1 %8831 }
0x3726   :  { %v9027_v53 = vpop.permute.xlu0 %9026  ;;  %v8476_v47 = vrot.slane %v8469_v62, %v12518_v9  ;;  %v8836_v13 = vrot.slane %v8832_v36, %v16682_v38 }
0x3727   :  { %v8655_v7 = vrot.slane %v8648_v56, %v12518_v9  ;;  %v9031_v2 = vrot.slane %v9027_v53, %v16685_v58 }
0x3728   :  { %8478 = vst.msk [vmem:[%s17190_s1 + $0x2] sm:$0x1] %vm17726_vm13, %v8476_v47  ;;  %v8843_v14 = vrot.slane %v8836_v13, %v12518_v9 }
0x3729   :  { %v9038_v17 = vrot.slane %v9031_v2, %v12518_v9  ;;  %8657 = vst.msk [vmem:[%s17190_s1 + $0x2] sm:$0x1] %vm16746_vm12, %v8655_v7  ;;  %v9222_v27 = vpop.permute.xlu1 %9221 }
0x372a   :  { %v9401_v49 = vpop.permute.xlu0 %9400  ;;  %v8850_v55 = vrot.slane %v8843_v14, %v12518_v9  ;;  %v9226_v43 = vrot.slane %v9222_v27, %v16743_v21 }
0x372b   :  { %v9045_v3 = vrot.slane %v9038_v17, %v12518_v9  ;;  %v9405_v51 = vrot.slane %v9401_v49, %v16376_v48 }
0x372c   :  { %8852 = vst.msk [vmem:[%s17190_s1 + $0x2] sm:$0x1] %vm16771_vm4, %v8850_v55  ;;  %v9233_v37 = vrot.slane %v9226_v43, %v12518_v9 }
0x372d   :  { %v9412_v16 = vrot.slane %v9405_v51, %v12518_v9  ;;  %9047 = vst.msk [vmem:[%s17190_s1 + $0x2] sm:$0x1] %vm16778_vm15, %v9045_v3  ;;  %v9596_v20 = vpop.permute.xlu1 %9595 }
0x372e   :  { %v9791_v46 = vpop.permute.xlu0 %9790  ;;  %v9240_v48 = vrot.slane %v9233_v37, %v12518_v9  ;;  %v9600_v28 = vrot.slane %v9596_v20, %v16387_v29 }
0x372f   :  { %v9419_v0 = vrot.slane %v9412_v16, %v12518_v9  ;;  %v9795_v60 = vrot.slane %v9791_v46, %v16363_v45 }
0x3730   :  { %9242 = vst.msk [vmem:[%s17190_s1 + $0x2] sm:$0x1] %vm16797_vm14, %v9240_v48  ;;  %v9607_v12 = vrot.slane %v9600_v28, %v12518_v9 }
0x3731   :  { %9421 = vst.msk [vmem:[%s17190_s1 + $0x3] sm:$0x1] %vm17722_vm1, %v9419_v0  ;;  %v9802_v30 = vrot.slane %v9795_v60, %v12518_v9  ;;  %v9986_v40 = vpop.permute.xlu1 %9985 }
0x3732   :  { %v10165_v29 = vpop.permute.xlu0 %10164  ;;  %v9614_v45 = vrot.slane %v9607_v12, %v12518_v9  ;;  %v9990_v24 = vrot.slane %v9986_v40, %v16366_v54 }
0x3733   :  { %v9809_v6 = vrot.slane %v9802_v30, %v12518_v9  ;;  %v10169_v50 = vrot.slane %v10165_v29, %v16369_v42 }
0x3734   :  { %9616 = vst.msk [vmem:[%s17190_s1 + $0x3] sm:$0x1] %vm16521_vm0, %v9614_v45  ;;  %v9997_v31 = vrot.slane %v9990_v24, %v12518_v9 }
0x3735   :  { %v10176_v4 = vrot.slane %v10169_v50, %v12518_v9  ;;  %9811 = vst.msk [vmem:[%s17190_s1 + $0x3] sm:$0x1] %vm16541_vm2, %v9809_v6  ;;  %v10360_v5 = vpop.permute.xlu1 %10359 }
0x3736   :  { %v10555_v54 = vpop.permute.xlu0 %10554  ;;  %v10004_v42 = vrot.slane %v9997_v31, %v12518_v9  ;;  %v10364_v62 = vrot.slane %v10360_v5, %v16384_v33 }
0x3737   :  { %v10183_v35 = vrot.slane %v10176_v4, %v12518_v9  ;;  %v10559_v56 = vrot.slane %v10555_v54, %v16403_v52 }
0x3738   :  { %10006 = vst.msk [vmem:[%s17190_s1 + $0x3] sm:$0x1] %vm16553_vm3, %v10004_v42  ;;  %v10371_v26 = vrot.slane %v10364_v62, %v12518_v9 }
0x3739   :  { %v10566_v36 = vrot.slane %v10559_v56, %v12518_v9  ;;  %10185 = vst.msk [vmem:[%s17190_s1 + $0x3] sm:$0x1] %vm16576_vm5, %v10183_v35 }
0x373a   :  { %v10378_v52 = vrot.slane %v10371_v26, %v12518_v9 }
0x373b   :  { %v10750_v53 = vpop.permute.xlu1 %10749  ;;  %v10573_v22 = vrot.slane %v10566_v36, %v12518_v9 }
0x373c   :  { %v10929_v33 = vpop.permute.xlu0 %10928  ;;  %v10754_v47 = vrot.slane %v10750_v53, %v16400_v8  ;;  %10380 = vst.msk [vmem:[%s17190_s1 + $0x3] sm:$0x1] %vm16594_vm6, %v10378_v52 }
0x373d   :  { %v10933_v7 = vrot.slane %v10929_v33, %v16432_v39  ;;  %10575 = vst.msk [vmem:[%s17190_s1 + $0x3] sm:$0x1] %vm16611_vm7, %v10573_v22 }
0x373e   :  { %v10761_v15 = vrot.slane %v10754_v47, %v12518_v9 }
0x373f   :  { %v10940_v13 = vrot.slane %v10933_v7, %v12518_v9  ;;  %v11124_v2 = vpop.permute.xlu1 %11123 }
0x3740   :  { %v11319_v8 = vpop.permute.xlu0 %11318  ;;  %v10768_v39 = vrot.slane %v10761_v15, %v12518_v9  ;;  %v11128_v14 = vrot.slane %v11124_v2, %v16491_v44 }
0x3741   :  { %v10947_v41 = vrot.slane %v10940_v13, %v12518_v9  ;;  %v11323_v17 = vrot.slane %v11319_v8, %v16494_v61 }
0x3742   :  { %10770 = vst.msk [vmem:[%s17190_s1 + $0x3] sm:$0x1] %vm16627_vm9, %v10768_v39  ;;  %v11135_v34 = vrot.slane %v11128_v14, %v12518_v9 }
0x3743   :  { %v11330_v27 = vrot.slane %v11323_v17, %v12518_v9  ;;  %10949 = vst.msk [vmem:[%s17190_s1 + $0x3] sm:$0x1] %vm17723_vm10, %v10947_v41  ;;  %v11514_v49 = vpop.permute.xlu1 %11513 }
0x3744   :  { %v11693_v44 = vpop.permute.xlu0 %11692  ;;  %v11142_v61 = vrot.slane %v11135_v34, %v12518_v9  ;;  %v11518_v55 = vrot.slane %v11514_v49, %v16563_v59 }
0x3745   :  { %v11337_v18 = vrot.slane %v11330_v27, %v12518_v9  ;;  %v11697_v3 = vrot.slane %v11693_v44, %v16582_v10 }
0x3746   :  { %11144 = vst.msk [vmem:[%s17190_s1 + $0x3] sm:$0x1] %vm17724_vm11, %v11142_v61  ;;  %v11525_v11 = vrot.slane %v11518_v55, %v12518_v9 }
0x3747   :  { %v11704_v43 = vrot.slane %v11697_v3, %v12518_v9  ;;  %11339 = vst.msk [vmem:[%s17190_s1 + $0x3] sm:$0x1] %vm17725_vm8, %v11337_v18  ;;  %v11888_v51 = vpop.permute.xlu1 %11887 }
0x3748   :  { %v11532_v59 = vrot.slane %v11525_v11, %v12518_v9  ;;  %v11892_v23 = vrot.slane %v11888_v51, %v16682_v38 }
0x3749   :  { %v11711_v10 = vrot.slane %v11704_v43, %v12518_v9 }
0x374a   :  { %11534 = vst.msk [vmem:[%s17190_s1 + $0x3] sm:$0x1] %vm17726_vm13, %v11532_v59  ;;  %v11899_v37 = vrot.slane %v11892_v23, %v12518_v9 }
0x374b   :  { %11713 = vst.msk [vmem:[%s17190_s1 + $0x3] sm:$0x1] %vm16746_vm12, %v11711_v10  ;;  %v12083_v57 = vpop.permute.xlu1 %12082 }
0x374c   :  { %v11906_v16 = vrot.slane %v11899_v37, %v12518_v9  ;;  %v12087_v20 = vrot.slane %v12083_v57, %v16685_v58 }
0x374e   :  { %11908 = vst.msk [vmem:[%s17190_s1 + $0x3] sm:$0x1] %vm16771_vm4, %v11906_v16  ;;  %v12094_v38 = vrot.slane %v12087_v20, %v12518_v9 }
0x3750   :  { %v12101_v25 = vrot.slane %v12094_v38, %v12518_v9 }
0x3752   :  { %12103 = vst.msk [vmem:[%s17190_s1 + $0x3] sm:$0x1] %vm16778_vm15, %v12101_v25 }
0x375b   :  { %v12278_v63 = vpop.permute.xlu0 %12277 }
0x375c   :  { %v12282_v46 = vrot.slane %v12278_v63, %v16743_v21 }
0x375e   :  { %v12289_v58 = vrot.slane %v12282_v46, %v12518_v9 }
0x3760   :  { %v12296_v1 = vrot.slane %v12289_v58, %v12518_v9 }
0x3762   :  { %12298 = vst.msk [vmem:[%s17190_s1 + $0x3] sm:$0x1] %vm16797_vm14, %v12296_v1 }

</bundles_post_ra>
